<compile_context>
chip_gen: v7x
topology: tpu7x:2x2x1
jax: 0.10.0
libtpu: 0.0.40
codegen_flags: <defaults>
</compile_context>

<pallas_src>
import numpy as np
import jax
import jax.numpy as jnp
from jax.experimental import pallas as pl
from jax.experimental.pallas import tpu as pltpu


# ----------------------------------------------------------------------------
# Constant 0/1 spatial-gather matrices (shape-only, built once with numpy).
# S[t, in_pos, out_pos] = 1 iff input pixel `in_pos` feeds output pixel
# `out_pos` for kernel tap t.  Out-of-bounds taps stay 0 => zero padding.
# ----------------------------------------------------------------------------
def _conv_gather(h, w, kh, kw, stride, pad):
    oh = (h + 2 * pad - kh) // stride + 1
    ow = (w + 2 * pad - kw) // stride + 1
    s = np.zeros((kh * kw, h * w, oh * ow), np.float32)
    for ki in range(kh):
        for kj in range(kw):
            t = ki * kw + kj
            for r in range(oh):
                ih = r * stride + ki - pad
                if ih < 0 or ih >= h:
                    continue
                for c in range(ow):
                    iw = c * stride + kj - pad
                    if iw < 0 or iw >= w:
                        continue
                    s[t, ih * w + iw, r * ow + c] = 1.0
    return s


def _convT_gather(h, w, kh, kw, stride, pad):
    # PyTorch ConvTranspose2d (output_padding=0):
    #   out[oh, ow] += in[h, w] * W[..., ki, kj]  with oh = h*s + ki - p, etc.
    oh = (h - 1) * stride - 2 * pad + kh
    ow = (w - 1) * stride - 2 * pad + kw
    s = np.zeros((kh * kw, h * w, oh * ow), np.float32)
    for ki in range(kh):
        for kj in range(kw):
            t = ki * kw + kj
            for r in range(h):
                orow = r * stride + ki - pad
                if orow < 0 or orow >= oh:
                    continue
                for c in range(w):
                    ocol = c * stride + kj - pad
                    if ocol < 0 or ocol >= ow:
                        continue
                    s[t, r * w + c, orow * ow + ocol] = 1.0
    return s


def _pool_gather(h, w, k, stride):
    oh = (h - k) // stride + 1
    ow = (w - k) // stride + 1
    s = np.zeros((k * k, h * w, oh * ow), np.float32)
    for ki in range(k):
        for kj in range(k):
            t = ki * k + kj
            for r in range(oh):
                for c in range(ow):
                    s[t, (r * stride + ki) * w + (c * stride + kj),
                      r * ow + c] = 1.0
    return s


_S1 = _conv_gather(28, 28, 3, 3, 3, 1)     # conv  1->16, 28x28 -> 10x10
_P1 = _pool_gather(10, 10, 2, 2)           # pool  10x10 -> 5x5
_S2 = _conv_gather(5, 5, 3, 3, 2, 1)       # conv 16->8,  5x5  -> 3x3
_P2 = _pool_gather(3, 3, 2, 1)             # pool  3x3 -> 2x2   (encode)
_S3 = _convT_gather(2, 2, 3, 3, 2, 0)      # convT 8->16, 2x2  -> 5x5
_S4 = _convT_gather(5, 5, 5, 5, 3, 1)      # convT16->8,  5x5  -> 15x15
_S5 = _convT_gather(15, 15, 2, 2, 2, 1)    # convT 8->1, 15x15 -> 28x28


# ----------------------------------------------------------------------------
# Fused Pallas kernel (one grid step == one batch sample)
# ----------------------------------------------------------------------------
def _conv_taps(x_b, s_ref, w_ref):
    """sum_t  W_t(OC,IC) @ (x(IC,HW) @ S_t(HW,OHW))  -> (OC, OHW) f32."""
    acc = None
    for t in range(s_ref.shape[0]):
        g = jnp.dot(x_b, s_ref[t], preferred_element_type=jnp.float32)
        y = jnp.dot(w_ref[t], g.astype(jnp.bfloat16),
                    preferred_element_type=jnp.float32)
        acc = y if acc is None else acc + y
    return acc


def _pool_taps(x_b, p_ref):
    """elementwise max over the k*k gathered window views."""
    m = jnp.dot(x_b, p_ref[0], preferred_element_type=jnp.float32)
    for t in range(1, p_ref.shape[0]):
        m = jnp.maximum(m, jnp.dot(x_b, p_ref[t],
                                   preferred_element_type=jnp.float32))
    return m


def _fused_ae_kernel(x_ref,
                     s1_ref, w1_ref, b1_ref, p1_ref,
                     s2_ref, w2_ref, b2_ref, p2_ref,
                     s3_ref, w3_ref, b3_ref,
                     s4_ref, w4_ref, b4_ref,
                     s5_ref, w5_ref, b5_ref,
                     enc_ref, dec_ref):
    bf16 = jnp.bfloat16
    x = x_ref[...].astype(bf16)                                   # (8, 784)

    # ----- encoder ----------------------------------------------------------
    y = _conv_taps(x, s1_ref, w1_ref) + b1_ref[...]               # (16, 100)
    y = jnp.maximum(y, 0.0)                                       # ReLU
    y = _pool_taps(y.astype(bf16), p1_ref)                        # (16, 25)

    y = _conv_taps(y.astype(bf16), s2_ref, w2_ref) + b2_ref[...]  # (8, 9)
    y = jnp.maximum(y, 0.0)
    enc = _pool_taps(y.astype(bf16), p2_ref)                      # (8, 4)
    enc_ref[...] = enc.astype(enc_ref.dtype)

    # ----- decoder ----------------------------------------------------------
    y = _conv_taps(enc.astype(bf16), s3_ref, w3_ref) + b3_ref[...]  # (16, 25)
    y = jnp.maximum(y, 0.0)
    y = _conv_taps(y.astype(bf16), s4_ref, w4_ref) + b4_ref[...]    # (8, 225)
    y = jnp.maximum(y, 0.0)
    y = _conv_taps(y.astype(bf16), s5_ref, w5_ref) + b5_ref[...]    # (1, 784)
    dec_ref[...] = jnp.tanh(y).astype(dec_ref.dtype)


# ----------------------------------------------------------------------------
# Host wrapper
# ----------------------------------------------------------------------------
def _conv_w_taps(w):      # Conv2d weight (OC, IC, KH, KW) -> (KH*KW, OC, IC)
    oc, ic, kh, kw = w.shape
    return jnp.transpose(w, (2, 3, 0, 1)).reshape(kh * kw, oc, ic)


def _convT_w_taps(w):     # ConvTranspose2d weight (IC, OC, KH, KW) -> (T, OC, IC)
    ic, oc, kh, kw = w.shape
    return jnp.transpose(w, (2, 3, 1, 0)).reshape(kh * kw, oc, ic)


def conv_autoencoder_forward(x, p):
    n = x.shape[0]
    f32, bf16 = jnp.float32, jnp.bfloat16

    # NCHW (n,1,28,28) -> (n, 8, 784); channel 0 is the image, channels 1..7
    # are zeros so every in-kernel matmul has contraction dim >= 8.
    x_flat = x.reshape(n, 1, 28 * 28).astype(f32)
    x_pad = jnp.pad(x_flat, ((0, 0), (0, 7), (0, 0)))

    # per-tap weight matrices (KH*KW, OC, IC), cast once to bf16 for the MXU
    w1 = jnp.pad(_conv_w_taps(p["e1_w"]), ((0, 0), (0, 0), (0, 7))).astype(bf16)
    w2 = _conv_w_taps(p["e2_w"]).astype(bf16)
    w3 = _convT_w_taps(p["d1_w"]).astype(bf16)
    w4 = _convT_w_taps(p["d2_w"]).astype(bf16)
    w5 = _convT_w_taps(p["d3_w"]).astype(bf16)

    b1 = p["e1_b"].reshape(16, 1).astype(f32)
    b2 = p["e2_b"].reshape(8, 1).astype(f32)
    b3 = p["d1_b"].reshape(16, 1).astype(f32)
    b4 = p["d2_b"].reshape(8, 1).astype(f32)
    b5 = p["d3_b"].reshape(1, 1).astype(f32)

    s1 = jnp.asarray(_S1, bf16)
    pl1 = jnp.asarray(_P1, bf16)
    s2 = jnp.asarray(_S2, bf16)
    pl2 = jnp.asarray(_P2, bf16)
    s3 = jnp.asarray(_S3, bf16)
    s4 = jnp.asarray(_S4, bf16)
    s5 = jnp.asarray(_S5, bf16)

    consts = (s1, w1, b1, pl1,
              s2, w2, b2, pl2,
              s3, w3, b3,
              s4, w4, b4,
              s5, w5, b5)

    def _bcast_spec(a):
        nd = a.ndim
        return pl.BlockSpec(a.shape, lambda i, _nd=nd: (0,) * _nd)

    in_specs = [pl.BlockSpec((None, 8, 28 * 28), lambda i: (i, 0, 0))]
    in_specs += [_bcast_spec(a) for a in consts]

    out_specs = (pl.BlockSpec((None, 8, 4), lambda i: (i, 0, 0)),
                 pl.BlockSpec((None, 1, 28 * 28), lambda i: (i, 0, 0)))
    out_shape = (jax.ShapeDtypeStruct((n, 8, 4), f32),
                 jax.ShapeDtypeStruct((n, 1, 28 * 28), f32))

    enc, dec = pl.pallas_call(
        _fused_ae_kernel,
        grid=(n,),
        in_specs=in_specs,
        out_specs=out_specs,
        out_shape=out_shape,
        compiler_params=pltpu.CompilerParams(
            dimension_semantics=("parallel",)),
    )(x_pad, *consts)

    encode = enc.reshape(n, 8, 2, 2)
    decode = dec.reshape(n, 1, 28, 28)
    return encode, decode


# ----------------------------------------------------------------------------
# Pure-JAX (XLA) reference with exact PyTorch semantics, for validation.
# ----------------------------------------------------------------------------
def _reference_forward(x, p):
    dn = ("NCHW", "OIHW", "NCHW")

    def conv(h, w, b, stride, pad):
        y = jax.lax.conv_general_dilated(
            h, w, (stride, stride), [(pad, pad), (pad, pad)],
            dimension_numbers=dn)
        return y + b.reshape(1, -1, 1, 1)

    def convT(h, w, b, stride, pad):
        kh, kw = w.shape[2], w.shape[3]
        wf = jnp.flip(w, (2, 3)).transpose(1, 0, 2, 3)   # (OC, IC, KH, KW)
        y = jax.lax.conv_general_dilated(
            h, wf, (1, 1),
            [(kh - 1 - pad, kh - 1 - pad), (kw - 1 - pad, kw - 1 - pad)],
            lhs_dilation=(stride, stride), dimension_numbers=dn)
        return y + b.reshape(1, -1, 1, 1)

    def pool(h, k, stride):
        return jax.lax.reduce_window(
            h, -jnp.inf, jax.lax.max,
            (1, 1, k, k), (1, 1, stride, stride), "VALID")

    h = jax.nn.relu(conv(x, p["e1_w"], p["e1_b"], 3, 1))
    h = pool(h, 2, 2)
    h = jax.nn.relu(conv(h, p["e2_w"], p["e2_b"], 2, 1))
    enc = pool(h, 2, 1)
    d = jax.nn.relu(convT(enc, p["d1_w"], p["d1_b"], 2, 0))
    d = jax.nn.relu(convT(d, p["d2_w"], p["d2_b"], 3, 1))
    dec = jnp.tanh(convT(d, p["d3_w"], p["d3_b"], 2, 1))
    return enc, dec


# ----------------------------------------------------------------------------
# Parameter init (mirrors PyTorch default uniform(-1/sqrt(fan_in), +...))
# ----------------------------------------------------------------------------
def init_params(key):
    def uinit(k, shape, fan_in):
        bound = 1.0 / np.sqrt(float(fan_in))
        return jax.random.uniform(k, shape, jnp.float32, -bound, bound)

    ks = jax.random.split(key, 10)
    p = {}
    # encoder (Conv2d weights: (OC, IC, KH, KW))
    p["e1_w"] = uinit(ks[0], (16, 1, 3, 3), 1 * 3 * 3)
    p["e1_b"] = uinit(ks[1], (16,), 1 * 3 * 3)
    p["e2_w"] = uinit(ks[2], (8, 16, 3, 3), 16 * 3 * 3)
    p["e2_b"] = uinit(ks[3], (8,), 16 * 3 * 3)
    # decoder (ConvTranspose2d weights: (IC, OC, KH, KW))
    p["d1_w"] = uinit(ks[4], (8, 16, 3, 3), 8 * 3 * 3)
    p["d1_b"] = uinit(ks[5], (16,), 8 * 3 * 3)
    p["d2_w"] = uinit(ks[6], (16, 8, 5, 5), 16 * 5 * 5)
    p["d2_b"] = uinit(ks[7], (8,), 16 * 5 * 5)
    p["d3_w"] = uinit(ks[8], (8, 1, 2, 2), 8 * 2 * 2)
    p["d3_b"] = uinit(ks[9], (1,), 8 * 2 * 2)
    return p


if __name__ == "__main__":
    key = jax.random.PRNGKey(0)
    k_x, k_p = jax.random.split(key)
    x = jax.random.normal(k_x, (2, 1, 28, 28), jnp.float32)   # NCHW, like PyTorch
    params = init_params(k_p)

    encode, decode = jax.jit(conv_autoencoder_forward)(x, params)
    jax.block_until_ready(encode)
    jax.block_until_ready(decode)

    assert encode.shape == (2, 8, 2, 2), encode.shape
    assert decode.shape == (2, 1, 28, 28), decode.shape
    assert bool(jnp.all(jnp.isfinite(encode))) and bool(jnp.all(jnp.isfinite(decode)))
    assert bool(jnp.all(jnp.abs(decode) <= 1.0))   # tanh output range

    # numerical check against a pure-JAX reference (loose tol: kernel uses
    # bf16 MXU operands with f32 accumulation)
    enc_ref, dec_ref = jax.jit(_reference_forward)(x, params)
    np.testing.assert_allclose(np.asarray(encode), np.asarray(enc_ref),
                               rtol=0.1, atol=0.1)
    np.testing.assert_allclose(np.asarray(decode), np.asarray(dec_ref),
                               rtol=0.1, atol=0.1)

    print("KERNEL_OK")
</pallas_src>

<mosaic_0001>
module attributes {stable_mosaic.version = 11 : i64} {
  func.func @_fused_ae_kernel(%arg0: i32, %arg1: memref<1x8x784xf32, #tpu.memory_space<vmem>>, %arg2: memref<9x784x100xbf16, #tpu.memory_space<vmem>>, %arg3: memref<9x16x8xbf16, #tpu.memory_space<vmem>>, %arg4: memref<16x1xf32, #tpu.memory_space<vmem>>, %arg5: memref<4x100x25xbf16, #tpu.memory_space<vmem>>, %arg6: memref<9x25x9xbf16, #tpu.memory_space<vmem>>, %arg7: memref<9x8x16xbf16, #tpu.memory_space<vmem>>, %arg8: memref<8x1xf32, #tpu.memory_space<vmem>>, %arg9: memref<4x9x4xbf16, #tpu.memory_space<vmem>>, %arg10: memref<9x4x25xbf16, #tpu.memory_space<vmem>>, %arg11: memref<9x16x8xbf16, #tpu.memory_space<vmem>>, %arg12: memref<16x1xf32, #tpu.memory_space<vmem>>, %arg13: memref<25x25x225xbf16, #tpu.memory_space<vmem>>, %arg14: memref<25x8x16xbf16, #tpu.memory_space<vmem>>, %arg15: memref<8x1xf32, #tpu.memory_space<vmem>>, %arg16: memref<4x225x784xbf16, #tpu.memory_space<vmem>>, %arg17: memref<4x1x8xbf16, #tpu.memory_space<vmem>>, %arg18: memref<1x1xf32, #tpu.memory_space<vmem>>, %arg19: memref<1x8x4xf32, #tpu.memory_space<vmem>>, %arg20: memref<1x1x784xf32, #tpu.memory_space<vmem>>) attributes {dimension_semantics = [#tpu.dimension_semantics<parallel>], iteration_bounds = array<i64: 2>, scalar_prefetch = 0 : i64, scratch_operands = 0 : i64, tpu.core_type = #tpu.core_type<tc>, window_params = [{transform_indices = @transform_0, window_bounds = array<i64: 1, 8, 784>}, {pipeline_mode = #tpu.pipeline_mode<synchronous>, transform_indices = @transform_1, window_bounds = array<i64: 9, 784, 100>}, {pipeline_mode = #tpu.pipeline_mode<synchronous>, transform_indices = @transform_2, window_bounds = array<i64: 9, 16, 8>}, {pipeline_mode = #tpu.pipeline_mode<synchronous>, transform_indices = @transform_3, window_bounds = array<i64: 16, 1>}, {pipeline_mode = #tpu.pipeline_mode<synchronous>, transform_indices = @transform_4, window_bounds = array<i64: 4, 100, 25>}, {pipeline_mode = #tpu.pipeline_mode<synchronous>, transform_indices = @transform_5, window_bounds = array<i64: 9, 25, 9>}, {pipeline_mode = #tpu.pipeline_mode<synchronous>, transform_indices = @transform_6, window_bounds = array<i64: 9, 8, 16>}, {pipeline_mode = #tpu.pipeline_mode<synchronous>, transform_indices = @transform_7, window_bounds = array<i64: 8, 1>}, {pipeline_mode = #tpu.pipeline_mode<synchronous>, transform_indices = @transform_8, window_bounds = array<i64: 4, 9, 4>}, {pipeline_mode = #tpu.pipeline_mode<synchronous>, transform_indices = @transform_9, window_bounds = array<i64: 9, 4, 25>}, {pipeline_mode = #tpu.pipeline_mode<synchronous>, transform_indices = @transform_10, window_bounds = array<i64: 9, 16, 8>}, {pipeline_mode = #tpu.pipeline_mode<synchronous>, transform_indices = @transform_11, window_bounds = array<i64: 16, 1>}, {pipeline_mode = #tpu.pipeline_mode<synchronous>, transform_indices = @transform_12, window_bounds = array<i64: 25, 25, 225>}, {pipeline_mode = #tpu.pipeline_mode<synchronous>, transform_indices = @transform_13, window_bounds = array<i64: 25, 8, 16>}, {pipeline_mode = #tpu.pipeline_mode<synchronous>, transform_indices = @transform_14, window_bounds = array<i64: 8, 1>}, {pipeline_mode = #tpu.pipeline_mode<synchronous>, transform_indices = @transform_15, window_bounds = array<i64: 4, 225, 784>}, {pipeline_mode = #tpu.pipeline_mode<synchronous>, transform_indices = @transform_16, window_bounds = array<i64: 4, 1, 8>}, {pipeline_mode = #tpu.pipeline_mode<synchronous>, transform_indices = @transform_17, window_bounds = array<i64: 1, 1>}, {transform_indices = @transform_18, window_bounds = array<i64: 1, 8, 4>}, {transform_indices = @transform_19, window_bounds = array<i64: 1, 1, 784>}]} {
    %c0 = arith.constant 0 : index
    %c0_0 = arith.constant 0 : index
    %c0_1 = arith.constant 0 : index
    %0 = vector.load %arg1[%c0, %c0_0, %c0_1] : memref<1x8x784xf32, #tpu.memory_space<vmem>>, vector<1x8x784xf32>
    %1 = vector.shape_cast %0 : vector<1x8x784xf32> to vector<8x784xf32>
    %2 = arith.truncf %1 : vector<8x784xf32> to vector<8x784xbf16>
    %c0_2 = arith.constant 0 : index
    %c0_3 = arith.constant 0 : index
    %c0_4 = arith.constant 0 : index
    %3 = vector.load %arg2[%c0_2, %c0_3, %c0_4] : memref<9x784x100xbf16, #tpu.memory_space<vmem>>, vector<1x784x100xbf16>
    %4 = vector.shape_cast %3 : vector<1x784x100xbf16> to vector<784x100xbf16>
    %cst = arith.constant dense<0.000000e+00> : vector<8x100xf32>
    %5 = tpu.matmul %2, %4, %cst {dimension_numbers = #tpu.dot_dimension_numbers<[1], [0], [0], [1], [0, 0, 1, 1], [], []>} : vector<8x784xbf16>, vector<784x100xbf16>, vector<8x100xf32> -> vector<8x100xf32>
    %c0_5 = arith.constant 0 : index
    %c0_6 = arith.constant 0 : index
    %c0_7 = arith.constant 0 : index
    %6 = vector.load %arg3[%c0_5, %c0_6, %c0_7] : memref<9x16x8xbf16, #tpu.memory_space<vmem>>, vector<1x16x8xbf16>
    %7 = vector.shape_cast %6 : vector<1x16x8xbf16> to vector<16x8xbf16>
    %8 = arith.truncf %5 : vector<8x100xf32> to vector<8x100xbf16>
    %cst_8 = arith.constant dense<0.000000e+00> : vector<16x100xf32>
    %9 = tpu.matmul %7, %8, %cst_8 {dimension_numbers = #tpu.dot_dimension_numbers<[1], [0], [0], [1], [0, 0, 1, 1], [], []>} : vector<16x8xbf16>, vector<8x100xbf16>, vector<16x100xf32> -> vector<16x100xf32>
    %c1 = arith.constant 1 : index
    %c0_9 = arith.constant 0 : index
    %c0_10 = arith.constant 0 : index
    %10 = vector.load %arg2[%c1, %c0_9, %c0_10] : memref<9x784x100xbf16, #tpu.memory_space<vmem>>, vector<1x784x100xbf16>
    %11 = vector.shape_cast %10 : vector<1x784x100xbf16> to vector<784x100xbf16>
    %cst_11 = arith.constant dense<0.000000e+00> : vector<8x100xf32>
    %12 = tpu.matmul %2, %11, %cst_11 {dimension_numbers = #tpu.dot_dimension_numbers<[1], [0], [0], [1], [0, 0, 1, 1], [], []>} : vector<8x784xbf16>, vector<784x100xbf16>, vector<8x100xf32> -> vector<8x100xf32>
    %c1_12 = arith.constant 1 : index
    %c0_13 = arith.constant 0 : index
    %c0_14 = arith.constant 0 : index
    %13 = vector.load %arg3[%c1_12, %c0_13, %c0_14] : memref<9x16x8xbf16, #tpu.memory_space<vmem>>, vector<1x16x8xbf16>
    %14 = vector.shape_cast %13 : vector<1x16x8xbf16> to vector<16x8xbf16>
    %15 = arith.truncf %12 : vector<8x100xf32> to vector<8x100xbf16>
    %cst_15 = arith.constant dense<0.000000e+00> : vector<16x100xf32>
    %16 = tpu.matmul %14, %15, %cst_15 {dimension_numbers = #tpu.dot_dimension_numbers<[1], [0], [0], [1], [0, 0, 1, 1], [], []>} : vector<16x8xbf16>, vector<8x100xbf16>, vector<16x100xf32> -> vector<16x100xf32>
    %17 = arith.addf %9, %16 : vector<16x100xf32>
    %c2 = arith.constant 2 : index
    %c0_16 = arith.constant 0 : index
    %c0_17 = arith.constant 0 : index
    %18 = vector.load %arg2[%c2, %c0_16, %c0_17] : memref<9x784x100xbf16, #tpu.memory_space<vmem>>, vector<1x784x100xbf16>
    %19 = vector.shape_cast %18 : vector<1x784x100xbf16> to vector<784x100xbf16>
    %cst_18 = arith.constant dense<0.000000e+00> : vector<8x100xf32>
    %20 = tpu.matmul %2, %19, %cst_18 {dimension_numbers = #tpu.dot_dimension_numbers<[1], [0], [0], [1], [0, 0, 1, 1], [], []>} : vector<8x784xbf16>, vector<784x100xbf16>, vector<8x100xf32> -> vector<8x100xf32>
    %c2_19 = arith.constant 2 : index
    %c0_20 = arith.constant 0 : index
    %c0_21 = arith.constant 0 : index
    %21 = vector.load %arg3[%c2_19, %c0_20, %c0_21] : memref<9x16x8xbf16, #tpu.memory_space<vmem>>, vector<1x16x8xbf16>
    %22 = vector.shape_cast %21 : vector<1x16x8xbf16> to vector<16x8xbf16>
    %23 = arith.truncf %20 : vector<8x100xf32> to vector<8x100xbf16>
    %cst_22 = arith.constant dense<0.000000e+00> : vector<16x100xf32>
    %24 = tpu.matmul %22, %23, %cst_22 {dimension_numbers = #tpu.dot_dimension_numbers<[1], [0], [0], [1], [0, 0, 1, 1], [], []>} : vector<16x8xbf16>, vector<8x100xbf16>, vector<16x100xf32> -> vector<16x100xf32>
    %25 = arith.addf %17, %24 : vector<16x100xf32>
    %c3 = arith.constant 3 : index
    %c0_23 = arith.constant 0 : index
    %c0_24 = arith.constant 0 : index
    %26 = vector.load %arg2[%c3, %c0_23, %c0_24] : memref<9x784x100xbf16, #tpu.memory_space<vmem>>, vector<1x784x100xbf16>
    %27 = vector.shape_cast %26 : vector<1x784x100xbf16> to vector<784x100xbf16>
    %cst_25 = arith.constant dense<0.000000e+00> : vector<8x100xf32>
    %28 = tpu.matmul %2, %27, %cst_25 {dimension_numbers = #tpu.dot_dimension_numbers<[1], [0], [0], [1], [0, 0, 1, 1], [], []>} : vector<8x784xbf16>, vector<784x100xbf16>, vector<8x100xf32> -> vector<8x100xf32>
    %c3_26 = arith.constant 3 : index
    %c0_27 = arith.constant 0 : index
    %c0_28 = arith.constant 0 : index
    %29 = vector.load %arg3[%c3_26, %c0_27, %c0_28] : memref<9x16x8xbf16, #tpu.memory_space<vmem>>, vector<1x16x8xbf16>
    %30 = vector.shape_cast %29 : vector<1x16x8xbf16> to vector<16x8xbf16>
    %31 = arith.truncf %28 : vector<8x100xf32> to vector<8x100xbf16>
    %cst_29 = arith.constant dense<0.000000e+00> : vector<16x100xf32>
    %32 = tpu.matmul %30, %31, %cst_29 {dimension_numbers = #tpu.dot_dimension_numbers<[1], [0], [0], [1], [0, 0, 1, 1], [], []>} : vector<16x8xbf16>, vector<8x100xbf16>, vector<16x100xf32> -> vector<16x100xf32>
    %33 = arith.addf %25, %32 : vector<16x100xf32>
    %c4 = arith.constant 4 : index
    %c0_30 = arith.constant 0 : index
    %c0_31 = arith.constant 0 : index
    %34 = vector.load %arg2[%c4, %c0_30, %c0_31] : memref<9x784x100xbf16, #tpu.memory_space<vmem>>, vector<1x784x100xbf16>
    %35 = vector.shape_cast %34 : vector<1x784x100xbf16> to vector<784x100xbf16>
    %cst_32 = arith.constant dense<0.000000e+00> : vector<8x100xf32>
    %36 = tpu.matmul %2, %35, %cst_32 {dimension_numbers = #tpu.dot_dimension_numbers<[1], [0], [0], [1], [0, 0, 1, 1], [], []>} : vector<8x784xbf16>, vector<784x100xbf16>, vector<8x100xf32> -> vector<8x100xf32>
    %c4_33 = arith.constant 4 : index
    %c0_34 = arith.constant 0 : index
    %c0_35 = arith.constant 0 : index
    %37 = vector.load %arg3[%c4_33, %c0_34, %c0_35] : memref<9x16x8xbf16, #tpu.memory_space<vmem>>, vector<1x16x8xbf16>
    %38 = vector.shape_cast %37 : vector<1x16x8xbf16> to vector<16x8xbf16>
    %39 = arith.truncf %36 : vector<8x100xf32> to vector<8x100xbf16>
    %cst_36 = arith.constant dense<0.000000e+00> : vector<16x100xf32>
    %40 = tpu.matmul %38, %39, %cst_36 {dimension_numbers = #tpu.dot_dimension_numbers<[1], [0], [0], [1], [0, 0, 1, 1], [], []>} : vector<16x8xbf16>, vector<8x100xbf16>, vector<16x100xf32> -> vector<16x100xf32>
    %41 = arith.addf %33, %40 : vector<16x100xf32>
    %c5 = arith.constant 5 : index
    %c0_37 = arith.constant 0 : index
    %c0_38 = arith.constant 0 : index
    %42 = vector.load %arg2[%c5, %c0_37, %c0_38] : memref<9x784x100xbf16, #tpu.memory_space<vmem>>, vector<1x784x100xbf16>
    %43 = vector.shape_cast %42 : vector<1x784x100xbf16> to vector<784x100xbf16>
    %cst_39 = arith.constant dense<0.000000e+00> : vector<8x100xf32>
    %44 = tpu.matmul %2, %43, %cst_39 {dimension_numbers = #tpu.dot_dimension_numbers<[1], [0], [0], [1], [0, 0, 1, 1], [], []>} : vector<8x784xbf16>, vector<784x100xbf16>, vector<8x100xf32> -> vector<8x100xf32>
    %c5_40 = arith.constant 5 : index
    %c0_41 = arith.constant 0 : index
    %c0_42 = arith.constant 0 : index
    %45 = vector.load %arg3[%c5_40, %c0_41, %c0_42] : memref<9x16x8xbf16, #tpu.memory_space<vmem>>, vector<1x16x8xbf16>
    %46 = vector.shape_cast %45 : vector<1x16x8xbf16> to vector<16x8xbf16>
    %47 = arith.truncf %44 : vector<8x100xf32> to vector<8x100xbf16>
    %cst_43 = arith.constant dense<0.000000e+00> : vector<16x100xf32>
    %48 = tpu.matmul %46, %47, %cst_43 {dimension_numbers = #tpu.dot_dimension_numbers<[1], [0], [0], [1], [0, 0, 1, 1], [], []>} : vector<16x8xbf16>, vector<8x100xbf16>, vector<16x100xf32> -> vector<16x100xf32>
    %49 = arith.addf %41, %48 : vector<16x100xf32>
    %c6 = arith.constant 6 : index
    %c0_44 = arith.constant 0 : index
    %c0_45 = arith.constant 0 : index
    %50 = vector.load %arg2[%c6, %c0_44, %c0_45] : memref<9x784x100xbf16, #tpu.memory_space<vmem>>, vector<1x784x100xbf16>
    %51 = vector.shape_cast %50 : vector<1x784x100xbf16> to vector<784x100xbf16>
    %cst_46 = arith.constant dense<0.000000e+00> : vector<8x100xf32>
    %52 = tpu.matmul %2, %51, %cst_46 {dimension_numbers = #tpu.dot_dimension_numbers<[1], [0], [0], [1], [0, 0, 1, 1], [], []>} : vector<8x784xbf16>, vector<784x100xbf16>, vector<8x100xf32> -> vector<8x100xf32>
    %c6_47 = arith.constant 6 : index
    %c0_48 = arith.constant 0 : index
    %c0_49 = arith.constant 0 : index
    %53 = vector.load %arg3[%c6_47, %c0_48, %c0_49] : memref<9x16x8xbf16, #tpu.memory_space<vmem>>, vector<1x16x8xbf16>
    %54 = vector.shape_cast %53 : vector<1x16x8xbf16> to vector<16x8xbf16>
    %55 = arith.truncf %52 : vector<8x100xf32> to vector<8x100xbf16>
    %cst_50 = arith.constant dense<0.000000e+00> : vector<16x100xf32>
    %56 = tpu.matmul %54, %55, %cst_50 {dimension_numbers = #tpu.dot_dimension_numbers<[1], [0], [0], [1], [0, 0, 1, 1], [], []>} : vector<16x8xbf16>, vector<8x100xbf16>, vector<16x100xf32> -> vector<16x100xf32>
    %57 = arith.addf %49, %56 : vector<16x100xf32>
    %c7 = arith.constant 7 : index
    %c0_51 = arith.constant 0 : index
    %c0_52 = arith.constant 0 : index
    %58 = vector.load %arg2[%c7, %c0_51, %c0_52] : memref<9x784x100xbf16, #tpu.memory_space<vmem>>, vector<1x784x100xbf16>
    %59 = vector.shape_cast %58 : vector<1x784x100xbf16> to vector<784x100xbf16>
    %cst_53 = arith.constant dense<0.000000e+00> : vector<8x100xf32>
    %60 = tpu.matmul %2, %59, %cst_53 {dimension_numbers = #tpu.dot_dimension_numbers<[1], [0], [0], [1], [0, 0, 1, 1], [], []>} : vector<8x784xbf16>, vector<784x100xbf16>, vector<8x100xf32> -> vector<8x100xf32>
    %c7_54 = arith.constant 7 : index
    %c0_55 = arith.constant 0 : index
    %c0_56 = arith.constant 0 : index
    %61 = vector.load %arg3[%c7_54, %c0_55, %c0_56] : memref<9x16x8xbf16, #tpu.memory_space<vmem>>, vector<1x16x8xbf16>
    %62 = vector.shape_cast %61 : vector<1x16x8xbf16> to vector<16x8xbf16>
    %63 = arith.truncf %60 : vector<8x100xf32> to vector<8x100xbf16>
    %cst_57 = arith.constant dense<0.000000e+00> : vector<16x100xf32>
    %64 = tpu.matmul %62, %63, %cst_57 {dimension_numbers = #tpu.dot_dimension_numbers<[1], [0], [0], [1], [0, 0, 1, 1], [], []>} : vector<16x8xbf16>, vector<8x100xbf16>, vector<16x100xf32> -> vector<16x100xf32>
    %65 = arith.addf %57, %64 : vector<16x100xf32>
    %c8 = arith.constant 8 : index
    %c0_58 = arith.constant 0 : index
    %c0_59 = arith.constant 0 : index
    %66 = vector.load %arg2[%c8, %c0_58, %c0_59] : memref<9x784x100xbf16, #tpu.memory_space<vmem>>, vector<1x784x100xbf16>
    %67 = vector.shape_cast %66 : vector<1x784x100xbf16> to vector<784x100xbf16>
    %cst_60 = arith.constant dense<0.000000e+00> : vector<8x100xf32>
    %68 = tpu.matmul %2, %67, %cst_60 {dimension_numbers = #tpu.dot_dimension_numbers<[1], [0], [0], [1], [0, 0, 1, 1], [], []>} : vector<8x784xbf16>, vector<784x100xbf16>, vector<8x100xf32> -> vector<8x100xf32>
    %c8_61 = arith.constant 8 : index
    %c0_62 = arith.constant 0 : index
    %c0_63 = arith.constant 0 : index
    %69 = vector.load %arg3[%c8_61, %c0_62, %c0_63] : memref<9x16x8xbf16, #tpu.memory_space<vmem>>, vector<1x16x8xbf16>
    %70 = vector.shape_cast %69 : vector<1x16x8xbf16> to vector<16x8xbf16>
    %71 = arith.truncf %68 : vector<8x100xf32> to vector<8x100xbf16>
    %cst_64 = arith.constant dense<0.000000e+00> : vector<16x100xf32>
    %72 = tpu.matmul %70, %71, %cst_64 {dimension_numbers = #tpu.dot_dimension_numbers<[1], [0], [0], [1], [0, 0, 1, 1], [], []>} : vector<16x8xbf16>, vector<8x100xbf16>, vector<16x100xf32> -> vector<16x100xf32>
    %73 = arith.addf %65, %72 : vector<16x100xf32>
    %c0_65 = arith.constant 0 : index
    %c0_66 = arith.constant 0 : index
    %74 = vector.load %arg4[%c0_65, %c0_66] : memref<16x1xf32, #tpu.memory_space<vmem>>, vector<16x1xf32>
    %75 = vector.broadcast %74 : vector<16x1xf32> to vector<16x100xf32>
    %76 = arith.addf %73, %75 : vector<16x100xf32>
    %cst_67 = arith.constant 0.000000e+00 : f32
    %77 = vector.broadcast %cst_67 : f32 to vector<16x100xf32>
    %78 = arith.maximumf %76, %77 : vector<16x100xf32>
    %79 = arith.truncf %78 : vector<16x100xf32> to vector<16x100xbf16>
    %c0_68 = arith.constant 0 : index
    %c0_69 = arith.constant 0 : index
    %c0_70 = arith.constant 0 : index
    %80 = vector.load %arg5[%c0_68, %c0_69, %c0_70] : memref<4x100x25xbf16, #tpu.memory_space<vmem>>, vector<1x100x25xbf16>
    %81 = vector.shape_cast %80 : vector<1x100x25xbf16> to vector<100x25xbf16>
    %cst_71 = arith.constant dense<0.000000e+00> : vector<16x25xf32>
    %82 = tpu.matmul %79, %81, %cst_71 {dimension_numbers = #tpu.dot_dimension_numbers<[1], [0], [0], [1], [0, 0, 1, 1], [], []>} : vector<16x100xbf16>, vector<100x25xbf16>, vector<16x25xf32> -> vector<16x25xf32>
    %c1_72 = arith.constant 1 : index
    %c0_73 = arith.constant 0 : index
    %c0_74 = arith.constant 0 : index
    %83 = vector.load %arg5[%c1_72, %c0_73, %c0_74] : memref<4x100x25xbf16, #tpu.memory_space<vmem>>, vector<1x100x25xbf16>
    %84 = vector.shape_cast %83 : vector<1x100x25xbf16> to vector<100x25xbf16>
    %cst_75 = arith.constant dense<0.000000e+00> : vector<16x25xf32>
    %85 = tpu.matmul %79, %84, %cst_75 {dimension_numbers = #tpu.dot_dimension_numbers<[1], [0], [0], [1], [0, 0, 1, 1], [], []>} : vector<16x100xbf16>, vector<100x25xbf16>, vector<16x25xf32> -> vector<16x25xf32>
    %86 = arith.maximumf %82, %85 : vector<16x25xf32>
    %c2_76 = arith.constant 2 : index
    %c0_77 = arith.constant 0 : index
    %c0_78 = arith.constant 0 : index
    %87 = vector.load %arg5[%c2_76, %c0_77, %c0_78] : memref<4x100x25xbf16, #tpu.memory_space<vmem>>, vector<1x100x25xbf16>
    %88 = vector.shape_cast %87 : vector<1x100x25xbf16> to vector<100x25xbf16>
    %cst_79 = arith.constant dense<0.000000e+00> : vector<16x25xf32>
    %89 = tpu.matmul %79, %88, %cst_79 {dimension_numbers = #tpu.dot_dimension_numbers<[1], [0], [0], [1], [0, 0, 1, 1], [], []>} : vector<16x100xbf16>, vector<100x25xbf16>, vector<16x25xf32> -> vector<16x25xf32>
    %90 = arith.maximumf %86, %89 : vector<16x25xf32>
    %c3_80 = arith.constant 3 : index
    %c0_81 = arith.constant 0 : index
    %c0_82 = arith.constant 0 : index
    %91 = vector.load %arg5[%c3_80, %c0_81, %c0_82] : memref<4x100x25xbf16, #tpu.memory_space<vmem>>, vector<1x100x25xbf16>
    %92 = vector.shape_cast %91 : vector<1x100x25xbf16> to vector<100x25xbf16>
    %cst_83 = arith.constant dense<0.000000e+00> : vector<16x25xf32>
    %93 = tpu.matmul %79, %92, %cst_83 {dimension_numbers = #tpu.dot_dimension_numbers<[1], [0], [0], [1], [0, 0, 1, 1], [], []>} : vector<16x100xbf16>, vector<100x25xbf16>, vector<16x25xf32> -> vector<16x25xf32>
    %94 = arith.maximumf %90, %93 : vector<16x25xf32>
    %95 = arith.truncf %94 : vector<16x25xf32> to vector<16x25xbf16>
    %c0_84 = arith.constant 0 : index
    %c0_85 = arith.constant 0 : index
    %c0_86 = arith.constant 0 : index
    %96 = vector.load %arg6[%c0_84, %c0_85, %c0_86] : memref<9x25x9xbf16, #tpu.memory_space<vmem>>, vector<1x25x9xbf16>
    %97 = vector.shape_cast %96 : vector<1x25x9xbf16> to vector<25x9xbf16>
    %cst_87 = arith.constant dense<0.000000e+00> : vector<16x9xf32>
    %98 = tpu.matmul %95, %97, %cst_87 {dimension_numbers = #tpu.dot_dimension_numbers<[1], [0], [0], [1], [0, 0, 1, 1], [], []>} : vector<16x25xbf16>, vector<25x9xbf16>, vector<16x9xf32> -> vector<16x9xf32>
    %c0_88 = arith.constant 0 : index
    %c0_89 = arith.constant 0 : index
    %c0_90 = arith.constant 0 : index
    %99 = vector.load %arg7[%c0_88, %c0_89, %c0_90] : memref<9x8x16xbf16, #tpu.memory_space<vmem>>, vector<1x8x16xbf16>
    %100 = vector.shape_cast %99 : vector<1x8x16xbf16> to vector<8x16xbf16>
    %101 = arith.truncf %98 : vector<16x9xf32> to vector<16x9xbf16>
    %cst_91 = arith.constant dense<0.000000e+00> : vector<8x9xf32>
    %102 = tpu.matmul %100, %101, %cst_91 {dimension_numbers = #tpu.dot_dimension_numbers<[1], [0], [0], [1], [0, 0, 1, 1], [], []>} : vector<8x16xbf16>, vector<16x9xbf16>, vector<8x9xf32> -> vector<8x9xf32>
    %c1_92 = arith.constant 1 : index
    %c0_93 = arith.constant 0 : index
    %c0_94 = arith.constant 0 : index
    %103 = vector.load %arg6[%c1_92, %c0_93, %c0_94] : memref<9x25x9xbf16, #tpu.memory_space<vmem>>, vector<1x25x9xbf16>
    %104 = vector.shape_cast %103 : vector<1x25x9xbf16> to vector<25x9xbf16>
    %cst_95 = arith.constant dense<0.000000e+00> : vector<16x9xf32>
    %105 = tpu.matmul %95, %104, %cst_95 {dimension_numbers = #tpu.dot_dimension_numbers<[1], [0], [0], [1], [0, 0, 1, 1], [], []>} : vector<16x25xbf16>, vector<25x9xbf16>, vector<16x9xf32> -> vector<16x9xf32>
    %c1_96 = arith.constant 1 : index
    %c0_97 = arith.constant 0 : index
    %c0_98 = arith.constant 0 : index
    %106 = vector.load %arg7[%c1_96, %c0_97, %c0_98] : memref<9x8x16xbf16, #tpu.memory_space<vmem>>, vector<1x8x16xbf16>
    %107 = vector.shape_cast %106 : vector<1x8x16xbf16> to vector<8x16xbf16>
    %108 = arith.truncf %105 : vector<16x9xf32> to vector<16x9xbf16>
    %cst_99 = arith.constant dense<0.000000e+00> : vector<8x9xf32>
    %109 = tpu.matmul %107, %108, %cst_99 {dimension_numbers = #tpu.dot_dimension_numbers<[1], [0], [0], [1], [0, 0, 1, 1], [], []>} : vector<8x16xbf16>, vector<16x9xbf16>, vector<8x9xf32> -> vector<8x9xf32>
    %110 = arith.addf %102, %109 : vector<8x9xf32>
    %c2_100 = arith.constant 2 : index
    %c0_101 = arith.constant 0 : index
    %c0_102 = arith.constant 0 : index
    %111 = vector.load %arg6[%c2_100, %c0_101, %c0_102] : memref<9x25x9xbf16, #tpu.memory_space<vmem>>, vector<1x25x9xbf16>
    %112 = vector.shape_cast %111 : vector<1x25x9xbf16> to vector<25x9xbf16>
    %cst_103 = arith.constant dense<0.000000e+00> : vector<16x9xf32>
    %113 = tpu.matmul %95, %112, %cst_103 {dimension_numbers = #tpu.dot_dimension_numbers<[1], [0], [0], [1], [0, 0, 1, 1], [], []>} : vector<16x25xbf16>, vector<25x9xbf16>, vector<16x9xf32> -> vector<16x9xf32>
    %c2_104 = arith.constant 2 : index
    %c0_105 = arith.constant 0 : index
    %c0_106 = arith.constant 0 : index
    %114 = vector.load %arg7[%c2_104, %c0_105, %c0_106] : memref<9x8x16xbf16, #tpu.memory_space<vmem>>, vector<1x8x16xbf16>
    %115 = vector.shape_cast %114 : vector<1x8x16xbf16> to vector<8x16xbf16>
    %116 = arith.truncf %113 : vector<16x9xf32> to vector<16x9xbf16>
    %cst_107 = arith.constant dense<0.000000e+00> : vector<8x9xf32>
    %117 = tpu.matmul %115, %116, %cst_107 {dimension_numbers = #tpu.dot_dimension_numbers<[1], [0], [0], [1], [0, 0, 1, 1], [], []>} : vector<8x16xbf16>, vector<16x9xbf16>, vector<8x9xf32> -> vector<8x9xf32>
    %118 = arith.addf %110, %117 : vector<8x9xf32>
    %c3_108 = arith.constant 3 : index
    %c0_109 = arith.constant 0 : index
    %c0_110 = arith.constant 0 : index
    %119 = vector.load %arg6[%c3_108, %c0_109, %c0_110] : memref<9x25x9xbf16, #tpu.memory_space<vmem>>, vector<1x25x9xbf16>
    %120 = vector.shape_cast %119 : vector<1x25x9xbf16> to vector<25x9xbf16>
    %cst_111 = arith.constant dense<0.000000e+00> : vector<16x9xf32>
    %121 = tpu.matmul %95, %120, %cst_111 {dimension_numbers = #tpu.dot_dimension_numbers<[1], [0], [0], [1], [0, 0, 1, 1], [], []>} : vector<16x25xbf16>, vector<25x9xbf16>, vector<16x9xf32> -> vector<16x9xf32>
    %c3_112 = arith.constant 3 : index
    %c0_113 = arith.constant 0 : index
    %c0_114 = arith.constant 0 : index
    %122 = vector.load %arg7[%c3_112, %c0_113, %c0_114] : memref<9x8x16xbf16, #tpu.memory_space<vmem>>, vector<1x8x16xbf16>
    %123 = vector.shape_cast %122 : vector<1x8x16xbf16> to vector<8x16xbf16>
    %124 = arith.truncf %121 : vector<16x9xf32> to vector<16x9xbf16>
    %cst_115 = arith.constant dense<0.000000e+00> : vector<8x9xf32>
    %125 = tpu.matmul %123, %124, %cst_115 {dimension_numbers = #tpu.dot_dimension_numbers<[1], [0], [0], [1], [0, 0, 1, 1], [], []>} : vector<8x16xbf16>, vector<16x9xbf16>, vector<8x9xf32> -> vector<8x9xf32>
    %126 = arith.addf %118, %125 : vector<8x9xf32>
    %c4_116 = arith.constant 4 : index
    %c0_117 = arith.constant 0 : index
    %c0_118 = arith.constant 0 : index
    %127 = vector.load %arg6[%c4_116, %c0_117, %c0_118] : memref<9x25x9xbf16, #tpu.memory_space<vmem>>, vector<1x25x9xbf16>
    %128 = vector.shape_cast %127 : vector<1x25x9xbf16> to vector<25x9xbf16>
    %cst_119 = arith.constant dense<0.000000e+00> : vector<16x9xf32>
    %129 = tpu.matmul %95, %128, %cst_119 {dimension_numbers = #tpu.dot_dimension_numbers<[1], [0], [0], [1], [0, 0, 1, 1], [], []>} : vector<16x25xbf16>, vector<25x9xbf16>, vector<16x9xf32> -> vector<16x9xf32>
    %c4_120 = arith.constant 4 : index
    %c0_121 = arith.constant 0 : index
    %c0_122 = arith.constant 0 : index
    %130 = vector.load %arg7[%c4_120, %c0_121, %c0_122] : memref<9x8x16xbf16, #tpu.memory_space<vmem>>, vector<1x8x16xbf16>
    %131 = vector.shape_cast %130 : vector<1x8x16xbf16> to vector<8x16xbf16>
    %132 = arith.truncf %129 : vector<16x9xf32> to vector<16x9xbf16>
    %cst_123 = arith.constant dense<0.000000e+00> : vector<8x9xf32>
    %133 = tpu.matmul %131, %132, %cst_123 {dimension_numbers = #tpu.dot_dimension_numbers<[1], [0], [0], [1], [0, 0, 1, 1], [], []>} : vector<8x16xbf16>, vector<16x9xbf16>, vector<8x9xf32> -> vector<8x9xf32>
    %134 = arith.addf %126, %133 : vector<8x9xf32>
    %c5_124 = arith.constant 5 : index
    %c0_125 = arith.constant 0 : index
    %c0_126 = arith.constant 0 : index
    %135 = vector.load %arg6[%c5_124, %c0_125, %c0_126] : memref<9x25x9xbf16, #tpu.memory_space<vmem>>, vector<1x25x9xbf16>
    %136 = vector.shape_cast %135 : vector<1x25x9xbf16> to vector<25x9xbf16>
    %cst_127 = arith.constant dense<0.000000e+00> : vector<16x9xf32>
    %137 = tpu.matmul %95, %136, %cst_127 {dimension_numbers = #tpu.dot_dimension_numbers<[1], [0], [0], [1], [0, 0, 1, 1], [], []>} : vector<16x25xbf16>, vector<25x9xbf16>, vector<16x9xf32> -> vector<16x9xf32>
    %c5_128 = arith.constant 5 : index
    %c0_129 = arith.constant 0 : index
    %c0_130 = arith.constant 0 : index
    %138 = vector.load %arg7[%c5_128, %c0_129, %c0_130] : memref<9x8x16xbf16, #tpu.memory_space<vmem>>, vector<1x8x16xbf16>
    %139 = vector.shape_cast %138 : vector<1x8x16xbf16> to vector<8x16xbf16>
    %140 = arith.truncf %137 : vector<16x9xf32> to vector<16x9xbf16>
    %cst_131 = arith.constant dense<0.000000e+00> : vector<8x9xf32>
    %141 = tpu.matmul %139, %140, %cst_131 {dimension_numbers = #tpu.dot_dimension_numbers<[1], [0], [0], [1], [0, 0, 1, 1], [], []>} : vector<8x16xbf16>, vector<16x9xbf16>, vector<8x9xf32> -> vector<8x9xf32>
    %142 = arith.addf %134, %141 : vector<8x9xf32>
    %c6_132 = arith.constant 6 : index
    %c0_133 = arith.constant 0 : index
    %c0_134 = arith.constant 0 : index
    %143 = vector.load %arg6[%c6_132, %c0_133, %c0_134] : memref<9x25x9xbf16, #tpu.memory_space<vmem>>, vector<1x25x9xbf16>
    %144 = vector.shape_cast %143 : vector<1x25x9xbf16> to vector<25x9xbf16>
    %cst_135 = arith.constant dense<0.000000e+00> : vector<16x9xf32>
    %145 = tpu.matmul %95, %144, %cst_135 {dimension_numbers = #tpu.dot_dimension_numbers<[1], [0], [0], [1], [0, 0, 1, 1], [], []>} : vector<16x25xbf16>, vector<25x9xbf16>, vector<16x9xf32> -> vector<16x9xf32>
    %c6_136 = arith.constant 6 : index
    %c0_137 = arith.constant 0 : index
    %c0_138 = arith.constant 0 : index
    %146 = vector.load %arg7[%c6_136, %c0_137, %c0_138] : memref<9x8x16xbf16, #tpu.memory_space<vmem>>, vector<1x8x16xbf16>
    %147 = vector.shape_cast %146 : vector<1x8x16xbf16> to vector<8x16xbf16>
    %148 = arith.truncf %145 : vector<16x9xf32> to vector<16x9xbf16>
    %cst_139 = arith.constant dense<0.000000e+00> : vector<8x9xf32>
    %149 = tpu.matmul %147, %148, %cst_139 {dimension_numbers = #tpu.dot_dimension_numbers<[1], [0], [0], [1], [0, 0, 1, 1], [], []>} : vector<8x16xbf16>, vector<16x9xbf16>, vector<8x9xf32> -> vector<8x9xf32>
    %150 = arith.addf %142, %149 : vector<8x9xf32>
    %c7_140 = arith.constant 7 : index
    %c0_141 = arith.constant 0 : index
    %c0_142 = arith.constant 0 : index
    %151 = vector.load %arg6[%c7_140, %c0_141, %c0_142] : memref<9x25x9xbf16, #tpu.memory_space<vmem>>, vector<1x25x9xbf16>
    %152 = vector.shape_cast %151 : vector<1x25x9xbf16> to vector<25x9xbf16>
    %cst_143 = arith.constant dense<0.000000e+00> : vector<16x9xf32>
    %153 = tpu.matmul %95, %152, %cst_143 {dimension_numbers = #tpu.dot_dimension_numbers<[1], [0], [0], [1], [0, 0, 1, 1], [], []>} : vector<16x25xbf16>, vector<25x9xbf16>, vector<16x9xf32> -> vector<16x9xf32>
    %c7_144 = arith.constant 7 : index
    %c0_145 = arith.constant 0 : index
    %c0_146 = arith.constant 0 : index
    %154 = vector.load %arg7[%c7_144, %c0_145, %c0_146] : memref<9x8x16xbf16, #tpu.memory_space<vmem>>, vector<1x8x16xbf16>
    %155 = vector.shape_cast %154 : vector<1x8x16xbf16> to vector<8x16xbf16>
    %156 = arith.truncf %153 : vector<16x9xf32> to vector<16x9xbf16>
    %cst_147 = arith.constant dense<0.000000e+00> : vector<8x9xf32>
    %157 = tpu.matmul %155, %156, %cst_147 {dimension_numbers = #tpu.dot_dimension_numbers<[1], [0], [0], [1], [0, 0, 1, 1], [], []>} : vector<8x16xbf16>, vector<16x9xbf16>, vector<8x9xf32> -> vector<8x9xf32>
    %158 = arith.addf %150, %157 : vector<8x9xf32>
    %c8_148 = arith.constant 8 : index
    %c0_149 = arith.constant 0 : index
    %c0_150 = arith.constant 0 : index
    %159 = vector.load %arg6[%c8_148, %c0_149, %c0_150] : memref<9x25x9xbf16, #tpu.memory_space<vmem>>, vector<1x25x9xbf16>
    %160 = vector.shape_cast %159 : vector<1x25x9xbf16> to vector<25x9xbf16>
    %cst_151 = arith.constant dense<0.000000e+00> : vector<16x9xf32>
    %161 = tpu.matmul %95, %160, %cst_151 {dimension_numbers = #tpu.dot_dimension_numbers<[1], [0], [0], [1], [0, 0, 1, 1], [], []>} : vector<16x25xbf16>, vector<25x9xbf16>, vector<16x9xf32> -> vector<16x9xf32>
    %c8_152 = arith.constant 8 : index
    %c0_153 = arith.constant 0 : index
    %c0_154 = arith.constant 0 : index
    %162 = vector.load %arg7[%c8_152, %c0_153, %c0_154] : memref<9x8x16xbf16, #tpu.memory_space<vmem>>, vector<1x8x16xbf16>
    %163 = vector.shape_cast %162 : vector<1x8x16xbf16> to vector<8x16xbf16>
    %164 = arith.truncf %161 : vector<16x9xf32> to vector<16x9xbf16>
    %cst_155 = arith.constant dense<0.000000e+00> : vector<8x9xf32>
    %165 = tpu.matmul %163, %164, %cst_155 {dimension_numbers = #tpu.dot_dimension_numbers<[1], [0], [0], [1], [0, 0, 1, 1], [], []>} : vector<8x16xbf16>, vector<16x9xbf16>, vector<8x9xf32> -> vector<8x9xf32>
    %166 = arith.addf %158, %165 : vector<8x9xf32>
    %c0_156 = arith.constant 0 : index
    %c0_157 = arith.constant 0 : index
    %167 = vector.load %arg8[%c0_156, %c0_157] : memref<8x1xf32, #tpu.memory_space<vmem>>, vector<8x1xf32>
    %168 = vector.broadcast %167 : vector<8x1xf32> to vector<8x9xf32>
    %169 = arith.addf %166, %168 : vector<8x9xf32>
    %cst_158 = arith.constant 0.000000e+00 : f32
    %170 = vector.broadcast %cst_158 : f32 to vector<8x9xf32>
    %171 = arith.maximumf %169, %170 : vector<8x9xf32>
    %172 = arith.truncf %171 : vector<8x9xf32> to vector<8x9xbf16>
    %c0_159 = arith.constant 0 : index
    %c0_160 = arith.constant 0 : index
    %c0_161 = arith.constant 0 : index
    %173 = vector.load %arg9[%c0_159, %c0_160, %c0_161] : memref<4x9x4xbf16, #tpu.memory_space<vmem>>, vector<1x9x4xbf16>
    %174 = vector.shape_cast %173 : vector<1x9x4xbf16> to vector<9x4xbf16>
    %cst_162 = arith.constant dense<0.000000e+00> : vector<8x4xf32>
    %175 = tpu.matmul %172, %174, %cst_162 {dimension_numbers = #tpu.dot_dimension_numbers<[1], [0], [0], [1], [0, 0, 1, 1], [], []>} : vector<8x9xbf16>, vector<9x4xbf16>, vector<8x4xf32> -> vector<8x4xf32>
    %c1_163 = arith.constant 1 : index
    %c0_164 = arith.constant 0 : index
    %c0_165 = arith.constant 0 : index
    %176 = vector.load %arg9[%c1_163, %c0_164, %c0_165] : memref<4x9x4xbf16, #tpu.memory_space<vmem>>, vector<1x9x4xbf16>
    %177 = vector.shape_cast %176 : vector<1x9x4xbf16> to vector<9x4xbf16>
    %cst_166 = arith.constant dense<0.000000e+00> : vector<8x4xf32>
    %178 = tpu.matmul %172, %177, %cst_166 {dimension_numbers = #tpu.dot_dimension_numbers<[1], [0], [0], [1], [0, 0, 1, 1], [], []>} : vector<8x9xbf16>, vector<9x4xbf16>, vector<8x4xf32> -> vector<8x4xf32>
    %179 = arith.maximumf %175, %178 : vector<8x4xf32>
    %c2_167 = arith.constant 2 : index
    %c0_168 = arith.constant 0 : index
    %c0_169 = arith.constant 0 : index
    %180 = vector.load %arg9[%c2_167, %c0_168, %c0_169] : memref<4x9x4xbf16, #tpu.memory_space<vmem>>, vector<1x9x4xbf16>
    %181 = vector.shape_cast %180 : vector<1x9x4xbf16> to vector<9x4xbf16>
    %cst_170 = arith.constant dense<0.000000e+00> : vector<8x4xf32>
    %182 = tpu.matmul %172, %181, %cst_170 {dimension_numbers = #tpu.dot_dimension_numbers<[1], [0], [0], [1], [0, 0, 1, 1], [], []>} : vector<8x9xbf16>, vector<9x4xbf16>, vector<8x4xf32> -> vector<8x4xf32>
    %183 = arith.maximumf %179, %182 : vector<8x4xf32>
    %c3_171 = arith.constant 3 : index
    %c0_172 = arith.constant 0 : index
    %c0_173 = arith.constant 0 : index
    %184 = vector.load %arg9[%c3_171, %c0_172, %c0_173] : memref<4x9x4xbf16, #tpu.memory_space<vmem>>, vector<1x9x4xbf16>
    %185 = vector.shape_cast %184 : vector<1x9x4xbf16> to vector<9x4xbf16>
    %cst_174 = arith.constant dense<0.000000e+00> : vector<8x4xf32>
    %186 = tpu.matmul %172, %185, %cst_174 {dimension_numbers = #tpu.dot_dimension_numbers<[1], [0], [0], [1], [0, 0, 1, 1], [], []>} : vector<8x9xbf16>, vector<9x4xbf16>, vector<8x4xf32> -> vector<8x4xf32>
    %187 = arith.maximumf %183, %186 : vector<8x4xf32>
    %c0_175 = arith.constant 0 : index
    %c0_176 = arith.constant 0 : index
    %c0_177 = arith.constant 0 : index
    %188 = vector.load %arg19[%c0_175, %c0_176, %c0_177] : memref<1x8x4xf32, #tpu.memory_space<vmem>>, vector<1x8x4xf32>
    %189 = vector.shape_cast %188 : vector<1x8x4xf32> to vector<8x4xf32>
    %190 = vector.shape_cast %187 : vector<8x4xf32> to vector<1x8x4xf32>
    tpu.vector_store %arg19[%c0_175, %c0_176, %c0_177], %190 {strides = array<i32>} : memref<1x8x4xf32, #tpu.memory_space<vmem>>, vector<1x8x4xf32>,
    %191 = arith.truncf %187 : vector<8x4xf32> to vector<8x4xbf16>
    %c0_178 = arith.constant 0 : index
    %c0_179 = arith.constant 0 : index
    %c0_180 = arith.constant 0 : index
    %192 = vector.load %arg10[%c0_178, %c0_179, %c0_180] : memref<9x4x25xbf16, #tpu.memory_space<vmem>>, vector<1x4x25xbf16>
    %193 = vector.shape_cast %192 : vector<1x4x25xbf16> to vector<4x25xbf16>
    %cst_181 = arith.constant dense<0.000000e+00> : vector<8x25xf32>
    %194 = tpu.matmul %191, %193, %cst_181 {dimension_numbers = #tpu.dot_dimension_numbers<[1], [0], [0], [1], [0, 0, 1, 1], [], []>} : vector<8x4xbf16>, vector<4x25xbf16>, vector<8x25xf32> -> vector<8x25xf32>
    %c0_182 = arith.constant 0 : index
    %c0_183 = arith.constant 0 : index
    %c0_184 = arith.constant 0 : index
    %195 = vector.load %arg11[%c0_182, %c0_183, %c0_184] : memref<9x16x8xbf16, #tpu.memory_space<vmem>>, vector<1x16x8xbf16>
    %196 = vector.shape_cast %195 : vector<1x16x8xbf16> to vector<16x8xbf16>
    %197 = arith.truncf %194 : vector<8x25xf32> to vector<8x25xbf16>
    %cst_185 = arith.constant dense<0.000000e+00> : vector<16x25xf32>
    %198 = tpu.matmul %196, %197, %cst_185 {dimension_numbers = #tpu.dot_dimension_numbers<[1], [0], [0], [1], [0, 0, 1, 1], [], []>} : vector<16x8xbf16>, vector<8x25xbf16>, vector<16x25xf32> -> vector<16x25xf32>
    %c1_186 = arith.constant 1 : index
    %c0_187 = arith.constant 0 : index
    %c0_188 = arith.constant 0 : index
    %199 = vector.load %arg10[%c1_186, %c0_187, %c0_188] : memref<9x4x25xbf16, #tpu.memory_space<vmem>>, vector<1x4x25xbf16>
    %200 = vector.shape_cast %199 : vector<1x4x25xbf16> to vector<4x25xbf16>
    %cst_189 = arith.constant dense<0.000000e+00> : vector<8x25xf32>
    %201 = tpu.matmul %191, %200, %cst_189 {dimension_numbers = #tpu.dot_dimension_numbers<[1], [0], [0], [1], [0, 0, 1, 1], [], []>} : vector<8x4xbf16>, vector<4x25xbf16>, vector<8x25xf32> -> vector<8x25xf32>
    %c1_190 = arith.constant 1 : index
    %c0_191 = arith.constant 0 : index
    %c0_192 = arith.constant 0 : index
    %202 = vector.load %arg11[%c1_190, %c0_191, %c0_192] : memref<9x16x8xbf16, #tpu.memory_space<vmem>>, vector<1x16x8xbf16>
    %203 = vector.shape_cast %202 : vector<1x16x8xbf16> to vector<16x8xbf16>
    %204 = arith.truncf %201 : vector<8x25xf32> to vector<8x25xbf16>
    %cst_193 = arith.constant dense<0.000000e+00> : vector<16x25xf32>
    %205 = tpu.matmul %203, %204, %cst_193 {dimension_numbers = #tpu.dot_dimension_numbers<[1], [0], [0], [1], [0, 0, 1, 1], [], []>} : vector<16x8xbf16>, vector<8x25xbf16>, vector<16x25xf32> -> vector<16x25xf32>
    %206 = arith.addf %198, %205 : vector<16x25xf32>
    %c2_194 = arith.constant 2 : index
    %c0_195 = arith.constant 0 : index
    %c0_196 = arith.constant 0 : index
    %207 = vector.load %arg10[%c2_194, %c0_195, %c0_196] : memref<9x4x25xbf16, #tpu.memory_space<vmem>>, vector<1x4x25xbf16>
    %208 = vector.shape_cast %207 : vector<1x4x25xbf16> to vector<4x25xbf16>
    %cst_197 = arith.constant dense<0.000000e+00> : vector<8x25xf32>
    %209 = tpu.matmul %191, %208, %cst_197 {dimension_numbers = #tpu.dot_dimension_numbers<[1], [0], [0], [1], [0, 0, 1, 1], [], []>} : vector<8x4xbf16>, vector<4x25xbf16>, vector<8x25xf32> -> vector<8x25xf32>
    %c2_198 = arith.constant 2 : index
    %c0_199 = arith.constant 0 : index
    %c0_200 = arith.constant 0 : index
    %210 = vector.load %arg11[%c2_198, %c0_199, %c0_200] : memref<9x16x8xbf16, #tpu.memory_space<vmem>>, vector<1x16x8xbf16>
    %211 = vector.shape_cast %210 : vector<1x16x8xbf16> to vector<16x8xbf16>
    %212 = arith.truncf %209 : vector<8x25xf32> to vector<8x25xbf16>
    %cst_201 = arith.constant dense<0.000000e+00> : vector<16x25xf32>
    %213 = tpu.matmul %211, %212, %cst_201 {dimension_numbers = #tpu.dot_dimension_numbers<[1], [0], [0], [1], [0, 0, 1, 1], [], []>} : vector<16x8xbf16>, vector<8x25xbf16>, vector<16x25xf32> -> vector<16x25xf32>
    %214 = arith.addf %206, %213 : vector<16x25xf32>
    %c3_202 = arith.constant 3 : index
    %c0_203 = arith.constant 0 : index
    %c0_204 = arith.constant 0 : index
    %215 = vector.load %arg10[%c3_202, %c0_203, %c0_204] : memref<9x4x25xbf16, #tpu.memory_space<vmem>>, vector<1x4x25xbf16>
    %216 = vector.shape_cast %215 : vector<1x4x25xbf16> to vector<4x25xbf16>
    %cst_205 = arith.constant dense<0.000000e+00> : vector<8x25xf32>
    %217 = tpu.matmul %191, %216, %cst_205 {dimension_numbers = #tpu.dot_dimension_numbers<[1], [0], [0], [1], [0, 0, 1, 1], [], []>} : vector<8x4xbf16>, vector<4x25xbf16>, vector<8x25xf32> -> vector<8x25xf32>
    %c3_206 = arith.constant 3 : index
    %c0_207 = arith.constant 0 : index
    %c0_208 = arith.constant 0 : index
    %218 = vector.load %arg11[%c3_206, %c0_207, %c0_208] : memref<9x16x8xbf16, #tpu.memory_space<vmem>>, vector<1x16x8xbf16>
    %219 = vector.shape_cast %218 : vector<1x16x8xbf16> to vector<16x8xbf16>
    %220 = arith.truncf %217 : vector<8x25xf32> to vector<8x25xbf16>
    %cst_209 = arith.constant dense<0.000000e+00> : vector<16x25xf32>
    %221 = tpu.matmul %219, %220, %cst_209 {dimension_numbers = #tpu.dot_dimension_numbers<[1], [0], [0], [1], [0, 0, 1, 1], [], []>} : vector<16x8xbf16>, vector<8x25xbf16>, vector<16x25xf32> -> vector<16x25xf32>
    %222 = arith.addf %214, %221 : vector<16x25xf32>
    %c4_210 = arith.constant 4 : index
    %c0_211 = arith.constant 0 : index
    %c0_212 = arith.constant 0 : index
    %223 = vector.load %arg10[%c4_210, %c0_211, %c0_212] : memref<9x4x25xbf16, #tpu.memory_space<vmem>>, vector<1x4x25xbf16>
    %224 = vector.shape_cast %223 : vector<1x4x25xbf16> to vector<4x25xbf16>
    %cst_213 = arith.constant dense<0.000000e+00> : vector<8x25xf32>
    %225 = tpu.matmul %191, %224, %cst_213 {dimension_numbers = #tpu.dot_dimension_numbers<[1], [0], [0], [1], [0, 0, 1, 1], [], []>} : vector<8x4xbf16>, vector<4x25xbf16>, vector<8x25xf32> -> vector<8x25xf32>
    %c4_214 = arith.constant 4 : index
    %c0_215 = arith.constant 0 : index
    %c0_216 = arith.constant 0 : index
    %226 = vector.load %arg11[%c4_214, %c0_215, %c0_216] : memref<9x16x8xbf16, #tpu.memory_space<vmem>>, vector<1x16x8xbf16>
    %227 = vector.shape_cast %226 : vector<1x16x8xbf16> to vector<16x8xbf16>
    %228 = arith.truncf %225 : vector<8x25xf32> to vector<8x25xbf16>
    %cst_217 = arith.constant dense<0.000000e+00> : vector<16x25xf32>
    %229 = tpu.matmul %227, %228, %cst_217 {dimension_numbers = #tpu.dot_dimension_numbers<[1], [0], [0], [1], [0, 0, 1, 1], [], []>} : vector<16x8xbf16>, vector<8x25xbf16>, vector<16x25xf32> -> vector<16x25xf32>
    %230 = arith.addf %222, %229 : vector<16x25xf32>
    %c5_218 = arith.constant 5 : index
    %c0_219 = arith.constant 0 : index
    %c0_220 = arith.constant 0 : index
    %231 = vector.load %arg10[%c5_218, %c0_219, %c0_220] : memref<9x4x25xbf16, #tpu.memory_space<vmem>>, vector<1x4x25xbf16>
    %232 = vector.shape_cast %231 : vector<1x4x25xbf16> to vector<4x25xbf16>
    %cst_221 = arith.constant dense<0.000000e+00> : vector<8x25xf32>
    %233 = tpu.matmul %191, %232, %cst_221 {dimension_numbers = #tpu.dot_dimension_numbers<[1], [0], [0], [1], [0, 0, 1, 1], [], []>} : vector<8x4xbf16>, vector<4x25xbf16>, vector<8x25xf32> -> vector<8x25xf32>
    %c5_222 = arith.constant 5 : index
    %c0_223 = arith.constant 0 : index
    %c0_224 = arith.constant 0 : index
    %234 = vector.load %arg11[%c5_222, %c0_223, %c0_224] : memref<9x16x8xbf16, #tpu.memory_space<vmem>>, vector<1x16x8xbf16>
    %235 = vector.shape_cast %234 : vector<1x16x8xbf16> to vector<16x8xbf16>
    %236 = arith.truncf %233 : vector<8x25xf32> to vector<8x25xbf16>
    %cst_225 = arith.constant dense<0.000000e+00> : vector<16x25xf32>
    %237 = tpu.matmul %235, %236, %cst_225 {dimension_numbers = #tpu.dot_dimension_numbers<[1], [0], [0], [1], [0, 0, 1, 1], [], []>} : vector<16x8xbf16>, vector<8x25xbf16>, vector<16x25xf32> -> vector<16x25xf32>
    %238 = arith.addf %230, %237 : vector<16x25xf32>
    %c6_226 = arith.constant 6 : index
    %c0_227 = arith.constant 0 : index
    %c0_228 = arith.constant 0 : index
    %239 = vector.load %arg10[%c6_226, %c0_227, %c0_228] : memref<9x4x25xbf16, #tpu.memory_space<vmem>>, vector<1x4x25xbf16>
    %240 = vector.shape_cast %239 : vector<1x4x25xbf16> to vector<4x25xbf16>
    %cst_229 = arith.constant dense<0.000000e+00> : vector<8x25xf32>
    %241 = tpu.matmul %191, %240, %cst_229 {dimension_numbers = #tpu.dot_dimension_numbers<[1], [0], [0], [1], [0, 0, 1, 1], [], []>} : vector<8x4xbf16>, vector<4x25xbf16>, vector<8x25xf32> -> vector<8x25xf32>
    %c6_230 = arith.constant 6 : index
    %c0_231 = arith.constant 0 : index
    %c0_232 = arith.constant 0 : index
    %242 = vector.load %arg11[%c6_230, %c0_231, %c0_232] : memref<9x16x8xbf16, #tpu.memory_space<vmem>>, vector<1x16x8xbf16>
    %243 = vector.shape_cast %242 : vector<1x16x8xbf16> to vector<16x8xbf16>
    %244 = arith.truncf %241 : vector<8x25xf32> to vector<8x25xbf16>
    %cst_233 = arith.constant dense<0.000000e+00> : vector<16x25xf32>
    %245 = tpu.matmul %243, %244, %cst_233 {dimension_numbers = #tpu.dot_dimension_numbers<[1], [0], [0], [1], [0, 0, 1, 1], [], []>} : vector<16x8xbf16>, vector<8x25xbf16>, vector<16x25xf32> -> vector<16x25xf32>
    %246 = arith.addf %238, %245 : vector<16x25xf32>
    %c7_234 = arith.constant 7 : index
    %c0_235 = arith.constant 0 : index
    %c0_236 = arith.constant 0 : index
    %247 = vector.load %arg10[%c7_234, %c0_235, %c0_236] : memref<9x4x25xbf16, #tpu.memory_space<vmem>>, vector<1x4x25xbf16>
    %248 = vector.shape_cast %247 : vector<1x4x25xbf16> to vector<4x25xbf16>
    %cst_237 = arith.constant dense<0.000000e+00> : vector<8x25xf32>
    %249 = tpu.matmul %191, %248, %cst_237 {dimension_numbers = #tpu.dot_dimension_numbers<[1], [0], [0], [1], [0, 0, 1, 1], [], []>} : vector<8x4xbf16>, vector<4x25xbf16>, vector<8x25xf32> -> vector<8x25xf32>
    %c7_238 = arith.constant 7 : index
    %c0_239 = arith.constant 0 : index
    %c0_240 = arith.constant 0 : index
    %250 = vector.load %arg11[%c7_238, %c0_239, %c0_240] : memref<9x16x8xbf16, #tpu.memory_space<vmem>>, vector<1x16x8xbf16>
    %251 = vector.shape_cast %250 : vector<1x16x8xbf16> to vector<16x8xbf16>
    %252 = arith.truncf %249 : vector<8x25xf32> to vector<8x25xbf16>
    %cst_241 = arith.constant dense<0.000000e+00> : vector<16x25xf32>
    %253 = tpu.matmul %251, %252, %cst_241 {dimension_numbers = #tpu.dot_dimension_numbers<[1], [0], [0], [1], [0, 0, 1, 1], [], []>} : vector<16x8xbf16>, vector<8x25xbf16>, vector<16x25xf32> -> vector<16x25xf32>
    %254 = arith.addf %246, %253 : vector<16x25xf32>
    %c8_242 = arith.constant 8 : index
    %c0_243 = arith.constant 0 : index
    %c0_244 = arith.constant 0 : index
    %255 = vector.load %arg10[%c8_242, %c0_243, %c0_244] : memref<9x4x25xbf16, #tpu.memory_space<vmem>>, vector<1x4x25xbf16>
    %256 = vector.shape_cast %255 : vector<1x4x25xbf16> to vector<4x25xbf16>
    %cst_245 = arith.constant dense<0.000000e+00> : vector<8x25xf32>
    %257 = tpu.matmul %191, %256, %cst_245 {dimension_numbers = #tpu.dot_dimension_numbers<[1], [0], [0], [1], [0, 0, 1, 1], [], []>} : vector<8x4xbf16>, vector<4x25xbf16>, vector<8x25xf32> -> vector<8x25xf32>
    %c8_246 = arith.constant 8 : index
    %c0_247 = arith.constant 0 : index
    %c0_248 = arith.constant 0 : index
    %258 = vector.load %arg11[%c8_246, %c0_247, %c0_248] : memref<9x16x8xbf16, #tpu.memory_space<vmem>>, vector<1x16x8xbf16>
    %259 = vector.shape_cast %258 : vector<1x16x8xbf16> to vector<16x8xbf16>
    %260 = arith.truncf %257 : vector<8x25xf32> to vector<8x25xbf16>
    %cst_249 = arith.constant dense<0.000000e+00> : vector<16x25xf32>
    %261 = tpu.matmul %259, %260, %cst_249 {dimension_numbers = #tpu.dot_dimension_numbers<[1], [0], [0], [1], [0, 0, 1, 1], [], []>} : vector<16x8xbf16>, vector<8x25xbf16>, vector<16x25xf32> -> vector<16x25xf32>
    %262 = arith.addf %254, %261 : vector<16x25xf32>
    %c0_250 = arith.constant 0 : index
    %c0_251 = arith.constant 0 : index
    %263 = vector.load %arg12[%c0_250, %c0_251] : memref<16x1xf32, #tpu.memory_space<vmem>>, vector<16x1xf32>
    %264 = vector.broadcast %263 : vector<16x1xf32> to vector<16x25xf32>
    %265 = arith.addf %262, %264 : vector<16x25xf32>
    %cst_252 = arith.constant 0.000000e+00 : f32
    %266 = vector.broadcast %cst_252 : f32 to vector<16x25xf32>
    %267 = arith.maximumf %265, %266 : vector<16x25xf32>
    %268 = arith.truncf %267 : vector<16x25xf32> to vector<16x25xbf16>
    %c0_253 = arith.constant 0 : index
    %c0_254 = arith.constant 0 : index
    %c0_255 = arith.constant 0 : index
    %269 = vector.load %arg13[%c0_253, %c0_254, %c0_255] : memref<25x25x225xbf16, #tpu.memory_space<vmem>>, vector<1x25x225xbf16>
    %270 = vector.shape_cast %269 : vector<1x25x225xbf16> to vector<25x225xbf16>
    %cst_256 = arith.constant dense<0.000000e+00> : vector<16x225xf32>
    %271 = tpu.matmul %268, %270, %cst_256 {dimension_numbers = #tpu.dot_dimension_numbers<[1], [0], [0], [1], [0, 0, 1, 1], [], []>} : vector<16x25xbf16>, vector<25x225xbf16>, vector<16x225xf32> -> vector<16x225xf32>
    %c0_257 = arith.constant 0 : index
    %c0_258 = arith.constant 0 : index
    %c0_259 = arith.constant 0 : index
    %272 = vector.load %arg14[%c0_257, %c0_258, %c0_259] : memref<25x8x16xbf16, #tpu.memory_space<vmem>>, vector<1x8x16xbf16>
    %273 = vector.shape_cast %272 : vector<1x8x16xbf16> to vector<8x16xbf16>
    %274 = arith.truncf %271 : vector<16x225xf32> to vector<16x225xbf16>
    %cst_260 = arith.constant dense<0.000000e+00> : vector<8x225xf32>
    %275 = tpu.matmul %273, %274, %cst_260 {dimension_numbers = #tpu.dot_dimension_numbers<[1], [0], [0], [1], [0, 0, 1, 1], [], []>} : vector<8x16xbf16>, vector<16x225xbf16>, vector<8x225xf32> -> vector<8x225xf32>
    %c1_261 = arith.constant 1 : index
    %c0_262 = arith.constant 0 : index
    %c0_263 = arith.constant 0 : index
    %276 = vector.load %arg13[%c1_261, %c0_262, %c0_263] : memref<25x25x225xbf16, #tpu.memory_space<vmem>>, vector<1x25x225xbf16>
    %277 = vector.shape_cast %276 : vector<1x25x225xbf16> to vector<25x225xbf16>
    %cst_264 = arith.constant dense<0.000000e+00> : vector<16x225xf32>
    %278 = tpu.matmul %268, %277, %cst_264 {dimension_numbers = #tpu.dot_dimension_numbers<[1], [0], [0], [1], [0, 0, 1, 1], [], []>} : vector<16x25xbf16>, vector<25x225xbf16>, vector<16x225xf32> -> vector<16x225xf32>
    %c1_265 = arith.constant 1 : index
    %c0_266 = arith.constant 0 : index
    %c0_267 = arith.constant 0 : index
    %279 = vector.load %arg14[%c1_265, %c0_266, %c0_267] : memref<25x8x16xbf16, #tpu.memory_space<vmem>>, vector<1x8x16xbf16>
    %280 = vector.shape_cast %279 : vector<1x8x16xbf16> to vector<8x16xbf16>
    %281 = arith.truncf %278 : vector<16x225xf32> to vector<16x225xbf16>
    %cst_268 = arith.constant dense<0.000000e+00> : vector<8x225xf32>
    %282 = tpu.matmul %280, %281, %cst_268 {dimension_numbers = #tpu.dot_dimension_numbers<[1], [0], [0], [1], [0, 0, 1, 1], [], []>} : vector<8x16xbf16>, vector<16x225xbf16>, vector<8x225xf32> -> vector<8x225xf32>
    %283 = arith.addf %275, %282 : vector<8x225xf32>
    %c2_269 = arith.constant 2 : index
    %c0_270 = arith.constant 0 : index
    %c0_271 = arith.constant 0 : index
    %284 = vector.load %arg13[%c2_269, %c0_270, %c0_271] : memref<25x25x225xbf16, #tpu.memory_space<vmem>>, vector<1x25x225xbf16>
    %285 = vector.shape_cast %284 : vector<1x25x225xbf16> to vector<25x225xbf16>
    %cst_272 = arith.constant dense<0.000000e+00> : vector<16x225xf32>
    %286 = tpu.matmul %268, %285, %cst_272 {dimension_numbers = #tpu.dot_dimension_numbers<[1], [0], [0], [1], [0, 0, 1, 1], [], []>} : vector<16x25xbf16>, vector<25x225xbf16>, vector<16x225xf32> -> vector<16x225xf32>
    %c2_273 = arith.constant 2 : index
    %c0_274 = arith.constant 0 : index
    %c0_275 = arith.constant 0 : index
    %287 = vector.load %arg14[%c2_273, %c0_274, %c0_275] : memref<25x8x16xbf16, #tpu.memory_space<vmem>>, vector<1x8x16xbf16>
    %288 = vector.shape_cast %287 : vector<1x8x16xbf16> to vector<8x16xbf16>
    %289 = arith.truncf %286 : vector<16x225xf32> to vector<16x225xbf16>
    %cst_276 = arith.constant dense<0.000000e+00> : vector<8x225xf32>
    %290 = tpu.matmul %288, %289, %cst_276 {dimension_numbers = #tpu.dot_dimension_numbers<[1], [0], [0], [1], [0, 0, 1, 1], [], []>} : vector<8x16xbf16>, vector<16x225xbf16>, vector<8x225xf32> -> vector<8x225xf32>
    %291 = arith.addf %283, %290 : vector<8x225xf32>
    %c3_277 = arith.constant 3 : index
    %c0_278 = arith.constant 0 : index
    %c0_279 = arith.constant 0 : index
    %292 = vector.load %arg13[%c3_277, %c0_278, %c0_279] : memref<25x25x225xbf16, #tpu.memory_space<vmem>>, vector<1x25x225xbf16>
    %293 = vector.shape_cast %292 : vector<1x25x225xbf16> to vector<25x225xbf16>
    %cst_280 = arith.constant dense<0.000000e+00> : vector<16x225xf32>
    %294 = tpu.matmul %268, %293, %cst_280 {dimension_numbers = #tpu.dot_dimension_numbers<[1], [0], [0], [1], [0, 0, 1, 1], [], []>} : vector<16x25xbf16>, vector<25x225xbf16>, vector<16x225xf32> -> vector<16x225xf32>
    %c3_281 = arith.constant 3 : index
    %c0_282 = arith.constant 0 : index
    %c0_283 = arith.constant 0 : index
    %295 = vector.load %arg14[%c3_281, %c0_282, %c0_283] : memref<25x8x16xbf16, #tpu.memory_space<vmem>>, vector<1x8x16xbf16>
    %296 = vector.shape_cast %295 : vector<1x8x16xbf16> to vector<8x16xbf16>
    %297 = arith.truncf %294 : vector<16x225xf32> to vector<16x225xbf16>
    %cst_284 = arith.constant dense<0.000000e+00> : vector<8x225xf32>
    %298 = tpu.matmul %296, %297, %cst_284 {dimension_numbers = #tpu.dot_dimension_numbers<[1], [0], [0], [1], [0, 0, 1, 1], [], []>} : vector<8x16xbf16>, vector<16x225xbf16>, vector<8x225xf32> -> vector<8x225xf32>
    %299 = arith.addf %291, %298 : vector<8x225xf32>
    %c4_285 = arith.constant 4 : index
    %c0_286 = arith.constant 0 : index
    %c0_287 = arith.constant 0 : index
    %300 = vector.load %arg13[%c4_285, %c0_286, %c0_287] : memref<25x25x225xbf16, #tpu.memory_space<vmem>>, vector<1x25x225xbf16>
    %301 = vector.shape_cast %300 : vector<1x25x225xbf16> to vector<25x225xbf16>
    %cst_288 = arith.constant dense<0.000000e+00> : vector<16x225xf32>
    %302 = tpu.matmul %268, %301, %cst_288 {dimension_numbers = #tpu.dot_dimension_numbers<[1], [0], [0], [1], [0, 0, 1, 1], [], []>} : vector<16x25xbf16>, vector<25x225xbf16>, vector<16x225xf32> -> vector<16x225xf32>
    %c4_289 = arith.constant 4 : index
    %c0_290 = arith.constant 0 : index
    %c0_291 = arith.constant 0 : index
    %303 = vector.load %arg14[%c4_289, %c0_290, %c0_291] : memref<25x8x16xbf16, #tpu.memory_space<vmem>>, vector<1x8x16xbf16>
    %304 = vector.shape_cast %303 : vector<1x8x16xbf16> to vector<8x16xbf16>
    %305 = arith.truncf %302 : vector<16x225xf32> to vector<16x225xbf16>
    %cst_292 = arith.constant dense<0.000000e+00> : vector<8x225xf32>
    %306 = tpu.matmul %304, %305, %cst_292 {dimension_numbers = #tpu.dot_dimension_numbers<[1], [0], [0], [1], [0, 0, 1, 1], [], []>} : vector<8x16xbf16>, vector<16x225xbf16>, vector<8x225xf32> -> vector<8x225xf32>
    %307 = arith.addf %299, %306 : vector<8x225xf32>
    %c5_293 = arith.constant 5 : index
    %c0_294 = arith.constant 0 : index
    %c0_295 = arith.constant 0 : index
    %308 = vector.load %arg13[%c5_293, %c0_294, %c0_295] : memref<25x25x225xbf16, #tpu.memory_space<vmem>>, vector<1x25x225xbf16>
    %309 = vector.shape_cast %308 : vector<1x25x225xbf16> to vector<25x225xbf16>
    %cst_296 = arith.constant dense<0.000000e+00> : vector<16x225xf32>
    %310 = tpu.matmul %268, %309, %cst_296 {dimension_numbers = #tpu.dot_dimension_numbers<[1], [0], [0], [1], [0, 0, 1, 1], [], []>} : vector<16x25xbf16>, vector<25x225xbf16>, vector<16x225xf32> -> vector<16x225xf32>
    %c5_297 = arith.constant 5 : index
    %c0_298 = arith.constant 0 : index
    %c0_299 = arith.constant 0 : index
    %311 = vector.load %arg14[%c5_297, %c0_298, %c0_299] : memref<25x8x16xbf16, #tpu.memory_space<vmem>>, vector<1x8x16xbf16>
    %312 = vector.shape_cast %311 : vector<1x8x16xbf16> to vector<8x16xbf16>
    %313 = arith.truncf %310 : vector<16x225xf32> to vector<16x225xbf16>
    %cst_300 = arith.constant dense<0.000000e+00> : vector<8x225xf32>
    %314 = tpu.matmul %312, %313, %cst_300 {dimension_numbers = #tpu.dot_dimension_numbers<[1], [0], [0], [1], [0, 0, 1, 1], [], []>} : vector<8x16xbf16>, vector<16x225xbf16>, vector<8x225xf32> -> vector<8x225xf32>
    %315 = arith.addf %307, %314 : vector<8x225xf32>
    %c6_301 = arith.constant 6 : index
    %c0_302 = arith.constant 0 : index
    %c0_303 = arith.constant 0 : index
    %316 = vector.load %arg13[%c6_301, %c0_302, %c0_303] : memref<25x25x225xbf16, #tpu.memory_space<vmem>>, vector<1x25x225xbf16>
    %317 = vector.shape_cast %316 : vector<1x25x225xbf16> to vector<25x225xbf16>
    %cst_304 = arith.constant dense<0.000000e+00> : vector<16x225xf32>
    %318 = tpu.matmul %268, %317, %cst_304 {dimension_numbers = #tpu.dot_dimension_numbers<[1], [0], [0], [1], [0, 0, 1, 1], [], []>} : vector<16x25xbf16>, vector<25x225xbf16>, vector<16x225xf32> -> vector<16x225xf32>
    %c6_305 = arith.constant 6 : index
    %c0_306 = arith.constant 0 : index
    %c0_307 = arith.constant 0 : index
    %319 = vector.load %arg14[%c6_305, %c0_306, %c0_307] : memref<25x8x16xbf16, #tpu.memory_space<vmem>>, vector<1x8x16xbf16>
    %320 = vector.shape_cast %319 : vector<1x8x16xbf16> to vector<8x16xbf16>
    %321 = arith.truncf %318 : vector<16x225xf32> to vector<16x225xbf16>
    %cst_308 = arith.constant dense<0.000000e+00> : vector<8x225xf32>
    %322 = tpu.matmul %320, %321, %cst_308 {dimension_numbers = #tpu.dot_dimension_numbers<[1], [0], [0], [1], [0, 0, 1, 1], [], []>} : vector<8x16xbf16>, vector<16x225xbf16>, vector<8x225xf32> -> vector<8x225xf32>
    %323 = arith.addf %315, %322 : vector<8x225xf32>
    %c7_309 = arith.constant 7 : index
    %c0_310 = arith.constant 0 : index
    %c0_311 = arith.constant 0 : index
    %324 = vector.load %arg13[%c7_309, %c0_310, %c0_311] : memref<25x25x225xbf16, #tpu.memory_space<vmem>>, vector<1x25x225xbf16>
    %325 = vector.shape_cast %324 : vector<1x25x225xbf16> to vector<25x225xbf16>
    %cst_312 = arith.constant dense<0.000000e+00> : vector<16x225xf32>
    %326 = tpu.matmul %268, %325, %cst_312 {dimension_numbers = #tpu.dot_dimension_numbers<[1], [0], [0], [1], [0, 0, 1, 1], [], []>} : vector<16x25xbf16>, vector<25x225xbf16>, vector<16x225xf32> -> vector<16x225xf32>
    %c7_313 = arith.constant 7 : index
    %c0_314 = arith.constant 0 : index
    %c0_315 = arith.constant 0 : index
    %327 = vector.load %arg14[%c7_313, %c0_314, %c0_315] : memref<25x8x16xbf16, #tpu.memory_space<vmem>>, vector<1x8x16xbf16>
    %328 = vector.shape_cast %327 : vector<1x8x16xbf16> to vector<8x16xbf16>
    %329 = arith.truncf %326 : vector<16x225xf32> to vector<16x225xbf16>
    %cst_316 = arith.constant dense<0.000000e+00> : vector<8x225xf32>
    %330 = tpu.matmul %328, %329, %cst_316 {dimension_numbers = #tpu.dot_dimension_numbers<[1], [0], [0], [1], [0, 0, 1, 1], [], []>} : vector<8x16xbf16>, vector<16x225xbf16>, vector<8x225xf32> -> vector<8x225xf32>
    %331 = arith.addf %323, %330 : vector<8x225xf32>
    %c8_317 = arith.constant 8 : index
    %c0_318 = arith.constant 0 : index
    %c0_319 = arith.constant 0 : index
    %332 = vector.load %arg13[%c8_317, %c0_318, %c0_319] : memref<25x25x225xbf16, #tpu.memory_space<vmem>>, vector<1x25x225xbf16>
    %333 = vector.shape_cast %332 : vector<1x25x225xbf16> to vector<25x225xbf16>
    %cst_320 = arith.constant dense<0.000000e+00> : vector<16x225xf32>
    %334 = tpu.matmul %268, %333, %cst_320 {dimension_numbers = #tpu.dot_dimension_numbers<[1], [0], [0], [1], [0, 0, 1, 1], [], []>} : vector<16x25xbf16>, vector<25x225xbf16>, vector<16x225xf32> -> vector<16x225xf32>
    %c8_321 = arith.constant 8 : index
    %c0_322 = arith.constant 0 : index
    %c0_323 = arith.constant 0 : index
    %335 = vector.load %arg14[%c8_321, %c0_322, %c0_323] : memref<25x8x16xbf16, #tpu.memory_space<vmem>>, vector<1x8x16xbf16>
    %336 = vector.shape_cast %335 : vector<1x8x16xbf16> to vector<8x16xbf16>
    %337 = arith.truncf %334 : vector<16x225xf32> to vector<16x225xbf16>
    %cst_324 = arith.constant dense<0.000000e+00> : vector<8x225xf32>
    %338 = tpu.matmul %336, %337, %cst_324 {dimension_numbers = #tpu.dot_dimension_numbers<[1], [0], [0], [1], [0, 0, 1, 1], [], []>} : vector<8x16xbf16>, vector<16x225xbf16>, vector<8x225xf32> -> vector<8x225xf32>
    %339 = arith.addf %331, %338 : vector<8x225xf32>
    %c9 = arith.constant 9 : index
    %c0_325 = arith.constant 0 : index
    %c0_326 = arith.constant 0 : index
    %340 = vector.load %arg13[%c9, %c0_325, %c0_326] : memref<25x25x225xbf16, #tpu.memory_space<vmem>>, vector<1x25x225xbf16>
    %341 = vector.shape_cast %340 : vector<1x25x225xbf16> to vector<25x225xbf16>
    %cst_327 = arith.constant dense<0.000000e+00> : vector<16x225xf32>
    %342 = tpu.matmul %268, %341, %cst_327 {dimension_numbers = #tpu.dot_dimension_numbers<[1], [0], [0], [1], [0, 0, 1, 1], [], []>} : vector<16x25xbf16>, vector<25x225xbf16>, vector<16x225xf32> -> vector<16x225xf32>
    %c9_328 = arith.constant 9 : index
    %c0_329 = arith.constant 0 : index
    %c0_330 = arith.constant 0 : index
    %343 = vector.load %arg14[%c9_328, %c0_329, %c0_330] : memref<25x8x16xbf16, #tpu.memory_space<vmem>>, vector<1x8x16xbf16>
    %344 = vector.shape_cast %343 : vector<1x8x16xbf16> to vector<8x16xbf16>
    %345 = arith.truncf %342 : vector<16x225xf32> to vector<16x225xbf16>
    %cst_331 = arith.constant dense<0.000000e+00> : vector<8x225xf32>
    %346 = tpu.matmul %344, %345, %cst_331 {dimension_numbers = #tpu.dot_dimension_numbers<[1], [0], [0], [1], [0, 0, 1, 1], [], []>} : vector<8x16xbf16>, vector<16x225xbf16>, vector<8x225xf32> -> vector<8x225xf32>
    %347 = arith.addf %339, %346 : vector<8x225xf32>
    %c10 = arith.constant 10 : index
    %c0_332 = arith.constant 0 : index
    %c0_333 = arith.constant 0 : index
    %348 = vector.load %arg13[%c10, %c0_332, %c0_333] : memref<25x25x225xbf16, #tpu.memory_space<vmem>>, vector<1x25x225xbf16>
    %349 = vector.shape_cast %348 : vector<1x25x225xbf16> to vector<25x225xbf16>
    %cst_334 = arith.constant dense<0.000000e+00> : vector<16x225xf32>
    %350 = tpu.matmul %268, %349, %cst_334 {dimension_numbers = #tpu.dot_dimension_numbers<[1], [0], [0], [1], [0, 0, 1, 1], [], []>} : vector<16x25xbf16>, vector<25x225xbf16>, vector<16x225xf32> -> vector<16x225xf32>
    %c10_335 = arith.constant 10 : index
    %c0_336 = arith.constant 0 : index
    %c0_337 = arith.constant 0 : index
    %351 = vector.load %arg14[%c10_335, %c0_336, %c0_337] : memref<25x8x16xbf16, #tpu.memory_space<vmem>>, vector<1x8x16xbf16>
    %352 = vector.shape_cast %351 : vector<1x8x16xbf16> to vector<8x16xbf16>
    %353 = arith.truncf %350 : vector<16x225xf32> to vector<16x225xbf16>
    %cst_338 = arith.constant dense<0.000000e+00> : vector<8x225xf32>
    %354 = tpu.matmul %352, %353, %cst_338 {dimension_numbers = #tpu.dot_dimension_numbers<[1], [0], [0], [1], [0, 0, 1, 1], [], []>} : vector<8x16xbf16>, vector<16x225xbf16>, vector<8x225xf32> -> vector<8x225xf32>
    %355 = arith.addf %347, %354 : vector<8x225xf32>
    %c11 = arith.constant 11 : index
    %c0_339 = arith.constant 0 : index
    %c0_340 = arith.constant 0 : index
    %356 = vector.load %arg13[%c11, %c0_339, %c0_340] : memref<25x25x225xbf16, #tpu.memory_space<vmem>>, vector<1x25x225xbf16>
    %357 = vector.shape_cast %356 : vector<1x25x225xbf16> to vector<25x225xbf16>
    %cst_341 = arith.constant dense<0.000000e+00> : vector<16x225xf32>
    %358 = tpu.matmul %268, %357, %cst_341 {dimension_numbers = #tpu.dot_dimension_numbers<[1], [0], [0], [1], [0, 0, 1, 1], [], []>} : vector<16x25xbf16>, vector<25x225xbf16>, vector<16x225xf32> -> vector<16x225xf32>
    %c11_342 = arith.constant 11 : index
    %c0_343 = arith.constant 0 : index
    %c0_344 = arith.constant 0 : index
    %359 = vector.load %arg14[%c11_342, %c0_343, %c0_344] : memref<25x8x16xbf16, #tpu.memory_space<vmem>>, vector<1x8x16xbf16>
    %360 = vector.shape_cast %359 : vector<1x8x16xbf16> to vector<8x16xbf16>
    %361 = arith.truncf %358 : vector<16x225xf32> to vector<16x225xbf16>
    %cst_345 = arith.constant dense<0.000000e+00> : vector<8x225xf32>
    %362 = tpu.matmul %360, %361, %cst_345 {dimension_numbers = #tpu.dot_dimension_numbers<[1], [0], [0], [1], [0, 0, 1, 1], [], []>} : vector<8x16xbf16>, vector<16x225xbf16>, vector<8x225xf32> -> vector<8x225xf32>
    %363 = arith.addf %355, %362 : vector<8x225xf32>
    %c12 = arith.constant 12 : index
    %c0_346 = arith.constant 0 : index
    %c0_347 = arith.constant 0 : index
    %364 = vector.load %arg13[%c12, %c0_346, %c0_347] : memref<25x25x225xbf16, #tpu.memory_space<vmem>>, vector<1x25x225xbf16>
    %365 = vector.shape_cast %364 : vector<1x25x225xbf16> to vector<25x225xbf16>
    %cst_348 = arith.constant dense<0.000000e+00> : vector<16x225xf32>
    %366 = tpu.matmul %268, %365, %cst_348 {dimension_numbers = #tpu.dot_dimension_numbers<[1], [0], [0], [1], [0, 0, 1, 1], [], []>} : vector<16x25xbf16>, vector<25x225xbf16>, vector<16x225xf32> -> vector<16x225xf32>
    %c12_349 = arith.constant 12 : index
    %c0_350 = arith.constant 0 : index
    %c0_351 = arith.constant 0 : index
    %367 = vector.load %arg14[%c12_349, %c0_350, %c0_351] : memref<25x8x16xbf16, #tpu.memory_space<vmem>>, vector<1x8x16xbf16>
    %368 = vector.shape_cast %367 : vector<1x8x16xbf16> to vector<8x16xbf16>
    %369 = arith.truncf %366 : vector<16x225xf32> to vector<16x225xbf16>
    %cst_352 = arith.constant dense<0.000000e+00> : vector<8x225xf32>
    %370 = tpu.matmul %368, %369, %cst_352 {dimension_numbers = #tpu.dot_dimension_numbers<[1], [0], [0], [1], [0, 0, 1, 1], [], []>} : vector<8x16xbf16>, vector<16x225xbf16>, vector<8x225xf32> -> vector<8x225xf32>
    %371 = arith.addf %363, %370 : vector<8x225xf32>
    %c13 = arith.constant 13 : index
    %c0_353 = arith.constant 0 : index
    %c0_354 = arith.constant 0 : index
    %372 = vector.load %arg13[%c13, %c0_353, %c0_354] : memref<25x25x225xbf16, #tpu.memory_space<vmem>>, vector<1x25x225xbf16>
    %373 = vector.shape_cast %372 : vector<1x25x225xbf16> to vector<25x225xbf16>
    %cst_355 = arith.constant dense<0.000000e+00> : vector<16x225xf32>
    %374 = tpu.matmul %268, %373, %cst_355 {dimension_numbers = #tpu.dot_dimension_numbers<[1], [0], [0], [1], [0, 0, 1, 1], [], []>} : vector<16x25xbf16>, vector<25x225xbf16>, vector<16x225xf32> -> vector<16x225xf32>
    %c13_356 = arith.constant 13 : index
    %c0_357 = arith.constant 0 : index
    %c0_358 = arith.constant 0 : index
    %375 = vector.load %arg14[%c13_356, %c0_357, %c0_358] : memref<25x8x16xbf16, #tpu.memory_space<vmem>>, vector<1x8x16xbf16>
    %376 = vector.shape_cast %375 : vector<1x8x16xbf16> to vector<8x16xbf16>
    %377 = arith.truncf %374 : vector<16x225xf32> to vector<16x225xbf16>
    %cst_359 = arith.constant dense<0.000000e+00> : vector<8x225xf32>
    %378 = tpu.matmul %376, %377, %cst_359 {dimension_numbers = #tpu.dot_dimension_numbers<[1], [0], [0], [1], [0, 0, 1, 1], [], []>} : vector<8x16xbf16>, vector<16x225xbf16>, vector<8x225xf32> -> vector<8x225xf32>
    %379 = arith.addf %371, %378 : vector<8x225xf32>
    %c14 = arith.constant 14 : index
    %c0_360 = arith.constant 0 : index
    %c0_361 = arith.constant 0 : index
    %380 = vector.load %arg13[%c14, %c0_360, %c0_361] : memref<25x25x225xbf16, #tpu.memory_space<vmem>>, vector<1x25x225xbf16>
    %381 = vector.shape_cast %380 : vector<1x25x225xbf16> to vector<25x225xbf16>
    %cst_362 = arith.constant dense<0.000000e+00> : vector<16x225xf32>
    %382 = tpu.matmul %268, %381, %cst_362 {dimension_numbers = #tpu.dot_dimension_numbers<[1], [0], [0], [1], [0, 0, 1, 1], [], []>} : vector<16x25xbf16>, vector<25x225xbf16>, vector<16x225xf32> -> vector<16x225xf32>
    %c14_363 = arith.constant 14 : index
    %c0_364 = arith.constant 0 : index
    %c0_365 = arith.constant 0 : index
    %383 = vector.load %arg14[%c14_363, %c0_364, %c0_365] : memref<25x8x16xbf16, #tpu.memory_space<vmem>>, vector<1x8x16xbf16>
    %384 = vector.shape_cast %383 : vector<1x8x16xbf16> to vector<8x16xbf16>
    %385 = arith.truncf %382 : vector<16x225xf32> to vector<16x225xbf16>
    %cst_366 = arith.constant dense<0.000000e+00> : vector<8x225xf32>
    %386 = tpu.matmul %384, %385, %cst_366 {dimension_numbers = #tpu.dot_dimension_numbers<[1], [0], [0], [1], [0, 0, 1, 1], [], []>} : vector<8x16xbf16>, vector<16x225xbf16>, vector<8x225xf32> -> vector<8x225xf32>
    %387 = arith.addf %379, %386 : vector<8x225xf32>
    %c15 = arith.constant 15 : index
    %c0_367 = arith.constant 0 : index
    %c0_368 = arith.constant 0 : index
    %388 = vector.load %arg13[%c15, %c0_367, %c0_368] : memref<25x25x225xbf16, #tpu.memory_space<vmem>>, vector<1x25x225xbf16>
    %389 = vector.shape_cast %388 : vector<1x25x225xbf16> to vector<25x225xbf16>
    %cst_369 = arith.constant dense<0.000000e+00> : vector<16x225xf32>
    %390 = tpu.matmul %268, %389, %cst_369 {dimension_numbers = #tpu.dot_dimension_numbers<[1], [0], [0], [1], [0, 0, 1, 1], [], []>} : vector<16x25xbf16>, vector<25x225xbf16>, vector<16x225xf32> -> vector<16x225xf32>
    %c15_370 = arith.constant 15 : index
    %c0_371 = arith.constant 0 : index
    %c0_372 = arith.constant 0 : index
    %391 = vector.load %arg14[%c15_370, %c0_371, %c0_372] : memref<25x8x16xbf16, #tpu.memory_space<vmem>>, vector<1x8x16xbf16>
    %392 = vector.shape_cast %391 : vector<1x8x16xbf16> to vector<8x16xbf16>
    %393 = arith.truncf %390 : vector<16x225xf32> to vector<16x225xbf16>
    %cst_373 = arith.constant dense<0.000000e+00> : vector<8x225xf32>
    %394 = tpu.matmul %392, %393, %cst_373 {dimension_numbers = #tpu.dot_dimension_numbers<[1], [0], [0], [1], [0, 0, 1, 1], [], []>} : vector<8x16xbf16>, vector<16x225xbf16>, vector<8x225xf32> -> vector<8x225xf32>
    %395 = arith.addf %387, %394 : vector<8x225xf32>
    %c16 = arith.constant 16 : index
    %c0_374 = arith.constant 0 : index
    %c0_375 = arith.constant 0 : index
    %396 = vector.load %arg13[%c16, %c0_374, %c0_375] : memref<25x25x225xbf16, #tpu.memory_space<vmem>>, vector<1x25x225xbf16>
    %397 = vector.shape_cast %396 : vector<1x25x225xbf16> to vector<25x225xbf16>
    %cst_376 = arith.constant dense<0.000000e+00> : vector<16x225xf32>
    %398 = tpu.matmul %268, %397, %cst_376 {dimension_numbers = #tpu.dot_dimension_numbers<[1], [0], [0], [1], [0, 0, 1, 1], [], []>} : vector<16x25xbf16>, vector<25x225xbf16>, vector<16x225xf32> -> vector<16x225xf32>
    %c16_377 = arith.constant 16 : index
    %c0_378 = arith.constant 0 : index
    %c0_379 = arith.constant 0 : index
    %399 = vector.load %arg14[%c16_377, %c0_378, %c0_379] : memref<25x8x16xbf16, #tpu.memory_space<vmem>>, vector<1x8x16xbf16>
    %400 = vector.shape_cast %399 : vector<1x8x16xbf16> to vector<8x16xbf16>
    %401 = arith.truncf %398 : vector<16x225xf32> to vector<16x225xbf16>
    %cst_380 = arith.constant dense<0.000000e+00> : vector<8x225xf32>
    %402 = tpu.matmul %400, %401, %cst_380 {dimension_numbers = #tpu.dot_dimension_numbers<[1], [0], [0], [1], [0, 0, 1, 1], [], []>} : vector<8x16xbf16>, vector<16x225xbf16>, vector<8x225xf32> -> vector<8x225xf32>
    %403 = arith.addf %395, %402 : vector<8x225xf32>
    %c17 = arith.constant 17 : index
    %c0_381 = arith.constant 0 : index
    %c0_382 = arith.constant 0 : index
    %404 = vector.load %arg13[%c17, %c0_381, %c0_382] : memref<25x25x225xbf16, #tpu.memory_space<vmem>>, vector<1x25x225xbf16>
    %405 = vector.shape_cast %404 : vector<1x25x225xbf16> to vector<25x225xbf16>
    %cst_383 = arith.constant dense<0.000000e+00> : vector<16x225xf32>
    %406 = tpu.matmul %268, %405, %cst_383 {dimension_numbers = #tpu.dot_dimension_numbers<[1], [0], [0], [1], [0, 0, 1, 1], [], []>} : vector<16x25xbf16>, vector<25x225xbf16>, vector<16x225xf32> -> vector<16x225xf32>
    %c17_384 = arith.constant 17 : index
    %c0_385 = arith.constant 0 : index
    %c0_386 = arith.constant 0 : index
    %407 = vector.load %arg14[%c17_384, %c0_385, %c0_386] : memref<25x8x16xbf16, #tpu.memory_space<vmem>>, vector<1x8x16xbf16>
    %408 = vector.shape_cast %407 : vector<1x8x16xbf16> to vector<8x16xbf16>
    %409 = arith.truncf %406 : vector<16x225xf32> to vector<16x225xbf16>
    %cst_387 = arith.constant dense<0.000000e+00> : vector<8x225xf32>
    %410 = tpu.matmul %408, %409, %cst_387 {dimension_numbers = #tpu.dot_dimension_numbers<[1], [0], [0], [1], [0, 0, 1, 1], [], []>} : vector<8x16xbf16>, vector<16x225xbf16>, vector<8x225xf32> -> vector<8x225xf32>
    %411 = arith.addf %403, %410 : vector<8x225xf32>
    %c18 = arith.constant 18 : index
    %c0_388 = arith.constant 0 : index
    %c0_389 = arith.constant 0 : index
    %412 = vector.load %arg13[%c18, %c0_388, %c0_389] : memref<25x25x225xbf16, #tpu.memory_space<vmem>>, vector<1x25x225xbf16>
    %413 = vector.shape_cast %412 : vector<1x25x225xbf16> to vector<25x225xbf16>
    %cst_390 = arith.constant dense<0.000000e+00> : vector<16x225xf32>
    %414 = tpu.matmul %268, %413, %cst_390 {dimension_numbers = #tpu.dot_dimension_numbers<[1], [0], [0], [1], [0, 0, 1, 1], [], []>} : vector<16x25xbf16>, vector<25x225xbf16>, vector<16x225xf32> -> vector<16x225xf32>
    %c18_391 = arith.constant 18 : index
    %c0_392 = arith.constant 0 : index
    %c0_393 = arith.constant 0 : index
    %415 = vector.load %arg14[%c18_391, %c0_392, %c0_393] : memref<25x8x16xbf16, #tpu.memory_space<vmem>>, vector<1x8x16xbf16>
    %416 = vector.shape_cast %415 : vector<1x8x16xbf16> to vector<8x16xbf16>
    %417 = arith.truncf %414 : vector<16x225xf32> to vector<16x225xbf16>
    %cst_394 = arith.constant dense<0.000000e+00> : vector<8x225xf32>
    %418 = tpu.matmul %416, %417, %cst_394 {dimension_numbers = #tpu.dot_dimension_numbers<[1], [0], [0], [1], [0, 0, 1, 1], [], []>} : vector<8x16xbf16>, vector<16x225xbf16>, vector<8x225xf32> -> vector<8x225xf32>
    %419 = arith.addf %411, %418 : vector<8x225xf32>
    %c19 = arith.constant 19 : index
    %c0_395 = arith.constant 0 : index
    %c0_396 = arith.constant 0 : index
    %420 = vector.load %arg13[%c19, %c0_395, %c0_396] : memref<25x25x225xbf16, #tpu.memory_space<vmem>>, vector<1x25x225xbf16>
    %421 = vector.shape_cast %420 : vector<1x25x225xbf16> to vector<25x225xbf16>
    %cst_397 = arith.constant dense<0.000000e+00> : vector<16x225xf32>
    %422 = tpu.matmul %268, %421, %cst_397 {dimension_numbers = #tpu.dot_dimension_numbers<[1], [0], [0], [1], [0, 0, 1, 1], [], []>} : vector<16x25xbf16>, vector<25x225xbf16>, vector<16x225xf32> -> vector<16x225xf32>
    %c19_398 = arith.constant 19 : index
    %c0_399 = arith.constant 0 : index
    %c0_400 = arith.constant 0 : index
    %423 = vector.load %arg14[%c19_398, %c0_399, %c0_400] : memref<25x8x16xbf16, #tpu.memory_space<vmem>>, vector<1x8x16xbf16>
    %424 = vector.shape_cast %423 : vector<1x8x16xbf16> to vector<8x16xbf16>
    %425 = arith.truncf %422 : vector<16x225xf32> to vector<16x225xbf16>
    %cst_401 = arith.constant dense<0.000000e+00> : vector<8x225xf32>
    %426 = tpu.matmul %424, %425, %cst_401 {dimension_numbers = #tpu.dot_dimension_numbers<[1], [0], [0], [1], [0, 0, 1, 1], [], []>} : vector<8x16xbf16>, vector<16x225xbf16>, vector<8x225xf32> -> vector<8x225xf32>
    %427 = arith.addf %419, %426 : vector<8x225xf32>
    %c20 = arith.constant 20 : index
    %c0_402 = arith.constant 0 : index
    %c0_403 = arith.constant 0 : index
    %428 = vector.load %arg13[%c20, %c0_402, %c0_403] : memref<25x25x225xbf16, #tpu.memory_space<vmem>>, vector<1x25x225xbf16>
    %429 = vector.shape_cast %428 : vector<1x25x225xbf16> to vector<25x225xbf16>
    %cst_404 = arith.constant dense<0.000000e+00> : vector<16x225xf32>
    %430 = tpu.matmul %268, %429, %cst_404 {dimension_numbers = #tpu.dot_dimension_numbers<[1], [0], [0], [1], [0, 0, 1, 1], [], []>} : vector<16x25xbf16>, vector<25x225xbf16>, vector<16x225xf32> -> vector<16x225xf32>
    %c20_405 = arith.constant 20 : index
    %c0_406 = arith.constant 0 : index
    %c0_407 = arith.constant 0 : index
    %431 = vector.load %arg14[%c20_405, %c0_406, %c0_407] : memref<25x8x16xbf16, #tpu.memory_space<vmem>>, vector<1x8x16xbf16>
    %432 = vector.shape_cast %431 : vector<1x8x16xbf16> to vector<8x16xbf16>
    %433 = arith.truncf %430 : vector<16x225xf32> to vector<16x225xbf16>
    %cst_408 = arith.constant dense<0.000000e+00> : vector<8x225xf32>
    %434 = tpu.matmul %432, %433, %cst_408 {dimension_numbers = #tpu.dot_dimension_numbers<[1], [0], [0], [1], [0, 0, 1, 1], [], []>} : vector<8x16xbf16>, vector<16x225xbf16>, vector<8x225xf32> -> vector<8x225xf32>
    %435 = arith.addf %427, %434 : vector<8x225xf32>
    %c21 = arith.constant 21 : index
    %c0_409 = arith.constant 0 : index
    %c0_410 = arith.constant 0 : index
    %436 = vector.load %arg13[%c21, %c0_409, %c0_410] : memref<25x25x225xbf16, #tpu.memory_space<vmem>>, vector<1x25x225xbf16>
    %437 = vector.shape_cast %436 : vector<1x25x225xbf16> to vector<25x225xbf16>
    %cst_411 = arith.constant dense<0.000000e+00> : vector<16x225xf32>
    %438 = tpu.matmul %268, %437, %cst_411 {dimension_numbers = #tpu.dot_dimension_numbers<[1], [0], [0], [1], [0, 0, 1, 1], [], []>} : vector<16x25xbf16>, vector<25x225xbf16>, vector<16x225xf32> -> vector<16x225xf32>
    %c21_412 = arith.constant 21 : index
    %c0_413 = arith.constant 0 : index
    %c0_414 = arith.constant 0 : index
    %439 = vector.load %arg14[%c21_412, %c0_413, %c0_414] : memref<25x8x16xbf16, #tpu.memory_space<vmem>>, vector<1x8x16xbf16>
    %440 = vector.shape_cast %439 : vector<1x8x16xbf16> to vector<8x16xbf16>
    %441 = arith.truncf %438 : vector<16x225xf32> to vector<16x225xbf16>
    %cst_415 = arith.constant dense<0.000000e+00> : vector<8x225xf32>
    %442 = tpu.matmul %440, %441, %cst_415 {dimension_numbers = #tpu.dot_dimension_numbers<[1], [0], [0], [1], [0, 0, 1, 1], [], []>} : vector<8x16xbf16>, vector<16x225xbf16>, vector<8x225xf32> -> vector<8x225xf32>
    %443 = arith.addf %435, %442 : vector<8x225xf32>
    %c22 = arith.constant 22 : index
    %c0_416 = arith.constant 0 : index
    %c0_417 = arith.constant 0 : index
    %444 = vector.load %arg13[%c22, %c0_416, %c0_417] : memref<25x25x225xbf16, #tpu.memory_space<vmem>>, vector<1x25x225xbf16>
    %445 = vector.shape_cast %444 : vector<1x25x225xbf16> to vector<25x225xbf16>
    %cst_418 = arith.constant dense<0.000000e+00> : vector<16x225xf32>
    %446 = tpu.matmul %268, %445, %cst_418 {dimension_numbers = #tpu.dot_dimension_numbers<[1], [0], [0], [1], [0, 0, 1, 1], [], []>} : vector<16x25xbf16>, vector<25x225xbf16>, vector<16x225xf32> -> vector<16x225xf32>
    %c22_419 = arith.constant 22 : index
    %c0_420 = arith.constant 0 : index
    %c0_421 = arith.constant 0 : index
    %447 = vector.load %arg14[%c22_419, %c0_420, %c0_421] : memref<25x8x16xbf16, #tpu.memory_space<vmem>>, vector<1x8x16xbf16>
    %448 = vector.shape_cast %447 : vector<1x8x16xbf16> to vector<8x16xbf16>
    %449 = arith.truncf %446 : vector<16x225xf32> to vector<16x225xbf16>
    %cst_422 = arith.constant dense<0.000000e+00> : vector<8x225xf32>
    %450 = tpu.matmul %448, %449, %cst_422 {dimension_numbers = #tpu.dot_dimension_numbers<[1], [0], [0], [1], [0, 0, 1, 1], [], []>} : vector<8x16xbf16>, vector<16x225xbf16>, vector<8x225xf32> -> vector<8x225xf32>
    %451 = arith.addf %443, %450 : vector<8x225xf32>
    %c23 = arith.constant 23 : index
    %c0_423 = arith.constant 0 : index
    %c0_424 = arith.constant 0 : index
    %452 = vector.load %arg13[%c23, %c0_423, %c0_424] : memref<25x25x225xbf16, #tpu.memory_space<vmem>>, vector<1x25x225xbf16>
    %453 = vector.shape_cast %452 : vector<1x25x225xbf16> to vector<25x225xbf16>
    %cst_425 = arith.constant dense<0.000000e+00> : vector<16x225xf32>
    %454 = tpu.matmul %268, %453, %cst_425 {dimension_numbers = #tpu.dot_dimension_numbers<[1], [0], [0], [1], [0, 0, 1, 1], [], []>} : vector<16x25xbf16>, vector<25x225xbf16>, vector<16x225xf32> -> vector<16x225xf32>
    %c23_426 = arith.constant 23 : index
    %c0_427 = arith.constant 0 : index
    %c0_428 = arith.constant 0 : index
    %455 = vector.load %arg14[%c23_426, %c0_427, %c0_428] : memref<25x8x16xbf16, #tpu.memory_space<vmem>>, vector<1x8x16xbf16>
    %456 = vector.shape_cast %455 : vector<1x8x16xbf16> to vector<8x16xbf16>
    %457 = arith.truncf %454 : vector<16x225xf32> to vector<16x225xbf16>
    %cst_429 = arith.constant dense<0.000000e+00> : vector<8x225xf32>
    %458 = tpu.matmul %456, %457, %cst_429 {dimension_numbers = #tpu.dot_dimension_numbers<[1], [0], [0], [1], [0, 0, 1, 1], [], []>} : vector<8x16xbf16>, vector<16x225xbf16>, vector<8x225xf32> -> vector<8x225xf32>
    %459 = arith.addf %451, %458 : vector<8x225xf32>
    %c24 = arith.constant 24 : index
    %c0_430 = arith.constant 0 : index
    %c0_431 = arith.constant 0 : index
    %460 = vector.load %arg13[%c24, %c0_430, %c0_431] : memref<25x25x225xbf16, #tpu.memory_space<vmem>>, vector<1x25x225xbf16>
    %461 = vector.shape_cast %460 : vector<1x25x225xbf16> to vector<25x225xbf16>
    %cst_432 = arith.constant dense<0.000000e+00> : vector<16x225xf32>
    %462 = tpu.matmul %268, %461, %cst_432 {dimension_numbers = #tpu.dot_dimension_numbers<[1], [0], [0], [1], [0, 0, 1, 1], [], []>} : vector<16x25xbf16>, vector<25x225xbf16>, vector<16x225xf32> -> vector<16x225xf32>
    %c24_433 = arith.constant 24 : index
    %c0_434 = arith.constant 0 : index
    %c0_435 = arith.constant 0 : index
    %463 = vector.load %arg14[%c24_433, %c0_434, %c0_435] : memref<25x8x16xbf16, #tpu.memory_space<vmem>>, vector<1x8x16xbf16>
    %464 = vector.shape_cast %463 : vector<1x8x16xbf16> to vector<8x16xbf16>
    %465 = arith.truncf %462 : vector<16x225xf32> to vector<16x225xbf16>
    %cst_436 = arith.constant dense<0.000000e+00> : vector<8x225xf32>
    %466 = tpu.matmul %464, %465, %cst_436 {dimension_numbers = #tpu.dot_dimension_numbers<[1], [0], [0], [1], [0, 0, 1, 1], [], []>} : vector<8x16xbf16>, vector<16x225xbf16>, vector<8x225xf32> -> vector<8x225xf32>
    %467 = arith.addf %459, %466 : vector<8x225xf32>
    %c0_437 = arith.constant 0 : index
    %c0_438 = arith.constant 0 : index
    %468 = vector.load %arg15[%c0_437, %c0_438] : memref<8x1xf32, #tpu.memory_space<vmem>>, vector<8x1xf32>
    %469 = vector.broadcast %468 : vector<8x1xf32> to vector<8x225xf32>
    %470 = arith.addf %467, %469 : vector<8x225xf32>
    %cst_439 = arith.constant 0.000000e+00 : f32
    %471 = vector.broadcast %cst_439 : f32 to vector<8x225xf32>
    %472 = arith.maximumf %470, %471 : vector<8x225xf32>
    %473 = arith.truncf %472 : vector<8x225xf32> to vector<8x225xbf16>
    %c0_440 = arith.constant 0 : index
    %c0_441 = arith.constant 0 : index
    %c0_442 = arith.constant 0 : index
    %474 = vector.load %arg16[%c0_440, %c0_441, %c0_442] : memref<4x225x784xbf16, #tpu.memory_space<vmem>>, vector<1x225x784xbf16>
    %475 = vector.shape_cast %474 : vector<1x225x784xbf16> to vector<225x784xbf16>
    %cst_443 = arith.constant dense<0.000000e+00> : vector<8x784xf32>
    %476 = tpu.matmul %473, %475, %cst_443 {dimension_numbers = #tpu.dot_dimension_numbers<[1], [0], [0], [1], [0, 0, 1, 1], [], []>} : vector<8x225xbf16>, vector<225x784xbf16>, vector<8x784xf32> -> vector<8x784xf32>
    %c0_444 = arith.constant 0 : index
    %c0_445 = arith.constant 0 : index
    %c0_446 = arith.constant 0 : index
    %477 = vector.load %arg17[%c0_444, %c0_445, %c0_446] : memref<4x1x8xbf16, #tpu.memory_space<vmem>>, vector<1x1x8xbf16>
    %478 = vector.shape_cast %477 : vector<1x1x8xbf16> to vector<1x8xbf16>
    %479 = arith.truncf %476 : vector<8x784xf32> to vector<8x784xbf16>
    %cst_447 = arith.constant dense<0.000000e+00> : vector<1x784xf32>
    %480 = tpu.matmul %478, %479, %cst_447 {dimension_numbers = #tpu.dot_dimension_numbers<[1], [0], [0], [1], [0, 0, 1, 1], [], []>} : vector<1x8xbf16>, vector<8x784xbf16>, vector<1x784xf32> -> vector<1x784xf32>
    %c1_448 = arith.constant 1 : index
    %c0_449 = arith.constant 0 : index
    %c0_450 = arith.constant 0 : index
    %481 = vector.load %arg16[%c1_448, %c0_449, %c0_450] : memref<4x225x784xbf16, #tpu.memory_space<vmem>>, vector<1x225x784xbf16>
    %482 = vector.shape_cast %481 : vector<1x225x784xbf16> to vector<225x784xbf16>
    %cst_451 = arith.constant dense<0.000000e+00> : vector<8x784xf32>
    %483 = tpu.matmul %473, %482, %cst_451 {dimension_numbers = #tpu.dot_dimension_numbers<[1], [0], [0], [1], [0, 0, 1, 1], [], []>} : vector<8x225xbf16>, vector<225x784xbf16>, vector<8x784xf32> -> vector<8x784xf32>
    %c1_452 = arith.constant 1 : index
    %c0_453 = arith.constant 0 : index
    %c0_454 = arith.constant 0 : index
    %484 = vector.load %arg17[%c1_452, %c0_453, %c0_454] : memref<4x1x8xbf16, #tpu.memory_space<vmem>>, vector<1x1x8xbf16>
    %485 = vector.shape_cast %484 : vector<1x1x8xbf16> to vector<1x8xbf16>
    %486 = arith.truncf %483 : vector<8x784xf32> to vector<8x784xbf16>
    %cst_455 = arith.constant dense<0.000000e+00> : vector<1x784xf32>
    %487 = tpu.matmul %485, %486, %cst_455 {dimension_numbers = #tpu.dot_dimension_numbers<[1], [0], [0], [1], [0, 0, 1, 1], [], []>} : vector<1x8xbf16>, vector<8x784xbf16>, vector<1x784xf32> -> vector<1x784xf32>
    %488 = arith.addf %480, %487 : vector<1x784xf32>
    %c2_456 = arith.constant 2 : index
    %c0_457 = arith.constant 0 : index
    %c0_458 = arith.constant 0 : index
    %489 = vector.load %arg16[%c2_456, %c0_457, %c0_458] : memref<4x225x784xbf16, #tpu.memory_space<vmem>>, vector<1x225x784xbf16>
    %490 = vector.shape_cast %489 : vector<1x225x784xbf16> to vector<225x784xbf16>
    %cst_459 = arith.constant dense<0.000000e+00> : vector<8x784xf32>
    %491 = tpu.matmul %473, %490, %cst_459 {dimension_numbers = #tpu.dot_dimension_numbers<[1], [0], [0], [1], [0, 0, 1, 1], [], []>} : vector<8x225xbf16>, vector<225x784xbf16>, vector<8x784xf32> -> vector<8x784xf32>
    %c2_460 = arith.constant 2 : index
    %c0_461 = arith.constant 0 : index
    %c0_462 = arith.constant 0 : index
    %492 = vector.load %arg17[%c2_460, %c0_461, %c0_462] : memref<4x1x8xbf16, #tpu.memory_space<vmem>>, vector<1x1x8xbf16>
    %493 = vector.shape_cast %492 : vector<1x1x8xbf16> to vector<1x8xbf16>
    %494 = arith.truncf %491 : vector<8x784xf32> to vector<8x784xbf16>
    %cst_463 = arith.constant dense<0.000000e+00> : vector<1x784xf32>
    %495 = tpu.matmul %493, %494, %cst_463 {dimension_numbers = #tpu.dot_dimension_numbers<[1], [0], [0], [1], [0, 0, 1, 1], [], []>} : vector<1x8xbf16>, vector<8x784xbf16>, vector<1x784xf32> -> vector<1x784xf32>
    %496 = arith.addf %488, %495 : vector<1x784xf32>
    %c3_464 = arith.constant 3 : index
    %c0_465 = arith.constant 0 : index
    %c0_466 = arith.constant 0 : index
    %497 = vector.load %arg16[%c3_464, %c0_465, %c0_466] : memref<4x225x784xbf16, #tpu.memory_space<vmem>>, vector<1x225x784xbf16>
    %498 = vector.shape_cast %497 : vector<1x225x784xbf16> to vector<225x784xbf16>
    %cst_467 = arith.constant dense<0.000000e+00> : vector<8x784xf32>
    %499 = tpu.matmul %473, %498, %cst_467 {dimension_numbers = #tpu.dot_dimension_numbers<[1], [0], [0], [1], [0, 0, 1, 1], [], []>} : vector<8x225xbf16>, vector<225x784xbf16>, vector<8x784xf32> -> vector<8x784xf32>
    %c3_468 = arith.constant 3 : index
    %c0_469 = arith.constant 0 : index
    %c0_470 = arith.constant 0 : index
    %500 = vector.load %arg17[%c3_468, %c0_469, %c0_470] : memref<4x1x8xbf16, #tpu.memory_space<vmem>>, vector<1x1x8xbf16>
    %501 = vector.shape_cast %500 : vector<1x1x8xbf16> to vector<1x8xbf16>
    %502 = arith.truncf %499 : vector<8x784xf32> to vector<8x784xbf16>
    %cst_471 = arith.constant dense<0.000000e+00> : vector<1x784xf32>
    %503 = tpu.matmul %501, %502, %cst_471 {dimension_numbers = #tpu.dot_dimension_numbers<[1], [0], [0], [1], [0, 0, 1, 1], [], []>} : vector<1x8xbf16>, vector<8x784xbf16>, vector<1x784xf32> -> vector<1x784xf32>
    %504 = arith.addf %496, %503 : vector<1x784xf32>
    %c0_472 = arith.constant 0 : index
    %c0_473 = arith.constant 0 : index
    %505 = vector.load %arg18[%c0_472, %c0_473] : memref<1x1xf32, #tpu.memory_space<vmem>>, vector<1x1xf32>
    %506 = vector.broadcast %505 : vector<1x1xf32> to vector<1x784xf32>
    %507 = arith.addf %504, %506 : vector<1x784xf32>
    %508 = math.tanh %507 : vector<1x784xf32>
    %c0_474 = arith.constant 0 : index
    %c0_475 = arith.constant 0 : index
    %c0_476 = arith.constant 0 : index
    %509 = vector.load %arg20[%c0_474, %c0_475, %c0_476] : memref<1x1x784xf32, #tpu.memory_space<vmem>>, vector<1x1x784xf32>
    %510 = vector.shape_cast %509 : vector<1x1x784xf32> to vector<1x784xf32>
    %511 = vector.shape_cast %508 : vector<1x784xf32> to vector<1x1x784xf32>
    tpu.vector_store %arg20[%c0_474, %c0_475, %c0_476], %511 {strides = array<i32>} : memref<1x1x784xf32, #tpu.memory_space<vmem>>, vector<1x1x784xf32>,
    return
  }
  func.func @transform_0(%arg0: i32) -> (i32, i32, i32) {
    %c0_i32 = arith.constant 0 : i32
    %c0_i32_0 = arith.constant 0 : i32
    %c0_i32_1 = arith.constant 0 : i32
    return %arg0, %c0_i32, %c0_i32_0 : i32, i32, i32
  }
  func.func @transform_1(%arg0: i32) -> (i32, i32, i32) {
    %c0_i32 = arith.constant 0 : i32
    %c0_i32_0 = arith.constant 0 : i32
    %c0_i32_1 = arith.constant 0 : i32
    %c0_i32_2 = arith.constant 0 : i32
    return %c0_i32, %c0_i32_0, %c0_i32_1 : i32, i32, i32
  }
  func.func @transform_2(%arg0: i32) -> (i32, i32, i32) {
    %c0_i32 = arith.constant 0 : i32
    %c0_i32_0 = arith.constant 0 : i32
    %c0_i32_1 = arith.constant 0 : i32
    %c0_i32_2 = arith.constant 0 : i32
    return %c0_i32, %c0_i32_0, %c0_i32_1 : i32, i32, i32
  }
  func.func @transform_3(%arg0: i32) -> (i32, i32) {
    %c0_i32 = arith.constant 0 : i32
    %c0_i32_0 = arith.constant 0 : i32
    %c0_i32_1 = arith.constant 0 : i32
    return %c0_i32, %c0_i32_0 : i32, i32
  }
  func.func @transform_4(%arg0: i32) -> (i32, i32, i32) {
    %c0_i32 = arith.constant 0 : i32
    %c0_i32_0 = arith.constant 0 : i32
    %c0_i32_1 = arith.constant 0 : i32
    %c0_i32_2 = arith.constant 0 : i32
    return %c0_i32, %c0_i32_0, %c0_i32_1 : i32, i32, i32
  }
  func.func @transform_5(%arg0: i32) -> (i32, i32, i32) {
    %c0_i32 = arith.constant 0 : i32
    %c0_i32_0 = arith.constant 0 : i32
    %c0_i32_1 = arith.constant 0 : i32
    %c0_i32_2 = arith.constant 0 : i32
    return %c0_i32, %c0_i32_0, %c0_i32_1 : i32, i32, i32
  }
  func.func @transform_6(%arg0: i32) -> (i32, i32, i32) {
    %c0_i32 = arith.constant 0 : i32
    %c0_i32_0 = arith.constant 0 : i32
    %c0_i32_1 = arith.constant 0 : i32
    %c0_i32_2 = arith.constant 0 : i32
    return %c0_i32, %c0_i32_0, %c0_i32_1 : i32, i32, i32
  }
  func.func @transform_7(%arg0: i32) -> (i32, i32) {
    %c0_i32 = arith.constant 0 : i32
    %c0_i32_0 = arith.constant 0 : i32
    %c0_i32_1 = arith.constant 0 : i32
    return %c0_i32, %c0_i32_0 : i32, i32
  }
  func.func @transform_8(%arg0: i32) -> (i32, i32, i32) {
    %c0_i32 = arith.constant 0 : i32
    %c0_i32_0 = arith.constant 0 : i32
    %c0_i32_1 = arith.constant 0 : i32
    %c0_i32_2 = arith.constant 0 : i32
    return %c0_i32, %c0_i32_0, %c0_i32_1 : i32, i32, i32
  }
  func.func @transform_9(%arg0: i32) -> (i32, i32, i32) {
    %c0_i32 = arith.constant 0 : i32
    %c0_i32_0 = arith.constant 0 : i32
    %c0_i32_1 = arith.constant 0 : i32
    %c0_i32_2 = arith.constant 0 : i32
    return %c0_i32, %c0_i32_0, %c0_i32_1 : i32, i32, i32
  }
  func.func @transform_10(%arg0: i32) -> (i32, i32, i32) {
    %c0_i32 = arith.constant 0 : i32
    %c0_i32_0 = arith.constant 0 : i32
    %c0_i32_1 = arith.constant 0 : i32
    %c0_i32_2 = arith.constant 0 : i32
    return %c0_i32, %c0_i32_0, %c0_i32_1 : i32, i32, i32
  }
  func.func @transform_11(%arg0: i32) -> (i32, i32) {
    %c0_i32 = arith.constant 0 : i32
    %c0_i32_0 = arith.constant 0 : i32
    %c0_i32_1 = arith.constant 0 : i32
    return %c0_i32, %c0_i32_0 : i32, i32
  }
  func.func @transform_12(%arg0: i32) -> (i32, i32, i32) {
    %c0_i32 = arith.constant 0 : i32
    %c0_i32_0 = arith.constant 0 : i32
    %c0_i32_1 = arith.constant 0 : i32
    %c0_i32_2 = arith.constant 0 : i32
    return %c0_i32, %c0_i32_0, %c0_i32_1 : i32, i32, i32
  }
  func.func @transform_13(%arg0: i32) -> (i32, i32, i32) {
    %c0_i32 = arith.constant 0 : i32
    %c0_i32_0 = arith.constant 0 : i32
    %c0_i32_1 = arith.constant 0 : i32
    %c0_i32_2 = arith.constant 0 : i32
    return %c0_i32, %c0_i32_0, %c0_i32_1 : i32, i32, i32
  }
  func.func @transform_14(%arg0: i32) -> (i32, i32) {
    %c0_i32 = arith.constant 0 : i32
    %c0_i32_0 = arith.constant 0 : i32
    %c0_i32_1 = arith.constant 0 : i32
    return %c0_i32, %c0_i32_0 : i32, i32
  }
  func.func @transform_15(%arg0: i32) -> (i32, i32, i32) {
    %c0_i32 = arith.constant 0 : i32
    %c0_i32_0 = arith.constant 0 : i32
    %c0_i32_1 = arith.constant 0 : i32
    %c0_i32_2 = arith.constant 0 : i32
    return %c0_i32, %c0_i32_0, %c0_i32_1 : i32, i32, i32
  }
  func.func @transform_16(%arg0: i32) -> (i32, i32, i32) {
    %c0_i32 = arith.constant 0 : i32
    %c0_i32_0 = arith.constant 0 : i32
    %c0_i32_1 = arith.constant 0 : i32
    %c0_i32_2 = arith.constant 0 : i32
    return %c0_i32, %c0_i32_0, %c0_i32_1 : i32, i32, i32
  }
  func.func @transform_17(%arg0: i32) -> (i32, i32) {
    %c0_i32 = arith.constant 0 : i32
    %c0_i32_0 = arith.constant 0 : i32
    %c0_i32_1 = arith.constant 0 : i32
    return %c0_i32, %c0_i32_0 : i32, i32
  }
  func.func @transform_18(%arg0: i32) -> (i32, i32, i32) {
    %c0_i32 = arith.constant 0 : i32
    %c0_i32_0 = arith.constant 0 : i32
    %c0_i32_1 = arith.constant 0 : i32
    return %arg0, %c0_i32, %c0_i32_0 : i32, i32, i32
  }
  func.func @transform_19(%arg0: i32) -> (i32, i32, i32) {
    %c0_i32 = arith.constant 0 : i32
    %c0_i32_0 = arith.constant 0 : i32
    %c0_i32_1 = arith.constant 0 : i32
    return %arg0, %c0_i32, %c0_i32_0 : i32, i32, i32
  }
}

</mosaic_0001>

<bundles_post_ra>
// kernel: conv_autoencoder_forward.1
= control target key start
LH: loop header
LB: loop body
LE: loop exit
PB: predicated region body
PF: predicated region fallthrough
CT: control target
= control target key end

     0   :  { %s21715_s0 = inlined_call_operand.vmem [shape: f32[2,8,784], index: 0, kind: input, shape index: {}]   ;;  %s21716_s1 = inlined_call_operand.hbm [shape: bf16[9,784,100], index: 1, kind: input, shape index: {}]   ;;  %s21717_s2 = inlined_call_operand.vmem [shape: bf16[9,16,8], index: 2, kind: input, shape index: {}]   ;;  %s21718_s3 = inlined_call_operand.vmem [shape: f32[16,1], index: 3, kind: input, shape index: {}]   ;;  %s21719_s4 = inlined_call_operand.hbm [shape: bf16[4,100,25], index: 4, kind: input, shape index: {}]   ;;  %s21720_s5 = inlined_call_operand.hbm [shape: bf16[9,25,9], index: 5, kind: input, shape index: {}]   ;;  %s21721_s6 = inlined_call_operand.vmem [shape: bf16[9,8,16], index: 6, kind: input, shape index: {}]   ;;  %s21722_s7 = inlined_call_operand.vmem [shape: f32[8,1], index: 7, kind: input, shape index: {}]   ;;  %s21723_s8 = inlined_call_operand.hbm [shape: bf16[4,9,4], index: 8, kind: input, shape index: {}]   ;;  %s21724_s9 = inlined_call_operand.hbm [shape: bf16[9,4,25], index: 9, kind: input, shape index: {}]   ;;  %s21725_s10 = inlined_call_operand.vmem [shape: bf16[9,16,8], index: 10, kind: input, shape index: {}]   ;;  %s21726_s11 = inlined_call_operand.vmem [shape: f32[16,1], index: 11, kind: input, shape index: {}]   ;;  %s21727_s12 = inlined_call_operand.hbm [shape: bf16[25,25,225], index: 12, kind: input, shape index: {}]   ;;  %s21728_s13 = inlined_call_operand.vmem [shape: bf16[25,8,16], index: 13, kind: input, shape index: {}]   ;;  %s21729_s14 = inlined_call_operand.vmem [shape: f32[8,1], index: 14, kind: input, shape index: {}]   ;;  %s21730_s15 = inlined_call_operand.hbm [shape: bf16[4,225,784], index: 15, kind: input, shape index: {}]   ;;  %s21731_s16 = inlined_call_operand.vmem [shape: bf16[4,1,8], index: 16, kind: input, shape index: {}]   ;;  %s21732_s17 = inlined_call_operand.<no memory space> [shape: f32[1,1], index: 17, kind: input, shape index: {}]   ;;  %s21733_s18 = inlined_call_operand.vmem [shape: f32[2,8,4], index: 18, kind: output, shape index: {0}]   ;;  %s21734_s19 = inlined_call_operand.vmem [shape: f32[2,1,784], index: 19, kind: output, shape index: {1}]  }
   0x1   :  { %21746 = sst [smem:[#allocation19_spill]] %s21715_s0  ;;  %v25_v0 = vstv %s21732_s17 }
   0x2   :  { %21747 = sst [smem:[#allocation20_spill]] %s21716_s1  ;;  %26 = vst [vmem:[#allocation2] sm:$0x1] %v25_v0 }
   0x3   :  { %21748 = sst [smem:[#allocation21_spill]] %s21717_s2 }
   0x4   :  { %21749 = sst [smem:[#allocation22_spill]] %s21718_s3 }
   0x5   :  { %21750 = sst [smem:[#allocation23_spill]] %s21719_s4 }
   0x6   :  { %21751 = sst [smem:[#allocation24_spill]] %s21731_s16 }
   0x7   :  { %21752 = sst [smem:[#allocation25_spill]] %s21734_s19 }
   0x8   :  { %27 = vsyncpa [#allocation4], 0 }
   0x9   :  { %28 = vsyncpa [#allocation6], 0 }
   0xa   :  { %29 = vsyncpa [#allocation9], 0 }
   0xb   :  { %30 = vsyncpa [#allocation12], 0  ;;  %s20363_s20 = smov 0  }
   0xc LB: > { %21753 = sst [smem:[#allocation18_spill]] %s20238_s20  ;;  %s20369_s21 = sadd.s32 4294967295, %s20238_s20   ;;  %s20238_s20 = sphi %s20363_s20, %s36_s20  }
   0xd   : > { %p16169_p0 = scmp.ge.s32.totalorder %s20238_s20, 1  ;;  %p476_p1 = scmp.lt.s32.totalorder %s20238_s20, 3 }
   0xe   : > { %p21744_p2 = scmp.eq.s32.totalorder %s20369_s21, 0  ;;  %s20240_s1 = smov [#allocation5]  }
   0xf   : > { %p20374_p3 = pnand %p16169_p0, %p476_p1  ;;  %s507_s22 = sshll.u32 %s20240_s1, 4  ;;  %s20378_s22 = int_to_ptr.vmem [resolvable:$true] %s507_s22 }
  0x10   : > { %s20241_s2 = smov [#allocation8]   ;;  %s20242_s25 = smov [#allocation11]  }
  0x11   : > { %s21754_s17 = scalar_select %p20374_p3, 1, 0 }
  0x12   : > { %p18693_p4 = pneg %p20374_p3  ;;  %s539_s23 = sshll.u32 %s20241_s2, 4  ;;  %s20382_s23 = int_to_ptr.vmem [resolvable:$true] %s539_s23 }
  0x13   : > { %s571_s3 = sshll.u32 %s20242_s25, 4  ;;  %s21756_s4 = sld [smem:[#allocation23_spill]]  ;;  %s20390_s3 = int_to_ptr.vmem [resolvable:$true] %s571_s3 }
  0x14   : > { %p20386_p5 = pnand %p21744_p2, %p18693_p4 }
  0x16   : > { %p20400_p7 = pneg %p20386_p5 }
  0x19   : > { %s20020_s28 = scalar_lea.hbm %s21756_s4, 3328 }
  0x1a   : > { %p20021_p6 = scmp.ne.s32.totalorder %s21756_s4, %s20020_s28  ;;  %p20027_p10 = scmp.lt.u32.totalorder %s20020_s28, %s21756_s4 }
  0x1c   : > { %p20023_p8 = pnand %p20400_p7, %p20021_p6 }
  0x1e   : > { %p20024_p9 = pneg %p20023_p8 }
  0x20   : > { %p20029_p11 = pnand %p20027_p10, %p20024_p9 }
  0x22   : > { %20032 = shalt.err (!%p20029_p11)
}
  0x23   : > { %s20033_s25 = scalar_lea.vmem %s20378_s22, 3328  ;;  %p20041_p1 = scmp.lt.s32.totalorder %s20378_s22, %s20378_s22 }
  0x24   : > { %p20034_p12 = scmp.ne.s32.totalorder %s20378_s22, %s20033_s25  ;;  %p20042_p4 = scmp.lt.s32.totalorder %s20033_s25, %s20033_s25 }
  0x26   : > { %p20036_p13 = pnand %p20034_p12, %p20400_p7  ;;  %p20043_p6 = por %p20042_p4, %p20041_p1 }
  0x28   : > { %p20037_p0 = pneg %p20036_p13 }
  0x2a   : > { %p20044_p8 = pnand %p20043_p6, %p20037_p0 }
  0x2c   : > { %20047 = shalt.err (!%p20044_p8)
}
  0x2d   : > { %s21740_s26 = smov 64   ;;  %s21742_s27 = smov 4  }
  0x2e   : > { %18699 = dma.hbm_to_vmem [thread:$0]  (!%p20386_p5), %s21756_s4, 3328, %s20378_s22, [#allocation6], %s21740_s26, %s21740_s26, %s21742_s27  }
  0x2f   : > { %s20048_s2 = scalar_lea.hbm %s21723_s8, 512 }
  0x30   : > { %p20049_p9 = scmp.ne.s32.totalorder %s21723_s8, %s20048_s2  ;;  %p20055_p12 = scmp.lt.u32.totalorder %s20048_s2, %s21723_s8 }
  0x32   : > { %p20051_p10 = pnand %p20049_p9, %p20400_p7 }
  0x34   : > { %p20052_p11 = pneg %p20051_p10 }
  0x36   : > { %p20057_p13 = pnand %p20055_p12, %p20052_p11 }
  0x38   : > { %20060 = shalt.err (!%p20057_p13)
}
  0x39   : > { %s20061_s22 = scalar_lea.vmem %s20382_s23, 512  ;;  %p20069_p6 = scmp.lt.s32.totalorder %s20382_s23, %s20382_s23 }
  0x3a   : > { %p20062_p0 = scmp.ne.s32.totalorder %s20382_s23, %s20061_s22  ;;  %p20070_p8 = scmp.lt.s32.totalorder %s20061_s22, %s20061_s22 }
  0x3c   : > { %p20064_p1 = pnand %p20062_p0, %p20400_p7  ;;  %p20071_p9 = por %p20070_p8, %p20069_p6 }
  0x3e   : > { %p20065_p4 = pneg %p20064_p1 }
  0x40   : > { %p20072_p10 = pnand %p20071_p9, %p20065_p4 }
  0x42   : > { %20075 = shalt.err (!%p20072_p10)
}
  0x43   : > { %18705 = dma.hbm_to_vmem [thread:$0]  (!%p20386_p5), %s21723_s8, 512, %s20382_s23, [#allocation9], %s21740_s26, %s21740_s26, %s21742_s27  }
  0x44   : > { %s20076_s29 = scalar_lea.hbm %s21727_s12, 12800 }
  0x45   : > { %p20077_p11 = scmp.ne.s32.totalorder %s21727_s12, %s20076_s29  ;;  %p20083_p0 = scmp.lt.u32.totalorder %s20076_s29, %s21727_s12 }
  0x47   : > { %p20079_p12 = pnand %p20077_p11, %p20400_p7 }
  0x49   : > { %p20080_p13 = pneg %p20079_p12 }
  0x4b   : > { %p20085_p1 = pnand %p20083_p0, %p20080_p13 }
  0x4d   : > { %20088 = shalt.err (!%p20085_p1)
}
  0x4e   : > { %s20089_s23 = scalar_lea.vmem %s20390_s3, 12800  ;;  %p20097_p9 = scmp.lt.s32.totalorder %s20390_s3, %s20390_s3 }
  0x4f   : > { %p20090_p4 = scmp.ne.s32.totalorder %s20390_s3, %s20089_s23  ;;  %p20098_p10 = scmp.lt.s32.totalorder %s20089_s23, %s20089_s23 }
  0x51   : > { %p20092_p6 = pnand %p20090_p4, %p20400_p7  ;;  %p20099_p11 = por %p20098_p10, %p20097_p9 }
  0x53   : > { %p20093_p8 = pneg %p20092_p6 }
  0x55   : > { %p20100_p12 = pnand %p20099_p11, %p20093_p8 }
  0x57   : > { %20103 = shalt.err (!%p20100_p12)
}
  0x58   : > { %s20245_s22 = smov 128   ;;  %s20246_s16 = smov 8  }
  0x59   : > { %18711 = dma.hbm_to_vmem [thread:$0]  (!%p20386_p5), %s21727_s12, 12800, %s20390_s3, [#allocation12], %s20245_s22, %s20245_s22, %s20246_s16  }
  0x5a   : > { %s20247_s28 = smov [#allocation3]   ;;  %s20248_s0 = smov [#allocation7]  }
  0x5b   : > { %s488_s29 = sshll.u32 %s20247_s28, 4  ;;  %s520_s1 = sshll.u32 %s20248_s0, 4  ;;  %s489_s29 = int_to_ptr.vmem [resolvable:$true] %s488_s29  ;;  %s20473_s1 = int_to_ptr.vmem [resolvable:$true] %s520_s1 }
  0x5c   : > { %s21758_s23 = sld [smem:[#allocation20_spill]] }
  0x62   : > { %s20104_s26 = scalar_lea.hbm %s21758_s23, 56448 }
  0x63   : > { %p20105_p13 = scmp.ne.s32.totalorder %s21758_s23, %s20104_s26  ;;  %p20111_p4 = scmp.lt.u32.totalorder %s20104_s26, %s21758_s23 }
  0x65   : > { %p20107_p0 = pnand %p20105_p13, %p20400_p7 }
  0x67   : > { %p20108_p1 = pneg %p20107_p0 }
  0x69   : > { %p20113_p6 = pnand %p20111_p4, %p20108_p1 }
  0x6b   : > { %20116 = shalt.err (!%p20113_p6)
}
  0x6c   : > { %s20117_s22 = scalar_lea.vmem %s489_s29, 56448  ;;  %p20125_p11 = scmp.lt.s32.totalorder %s489_s29, %s489_s29 }
  0x6d   : > { %p20118_p8 = scmp.ne.s32.totalorder %s489_s29, %s20117_s22  ;;  %p20126_p12 = scmp.lt.s32.totalorder %s20117_s22, %s20117_s22 }
  0x6f   : > { %p20120_p9 = pnand %p20118_p8, %p20400_p7  ;;  %p20127_p2 = por %p20126_p12, %p20125_p11 }
  0x71   : > { %p20121_p10 = pneg %p20120_p9 }
  0x73   : > { %p20128_p3 = pnand %p20127_p2, %p20121_p10 }
  0x75   : > { %20131 = shalt.err (!%p20128_p3)
}
  0x76   : > { %s21759_s4 = smov 4   ;;  %s21760_s27 = smov 64  }
  0x77   : > { %18696 = dma.hbm_to_vmem [thread:$0]  (!%p20386_p5), %s21758_s23, 56448, %s489_s29, [#allocation4], %s21760_s27, %s21760_s27, %s21759_s4  }
  0x78   : > { %s20132_s0 = scalar_lea.hbm %s21720_s5, 2304 }
  0x79   : > { %p20133_p13 = scmp.ne.s32.totalorder %s21720_s5, %s20132_s0  ;;  %p20139_p0 = scmp.lt.u32.totalorder %s20132_s0, %s21720_s5 }
  0x7b   : > { %p20135_p2 = pnand %p20133_p13, %p20400_p7 }
  0x7d   : > { %p20136_p3 = pneg %p20135_p2 }
  0x7f   : > { %p20141_p1 = pnand %p20139_p0, %p20136_p3 }
  0x81   : > { %20144 = shalt.err (!%p20141_p1)
}
  0x82   : > { %s20145_s29 = scalar_lea.vmem %s20473_s1, 2304  ;;  %p20153_p9 = scmp.lt.s32.totalorder %s20473_s1, %s20473_s1 }
  0x83   : > { %p20146_p4 = scmp.ne.s32.totalorder %s20473_s1, %s20145_s29  ;;  %p20154_p10 = scmp.lt.s32.totalorder %s20145_s29, %s20145_s29 }
  0x85   : > { %p20148_p6 = pnand %p20146_p4, %p20400_p7  ;;  %p20155_p11 = por %p20154_p10, %p20153_p9 }
  0x87   : > { %p20149_p8 = pneg %p20148_p6 }
  0x89   : > { %p20156_p12 = pnand %p20155_p11, %p20149_p8 }
  0x8b   : > { %20159 = shalt.err (!%p20156_p12)
}
  0x8c   : > { %18702 = dma.hbm_to_vmem [thread:$0]  (!%p20386_p5), %s21720_s5, 2304, %s20473_s1, [#allocation6], %s21760_s27, %s21760_s27, %s21759_s4  }
  0x8d   : > { %s20249_s26 = smov [#allocation10]   ;;  %s20160_s2 = scalar_lea.hbm %s21724_s9, 288 }
  0x8e   : > { %s552_s20 = sshll.u32 %s20249_s26, 4  ;;  %p20161_p13 = scmp.ne.s32.totalorder %s21724_s9, %s20160_s2  ;;  %s553_s20 = int_to_ptr.vmem [resolvable:$true] %s552_s20 }
  0x8f   : > { %p20167_p0 = scmp.lt.u32.totalorder %s20160_s2, %s21724_s9 }
  0x90   : > { %p20163_p2 = pnand %p20161_p13, %p20400_p7 }
  0x92   : > { %p20164_p3 = pneg %p20163_p2 }
  0x94   : > { %p20169_p1 = pnand %p20167_p0, %p20164_p3 }
  0x96   : > { %20172 = shalt.err (!%p20169_p1)
}
  0x97   : > { %s20173_s1 = scalar_lea.vmem %s553_s20, 288  ;;  %p20181_p9 = scmp.lt.s32.totalorder %s553_s20, %s553_s20 }
  0x98   : > { %p20174_p4 = scmp.ne.s32.totalorder %s553_s20, %s20173_s1  ;;  %p20182_p10 = scmp.lt.s32.totalorder %s20173_s1, %s20173_s1 }
  0x9a   : > { %p20176_p6 = pnand %p20174_p4, %p20400_p7  ;;  %p20183_p11 = por %p20182_p10, %p20181_p9 }
  0x9c   : > { %p20177_p8 = pneg %p20176_p6 }
  0x9e   : > { %p20184_p12 = pnand %p20183_p11, %p20177_p8 }
  0xa0   : > { %20187 = shalt.err (!%p20184_p12)
}
  0xa1   : > { %s20250_s4 = smov 32   ;;  %s20251_s27 = smov 2  }
  0xa2   : > { %18708 = dma.hbm_to_vmem [thread:$0]  (!%p20386_p5), %s21724_s9, 288, %s553_s20, [#allocation9], %s20250_s4, %s20250_s4, %s20251_s27  }
  0xa3   : > { %s20252_s26 = smov [#allocation13]   ;;  %s20188_s25 = scalar_lea.hbm %s21730_s15, 51968 }
  0xa4   : > { %s590_s28 = sshll.u32 %s20252_s26, 4  ;;  %p20189_p13 = scmp.ne.s32.totalorder %s21730_s15, %s20188_s25  ;;  %s591_s28 = int_to_ptr.vmem [resolvable:$true] %s590_s28 }
  0xa5   : > { %p20195_p0 = scmp.lt.u32.totalorder %s20188_s25, %s21730_s15 }
  0xa6   : > { %p20191_p2 = pnand %p20189_p13, %p20400_p7 }
  0xa8   : > { %p20192_p3 = pneg %p20191_p2 }
  0xaa   : > { %p20197_p1 = pnand %p20195_p0, %p20192_p3 }
  0xac   : > { %20200 = shalt.err (!%p20197_p1)
}
  0xad   : > { %s20201_s20 = scalar_lea.vmem %s591_s28, 51968  ;;  %p20209_p9 = scmp.lt.s32.totalorder %s591_s28, %s591_s28 }
  0xae   : > { %p20202_p4 = scmp.ne.s32.totalorder %s591_s28, %s20201_s20  ;;  %p20210_p10 = scmp.lt.s32.totalorder %s20201_s20, %s20201_s20 }
  0xb0   : > { %p20204_p6 = pnand %p20202_p4, %p20400_p7  ;;  %p20211_p11 = por %p20210_p10, %p20209_p9 }
  0xb2   : > { %p20205_p8 = pneg %p20204_p6 }
  0xb4   : > { %p20212_p12 = pnand %p20211_p11, %p20205_p8 }
  0xb6   : > { %20215 = shalt.err (!%p20212_p12)
}
  0xb7   : > { %s20253_s4 = smov 448   ;;  %s20254_s27 = smov 28  }
  0xb8   : > { %18714 = dma.hbm_to_vmem [thread:$0]  (!%p20386_p5), %s21730_s15, 51968, %s591_s28, [#allocation12], %s20253_s4, %s20253_s4, %s20254_s27  }
  0xb9   : > { %p21761_p13 = scmp.ne.s32.totalorder %s21754_s17, 0 }
  0xba   : > { %p21762_p2 = scmp.eq.s32.totalorder (!%p21761_p13), %s20369_s21, 0 }
  0xbb   : > { %620 = sbr.rel (%p21761_p13) target bundleno = 6873 (0x1ad9), region = 92 }
  0xc2   : > { %20221 = dma.done.wait (%p21762_p2), [#allocation4], 56448   ;;  %p21763_p7 = pmov %p21762_p2 }
  0xc3   : > { %p21764_p3 = pmov %p21762_p2 }
  0xc4   : > { %20223 = vsyncadd (%p21763_p7), [#allocation4], 4294910848 }
  0xc5   : > { %20225 = dma.done.wait (%p21764_p3), [#allocation6], 5632   ;;  %p21765_p0 = pmov %p21762_p2 }
  0xc7   : > { %20227 = vsyncadd (%p21765_p0), [#allocation6], 4294961664  ;;  %p21766_p1 = pmov %p21765_p0 }
  0xc8   : > { %p21767_p5 = pmov %p21765_p0 }
  0xc9   : > { %20229 = dma.done.wait (%p21766_p1), [#allocation9], 800  }
  0xca   : > { %20231 = vsyncadd (%p21767_p5), [#allocation9], 4294966496  ;;  %p21768_p4 = pmov %p21765_p0 }
  0xcb   : > { %p21769_p6 = pmov %p21765_p0 }
  0xcc   : > { %20233 = dma.done.wait (%p21768_p4), [#allocation12], 64768  }
  0xcd   : > { %20235 = vsyncadd (%p21769_p6), [#allocation12], 4294902528  ;;  %v18759_v1 = vld [vmem:[#allocation3 + $0x40] sm:$0xff]   ;;  %v18763_v5 = vld [vmem:[#allocation3 + $0x48] sm:$0xff]   ;;  %p703_p8 = scmp.lt.s32.totalorder %s20369_s21, 1  ;;  %s21770_s26 = sld [smem:[#allocation19_spill]] }
  0xce   : > { %v18760_v2 = vld [vmem:[#allocation3 + $0xc0] sm:$0xff]   ;;  %17442 = vmatprep.subr.bf16.mxu0 %v18759_v1  ;;  %v18764_v6 = vld [vmem:[#allocation3 + $0xc8] sm:$0xff]   ;;  %v18767_v9 = vld [vmem:[#allocation3 + $0x50] sm:$0xff]   ;;  %v20255_v42 = vmov 0.0   ;;  %vm20256_vm0 = vmmov 0   ;;  %vm1123_vm1 = vcmask 130048  }
  0xcf   : > { %v18761_v3 = vld [vmem:[#allocation3] sm:$0xff]   ;;  %17464 = vmatprep.subr.bf16.mxu1 %v18760_v2  ;;  %v18765_v7 = vld [vmem:[#allocation3 + $0x8] sm:$0xff]   ;;  %v18768_v10 = vld [vmem:[#allocation3 + $0xd0] sm:$0xff]   ;;  %s21777_s21 = smov (!%p703_p8, %s20369_s21), 1  ;;  %vm1856_vm2 = vcmask 1043456   ;;  %vm1852_vm3 = vcmask 64512  }
  0xd0   : > { %v18762_v4 = vld [vmem:[#allocation3 + $0x80] sm:$0xff]   ;;  %17443 = vmatpush3.bf16.msra.mxu0 %v18761_v3  ;;  %v18766_v8 = vld [vmem:[#allocation3 + $0x88] sm:$0xff]   ;;  %v18769_v11 = vld [vmem:[#allocation3 + $0x10] sm:$0xff]   ;;  %s18663_s17 = smul.u32 56, %s21777_s21  ;;  %s21771_s25 = sld [smem:[#allocation21_spill]]  ;;  %vm6303_vm4 = vcmask 1041408  }
  0xd1   : > { %17465 = vmatpush3.bf16.msra.mxu1 %v18762_v4  ;;  %17444 = vmatprep.subr.bf16.mxu0 %v18763_v5  ;;  %v18770_v12 = vld [vmem:[#allocation3 + $0x90] sm:$0xff]   ;;  %v18771_v13 = vld [vmem:[#allocation3 + $0x58] sm:$0xff]   ;;  %v18775_v17 = vld [vmem:[#allocation3 + $0x60] sm:$0xff]   ;;  %s21772_s19 = sld [smem:[#allocation22_spill]]  ;;  %vm6299_vm5 = vcmask 818176   ;;  %vm6665_vm6 = vcmask 1044480  }
  0xd2   : > { %17466 = vmatprep.subr.bf16.mxu1 %v18764_v6  ;;  %v18772_v14 = vld [vmem:[#allocation3 + $0xd8] sm:$0xff]   ;;  %v18776_v18 = vld [vmem:[#allocation3 + $0xe0] sm:$0xff]   ;;  %v18779_v21 = vld [vmem:[#allocation3 + $0x68] sm:$0xff]   ;;  %vm6661_vm7 = vcmask 203776   ;;  %vm7628_vm8 = vcmask 72704   ;;  %s16187_s3 = sshll.u32 %s21777_s21, 3 }
  0xd3   : > { %v18773_v15 = vld [vmem:[#allocation3 + $0x18] sm:$0xff]   ;;  %v18777_v19 = vld [vmem:[#allocation3 + $0x20] sm:$0xff]   ;;  %v18780_v22 = vld [vmem:[#allocation3 + $0xe8] sm:$0xff]   ;;  %s20584_s28 = scalar_lea.vmem %s21770_s26, %s18663_s17  ;;  %s711_s20 = scalar_lea.vmem %s21733_s18, %s16187_s3  ;;  %vm7831_vm9 = vcmask 31744   ;;  %vm12476_vm10 = vcmask 1040384   ;;  %vm12472_vm11 = vcmask 793600  }
  0xd4   : > { %17445 = vmatpush3.bf16.msra.mxu0 %v18765_v7  ;;  %v18774_v16 = vld [vmem:[#allocation3 + $0x98] sm:$0xff]   ;;  %v18778_v20 = vld [vmem:[#allocation3 + $0xa0] sm:$0xff]   ;;  %v18781_v23 = vld [vmem:[#allocation3 + $0x28] sm:$0xff]   ;;  %s21773_s2 = sld [smem:[#allocation24_spill]]  ;;  %s18664_s22 = smul.u32 7, %s21777_s21 }
  0xd5   : > { %17467 = vmatpush3.bf16.msra.mxu1 %v18766_v8  ;;  %17446 = vmatprep.subr.bf16.mxu0 %v18767_v9  ;;  %v18782_v24 = vld [vmem:[#allocation3 + $0xa8] sm:$0xff]   ;;  %v18783_v25 = vld [vmem:[#allocation3 + $0x70] sm:$0xff]   ;;  %v18787_v29 = vld [vmem:[#allocation3 + $0x78] sm:$0xff]   ;;  %s21774_s24 = sld [smem:[#allocation25_spill]] }
  0xd6   : > { %17468 = vmatprep.subr.bf16.mxu1 %v18768_v10  ;;  %v18784_v26 = vld [vmem:[#allocation3 + $0xf0] sm:$0xff]   ;;  %v18788_v30 = vld [vmem:[#allocation3 + $0xf8] sm:$0xff]   ;;  %v718_v33 = vld [vmem:[%s20584_s28 + $0x8] sm:$0xff] }
  0xd7   : > { %v18785_v27 = vld [vmem:[#allocation3 + $0x30] sm:$0xff]   ;;  %v18789_v31 = vld [vmem:[#allocation3 + $0x38] sm:$0xff]   ;;  %v20589_v36 = vpack.c.bf16 %v718_v33, %v718_v33  ;;  %v18791_v41 = vld [vmem:[#allocation3 + $0x140] sm:$0xff]  }
  0xd8   : > { %17447 = vmatpush3.bf16.msra.mxu0 %v18769_v11  ;;  %v18786_v28 = vld [vmem:[#allocation3 + $0xb0] sm:$0xff]   ;;  %v18790_v32 = vld [vmem:[#allocation3 + $0xb8] sm:$0xff]   ;;  %v18792_v43 = vld [vmem:[#allocation3 + $0x100] sm:$0xff]  }
  0xd9   : > { %17469 = vmatpush3.bf16.msra.mxu1 %v18770_v12  ;;  %17448 = vmatprep.subr.bf16.mxu0 %v18771_v13  ;;  %v720_v34 = vld [vmem:[%s20584_s28 + $0x18] sm:$0xff]  ;;  %v717_v35 = vld [vmem:[%s20584_s28] sm:$0xff]  ;;  %v719_v39 = vld [vmem:[%s20584_s28 + $0x10] sm:$0xff] }
  0xda   : > { %17470 = vmatprep.subr.bf16.mxu1 %v18772_v14  ;;  %v20591_v37 = vpack.c.bf16 %v720_v34, %v720_v34  ;;  %v20593_v38 = vpack.c.bf16 %v717_v35, %v717_v35  ;;  %v20596_v40 = vpack.c.bf16 %v719_v39, %v719_v39  ;;  %1159 = vmatprep.mubr.bf16.mxu0 %v20589_v36  ;;  %v18793_v44 = vld [vmem:[#allocation3 + $0x148] sm:$0xff]   ;;  %v18794_v45 = vld [vmem:[#allocation3 + $0x180] sm:$0xff]   ;;  %v18797_v48 = vld [vmem:[#allocation3 + $0x150] sm:$0xff]  }
  0xdb   : > { %v18795_v46 = vld [vmem:[#allocation3 + $0x108] sm:$0xff]   ;;  %v18799_v52 = vld [vmem:[#allocation3 + $0x110] sm:$0xff]   ;;  %v18801_v54 = vld [vmem:[#allocation3 + $0x158] sm:$0xff]   ;;  %s715_s30 = scalar_lea.vmem %s21774_s24, %s18664_s22 }
  0xdc   : > { %17449 = vmatpush3.bf16.msra.mxu0 %v18773_v15  ;;  %1199 = vmatprep.mubr.bf16.mxu1 %v20591_v37  ;;  %v18796_v47 = vld [vmem:[#allocation3 + $0x1c8] sm:$0xff]   ;;  %v18800_v53 = vld [vmem:[#allocation3 + $0x1d0] sm:$0xff]   ;;  %v18803_v56 = vld [vmem:[#allocation3 + $0x118] sm:$0xff]  }
  0xdd   : > { %17471 = vmatpush3.bf16.msra.mxu1 %v18774_v16  ;;  %17450 = vmatprep.subr.bf16.mxu0 %v18775_v17  ;;  %v723_v49 = vld [vmem:[%s20584_s28 + $0x30] sm:$0xff]  ;;  %v18804_v57 = vld [vmem:[#allocation3 + $0x1d8] sm:$0xff]   ;;  %v18805_v58 = vld [vmem:[#allocation3 + $0x160] sm:$0xff]  }
  0xde   : > { %17472 = vmatprep.subr.bf16.mxu1 %v18776_v18  ;;  %v20606_v50 = vpack.c.bf16 %v723_v49, %v723_v49  ;;  %v18798_v51 = vld [vmem:[#allocation3 + $0x188] sm:$0xff]   ;;  %v18802_v55 = vld [vmem:[#allocation3 + $0x190] sm:$0xff]   ;;  %v18806_v59 = vld [vmem:[#allocation3 + $0x198] sm:$0xff]  }
  0xdf   : > { %v18807_v60 = vld [vmem:[#allocation3 + $0x120] sm:$0xff]   ;;  %v18809_v62 = vld [vmem:[#allocation3 + $0x168] sm:$0xff]   ;;  %v18813_v2 = vld [vmem:[#allocation3 + $0x170] sm:$0xff]  }
  0xe0   : > { %17451 = vmatpush3.bf16.msra.mxu0 %v18777_v19  ;;  %v18808_v61 = vld [vmem:[#allocation3 + $0x1e0] sm:$0xff]   ;;  %v18811_v0 = vld [vmem:[#allocation3 + $0x128] sm:$0xff]   ;;  %v18815_v4 = vld [vmem:[#allocation3 + $0x130] sm:$0xff]  }
  0xe1   : > { %17473 = vmatpush3.bf16.msra.mxu1 %v18778_v20  ;;  %17452 = vmatprep.subr.bf16.mxu0 %v18779_v21  ;;  %v18810_v63 = vld [vmem:[#allocation3 + $0x1a0] sm:$0xff]   ;;  %v18812_v1 = vld [vmem:[#allocation3 + $0x1e8] sm:$0xff]   ;;  %v18816_v5 = vld [vmem:[#allocation3 + $0x1f0] sm:$0xff]  }
  0xe2   : > { %17474 = vmatprep.subr.bf16.mxu1 %v18780_v22  ;;  %v18814_v3 = vld [vmem:[#allocation3 + $0x1a8] sm:$0xff]   ;;  %v18817_v6 = vld [vmem:[#allocation3 + $0x178] sm:$0xff]   ;;  %v18818_v7 = vld [vmem:[#allocation3 + $0x1b0] sm:$0xff]  }
  0xe3   : > { %v18819_v8 = vld [vmem:[#allocation3 + $0x138] sm:$0xff]   ;;  %v722_v9 = vld [vmem:[%s20584_s28 + $0x28] sm:$0xff]  ;;  %v18826_v19 = vld [vmem:[#allocation3 + $0x250] sm:$0xff]  }
  0xe4   : > { %17453 = vmatpush3.bf16.msra.mxu0 %v18781_v23  ;;  %v20612_v10 = vpack.c.bf16 %v722_v9, %v722_v9  ;;  %v18820_v11 = vld [vmem:[#allocation3 + $0x1f8] sm:$0xff]   ;;  %v18822_v15 = vld [vmem:[#allocation3 + $0x248] sm:$0xff]   ;;  %v18824_v17 = vld [vmem:[#allocation3 + $0x200] sm:$0xff]  }
  0xe5   : > { %17475 = vmatpush3.bf16.msra.mxu1 %v18782_v24  ;;  %17454 = vmatprep.subr.bf16.mxu0 %v18783_v25  ;;  %v721_v12 = vld [vmem:[%s20584_s28 + $0x20] sm:$0xff]  ;;  %v18823_v16 = vld [vmem:[#allocation3 + $0x208] sm:$0xff]   ;;  %v18827_v20 = vld [vmem:[#allocation3 + $0x210] sm:$0xff]  }
  0xe6   : > { %17476 = vmatprep.subr.bf16.mxu1 %v18784_v26  ;;  %v20616_v13 = vpack.c.bf16 %v721_v12, %v721_v12  ;;  %v18821_v14 = vld [vmem:[#allocation3 + $0x1b8] sm:$0xff]   ;;  %v18825_v18 = vld [vmem:[#allocation3 + $0x1c0] sm:$0xff]   ;;  %v18828_v21 = vld [vmem:[#allocation3 + $0x2c8] sm:$0xff]  }
  0xe7   : > { %v18829_v22 = vld [vmem:[#allocation3 + $0x258] sm:$0xff]   ;;  %v18830_v23 = vld [vmem:[#allocation3 + $0x288] sm:$0xff]   ;;  %v18832_v25 = vld [vmem:[#allocation3 + $0x2d0] sm:$0xff]  }
  0xe8   : > { %17455 = vmatpush3.bf16.msra.mxu0 %v18785_v27  ;;  %v18831_v24 = vld [vmem:[#allocation3 + $0x218] sm:$0xff]   ;;  %v18833_v26 = vld [vmem:[#allocation3 + $0x260] sm:$0xff]   ;;  %v18834_v27 = vld [vmem:[#allocation3 + $0x290] sm:$0xff]  }
  0xe9   : > { %17477 = vmatpush3.bf16.msra.mxu1 %v18786_v28  ;;  %17456 = vmatprep.subr.bf16.mxu0 %v18787_v29  ;;  %v18835_v28 = vld [vmem:[#allocation3 + $0x220] sm:$0xff]   ;;  %v18836_v29 = vld [vmem:[#allocation3 + $0x2d8] sm:$0xff]   ;;  %v18841_v34 = vld [vmem:[#allocation3 + $0x270] sm:$0xff]  }
  0xea   : > { %17478 = vmatprep.subr.bf16.mxu1 %v18788_v30  ;;  %v18837_v30 = vld [vmem:[#allocation3 + $0x268] sm:$0xff]   ;;  %v18840_v33 = vld [vmem:[#allocation3 + $0x2e0] sm:$0xff]   ;;  %v18843_v39 = vld [vmem:[#allocation3 + $0x230] sm:$0xff]  }
  0xeb   : > { %v18842_v35 = vld [vmem:[#allocation3 + $0x2a0] sm:$0xff]  }
  0xec   : > { %17457 = vmatpush3.bf16.msra.mxu0 %v18789_v31  ;;  %v18838_v31 = vld [vmem:[#allocation3 + $0x298] sm:$0xff]   ;;  %v18851_v49 = vld [vmem:[#allocation3 + $0x240] sm:$0xff]  }
  0xed   : > { %17479 = vmatpush3.bf16.msra.mxu1 %v18790_v32  ;;  %17486 = vmatprep.subr.bf16.mxu0 %v18791_v41  ;;  %v18839_v32 = vld [vmem:[#allocation3 + $0x228] sm:$0xff]  }
  0xee   : > { %18201 = vmatprep.subr.bf16.mxu1 %v20255_v42  ;;  %v18844_v41 = vld [vmem:[#allocation3 + $0x2e8] sm:$0xff]  }
  0xef   : > { %1160 = vmatmul.mubr.bf16.vlgmr.msra.gmra.mrb[0].mxu0 %v20593_v38 }
  0xf0   : > { %1200 = vmatmul.mubr.bf16.vlgmr.msra.gmra.mrb[0].mxu1 %v20596_v40  ;;  %17487 = vmatpush3.bf16.msra.mxu0 %v18792_v43  ;;  %v18845_v43 = vld [vmem:[#allocation3 + $0x278] sm:$0xff]  }
  0xf1   : > { %18203 = vmatprep.mubr.msk.bf16.mxu1 %vm20256_vm0, %v20255_v42  ;;  %17488 = vmatprep.subr.bf16.mxu0 %v18793_v44  ;;  %v18846_v44 = vld [vmem:[#allocation3 + $0x2a8] sm:$0xff]  }
  0xf2   : > { %18202 = vmatpush3.bf16.msra.mxu1 %v18794_v45  ;;  %1239 = vmatprep.mubr.bf16.mxu0 %v20612_v10  ;;  %v18847_v45 = vld [vmem:[#allocation3 + $0x238] sm:$0xff]  }
  0xf3   : > { %17510 = vmatprep.subr.bf16.mxu1 %v18796_v47  ;;  %v18849_v47 = vld [vmem:[#allocation3 + $0x280] sm:$0xff]  }
  0xf4   : > { %17489 = vmatpush3.bf16.msra.mxu0 %v18795_v46  ;;  %v18848_v46 = vld [vmem:[#allocation3 + $0x2f0] sm:$0xff]  }
  0xf5   : > { %17490 = vmatprep.subr.bf16.mxu0 %v18797_v48  ;;  %v18850_v48 = vld [vmem:[#allocation3 + $0x2b0] sm:$0xff]  }
  0xf8   : > { %18204 = vmatmul.mubr.msk.bf16.vlgmr.msra.gmra.mrb[4].mxu1 %vm1123_vm1, %v20606_v50  ;;  %17491 = vmatpush3.bf16.msra.mxu0 %v18799_v52  ;;  %v18853_v52 = vld [vmem:[#allocation3 + $0x2b8] sm:$0xff]  }
  0xf9   : > { %17511 = vmatpush3.bf16.msra.mxu1 %v18798_v51  ;;  %1715 = vmatprep.mubr.bf16.mxu1 %v20589_v36  ;;  %v18852_v51 = vld [vmem:[#allocation3 + $0x2f8] sm:$0xff]  }
  0xfa   : > { %17512 = vmatprep.subr.bf16.mxu1 %v18800_v53  ;;  %17492 = vmatprep.subr.bf16.mxu0 %v18801_v54  ;;  %v18854_v53 = vld [vmem:[#allocation3 + $0x300] sm:$0xff]  }
  0xfb   : > { %v18855_v54 = vld [vmem:[#allocation3 + $0x2c0] sm:$0xff]  }
  0xfc   : > { %17493 = vmatpush3.bf16.msra.mxu0 %v18803_v56 }
  0xfd   : > { %17513 = vmatpush3.bf16.msra.mxu1 %v18802_v55  ;;  %17494 = vmatprep.subr.bf16.mxu0 %v18805_v58  ;;  %v18856_v55 = vld [vmem:[#allocation3 + $0x308] sm:$0xff]  }
  0xfe   : > { %17514 = vmatprep.subr.bf16.mxu1 %v18804_v57 }
 0x100   : > { %17495 = vmatpush3.bf16.msra.mxu0 %v18807_v60 }
 0x101   : > { %17515 = vmatpush3.bf16.msra.mxu1 %v18806_v59  ;;  %17496 = vmatprep.subr.bf16.mxu0 %v18809_v62 }
 0x102   : > { %17516 = vmatprep.subr.bf16.mxu1 %v18808_v61 }
 0x104   : > { %17497 = vmatpush3.bf16.msra.mxu0 %v18811_v0 }
 0x105   : > { %17517 = vmatpush3.bf16.msra.mxu1 %v18810_v63  ;;  %17498 = vmatprep.subr.bf16.mxu0 %v18813_v2 }
 0x106   : > { %17518 = vmatprep.subr.bf16.mxu1 %v18812_v1 }
 0x108   : > { %17499 = vmatpush3.bf16.msra.mxu0 %v18815_v4 }
 0x109   : > { %17519 = vmatpush3.bf16.msra.mxu1 %v18814_v3  ;;  %17500 = vmatprep.subr.bf16.mxu0 %v18817_v6 }
 0x10a   : > { %17520 = vmatprep.subr.bf16.mxu1 %v18816_v5 }
 0x10c   : > { %17501 = vmatpush3.bf16.msra.mxu0 %v18819_v8 }
 0x10d   : > { %17521 = vmatpush3.bf16.msra.mxu1 %v18818_v7  ;;  %17532 = vmatprep.subr.bf16.mxu0 %v18822_v15 }
 0x10e   : > { %17522 = vmatprep.subr.bf16.mxu1 %v18820_v11 }
 0x10f   : > { %1240 = vmatmul.mubr.bf16.vlgmr.msra.gmra.mrb[4].mxu0 %v20616_v13 }
 0x110   : > { %17533 = vmatpush3.bf16.msra.mxu0 %v18823_v16  ;;  %1755 = vmatprep.mubr.bf16.mxu0 %v20591_v37  ;;  %v18860_v16 = vld [vmem:[#allocation3 + $0x3d0] sm:$0xff]  }
 0x111   : > { %17523 = vmatpush3.bf16.msra.mxu1 %v18821_v14  ;;  %17534 = vmatprep.subr.bf16.mxu0 %v18826_v19 }
 0x112   : > { %17524 = vmatprep.subr.bf16.mxu1 %v18824_v17 }
 0x114   : > { %17535 = vmatpush3.bf16.msra.mxu0 %v18827_v20  ;;  %v18858_v20 = vld [vmem:[%s21771_s25] sm:$0xff]  }
 0x115   : > { %17525 = vmatpush3.bf16.msra.mxu1 %v18825_v18  ;;  %17536 = vmatprep.subr.bf16.mxu0 %v18829_v22 }
 0x116   : > { %17554 = vmatprep.subr.bf16.mxu1 %v18828_v21 }
 0x118   : > { %1716 = vmatmul.mubr.bf16.vlgmr.msra.gmra.mrb[8].mxu1 %v20593_v38  ;;  %17537 = vmatpush3.bf16.msra.mxu0 %v18831_v24 }
 0x119   : > { %17555 = vmatpush3.bf16.msra.mxu1 %v18830_v23  ;;  %1795 = vmatprep.mubr.bf16.mxu1 %v20612_v10  ;;  %v18862_v23 = vld [vmem:[#allocation3 + $0x390] sm:$0xff]  }
 0x11a   : > { %17556 = vmatprep.subr.bf16.mxu1 %v18832_v25  ;;  %17538 = vmatprep.subr.bf16.mxu0 %v18833_v26  ;;  %v18864_v26 = vld [vmem:[#allocation3 + $0x3d8] sm:$0xff]  }
 0x11c   : > { %17539 = vmatpush3.bf16.msra.mxu0 %v18835_v28  ;;  %v18868_v28 = vld [vmem:[#allocation3 + $0x3e0] sm:$0xff]  }
 0x11d   : > { %17557 = vmatpush3.bf16.msra.mxu1 %v18834_v27  ;;  %17540 = vmatprep.subr.bf16.mxu0 %v18837_v30  ;;  %v18866_v27 = vld [vmem:[#allocation3 + $0x398] sm:$0xff]   ;;  %v18872_v30 = vld [vmem:[#allocation3 + $0x3e8] sm:$0xff]  }
 0x11e   : > { %17558 = vmatprep.subr.bf16.mxu1 %v18836_v29  ;;  %v18870_v29 = vld [vmem:[#allocation3 + $0x3a0] sm:$0xff]  }
 0x120   : > { %17541 = vmatpush3.bf16.msra.mxu0 %v18839_v32  ;;  %v18876_v32 = vld [vmem:[#allocation3 + $0x3f0] sm:$0xff]  }
 0x121   : > { %17559 = vmatpush3.bf16.msra.mxu1 %v18838_v31  ;;  %17542 = vmatprep.subr.bf16.mxu0 %v18841_v34  ;;  %v18874_v31 = vld [vmem:[#allocation3 + $0x3a8] sm:$0xff]   ;;  %v18880_v34 = vld [vmem:[#allocation3 + $0x3f8] sm:$0xff]  }
 0x122   : > { %17560 = vmatprep.subr.bf16.mxu1 %v18840_v33  ;;  %v18878_v33 = vld [vmem:[#allocation3 + $0x3b0] sm:$0xff]  }
 0x124   : > { %17543 = vmatpush3.bf16.msra.mxu0 %v18843_v39  ;;  %v18884_v39 = vld [vmem:[#allocation3 + $0x400] sm:$0xff]  }
 0x125   : > { %17561 = vmatpush3.bf16.msra.mxu1 %v18842_v35  ;;  %17544 = vmatprep.subr.bf16.mxu0 %v18845_v43  ;;  %v18882_v35 = vld [vmem:[#allocation3 + $0x3b8] sm:$0xff]  }
 0x126   : > { %17562 = vmatprep.subr.bf16.mxu1 %v18844_v41 }
 0x128   : > { %17545 = vmatpush3.bf16.msra.mxu0 %v18847_v45 }
 0x129   : > { %17563 = vmatpush3.bf16.msra.mxu1 %v18846_v44  ;;  %17546 = vmatprep.subr.bf16.mxu0 %v18849_v47  ;;  %v18886_v44 = vld [vmem:[#allocation3 + $0x3c0] sm:$0xff]   ;;  %v18888_v47 = vld [vmem:[#allocation3 + $0x408] sm:$0xff]  }
 0x12a   : > { %17564 = vmatprep.subr.bf16.mxu1 %v18848_v46 }
 0x12c   : > { %17547 = vmatpush3.bf16.msra.mxu0 %v18851_v49 }
 0x12d   : > { %17565 = vmatpush3.bf16.msra.mxu1 %v18850_v48  ;;  %18207 = vmatprep.subr.bf16.mxu0 %v20255_v42 }
 0x12e   : > { %17566 = vmatprep.subr.bf16.mxu1 %v18852_v51  ;;  %v18890_v51 = vld [vmem:[#allocation3 + $0x3c8] sm:$0xff]  }
 0x12f   : > { %1756 = vmatmul.mubr.bf16.vlgmr.msra.gmra.mrb[8].mxu0 %v20596_v40 }
 0x130   : > { %18208 = vmatpush3.bf16.msra.mxu0 %v18856_v55  ;;  %18209 = vmatprep.mubr.msk.bf16.mxu0 %vm20256_vm0, %v20255_v42 }
 0x131   : > { %17567 = vmatpush3.bf16.msra.mxu1 %v18853_v52  ;;  %18213 = vmatprep.subr.bf16.mxu0 %v20255_v42 }
 0x132   : > { %17568 = vmatprep.subr.bf16.mxu1 %v18854_v53 }
 0x135   : > { %17569 = vmatpush3.bf16.msra.mxu1 %v18855_v54 }
 0x136   : > { %18219 = vmatprep.subr.bf16.mxu1 %v20255_v42 }
 0x137   : > { %18210 = vmatmul.mubr.msk.bf16.vlgmr.msra.gmra.mrb[12].mxu0 %vm1123_vm1, %v20606_v50 }
 0x138   : > { %1796 = vmatmul.mubr.bf16.vlgmr.msra.gmra.mrb[12].mxu1 %v20616_v13  ;;  %18215 = vmatprep.mubr.msk.bf16.mxu0 %vm20256_vm0, %v20255_v42 }
 0x139   : > { %18221 = vmatprep.mubr.msk.bf16.mxu1 %vm20256_vm0, %v20255_v42 }
 0x1c2   : > { %v17458_v56 = vpop.f32.mrb[0].mxu0 }
 0x1c3   : > { %v17480_v57 = vpop.f32.mrb[0].mxu1  ;;  %v17459_v58 = vpop.f32.mrb[1].mxu0 }
 0x1c4   : > { %v17481_v59 = vpop.f32.mrb[1].mxu1  ;;  %v17460_v60 = vadd.f32 %v17459_v58, %v17458_v56  ;;  %v17461_v63 = vpop.f32.mrb[2].mxu0  ;;  %v18907_v58 = vld [vmem:[#allocation3 + $0x490] sm:$0xff]  }
 0x1c5   : > { %v17482_v61 = vadd.f32 %v17481_v59, %v17480_v57  ;;  %v17483_v62 = vpop.f32.mrb[2].mxu1  ;;  %v17462_v1 = vpop.f32.mrb[3].mxu0 }
 0x1c6   : > { %v17484_v0 = vpop.f32.mrb[3].mxu1 }
 0x1c7   : > { %v1202_v2 = vadd.f32 %v17482_v61, %v17460_v60  ;;  %v18859_v0 = vld [vmem:[#allocation3 + $0x350] sm:$0xff]  }
 0x1cb   : > { %v1281_v3 = vpop.f32.mrb[4].mxu1 }
 0x1cc   : > { %v18205_v4 = vpop.f32.mrb[5].mxu1 }
 0x1cd   : > { %v1284_v5 = vpop.f32.mrb[6].mxu1 }
 0x1ce   : > { %v18206_v6 = vpop.f32.mrb[7].mxu1  ;;  %v18863_v5 = vld [vmem:[#allocation3 + $0x358] sm:$0xff]  }
 0x1cf   : > { %v18865_v6 = vld [vmem:[#allocation3 + $0x318] sm:$0xff]  }
 0x1e2   : > { %v17502_v7 = vpop.f32.mrb[4].mxu0 }
 0x1e3   : > { %v17503_v8 = vpop.f32.mrb[5].mxu0 }
 0x1e4   : > { %v17504_v9 = vadd.f32 %v17503_v8, %v17502_v7  ;;  %v17505_v11 = vpop.f32.mrb[6].mxu0  ;;  %v18867_v7 = vld [vmem:[#allocation3 + $0x360] sm:$0xff]  }
 0x1e5   : > { %v17506_v12 = vpop.f32.mrb[7].mxu0  ;;  %v18869_v8 = vld [vmem:[#allocation3 + $0x320] sm:$0xff]   ;;  %v18873_v11 = vld [vmem:[#allocation3 + $0x328] sm:$0xff]  }
 0x1e6   : > { %v1242_v14 = vadd.f32 %v17504_v9, %v1202_v2  ;;  %v18857_v2 = vld [vmem:[%s21771_s25 + $0x8] sm:$0xff]   ;;  %v18875_v12 = vld [vmem:[#allocation3 + $0x370] sm:$0xff]  }
 0x1e7   : > { %v18871_v9 = vld [vmem:[#allocation3 + $0x368] sm:$0xff]  }
 0x1e8   : > { %v1282_v15 = vadd.f32 %v1281_v3, %v1242_v14  ;;  %v18861_v3 = vld [vmem:[#allocation3 + $0x310] sm:$0xff]  }
 0x1e9   : > { %v18877_v14 = vld [vmem:[#allocation3 + $0x330] sm:$0xff]  }
 0x1ea   : > { %v1289_v19 = vpack.c.bf16 %v1282_v15, %v1282_v15  ;;  %v18879_v15 = vld [vmem:[#allocation3 + $0x378] sm:$0xff]  }
 0x1eb   : > { %v17526_v17 = vpop.f32.mrb[8].mxu1 }
 0x1ec   : > { %v17527_v18 = vpop.f32.mrb[9].mxu1  ;;  %v1910_v25 = vsel %vm1856_vm2, %v1289_v19, 0  ;;  %v18887_v19 = vld [vmem:[#allocation3 + $0x388] sm:$0xff]  }
 0x1ed   : > { %v17528_v21 = vadd.f32 %v17527_v18, %v17526_v17  ;;  %v17529_v22 = vpop.f32.mrb[10].mxu1  ;;  %18220 = vmatpush3.bf16.msra.mxu1 %v1910_v25  ;;  %v18883_v17 = vld [vmem:[#allocation3 + $0x380] sm:$0xff]  }
 0x1ee   : > { %v17530_v24 = vpop.f32.mrb[11].mxu1  ;;  %17604 = vmatprep.subr.bf16.mxu1 %v18860_v16  ;;  %v18881_v16 = vld [vmem:[#allocation3 + $0x338] sm:$0xff]   ;;  %v18885_v18 = vld [vmem:[#allocation3 + $0x340] sm:$0xff]   ;;  %v18892_v22 = vld [vmem:[#allocation3 + $0x410] sm:$0xff]  }
 0x1ef   : > { %v18894_v24 = vld [vmem:[#allocation3 + $0x418] sm:$0xff]   ;;  %v18895_v25 = vld [vmem:[#allocation3 + $0x460] sm:$0xff]  }
 0x1f0   : > { %18222 = vmatmul.mubr.msk.bf16.vlgmr.msra.gmra.mrb[16].mxu1 %vm1852_vm3, %v18858_v20  ;;  %v18889_v20 = vld [vmem:[#allocation3 + $0x348] sm:$0xff]  }
 0x1f1   : > { %17605 = vmatpush3.bf16.msra.mxu1 %v18862_v23  ;;  %2418 = vmatprep.mubr.bf16.mxu1 %v20591_v37  ;;  %v18893_v23 = vld [vmem:[#allocation3 + $0x458] sm:$0xff]  }
 0x1f2   : > { %17606 = vmatprep.subr.bf16.mxu1 %v18864_v26  ;;  %v18896_v26 = vld [vmem:[#allocation3 + $0x420] sm:$0xff]  }
 0x1f5   : > { %17607 = vmatpush3.bf16.msra.mxu1 %v18866_v27  ;;  %v18897_v27 = vld [vmem:[#allocation3 + $0x468] sm:$0xff]  }
 0x1f6   : > { %17608 = vmatprep.subr.bf16.mxu1 %v18868_v28  ;;  %v18898_v28 = vld [vmem:[#allocation3 + $0x428] sm:$0xff]  }
 0x1f9   : > { %17609 = vmatpush3.bf16.msra.mxu1 %v18870_v29  ;;  %v18899_v29 = vld [vmem:[#allocation3 + $0x470] sm:$0xff]  }
 0x1fa   : > { %17610 = vmatprep.subr.bf16.mxu1 %v18872_v30  ;;  %v18900_v30 = vld [vmem:[#allocation3 + $0x430] sm:$0xff]  }
 0x1fd   : > { %17611 = vmatpush3.bf16.msra.mxu1 %v18874_v31  ;;  %v18901_v31 = vld [vmem:[#allocation3 + $0x478] sm:$0xff]  }
 0x1fe   : > { %17612 = vmatprep.subr.bf16.mxu1 %v18876_v32  ;;  %v18902_v32 = vld [vmem:[#allocation3 + $0x438] sm:$0xff]  }
 0x201   : > { %17613 = vmatpush3.bf16.msra.mxu1 %v18878_v33  ;;  %v18903_v33 = vld [vmem:[#allocation3 + $0x480] sm:$0xff]  }
 0x202   : > { %v17548_v41 = vpop.f32.mrb[8].mxu0  ;;  %17614 = vmatprep.subr.bf16.mxu1 %v18880_v34  ;;  %v18904_v34 = vld [vmem:[#allocation3 + $0x440] sm:$0xff]  }
 0x203   : > { %v17549_v43 = vpop.f32.mrb[9].mxu0 }
 0x204   : > { %v17550_v45 = vadd.f32 %v17549_v43, %v17548_v41  ;;  %v17551_v46 = vpop.f32.mrb[10].mxu0  ;;  %v18910_v41 = vld [vmem:[#allocation3 + $0x558] sm:$0xff]  }
 0x205   : > { %v17552_v48 = vpop.f32.mrb[11].mxu0  ;;  %17615 = vmatpush3.bf16.msra.mxu1 %v18882_v35  ;;  %v18905_v35 = vld [vmem:[#allocation3 + $0x488] sm:$0xff]   ;;  %v18912_v43 = vld [vmem:[#allocation3 + $0x518] sm:$0xff]  }
 0x206   : > { %v1758_v49 = vadd.f32 %v17550_v45, %v17528_v21  ;;  %17616 = vmatprep.subr.bf16.mxu1 %v18884_v39  ;;  %v18891_v21 = vld [vmem:[#allocation3 + $0x450] sm:$0xff]   ;;  %v18906_v39 = vld [vmem:[#allocation3 + $0x448] sm:$0xff]   ;;  %v18916_v45 = vld [vmem:[#allocation3 + $0x520] sm:$0xff]  }
 0x207   : > { %v18918_v46 = vld [vmem:[#allocation3 + $0x568] sm:$0xff]   ;;  %v18922_v48 = vld [vmem:[#allocation3 + $0x570] sm:$0xff]  }
 0x209   : > { %17617 = vmatpush3.bf16.msra.mxu1 %v18886_v44  ;;  %v18914_v44 = vld [vmem:[#allocation3 + $0x560] sm:$0xff]  }
 0x20a   : > { %v1837_v54 = vpop.f32.mrb[12].mxu0  ;;  %17618 = vmatprep.subr.bf16.mxu1 %v18888_v47  ;;  %v18920_v47 = vld [vmem:[#allocation3 + $0x528] sm:$0xff]  }
 0x20b   : > { %v17570_v52 = vpop.f32.mrb[12].mxu1  ;;  %v18211_v57 = vpop.f32.mrb[13].mxu0 }
 0x20c   : > { %v17571_v53 = vpop.f32.mrb[13].mxu1  ;;  %v1840_v60 = vpop.f32.mrb[14].mxu0  ;;  %v18930_v57 = vld [vmem:[#allocation3 + $0x580] sm:$0xff]  }
 0x20d   : > { %v17572_v55 = vadd.f32 %v17571_v53, %v17570_v52  ;;  %v17573_v56 = vpop.f32.mrb[14].mxu1  ;;  %v18212_v62 = vpop.f32.mrb[15].mxu0  ;;  %17619 = vmatpush3.bf16.msra.mxu1 %v18890_v51  ;;  %v18924_v51 = vld [vmem:[#allocation3 + $0x530] sm:$0xff]   ;;  %v18936_v60 = vld [vmem:[#allocation3 + $0x548] sm:$0xff]  }
 0x20e   : > { %v17574_v59 = vpop.f32.mrb[15].mxu1  ;;  %18225 = vmatprep.subr.bf16.mxu1 %v20255_v42  ;;  %v18928_v56 = vld [vmem:[#allocation3 + $0x538] sm:$0xff]   ;;  %v18940_v62 = vld [vmem:[#allocation3 + $0x550] sm:$0xff]  }
 0x20f   : > { %v1798_v61 = vadd.f32 %v17572_v55, %v1758_v49  ;;  %v18926_v55 = vld [vmem:[#allocation3 + $0x578] sm:$0xff]   ;;  %v18934_v59 = vld [vmem:[#allocation3 + $0x588] sm:$0xff]  }
 0x210   : > { %2419 = vmatmul.mubr.bf16.vlgmr.msra.gmra.mrb[20].mxu1 %v20596_v40 }
 0x211   : > { %v1838_v63 = vadd.f32 %v1837_v54, %v1798_v61  ;;  %18226 = vmatpush3.bf16.msra.mxu1 %v18907_v58  ;;  %18227 = vmatprep.mubr.msk.bf16.mxu1 %vm20256_vm0, %v20255_v42  ;;  %v18932_v58 = vld [vmem:[#allocation3 + $0x540] sm:$0xff]   ;;  %v18938_v61 = vld [vmem:[#allocation3 + $0x590] sm:$0xff]  }
 0x212   : > { %18231 = vmatprep.subr.bf16.mxu1 %v20255_v42 }
 0x213   : > { %v1846_v1 = vpack.c.bf16 %v1838_v63, %v1838_v63 }
 0x215   : > { %v1858_v4 = vsel %vm1856_vm2, %v1846_v1, 0 }
 0x216   : > { %18214 = vmatpush3.bf16.msra.mxu0 %v1858_v4 }
 0x217   : > { %17582 = vmatprep.subr.bf16.mxu0 %v18859_v0 }
 0x218   : > { %18228 = vmatmul.mubr.msk.bf16.vlgmr.msra.gmra.mrb[24].mxu1 %vm1123_vm1, %v20606_v50 }
 0x219   : > { %18216 = vmatmul.mubr.msk.bf16.vlgmr.msra.gmra.mrb[16].mxu0 %vm1852_vm3, %v18857_v2  ;;  %18233 = vmatprep.mubr.msk.bf16.mxu1 %vm20256_vm0, %v20255_v42 }
 0x21a   : > { %17583 = vmatpush3.bf16.msra.mxu0 %v18861_v3  ;;  %2378 = vmatprep.mubr.bf16.mxu0 %v20589_v36 }
 0x21b   : > { %17584 = vmatprep.subr.bf16.mxu0 %v18863_v5 }
 0x21e   : > { %17585 = vmatpush3.bf16.msra.mxu0 %v18865_v6 }
 0x21f   : > { %17586 = vmatprep.subr.bf16.mxu0 %v18867_v7 }
 0x222   : > { %17587 = vmatpush3.bf16.msra.mxu0 %v18869_v8 }
 0x223   : > { %17588 = vmatprep.subr.bf16.mxu0 %v18871_v9 }
 0x226   : > { %17589 = vmatpush3.bf16.msra.mxu0 %v18873_v11 }
 0x227   : > { %17590 = vmatprep.subr.bf16.mxu0 %v18875_v12 }
 0x22a   : > { %17591 = vmatpush3.bf16.msra.mxu0 %v18877_v14 }
 0x22b   : > { %17592 = vmatprep.subr.bf16.mxu0 %v18879_v15 }
 0x22e   : > { %17593 = vmatpush3.bf16.msra.mxu0 %v18881_v16  ;;  %v18957_v16 = vld [vmem:[#allocation3 + $0x618] sm:$0xff]  }
 0x22f   : > { %17594 = vmatprep.subr.bf16.mxu0 %v18883_v17 }
 0x232   : > { %17595 = vmatpush3.bf16.msra.mxu0 %v18885_v18 }
 0x233   : > { %17596 = vmatprep.subr.bf16.mxu0 %v18887_v19 }
 0x236   : > { %17597 = vmatpush3.bf16.msra.mxu0 %v18889_v20 }
 0x237   : > { %17626 = vmatprep.subr.bf16.mxu0 %v18891_v21 }
 0x239   : > { %2379 = vmatmul.mubr.bf16.vlgmr.msra.gmra.mrb[20].mxu0 %v20593_v38 }
 0x23a   : > { %17627 = vmatpush3.bf16.msra.mxu0 %v18892_v22  ;;  %2458 = vmatprep.mubr.bf16.mxu0 %v20612_v10 }
 0x23b   : > { %17628 = vmatprep.subr.bf16.mxu0 %v18893_v23 }
 0x23e   : > { %17629 = vmatpush3.bf16.msra.mxu0 %v18894_v24 }
 0x23f   : > { %17630 = vmatprep.subr.bf16.mxu0 %v18895_v25 }
 0x242   : > { %17631 = vmatpush3.bf16.msra.mxu0 %v18896_v26 }
 0x243   : > { %17632 = vmatprep.subr.bf16.mxu0 %v18897_v27 }
 0x246   : > { %17633 = vmatpush3.bf16.msra.mxu0 %v18898_v28 }
 0x247   : > { %17634 = vmatprep.subr.bf16.mxu0 %v18899_v29 }
 0x24a   : > { %17635 = vmatpush3.bf16.msra.mxu0 %v18900_v30 }
 0x24b   : > { %17636 = vmatprep.subr.bf16.mxu0 %v18901_v31  ;;  %v18909_v31 = vld [vmem:[#allocation3 + $0x4d8] sm:$0xff]  }
 0x24e   : > { %17637 = vmatpush3.bf16.msra.mxu0 %v18902_v32 }
 0x24f   : > { %17638 = vmatprep.subr.bf16.mxu0 %v18903_v33  ;;  %v18908_v33 = vld [vmem:[%s21771_s25 + $0x10] sm:$0xff]  }
 0x252   : > { %17639 = vmatpush3.bf16.msra.mxu0 %v18904_v34  ;;  %v18911_v34 = vld [vmem:[#allocation3 + $0x498] sm:$0xff]  }
 0x253   : > { %17640 = vmatprep.subr.bf16.mxu0 %v18905_v35  ;;  %v18913_v35 = vld [vmem:[#allocation3 + $0x4e0] sm:$0xff]  }
 0x256   : > { %17641 = vmatpush3.bf16.msra.mxu0 %v18906_v39  ;;  %v18915_v39 = vld [vmem:[#allocation3 + $0x4a0] sm:$0xff]  }
 0x257   : > { %17674 = vmatprep.subr.bf16.mxu0 %v18910_v41  ;;  %v18917_v41 = vld [vmem:[#allocation3 + $0x4e8] sm:$0xff]  }
 0x259   : > { %2459 = vmatmul.mubr.bf16.vlgmr.msra.gmra.mrb[24].mxu0 %v20616_v13 }
 0x25a   : > { %3029 = vmatprep.mubr.bf16.mxu0 %v20591_v37  ;;  %17675 = vmatpush3.bf16.msra.mxu0 %v18912_v43  ;;  %v18919_v43 = vld [vmem:[#allocation3 + $0x4a8] sm:$0xff]  }
 0x25b   : > { %17676 = vmatprep.subr.bf16.mxu0 %v18914_v44  ;;  %v18921_v44 = vld [vmem:[#allocation3 + $0x4f0] sm:$0xff]  }
 0x25e   : > { %17677 = vmatpush3.bf16.msra.mxu0 %v18916_v45  ;;  %v18923_v45 = vld [vmem:[#allocation3 + $0x4b0] sm:$0xff]  }
 0x25f   : > { %17678 = vmatprep.subr.bf16.mxu0 %v18918_v46  ;;  %v18925_v46 = vld [vmem:[#allocation3 + $0x4f8] sm:$0xff]  }
 0x262   : > { %17679 = vmatpush3.bf16.msra.mxu0 %v18920_v47  ;;  %v18927_v47 = vld [vmem:[#allocation3 + $0x4b8] sm:$0xff]  }
 0x263   : > { %17680 = vmatprep.subr.bf16.mxu0 %v18922_v48  ;;  %v18929_v48 = vld [vmem:[#allocation3 + $0x500] sm:$0xff]  }
 0x266   : > { %17681 = vmatpush3.bf16.msra.mxu0 %v18924_v51  ;;  %v18933_v51 = vld [vmem:[#allocation3 + $0x508] sm:$0xff]  }
 0x267   : > { %17682 = vmatprep.subr.bf16.mxu0 %v18926_v55  ;;  %v18941_v55 = vld [vmem:[#allocation3 + $0x5d8] sm:$0xff]  }
 0x26a   : > { %17683 = vmatpush3.bf16.msra.mxu0 %v18928_v56  ;;  %v18942_v56 = vld [vmem:[#allocation3 + $0x598] sm:$0xff]  }
 0x26b   : > { %17684 = vmatprep.subr.bf16.mxu0 %v18930_v57  ;;  %v18943_v57 = vld [vmem:[#allocation3 + $0x5e0] sm:$0xff]  }
 0x26e   : > { %17685 = vmatpush3.bf16.msra.mxu0 %v18932_v58  ;;  %v18944_v58 = vld [vmem:[#allocation3 + $0x5a0] sm:$0xff]  }
 0x26f   : > { %17686 = vmatprep.subr.bf16.mxu0 %v18934_v59  ;;  %v18945_v59 = vld [vmem:[#allocation3 + $0x5e8] sm:$0xff]  }
 0x272   : > { %17687 = vmatpush3.bf16.msra.mxu0 %v18936_v60  ;;  %v18946_v60 = vld [vmem:[#allocation3 + $0x5a8] sm:$0xff]  }
 0x273   : > { %17688 = vmatprep.subr.bf16.mxu0 %v18938_v61  ;;  %v18947_v61 = vld [vmem:[#allocation3 + $0x5f0] sm:$0xff]  }
 0x276   : > { %17689 = vmatpush3.bf16.msra.mxu0 %v18940_v62  ;;  %v18948_v62 = vld [vmem:[#allocation3 + $0x5b0] sm:$0xff]  }
 0x277   : > { %18237 = vmatprep.subr.bf16.mxu0 %v20255_v42 }
 0x279   : > { %3030 = vmatmul.mubr.bf16.vlgmr.msra.gmra.mrb[28].mxu0 %v20596_v40 }
 0x27a   : > { %18239 = vmatprep.mubr.msk.bf16.mxu0 %vm20256_vm0, %v20255_v42  ;;  %18238 = vmatpush3.bf16.msra.mxu0 %v18957_v16 }
 0x27b   : > { %18243 = vmatprep.subr.bf16.mxu0 %v20255_v42 }
 0x281   : > { %18240 = vmatmul.mubr.msk.bf16.vlgmr.msra.gmra.mrb[32].mxu0 %vm1123_vm1, %v20606_v50 }
 0x282   : > { %18245 = vmatprep.mubr.msk.bf16.mxu0 %vm20256_vm0, %v20255_v42 }
 0x2c3   : > { %v1946_v49 = vpop.f32.mrb[16].mxu1 }
 0x2c4   : > { %v18223_v52 = vpop.f32.mrb[17].mxu1 }
 0x2c5   : > { %v1949_v53 = vpop.f32.mrb[18].mxu1  ;;  %v18935_v52 = vld [vmem:[#allocation3 + $0x4c8] sm:$0xff]  }
 0x2c6   : > { %v18224_v54 = vpop.f32.mrb[19].mxu1 }
 0x2c7   : > { %v18939_v54 = vld [vmem:[#allocation3 + $0x4d0] sm:$0xff]  }
 0x2e3   : > { %v17620_v63 = vpop.f32.mrb[20].mxu1 }
 0x2e4   : > { %v17621_v0 = vpop.f32.mrb[21].mxu1 }
 0x2e5   : > { %v17622_v1 = vadd.f32 %v17621_v0, %v17620_v63  ;;  %v17623_v2 = vpop.f32.mrb[22].mxu1  ;;  %v18949_v63 = vld [vmem:[#allocation3 + $0x5f8] sm:$0xff]  }
 0x2e6   : > { %v17624_v3 = vpop.f32.mrb[23].mxu1  ;;  %v18950_v0 = vld [vmem:[#allocation3 + $0x5b8] sm:$0xff]   ;;  %v18952_v2 = vld [vmem:[#allocation3 + $0x5c0] sm:$0xff]  }
 0x2e7   : > { %v18953_v3 = vld [vmem:[#allocation3 + $0x608] sm:$0xff]  }
 0x2eb   : > { %v2500_v8 = vpop.f32.mrb[24].mxu1 }
 0x2ec   : > { %v1894_v4 = vpop.f32.mrb[16].mxu0  ;;  %v18229_v12 = vpop.f32.mrb[25].mxu1 }
 0x2ed   : > { %v20664_v5 = vadd.f32 %v1946_v49, %v1894_v4  ;;  %v18217_v6 = vpop.f32.mrb[17].mxu0  ;;  %v2503_v14 = vpop.f32.mrb[26].mxu1  ;;  %v18931_v49 = vld [vmem:[#allocation3 + $0x4c0] sm:$0xff]   ;;  %v18954_v4 = vld [vmem:[#allocation3 + $0x5c8] sm:$0xff]  }
 0x2ee   : > { %v1897_v7 = vpop.f32.mrb[18].mxu0  ;;  %v18230_v15 = vpop.f32.mrb[27].mxu1  ;;  %v18955_v6 = vld [vmem:[#allocation3 + $0x610] sm:$0xff]  }
 0x2ef   : > { %v20666_v9 = vadd.f32 %v1949_v53, %v1897_v7  ;;  %v18218_v11 = vpop.f32.mrb[19].mxu0  ;;  %v18937_v53 = vld [vmem:[#allocation3 + $0x510] sm:$0xff]  }
 0x2f0   : > { %v18956_v7 = vld [vmem:[#allocation3 + $0x5d0] sm:$0xff]  }
 0x30c   : > { %v17598_v17 = vpop.f32.mrb[20].mxu0 }
 0x30d   : > { %v17599_v18 = vpop.f32.mrb[21].mxu0 }
 0x30e   : > { %v17600_v19 = vadd.f32 %v17599_v18, %v17598_v17  ;;  %v17601_v20 = vpop.f32.mrb[22].mxu0 }
 0x30f   : > { %v17602_v21 = vpop.f32.mrb[23].mxu0  ;;  %v18960_v20 = vld [vmem:[#allocation3 + $0x6e0] sm:$0xff]  }
 0x310   : > { %v2421_v22 = vadd.f32 %v17622_v1, %v17600_v19  ;;  %v18951_v1 = vld [vmem:[#allocation3 + $0x600] sm:$0xff]  }
 0x311   : > { %v18962_v21 = vld [vmem:[#allocation3 + $0x6a0] sm:$0xff]  }
 0x32c   : > { %v17642_v23 = vpop.f32.mrb[24].mxu0 }
 0x32d   : > { %v17643_v24 = vpop.f32.mrb[25].mxu0 }
 0x32e   : > { %v17644_v25 = vadd.f32 %v17643_v24, %v17642_v23  ;;  %v17645_v26 = vpop.f32.mrb[26].mxu0  ;;  %v18966_v23 = vld [vmem:[#allocation3 + $0x6a8] sm:$0xff]   ;;  %v18968_v24 = vld [vmem:[#allocation3 + $0x6f0] sm:$0xff]  }
 0x32f   : > { %v17646_v27 = vpop.f32.mrb[27].mxu0  ;;  %v18972_v26 = vld [vmem:[#allocation3 + $0x6f8] sm:$0xff]  }
 0x330   : > { %v2461_v28 = vadd.f32 %v17644_v25, %v2421_v22  ;;  %v18964_v22 = vld [vmem:[#allocation3 + $0x6e8] sm:$0xff]   ;;  %v18970_v25 = vld [vmem:[#allocation3 + $0x6b0] sm:$0xff]   ;;  %v18974_v27 = vld [vmem:[#allocation3 + $0x6b8] sm:$0xff]  }
 0x332   : > { %v2501_v29 = vadd.f32 %v2500_v8, %v2461_v28  ;;  %v18976_v28 = vld [vmem:[#allocation3 + $0x700] sm:$0xff]  }
 0x334   : > { %v2509_v30 = vpack.c.bf16 %v2501_v29, %v2501_v29  ;;  %v18978_v29 = vld [vmem:[#allocation3 + $0x6c0] sm:$0xff]  }
 0x336   : > { %v2519_v32 = vsel %vm1856_vm2, %v2509_v30, 0  ;;  %v18980_v30 = vld [vmem:[#allocation3 + $0x708] sm:$0xff]  }
 0x337   : > { %18232 = vmatpush3.bf16.msra.mxu1 %v2519_v32  ;;  %v18984_v32 = vld [vmem:[#allocation3 + $0x710] sm:$0xff]  }
 0x338   : > { %17652 = vmatprep.subr.bf16.mxu1 %v18909_v31  ;;  %v18982_v31 = vld [vmem:[#allocation3 + $0x6c8] sm:$0xff]  }
 0x33a   : > { %18234 = vmatmul.mubr.msk.bf16.vlgmr.msra.gmra.mrb[28].mxu1 %vm1852_vm3, %v18908_v33  ;;  %v18986_v33 = vld [vmem:[#allocation3 + $0x6d0] sm:$0xff]  }
 0x33b   : > { %17653 = vmatpush3.bf16.msra.mxu1 %v18911_v34  ;;  %2989 = vmatprep.mubr.bf16.mxu1 %v20589_v36  ;;  %v18988_v34 = vld [vmem:[#allocation3 + $0x718] sm:$0xff]  }
 0x33c   : > { %17654 = vmatprep.subr.bf16.mxu1 %v18913_v35  ;;  %v18990_v35 = vld [vmem:[#allocation3 + $0x6d8] sm:$0xff]  }
 0x33f   : > { %17655 = vmatpush3.bf16.msra.mxu1 %v18915_v39 }
 0x340   : > { %17656 = vmatprep.subr.bf16.mxu1 %v18917_v41 }
 0x343   : > { %17657 = vmatpush3.bf16.msra.mxu1 %v18919_v43 }
 0x344   : > { %17658 = vmatprep.subr.bf16.mxu1 %v18921_v44 }
 0x347   : > { %17659 = vmatpush3.bf16.msra.mxu1 %v18923_v45 }
 0x348   : > { %17660 = vmatprep.subr.bf16.mxu1 %v18925_v46 }
 0x34b   : > { %17661 = vmatpush3.bf16.msra.mxu1 %v18927_v47  ;;  %v19007_v47 = vld [vmem:[#allocation3 + $0x7a0] sm:$0xff]  }
 0x34c   : > { %17662 = vmatprep.subr.bf16.mxu1 %v18929_v48  ;;  %v17690_v8 = vpop.f32.mrb[28].mxu0 }
 0x34d   : > { %v17691_v11 = vpop.f32.mrb[29].mxu0 }
 0x34e   : > { %v17692_v12 = vadd.f32 %v17691_v11, %v17690_v8  ;;  %v17693_v14 = vpop.f32.mrb[30].mxu0  ;;  %v18975_v8 = vld [vmem:[#allocation3 + $0x680] sm:$0xff]  }
 0x34f   : > { %17663 = vmatpush3.bf16.msra.mxu1 %v18931_v49  ;;  %v17694_v15 = vpop.f32.mrb[31].mxu0  ;;  %v18977_v11 = vld [vmem:[#allocation3 + $0x640] sm:$0xff]   ;;  %v18981_v14 = vld [vmem:[#allocation3 + $0x648] sm:$0xff]  }
 0x350   : > { %17664 = vmatprep.subr.bf16.mxu1 %v18933_v51  ;;  %v18983_v15 = vld [vmem:[#allocation3 + $0x690] sm:$0xff]  }
 0x353   : > { %17665 = vmatpush3.bf16.msra.mxu1 %v18935_v52 }
 0x354   : > { %17666 = vmatprep.subr.bf16.mxu1 %v18937_v53  ;;  %v3111_v16 = vpop.f32.mrb[32].mxu0 }
 0x355   : > { %v18241_v17 = vpop.f32.mrb[33].mxu0 }
 0x356   : > { %v3114_v18 = vpop.f32.mrb[34].mxu0  ;;  %v18987_v17 = vld [vmem:[#allocation3 + $0x698] sm:$0xff]  }
 0x357   : > { %17667 = vmatpush3.bf16.msra.mxu1 %v18939_v54  ;;  %v18242_v19 = vpop.f32.mrb[35].mxu0  ;;  %v18989_v18 = vld [vmem:[#allocation3 + $0x658] sm:$0xff]  }
 0x358   : > { %17696 = vmatprep.subr.bf16.mxu1 %v18941_v55  ;;  %v18991_v19 = vld [vmem:[#allocation3 + $0x760] sm:$0xff]  }
 0x35a   : > { %2990 = vmatmul.mubr.bf16.vlgmr.msra.gmra.mrb[32].mxu1 %v20593_v38 }
 0x35b   : > { %17697 = vmatpush3.bf16.msra.mxu1 %v18942_v56  ;;  %3069 = vmatprep.mubr.bf16.mxu1 %v20612_v10 }
 0x35c   : > { %17698 = vmatprep.subr.bf16.mxu1 %v18943_v57 }
 0x35f   : > { %17699 = vmatpush3.bf16.msra.mxu1 %v18944_v58 }
 0x360   : > { %17700 = vmatprep.subr.bf16.mxu1 %v18945_v59 }
 0x363   : > { %17701 = vmatpush3.bf16.msra.mxu1 %v18946_v60 }
 0x364   : > { %17702 = vmatprep.subr.bf16.mxu1 %v18947_v61  ;;  %v18959_v61 = vld [vmem:[#allocation3 + $0x660] sm:$0xff]  }
 0x367   : > { %17703 = vmatpush3.bf16.msra.mxu1 %v18948_v62 }
 0x368   : > { %17704 = vmatprep.subr.bf16.mxu1 %v18949_v63  ;;  %v18958_v63 = vld [vmem:[%s21771_s25 + $0x18] sm:$0xff]  }
 0x36b   : > { %17705 = vmatpush3.bf16.msra.mxu1 %v18950_v0  ;;  %v18961_v0 = vld [vmem:[#allocation3 + $0x620] sm:$0xff]  }
 0x36c   : > { %17706 = vmatprep.subr.bf16.mxu1 %v18951_v1  ;;  %v18963_v1 = vld [vmem:[#allocation3 + $0x668] sm:$0xff]  }
 0x36f   : > { %17707 = vmatpush3.bf16.msra.mxu1 %v18952_v2  ;;  %v18965_v2 = vld [vmem:[#allocation3 + $0x628] sm:$0xff]  }
 0x370   : > { %17708 = vmatprep.subr.bf16.mxu1 %v18953_v3  ;;  %v18967_v3 = vld [vmem:[#allocation3 + $0x670] sm:$0xff]  }
 0x373   : > { %17709 = vmatpush3.bf16.msra.mxu1 %v18954_v4  ;;  %v18969_v4 = vld [vmem:[#allocation3 + $0x630] sm:$0xff]  }
 0x374   : > { %17710 = vmatprep.subr.bf16.mxu1 %v18955_v6  ;;  %v18971_v6 = vld [vmem:[#allocation3 + $0x678] sm:$0xff]  }
 0x377   : > { %17711 = vmatpush3.bf16.msra.mxu1 %v18956_v7  ;;  %v18973_v7 = vld [vmem:[#allocation3 + $0x638] sm:$0xff]  }
 0x378   : > { %17744 = vmatprep.subr.bf16.mxu1 %v18960_v20  ;;  %v18992_v20 = vld [vmem:[#allocation3 + $0x720] sm:$0xff]  }
 0x37a   : > { %3070 = vmatmul.mubr.bf16.vlgmr.msra.gmra.mrb[36].mxu1 %v20616_v13 }
 0x37b   : > { %3640 = vmatprep.mubr.bf16.mxu1 %v20591_v37  ;;  %17745 = vmatpush3.bf16.msra.mxu1 %v18962_v21  ;;  %v18993_v21 = vld [vmem:[#allocation3 + $0x768] sm:$0xff]  }
 0x37c   : > { %17746 = vmatprep.subr.bf16.mxu1 %v18964_v22  ;;  %v18994_v22 = vld [vmem:[#allocation3 + $0x728] sm:$0xff]  }
 0x37f   : > { %17747 = vmatpush3.bf16.msra.mxu1 %v18966_v23  ;;  %v18995_v23 = vld [vmem:[#allocation3 + $0x770] sm:$0xff]  }
 0x380   : > { %17748 = vmatprep.subr.bf16.mxu1 %v18968_v24  ;;  %v18996_v24 = vld [vmem:[#allocation3 + $0x730] sm:$0xff]  }
 0x383   : > { %17749 = vmatpush3.bf16.msra.mxu1 %v18970_v25  ;;  %v18997_v25 = vld [vmem:[#allocation3 + $0x778] sm:$0xff]  }
 0x384   : > { %17750 = vmatprep.subr.bf16.mxu1 %v18972_v26  ;;  %v18998_v26 = vld [vmem:[#allocation3 + $0x738] sm:$0xff]  }
 0x387   : > { %17751 = vmatpush3.bf16.msra.mxu1 %v18974_v27  ;;  %v18999_v27 = vld [vmem:[#allocation3 + $0x780] sm:$0xff]  }
 0x388   : > { %17752 = vmatprep.subr.bf16.mxu1 %v18976_v28  ;;  %v19000_v28 = vld [vmem:[#allocation3 + $0x740] sm:$0xff]  }
 0x38b   : > { %17753 = vmatpush3.bf16.msra.mxu1 %v18978_v29  ;;  %v19001_v29 = vld [vmem:[#allocation3 + $0x788] sm:$0xff]  }
 0x38c   : > { %17754 = vmatprep.subr.bf16.mxu1 %v18980_v30  ;;  %v19002_v30 = vld [vmem:[#allocation3 + $0x748] sm:$0xff]  }
 0x38f   : > { %17755 = vmatpush3.bf16.msra.mxu1 %v18982_v31  ;;  %v19003_v31 = vld [vmem:[#allocation3 + $0x790] sm:$0xff]  }
 0x390   : > { %17756 = vmatprep.subr.bf16.mxu1 %v18984_v32  ;;  %v19004_v32 = vld [vmem:[#allocation3 + $0x750] sm:$0xff]  }
 0x393   : > { %17757 = vmatpush3.bf16.msra.mxu1 %v18986_v33  ;;  %v19005_v33 = vld [vmem:[#allocation3 + $0x798] sm:$0xff]  }
 0x394   : > { %17758 = vmatprep.subr.bf16.mxu1 %v18988_v34  ;;  %v19006_v34 = vld [vmem:[#allocation3 + $0x758] sm:$0xff]  }
 0x397   : > { %17759 = vmatpush3.bf16.msra.mxu1 %v18990_v35 }
 0x398   : > { %18249 = vmatprep.subr.bf16.mxu1 %v20255_v42 }
 0x39a   : > { %3641 = vmatmul.mubr.bf16.vlgmr.msra.gmra.mrb[40].mxu1 %v20596_v40 }
 0x39b   : > { %18251 = vmatprep.mubr.msk.bf16.mxu1 %vm20256_vm0, %v20255_v42  ;;  %18250 = vmatpush3.bf16.msra.mxu1 %v19007_v47 }
 0x39c   : > { %18255 = vmatprep.subr.bf16.mxu1 %v20255_v42 }
 0x3a2   : > { %18252 = vmatmul.mubr.msk.bf16.vlgmr.msra.gmra.mrb[44].mxu1 %vm1123_vm1, %v20606_v50 }
 0x3a3   : > { %18257 = vmatprep.mubr.msk.bf16.mxu1 %vm20256_vm0, %v20255_v42 }
 0x40d   : > { %v2555_v39 = vpop.f32.mrb[28].mxu1 }
 0x40e   : > { %v20688_v41 = vadd.f32 %v2555_v39, %v20664_v5  ;;  %v18235_v43 = vpop.f32.mrb[29].mxu1 }
 0x40f   : > { %v2558_v44 = vpop.f32.mrb[30].mxu1 }
 0x410   : > { %v20691_v45 = vadd.f32 %v2558_v44, %v20666_v9  ;;  %v18236_v46 = vpop.f32.mrb[31].mxu1 }
 0x42d   : > { %v17668_v48 = vpop.f32.mrb[32].mxu1 }
 0x42e   : > { %v17669_v49 = vpop.f32.mrb[33].mxu1 }
 0x42f   : > { %v17670_v5 = vadd.f32 %v17669_v49, %v17668_v48  ;;  %v17671_v51 = vpop.f32.mrb[34].mxu1 }
 0x430   : > { %v17672_v52 = vpop.f32.mrb[35].mxu1  ;;  %v19010_v51 = vld [vmem:[#allocation3 + $0x868] sm:$0xff]  }
 0x431   : > { %v3032_v53 = vadd.f32 %v17692_v12, %v17670_v5  ;;  %v18979_v12 = vld [vmem:[#allocation3 + $0x688] sm:$0xff]  }
 0x432   : > { %v19012_v52 = vld [vmem:[#allocation3 + $0x828] sm:$0xff]  }
 0x44d   : > { %v17712_v54 = vpop.f32.mrb[36].mxu1 }
 0x44e   : > { %v17713_v9 = vpop.f32.mrb[37].mxu1 }
 0x44f   : > { %v17714_v55 = vadd.f32 %v17713_v9, %v17712_v54  ;;  %v17715_v56 = vpop.f32.mrb[38].mxu1  ;;  %v19016_v54 = vld [vmem:[#allocation3 + $0x830] sm:$0xff]   ;;  %v19018_v9 = vld [vmem:[#allocation3 + $0x878] sm:$0xff]  }
 0x450   : > { %v17716_v57 = vpop.f32.mrb[39].mxu1  ;;  %v19022_v56 = vld [vmem:[#allocation3 + $0x880] sm:$0xff]  }
 0x451   : > { %v3072_v58 = vadd.f32 %v17714_v55, %v3032_v53  ;;  %v19014_v53 = vld [vmem:[#allocation3 + $0x870] sm:$0xff]   ;;  %v19020_v55 = vld [vmem:[#allocation3 + $0x838] sm:$0xff]   ;;  %v19024_v57 = vld [vmem:[#allocation3 + $0x840] sm:$0xff]  }
 0x453   : > { %v3112_v59 = vadd.f32 %v3111_v16, %v3072_v58  ;;  %v18985_v16 = vld [vmem:[#allocation3 + $0x650] sm:$0xff]   ;;  %v19026_v58 = vld [vmem:[#allocation3 + $0x888] sm:$0xff]  }
 0x455   : > { %v3120_v60 = vpack.c.bf16 %v3112_v59, %v3112_v59  ;;  %v19028_v59 = vld [vmem:[#allocation3 + $0x848] sm:$0xff]  }
 0x457   : > { %v3130_v62 = vsel %vm1856_vm2, %v3120_v60, 0  ;;  %v19030_v60 = vld [vmem:[#allocation3 + $0x890] sm:$0xff]  }
 0x458   : > { %18244 = vmatpush3.bf16.msra.mxu0 %v3130_v62  ;;  %v19034_v62 = vld [vmem:[#allocation3 + $0x898] sm:$0xff]  }
 0x459   : > { %17722 = vmatprep.subr.bf16.mxu0 %v18959_v61  ;;  %v19032_v61 = vld [vmem:[#allocation3 + $0x850] sm:$0xff]  }
 0x45b   : > { %18246 = vmatmul.mubr.msk.bf16.vlgmr.msra.gmra.mrb[36].mxu0 %vm1852_vm3, %v18958_v63  ;;  %v19036_v63 = vld [vmem:[#allocation3 + $0x858] sm:$0xff]  }
 0x45c   : > { %17723 = vmatpush3.bf16.msra.mxu0 %v18961_v0  ;;  %3600 = vmatprep.mubr.bf16.mxu0 %v20589_v36  ;;  %v19038_v0 = vld [vmem:[#allocation3 + $0x8a0] sm:$0xff]  }
 0x45d   : > { %17724 = vmatprep.subr.bf16.mxu0 %v18963_v1  ;;  %v19040_v1 = vld [vmem:[#allocation3 + $0x860] sm:$0xff]  }
 0x460   : > { %17725 = vmatpush3.bf16.msra.mxu0 %v18965_v2 }
 0x461   : > { %17726 = vmatprep.subr.bf16.mxu0 %v18967_v3 }
 0x464   : > { %17727 = vmatpush3.bf16.msra.mxu0 %v18969_v4 }
 0x465   : > { %17728 = vmatprep.subr.bf16.mxu0 %v18971_v6 }
 0x468   : > { %17729 = vmatpush3.bf16.msra.mxu0 %v18973_v7 }
 0x469   : > { %17730 = vmatprep.subr.bf16.mxu0 %v18975_v8 }
 0x46c   : > { %17731 = vmatpush3.bf16.msra.mxu0 %v18977_v11  ;;  %v19057_v11 = vld [vmem:[#allocation3 + $0x928] sm:$0xff]  }
 0x46d   : > { %17732 = vmatprep.subr.bf16.mxu0 %v18979_v12  ;;  %v17760_v35 = vpop.f32.mrb[40].mxu1 }
 0x46e   : > { %v17761_v39 = vpop.f32.mrb[41].mxu1 }
 0x46f   : > { %v17762_v43 = vadd.f32 %v17761_v39, %v17760_v35  ;;  %v17763_v44 = vpop.f32.mrb[42].mxu1  ;;  %v19025_v35 = vld [vmem:[#allocation3 + $0x808] sm:$0xff]  }
 0x470   : > { %17733 = vmatpush3.bf16.msra.mxu0 %v18981_v14  ;;  %v17764_v46 = vpop.f32.mrb[43].mxu1  ;;  %v19027_v39 = vld [vmem:[#allocation3 + $0x7c8] sm:$0xff]   ;;  %v19031_v44 = vld [vmem:[#allocation3 + $0x7d0] sm:$0xff]  }
 0x471   : > { %17734 = vmatprep.subr.bf16.mxu0 %v18983_v15  ;;  %v19033_v46 = vld [vmem:[#allocation3 + $0x818] sm:$0xff]  }
 0x474   : > { %17735 = vmatpush3.bf16.msra.mxu0 %v18985_v16 }
 0x475   : > { %17736 = vmatprep.subr.bf16.mxu0 %v18987_v17  ;;  %v3722_v47 = vpop.f32.mrb[44].mxu1 }
 0x476   : > { %v18253_v48 = vpop.f32.mrb[45].mxu1 }
 0x477   : > { %v3725_v49 = vpop.f32.mrb[46].mxu1  ;;  %v19037_v48 = vld [vmem:[#allocation3 + $0x820] sm:$0xff]  }
 0x478   : > { %17737 = vmatpush3.bf16.msra.mxu0 %v18989_v18  ;;  %v18254_v5 = vpop.f32.mrb[47].mxu1  ;;  %v19039_v49 = vld [vmem:[#allocation3 + $0x7e0] sm:$0xff]  }
 0x479   : > { %17766 = vmatprep.subr.bf16.mxu0 %v18991_v19  ;;  %v19041_v5 = vld [vmem:[#allocation3 + $0x8e8] sm:$0xff]  }
 0x47b   : > { %3601 = vmatmul.mubr.bf16.vlgmr.msra.gmra.mrb[40].mxu0 %v20593_v38 }
 0x47c   : > { %17767 = vmatpush3.bf16.msra.mxu0 %v18992_v20  ;;  %3680 = vmatprep.mubr.bf16.mxu0 %v20612_v10 }
 0x47d   : > { %17768 = vmatprep.subr.bf16.mxu0 %v18993_v21 }
 0x480   : > { %17769 = vmatpush3.bf16.msra.mxu0 %v18994_v22 }
 0x481   : > { %17770 = vmatprep.subr.bf16.mxu0 %v18995_v23 }
 0x484   : > { %17771 = vmatpush3.bf16.msra.mxu0 %v18996_v24 }
 0x485   : > { %17772 = vmatprep.subr.bf16.mxu0 %v18997_v25  ;;  %v19009_v25 = vld [vmem:[#allocation3 + $0x7e8] sm:$0xff]  }
 0x488   : > { %17773 = vmatpush3.bf16.msra.mxu0 %v18998_v26 }
 0x489   : > { %17774 = vmatprep.subr.bf16.mxu0 %v18999_v27  ;;  %v19008_v27 = vld [vmem:[%s21771_s25 + $0x20] sm:$0xff]  }
 0x48c   : > { %17775 = vmatpush3.bf16.msra.mxu0 %v19000_v28  ;;  %v19011_v28 = vld [vmem:[#allocation3 + $0x7a8] sm:$0xff]  }
 0x48d   : > { %17776 = vmatprep.subr.bf16.mxu0 %v19001_v29  ;;  %v19013_v29 = vld [vmem:[#allocation3 + $0x7f0] sm:$0xff]  }
 0x490   : > { %17777 = vmatpush3.bf16.msra.mxu0 %v19002_v30  ;;  %v19015_v30 = vld [vmem:[#allocation3 + $0x7b0] sm:$0xff]  }
 0x491   : > { %17778 = vmatprep.subr.bf16.mxu0 %v19003_v31  ;;  %v19017_v31 = vld [vmem:[#allocation3 + $0x7f8] sm:$0xff]  }
 0x494   : > { %17779 = vmatpush3.bf16.msra.mxu0 %v19004_v32  ;;  %v19019_v32 = vld [vmem:[#allocation3 + $0x7b8] sm:$0xff]  }
 0x495   : > { %17780 = vmatprep.subr.bf16.mxu0 %v19005_v33  ;;  %v19021_v33 = vld [vmem:[#allocation3 + $0x800] sm:$0xff]  }
 0x498   : > { %17781 = vmatpush3.bf16.msra.mxu0 %v19006_v34  ;;  %v19023_v34 = vld [vmem:[#allocation3 + $0x7c0] sm:$0xff]  }
 0x499   : > { %17814 = vmatprep.subr.bf16.mxu0 %v19010_v51  ;;  %v19042_v51 = vld [vmem:[#allocation3 + $0x8a8] sm:$0xff]  }
 0x49b   : > { %3681 = vmatmul.mubr.bf16.vlgmr.msra.gmra.mrb[44].mxu0 %v20616_v13 }
 0x49c   : > { %4251 = vmatprep.mubr.bf16.mxu0 %v20591_v37  ;;  %17815 = vmatpush3.bf16.msra.mxu0 %v19012_v52  ;;  %v19043_v52 = vld [vmem:[#allocation3 + $0x8f0] sm:$0xff]  }
 0x49d   : > { %17816 = vmatprep.subr.bf16.mxu0 %v19014_v53  ;;  %v19044_v53 = vld [vmem:[#allocation3 + $0x8b0] sm:$0xff]  }
 0x4a0   : > { %17817 = vmatpush3.bf16.msra.mxu0 %v19016_v54  ;;  %v19045_v54 = vld [vmem:[#allocation3 + $0x8f8] sm:$0xff]  }
 0x4a1   : > { %17818 = vmatprep.subr.bf16.mxu0 %v19018_v9  ;;  %v19046_v9 = vld [vmem:[#allocation3 + $0x8b8] sm:$0xff]  }
 0x4a4   : > { %17819 = vmatpush3.bf16.msra.mxu0 %v19020_v55  ;;  %v19047_v55 = vld [vmem:[#allocation3 + $0x900] sm:$0xff]  }
 0x4a5   : > { %17820 = vmatprep.subr.bf16.mxu0 %v19022_v56  ;;  %v19048_v56 = vld [vmem:[#allocation3 + $0x8c0] sm:$0xff]  }
 0x4a8   : > { %17821 = vmatpush3.bf16.msra.mxu0 %v19024_v57  ;;  %v19049_v57 = vld [vmem:[#allocation3 + $0x908] sm:$0xff]  }
 0x4a9   : > { %17822 = vmatprep.subr.bf16.mxu0 %v19026_v58  ;;  %v19050_v58 = vld [vmem:[#allocation3 + $0x8c8] sm:$0xff]  }
 0x4ac   : > { %17823 = vmatpush3.bf16.msra.mxu0 %v19028_v59  ;;  %v19051_v59 = vld [vmem:[#allocation3 + $0x910] sm:$0xff]  }
 0x4ad   : > { %17824 = vmatprep.subr.bf16.mxu0 %v19030_v60  ;;  %v19052_v60 = vld [vmem:[#allocation3 + $0x8d0] sm:$0xff]  }
 0x4b0   : > { %17825 = vmatpush3.bf16.msra.mxu0 %v19032_v61  ;;  %v19053_v61 = vld [vmem:[#allocation3 + $0x918] sm:$0xff]  }
 0x4b1   : > { %17826 = vmatprep.subr.bf16.mxu0 %v19034_v62  ;;  %v19054_v62 = vld [vmem:[#allocation3 + $0x8d8] sm:$0xff]  }
 0x4b4   : > { %17827 = vmatpush3.bf16.msra.mxu0 %v19036_v63  ;;  %v19055_v63 = vld [vmem:[#allocation3 + $0x920] sm:$0xff]  }
 0x4b5   : > { %17828 = vmatprep.subr.bf16.mxu0 %v19038_v0  ;;  %v19056_v0 = vld [vmem:[#allocation3 + $0x8e0] sm:$0xff]  }
 0x4b8   : > { %17829 = vmatpush3.bf16.msra.mxu0 %v19040_v1 }
 0x4b9   : > { %18261 = vmatprep.subr.bf16.mxu0 %v20255_v42 }
 0x4bb   : > { %4252 = vmatmul.mubr.bf16.vlgmr.msra.gmra.mrb[48].mxu0 %v20596_v40 }
 0x4bc   : > { %18263 = vmatprep.mubr.msk.bf16.mxu0 %vm20256_vm0, %v20255_v42  ;;  %18262 = vmatpush3.bf16.msra.mxu0 %v19057_v11 }
 0x4bd   : > { %18267 = vmatprep.subr.bf16.mxu0 %v20255_v42 }
 0x4c3   : > { %18264 = vmatmul.mubr.msk.bf16.vlgmr.msra.gmra.mrb[52].mxu0 %vm1123_vm1, %v20606_v50 }
 0x4c4   : > { %18269 = vmatprep.mubr.msk.bf16.mxu0 %vm20256_vm0, %v20255_v42 }
 0x52e   : > { %v3166_v2 = vpop.f32.mrb[36].mxu0 }
 0x52f   : > { %v20713_v3 = vadd.f32 %v3166_v2, %v20688_v41  ;;  %v18247_v4 = vpop.f32.mrb[37].mxu0 }
 0x530   : > { %v3169_v6 = vpop.f32.mrb[38].mxu0 }
 0x531   : > { %v20716_v7 = vadd.f32 %v3169_v6, %v20691_v45  ;;  %v18248_v8 = vpop.f32.mrb[39].mxu0 }
 0x54e   : > { %v17738_v12 = vpop.f32.mrb[40].mxu0 }
 0x54f   : > { %v17739_v14 = vpop.f32.mrb[41].mxu0 }
 0x550   : > { %v17740_v41 = vadd.f32 %v17739_v14, %v17738_v12  ;;  %v17741_v15 = vpop.f32.mrb[42].mxu0 }
 0x551   : > { %v17742_v16 = vpop.f32.mrb[43].mxu0  ;;  %v19060_v15 = vld [vmem:[#allocation3 + $0x9f0] sm:$0xff]  }
 0x552   : > { %v3643_v17 = vadd.f32 %v17762_v43, %v17740_v41  ;;  %v19029_v43 = vld [vmem:[#allocation3 + $0x810] sm:$0xff]  }
 0x553   : > { %v19062_v16 = vld [vmem:[#allocation3 + $0x9b0] sm:$0xff]  }
 0x56e   : > { %v17782_v18 = vpop.f32.mrb[44].mxu0 }
 0x56f   : > { %v17783_v45 = vpop.f32.mrb[45].mxu0 }
 0x570   : > { %v17784_v19 = vadd.f32 %v17783_v45, %v17782_v18  ;;  %v17785_v20 = vpop.f32.mrb[46].mxu0  ;;  %v19066_v18 = vld [vmem:[#allocation3 + $0x9b8] sm:$0xff]   ;;  %v19068_v45 = vld [vmem:[#allocation3 + $0xa00] sm:$0xff]  }
 0x571   : > { %v17786_v21 = vpop.f32.mrb[47].mxu0  ;;  %v19072_v20 = vld [vmem:[#allocation3 + $0xa08] sm:$0xff]  }
 0x572   : > { %v3683_v22 = vadd.f32 %v17784_v19, %v3643_v17  ;;  %v19064_v17 = vld [vmem:[#allocation3 + $0x9f8] sm:$0xff]   ;;  %v19070_v19 = vld [vmem:[#allocation3 + $0x9c0] sm:$0xff]   ;;  %v19074_v21 = vld [vmem:[#allocation3 + $0x9c8] sm:$0xff]  }
 0x574   : > { %v3723_v23 = vadd.f32 %v3722_v47, %v3683_v22  ;;  %v19035_v47 = vld [vmem:[#allocation3 + $0x7d8] sm:$0xff]   ;;  %v19076_v22 = vld [vmem:[#allocation3 + $0xa10] sm:$0xff]  }
 0x576   : > { %v3731_v24 = vpack.c.bf16 %v3723_v23, %v3723_v23  ;;  %v19078_v23 = vld [vmem:[#allocation3 + $0x9d0] sm:$0xff]  }
 0x578   : > { %v3741_v26 = vsel %vm1856_vm2, %v3731_v24, 0  ;;  %v19080_v24 = vld [vmem:[#allocation3 + $0xa18] sm:$0xff]  }
 0x579   : > { %18256 = vmatpush3.bf16.msra.mxu1 %v3741_v26  ;;  %v19084_v26 = vld [vmem:[#allocation3 + $0xa20] sm:$0xff]  }
 0x57a   : > { %17792 = vmatprep.subr.bf16.mxu1 %v19009_v25  ;;  %v19082_v25 = vld [vmem:[#allocation3 + $0x9d8] sm:$0xff]  }
 0x57c   : > { %18258 = vmatmul.mubr.msk.bf16.vlgmr.msra.gmra.mrb[48].mxu1 %vm1852_vm3, %v19008_v27  ;;  %v19086_v27 = vld [vmem:[#allocation3 + $0x9e0] sm:$0xff]  }
 0x57d   : > { %17793 = vmatpush3.bf16.msra.mxu1 %v19011_v28  ;;  %4211 = vmatprep.mubr.bf16.mxu1 %v20589_v36  ;;  %v19088_v28 = vld [vmem:[#allocation3 + $0xa28] sm:$0xff]  }
 0x57e   : > { %17794 = vmatprep.subr.bf16.mxu1 %v19013_v29  ;;  %v19090_v29 = vld [vmem:[#allocation3 + $0x9e8] sm:$0xff]  }
 0x581   : > { %17795 = vmatpush3.bf16.msra.mxu1 %v19015_v30 }
 0x582   : > { %17796 = vmatprep.subr.bf16.mxu1 %v19017_v31 }
 0x585   : > { %17797 = vmatpush3.bf16.msra.mxu1 %v19019_v32 }
 0x586   : > { %17798 = vmatprep.subr.bf16.mxu1 %v19021_v33 }
 0x589   : > { %17799 = vmatpush3.bf16.msra.mxu1 %v19023_v34 }
 0x58a   : > { %17800 = vmatprep.subr.bf16.mxu1 %v19025_v35 }
 0x58d   : > { %17801 = vmatpush3.bf16.msra.mxu1 %v19027_v39  ;;  %v19107_v39 = vld [vmem:[#allocation3 + $0xab0] sm:$0xff]  }
 0x58e   : > { %17802 = vmatprep.subr.bf16.mxu1 %v19029_v43  ;;  %v17830_v1 = vpop.f32.mrb[48].mxu0 }
 0x58f   : > { %v17831_v2 = vpop.f32.mrb[49].mxu0 }
 0x590   : > { %v17832_v4 = vadd.f32 %v17831_v2, %v17830_v1  ;;  %v17833_v6 = vpop.f32.mrb[50].mxu0  ;;  %v19075_v1 = vld [vmem:[#allocation3 + $0x990] sm:$0xff]  }
 0x591   : > { %17803 = vmatpush3.bf16.msra.mxu1 %v19031_v44  ;;  %v17834_v8 = vpop.f32.mrb[51].mxu0  ;;  %v19077_v2 = vld [vmem:[#allocation3 + $0x950] sm:$0xff]   ;;  %v19081_v6 = vld [vmem:[#allocation3 + $0x958] sm:$0xff]  }
 0x592   : > { %17804 = vmatprep.subr.bf16.mxu1 %v19033_v46  ;;  %v19083_v8 = vld [vmem:[#allocation3 + $0x9a0] sm:$0xff]  }
 0x595   : > { %17805 = vmatpush3.bf16.msra.mxu1 %v19035_v47 }
 0x596   : > { %17806 = vmatprep.subr.bf16.mxu1 %v19037_v48  ;;  %v4333_v11 = vpop.f32.mrb[52].mxu0 }
 0x597   : > { %v18265_v12 = vpop.f32.mrb[53].mxu0 }
 0x598   : > { %v4336_v14 = vpop.f32.mrb[54].mxu0  ;;  %v19087_v12 = vld [vmem:[#allocation3 + $0x9a8] sm:$0xff]  }
 0x599   : > { %17807 = vmatpush3.bf16.msra.mxu1 %v19039_v49  ;;  %v18266_v41 = vpop.f32.mrb[55].mxu0  ;;  %v19089_v14 = vld [vmem:[#allocation3 + $0x968] sm:$0xff]  }
 0x59a   : > { %17836 = vmatprep.subr.bf16.mxu1 %v19041_v5  ;;  %v19091_v41 = vld [vmem:[#allocation3 + $0xa70] sm:$0xff]  }
 0x59c   : > { %4212 = vmatmul.mubr.bf16.vlgmr.msra.gmra.mrb[52].mxu1 %v20593_v38 }
 0x59d   : > { %17837 = vmatpush3.bf16.msra.mxu1 %v19042_v51  ;;  %4291 = vmatprep.mubr.bf16.mxu1 %v20612_v10 }
 0x59e   : > { %17838 = vmatprep.subr.bf16.mxu1 %v19043_v52 }
 0x5a1   : > { %17839 = vmatpush3.bf16.msra.mxu1 %v19044_v53 }
 0x5a2   : > { %17840 = vmatprep.subr.bf16.mxu1 %v19045_v54 }
 0x5a5   : > { %17841 = vmatpush3.bf16.msra.mxu1 %v19046_v9 }
 0x5a6   : > { %17842 = vmatprep.subr.bf16.mxu1 %v19047_v55  ;;  %v19059_v55 = vld [vmem:[#allocation3 + $0x970] sm:$0xff]  }
 0x5a9   : > { %17843 = vmatpush3.bf16.msra.mxu1 %v19048_v56 }
 0x5aa   : > { %17844 = vmatprep.subr.bf16.mxu1 %v19049_v57  ;;  %v19058_v57 = vld [vmem:[%s21771_s25 + $0x28] sm:$0xff]  }
 0x5ad   : > { %17845 = vmatpush3.bf16.msra.mxu1 %v19050_v58  ;;  %v19061_v58 = vld [vmem:[#allocation3 + $0x930] sm:$0xff]  }
 0x5ae   : > { %17846 = vmatprep.subr.bf16.mxu1 %v19051_v59  ;;  %v19063_v59 = vld [vmem:[#allocation3 + $0x978] sm:$0xff]  }
 0x5b1   : > { %17847 = vmatpush3.bf16.msra.mxu1 %v19052_v60  ;;  %v19065_v60 = vld [vmem:[#allocation3 + $0x938] sm:$0xff]  }
 0x5b2   : > { %17848 = vmatprep.subr.bf16.mxu1 %v19053_v61  ;;  %v19067_v61 = vld [vmem:[#allocation3 + $0x980] sm:$0xff]  }
 0x5b5   : > { %17849 = vmatpush3.bf16.msra.mxu1 %v19054_v62  ;;  %v19069_v62 = vld [vmem:[#allocation3 + $0x940] sm:$0xff]  }
 0x5b6   : > { %17850 = vmatprep.subr.bf16.mxu1 %v19055_v63  ;;  %v19071_v63 = vld [vmem:[#allocation3 + $0x988] sm:$0xff]  }
 0x5b9   : > { %17851 = vmatpush3.bf16.msra.mxu1 %v19056_v0  ;;  %v19073_v0 = vld [vmem:[#allocation3 + $0x948] sm:$0xff]  }
 0x5ba   : > { %17884 = vmatprep.subr.bf16.mxu1 %v19060_v15  ;;  %v19092_v15 = vld [vmem:[#allocation3 + $0xa30] sm:$0xff]  }
 0x5bc   : > { %4292 = vmatmul.mubr.bf16.vlgmr.msra.gmra.mrb[56].mxu1 %v20616_v13 }
 0x5bd   : > { %4862 = vmatprep.mubr.bf16.mxu1 %v20591_v37  ;;  %17885 = vmatpush3.bf16.msra.mxu1 %v19062_v16  ;;  %v19093_v16 = vld [vmem:[#allocation3 + $0xa78] sm:$0xff]  }
 0x5be   : > { %17886 = vmatprep.subr.bf16.mxu1 %v19064_v17  ;;  %v19094_v17 = vld [vmem:[#allocation3 + $0xa38] sm:$0xff]  }
 0x5c1   : > { %17887 = vmatpush3.bf16.msra.mxu1 %v19066_v18  ;;  %v19095_v18 = vld [vmem:[#allocation3 + $0xa80] sm:$0xff]  }
 0x5c2   : > { %17888 = vmatprep.subr.bf16.mxu1 %v19068_v45  ;;  %v19096_v45 = vld [vmem:[#allocation3 + $0xa40] sm:$0xff]  }
 0x5c5   : > { %17889 = vmatpush3.bf16.msra.mxu1 %v19070_v19  ;;  %v19097_v19 = vld [vmem:[#allocation3 + $0xa88] sm:$0xff]  }
 0x5c6   : > { %17890 = vmatprep.subr.bf16.mxu1 %v19072_v20  ;;  %v19098_v20 = vld [vmem:[#allocation3 + $0xa48] sm:$0xff]  }
 0x5c9   : > { %17891 = vmatpush3.bf16.msra.mxu1 %v19074_v21  ;;  %v19099_v21 = vld [vmem:[#allocation3 + $0xa90] sm:$0xff]  }
 0x5ca   : > { %17892 = vmatprep.subr.bf16.mxu1 %v19076_v22  ;;  %v19100_v22 = vld [vmem:[#allocation3 + $0xa50] sm:$0xff]  }
 0x5cd   : > { %17893 = vmatpush3.bf16.msra.mxu1 %v19078_v23  ;;  %v19101_v23 = vld [vmem:[#allocation3 + $0xa98] sm:$0xff]  }
 0x5ce   : > { %17894 = vmatprep.subr.bf16.mxu1 %v19080_v24  ;;  %v19102_v24 = vld [vmem:[#allocation3 + $0xa58] sm:$0xff]  }
 0x5d1   : > { %17895 = vmatpush3.bf16.msra.mxu1 %v19082_v25  ;;  %v19103_v25 = vld [vmem:[#allocation3 + $0xaa0] sm:$0xff]  }
 0x5d2   : > { %17896 = vmatprep.subr.bf16.mxu1 %v19084_v26  ;;  %v19104_v26 = vld [vmem:[#allocation3 + $0xa60] sm:$0xff]  }
 0x5d5   : > { %17897 = vmatpush3.bf16.msra.mxu1 %v19086_v27  ;;  %v19105_v27 = vld [vmem:[#allocation3 + $0xaa8] sm:$0xff]  }
 0x5d6   : > { %17898 = vmatprep.subr.bf16.mxu1 %v19088_v28  ;;  %v19106_v28 = vld [vmem:[#allocation3 + $0xa68] sm:$0xff]  }
 0x5d9   : > { %17899 = vmatpush3.bf16.msra.mxu1 %v19090_v29 }
 0x5da   : > { %18273 = vmatprep.subr.bf16.mxu1 %v20255_v42 }
 0x5dc   : > { %4863 = vmatmul.mubr.bf16.vlgmr.msra.gmra.mrb[60].mxu1 %v20596_v40 }
 0x5dd   : > { %18275 = vmatprep.mubr.msk.bf16.mxu1 %vm20256_vm0, %v20255_v42  ;;  %18274 = vmatpush3.bf16.msra.mxu1 %v19107_v39 }
 0x5de   : > { %18279 = vmatprep.subr.bf16.mxu1 %v20255_v42 }
 0x5e4   : > { %18276 = vmatmul.mubr.msk.bf16.vlgmr.msra.gmra.mrb[64].mxu1 %vm1123_vm1, %v20606_v50 }
 0x5e5   : > { %18281 = vmatprep.mubr.msk.bf16.mxu1 %vm20256_vm0, %v20255_v42 }
 0x64f   : > { %v3777_v30 = vpop.f32.mrb[48].mxu1 }
 0x650   : > { %v20738_v31 = vadd.f32 %v3777_v30, %v20713_v3  ;;  %v18259_v32 = vpop.f32.mrb[49].mxu1 }
 0x651   : > { %v3780_v33 = vpop.f32.mrb[50].mxu1 }
 0x652   : > { %v20741_v34 = vadd.f32 %v3780_v33, %v20716_v7  ;;  %v18260_v35 = vpop.f32.mrb[51].mxu1 }
 0x66f   : > { %v17808_v43 = vpop.f32.mrb[52].mxu1 }
 0x670   : > { %v17809_v44 = vpop.f32.mrb[53].mxu1 }
 0x671   : > { %v17810_v3 = vadd.f32 %v17809_v44, %v17808_v43  ;;  %v17811_v46 = vpop.f32.mrb[54].mxu1 }
 0x672   : > { %v17812_v47 = vpop.f32.mrb[55].mxu1  ;;  %v19110_v46 = vld [vmem:[#allocation3 + $0xb78] sm:$0xff]  }
 0x673   : > { %v4254_v48 = vadd.f32 %v17832_v4, %v17810_v3  ;;  %v19079_v4 = vld [vmem:[#allocation3 + $0x998] sm:$0xff]  }
 0x674   : > { %v19112_v47 = vld [vmem:[#allocation3 + $0xb38] sm:$0xff]  }
 0x68f   : > { %v17852_v49 = vpop.f32.mrb[56].mxu1 }
 0x690   : > { %v17853_v7 = vpop.f32.mrb[57].mxu1 }
 0x691   : > { %v17854_v5 = vadd.f32 %v17853_v7, %v17852_v49  ;;  %v17855_v51 = vpop.f32.mrb[58].mxu1  ;;  %v19116_v49 = vld [vmem:[#allocation3 + $0xb40] sm:$0xff]   ;;  %v19118_v7 = vld [vmem:[#allocation3 + $0xb88] sm:$0xff]  }
 0x692   : > { %v17856_v52 = vpop.f32.mrb[59].mxu1  ;;  %v19122_v51 = vld [vmem:[#allocation3 + $0xb90] sm:$0xff]  }
 0x693   : > { %v4294_v53 = vadd.f32 %v17854_v5, %v4254_v48  ;;  %v19114_v48 = vld [vmem:[#allocation3 + $0xb80] sm:$0xff]   ;;  %v19120_v5 = vld [vmem:[#allocation3 + $0xb48] sm:$0xff]   ;;  %v19124_v52 = vld [vmem:[#allocation3 + $0xb50] sm:$0xff]  }
 0x695   : > { %v4334_v54 = vadd.f32 %v4333_v11, %v4294_v53  ;;  %v19085_v11 = vld [vmem:[#allocation3 + $0x960] sm:$0xff]   ;;  %v19126_v53 = vld [vmem:[#allocation3 + $0xb98] sm:$0xff]  }
 0x697   : > { %v4342_v9 = vpack.c.bf16 %v4334_v54, %v4334_v54  ;;  %v19128_v54 = vld [vmem:[#allocation3 + $0xb58] sm:$0xff]  }
 0x699   : > { %v4352_v56 = vsel %vm1856_vm2, %v4342_v9, 0  ;;  %v19130_v9 = vld [vmem:[#allocation3 + $0xba0] sm:$0xff]  }
 0x69a   : > { %18268 = vmatpush3.bf16.msra.mxu0 %v4352_v56  ;;  %v19134_v56 = vld [vmem:[#allocation3 + $0xba8] sm:$0xff]  }
 0x69b   : > { %17862 = vmatprep.subr.bf16.mxu0 %v19059_v55  ;;  %v19132_v55 = vld [vmem:[#allocation3 + $0xb60] sm:$0xff]  }
 0x69d   : > { %18270 = vmatmul.mubr.msk.bf16.vlgmr.msra.gmra.mrb[56].mxu0 %vm1852_vm3, %v19058_v57  ;;  %v19136_v57 = vld [vmem:[#allocation3 + $0xb68] sm:$0xff]  }
 0x69e   : > { %17863 = vmatpush3.bf16.msra.mxu0 %v19061_v58  ;;  %4822 = vmatprep.mubr.bf16.mxu0 %v20589_v36  ;;  %v19138_v58 = vld [vmem:[#allocation3 + $0xbb0] sm:$0xff]  }
 0x69f   : > { %17864 = vmatprep.subr.bf16.mxu0 %v19063_v59  ;;  %v19140_v59 = vld [vmem:[#allocation3 + $0xb70] sm:$0xff]  }
 0x6a2   : > { %17865 = vmatpush3.bf16.msra.mxu0 %v19065_v60 }
 0x6a3   : > { %17866 = vmatprep.subr.bf16.mxu0 %v19067_v61 }
 0x6a6   : > { %17867 = vmatpush3.bf16.msra.mxu0 %v19069_v62 }
 0x6a7   : > { %17868 = vmatprep.subr.bf16.mxu0 %v19071_v63 }
 0x6aa   : > { %17869 = vmatpush3.bf16.msra.mxu0 %v19073_v0 }
 0x6ab   : > { %17870 = vmatprep.subr.bf16.mxu0 %v19075_v1 }
 0x6ae   : > { %17871 = vmatpush3.bf16.msra.mxu0 %v19077_v2  ;;  %v19157_v2 = vld [vmem:[#allocation3 + $0xc38] sm:$0xff]  }
 0x6af   : > { %17872 = vmatprep.subr.bf16.mxu0 %v19079_v4  ;;  %v17900_v29 = vpop.f32.mrb[60].mxu1 }
 0x6b0   : > { %v17901_v30 = vpop.f32.mrb[61].mxu1 }
 0x6b1   : > { %v17902_v32 = vadd.f32 %v17901_v30, %v17900_v29  ;;  %v17903_v33 = vpop.f32.mrb[62].mxu1  ;;  %v19125_v29 = vld [vmem:[#allocation3 + $0xb18] sm:$0xff]  }
 0x6b2   : > { %17873 = vmatpush3.bf16.msra.mxu0 %v19081_v6  ;;  %v17904_v35 = vpop.f32.mrb[63].mxu1  ;;  %v19127_v30 = vld [vmem:[#allocation3 + $0xad8] sm:$0xff]   ;;  %v19131_v33 = vld [vmem:[#allocation3 + $0xae0] sm:$0xff]  }
 0x6b3   : > { %17874 = vmatprep.subr.bf16.mxu0 %v19083_v8  ;;  %v19133_v35 = vld [vmem:[#allocation3 + $0xb28] sm:$0xff]  }
 0x6b6   : > { %17875 = vmatpush3.bf16.msra.mxu0 %v19085_v11 }
 0x6b7   : > { %17876 = vmatprep.subr.bf16.mxu0 %v19087_v12  ;;  %v4944_v39 = vpop.f32.mrb[64].mxu1 }
 0x6b8   : > { %v18277_v43 = vpop.f32.mrb[65].mxu1 }
 0x6b9   : > { %v4947_v44 = vpop.f32.mrb[66].mxu1  ;;  %v19137_v43 = vld [vmem:[#allocation3 + $0xb30] sm:$0xff]  }
 0x6ba   : > { %17877 = vmatpush3.bf16.msra.mxu0 %v19089_v14  ;;  %v18278_v3 = vpop.f32.mrb[67].mxu1  ;;  %v19139_v44 = vld [vmem:[#allocation3 + $0xaf0] sm:$0xff]  }
 0x6bb   : > { %17906 = vmatprep.subr.bf16.mxu0 %v19091_v41  ;;  %v19141_v3 = vld [vmem:[#allocation3 + $0xbf8] sm:$0xff]  }
 0x6bd   : > { %4823 = vmatmul.mubr.bf16.vlgmr.msra.gmra.mrb[60].mxu0 %v20593_v38 }
 0x6be   : > { %17907 = vmatpush3.bf16.msra.mxu0 %v19092_v15  ;;  %4902 = vmatprep.mubr.bf16.mxu0 %v20612_v10 }
 0x6bf   : > { %17908 = vmatprep.subr.bf16.mxu0 %v19093_v16 }
 0x6c2   : > { %17909 = vmatpush3.bf16.msra.mxu0 %v19094_v17 }
 0x6c3   : > { %17910 = vmatprep.subr.bf16.mxu0 %v19095_v18 }
 0x6c6   : > { %17911 = vmatpush3.bf16.msra.mxu0 %v19096_v45 }
 0x6c7   : > { %17912 = vmatprep.subr.bf16.mxu0 %v19097_v19  ;;  %v19109_v19 = vld [vmem:[#allocation3 + $0xaf8] sm:$0xff]  }
 0x6ca   : > { %17913 = vmatpush3.bf16.msra.mxu0 %v19098_v20 }
 0x6cb   : > { %17914 = vmatprep.subr.bf16.mxu0 %v19099_v21  ;;  %v19108_v21 = vld [vmem:[%s21771_s25 + $0x30] sm:$0xff]  }
 0x6ce   : > { %17915 = vmatpush3.bf16.msra.mxu0 %v19100_v22  ;;  %v19111_v22 = vld [vmem:[#allocation3 + $0xab8] sm:$0xff]  }
 0x6cf   : > { %17916 = vmatprep.subr.bf16.mxu0 %v19101_v23  ;;  %v19113_v23 = vld [vmem:[#allocation3 + $0xb00] sm:$0xff]  }
 0x6d2   : > { %17917 = vmatpush3.bf16.msra.mxu0 %v19102_v24  ;;  %v19115_v24 = vld [vmem:[#allocation3 + $0xac0] sm:$0xff]  }
 0x6d3   : > { %17918 = vmatprep.subr.bf16.mxu0 %v19103_v25  ;;  %v19117_v25 = vld [vmem:[#allocation3 + $0xb08] sm:$0xff]  }
 0x6d6   : > { %17919 = vmatpush3.bf16.msra.mxu0 %v19104_v26  ;;  %v19119_v26 = vld [vmem:[#allocation3 + $0xac8] sm:$0xff]  }
 0x6d7   : > { %17920 = vmatprep.subr.bf16.mxu0 %v19105_v27  ;;  %v19121_v27 = vld [vmem:[#allocation3 + $0xb10] sm:$0xff]  }
 0x6da   : > { %17921 = vmatpush3.bf16.msra.mxu0 %v19106_v28  ;;  %v19123_v28 = vld [vmem:[#allocation3 + $0xad0] sm:$0xff]  }
 0x6db   : > { %17954 = vmatprep.subr.bf16.mxu0 %v19110_v46  ;;  %v19142_v46 = vld [vmem:[#allocation3 + $0xbb8] sm:$0xff]  }
 0x6dd   : > { %4903 = vmatmul.mubr.bf16.vlgmr.msra.gmra.mrb[64].mxu0 %v20616_v13 }
 0x6de   : > { %5473 = vmatprep.mubr.bf16.mxu0 %v20591_v37  ;;  %17955 = vmatpush3.bf16.msra.mxu0 %v19112_v47  ;;  %v19143_v47 = vld [vmem:[#allocation3 + $0xc00] sm:$0xff]  }
 0x6df   : > { %17956 = vmatprep.subr.bf16.mxu0 %v19114_v48  ;;  %v19144_v48 = vld [vmem:[#allocation3 + $0xbc0] sm:$0xff]  }
 0x6e2   : > { %17957 = vmatpush3.bf16.msra.mxu0 %v19116_v49  ;;  %v19145_v49 = vld [vmem:[#allocation3 + $0xc08] sm:$0xff]  }
 0x6e3   : > { %17958 = vmatprep.subr.bf16.mxu0 %v19118_v7  ;;  %v19146_v7 = vld [vmem:[#allocation3 + $0xbc8] sm:$0xff]  }
 0x6e6   : > { %17959 = vmatpush3.bf16.msra.mxu0 %v19120_v5  ;;  %v19147_v5 = vld [vmem:[#allocation3 + $0xc10] sm:$0xff]  }
 0x6e7   : > { %17960 = vmatprep.subr.bf16.mxu0 %v19122_v51  ;;  %v19148_v51 = vld [vmem:[#allocation3 + $0xbd0] sm:$0xff]  }
 0x6ea   : > { %17961 = vmatpush3.bf16.msra.mxu0 %v19124_v52  ;;  %v19149_v52 = vld [vmem:[#allocation3 + $0xc18] sm:$0xff]  }
 0x6eb   : > { %17962 = vmatprep.subr.bf16.mxu0 %v19126_v53  ;;  %v19150_v53 = vld [vmem:[#allocation3 + $0xbd8] sm:$0xff]  }
 0x6ee   : > { %17963 = vmatpush3.bf16.msra.mxu0 %v19128_v54  ;;  %v19151_v54 = vld [vmem:[#allocation3 + $0xc20] sm:$0xff]  }
 0x6ef   : > { %17964 = vmatprep.subr.bf16.mxu0 %v19130_v9  ;;  %v19152_v9 = vld [vmem:[#allocation3 + $0xbe0] sm:$0xff]  }
 0x6f2   : > { %17965 = vmatpush3.bf16.msra.mxu0 %v19132_v55  ;;  %v19153_v55 = vld [vmem:[#allocation3 + $0xc28] sm:$0xff]  }
 0x6f3   : > { %17966 = vmatprep.subr.bf16.mxu0 %v19134_v56  ;;  %v19154_v56 = vld [vmem:[#allocation3 + $0xbe8] sm:$0xff]  }
 0x6f6   : > { %17967 = vmatpush3.bf16.msra.mxu0 %v19136_v57  ;;  %v19155_v57 = vld [vmem:[#allocation3 + $0xc30] sm:$0xff]  }
 0x6f7   : > { %17968 = vmatprep.subr.bf16.mxu0 %v19138_v58  ;;  %v19156_v58 = vld [vmem:[#allocation3 + $0xbf0] sm:$0xff]  }
 0x6fa   : > { %17969 = vmatpush3.bf16.msra.mxu0 %v19140_v59 }
 0x6fb   : > { %18285 = vmatprep.subr.bf16.mxu0 %v20255_v42 }
 0x6fd   : > { %5474 = vmatmul.mubr.bf16.vlgmr.msra.gmra.mrb[68].mxu0 %v20596_v40 }
 0x6fe   : > { %18287 = vmatprep.mubr.msk.bf16.mxu0 %vm20256_vm0, %v20255_v42  ;;  %18286 = vmatpush3.bf16.msra.mxu0 %v19157_v2 }
 0x6ff   : > { %18291 = vmatprep.subr.bf16.mxu0 %v20255_v42 }
 0x705   : > { %18288 = vmatmul.mubr.msk.bf16.vlgmr.msra.gmra.mrb[72].mxu0 %vm1123_vm1, %v20606_v50 }
 0x706   : > { %18293 = vmatprep.mubr.msk.bf16.mxu0 %vm20256_vm0, %v20255_v42 }
 0x770   : > { %v4388_v60 = vpop.f32.mrb[56].mxu0 }
 0x771   : > { %v20763_v61 = vadd.f32 %v4388_v60, %v20738_v31  ;;  %v18271_v62 = vpop.f32.mrb[57].mxu0 }
 0x772   : > { %v4391_v63 = vpop.f32.mrb[58].mxu0 }
 0x773   : > { %v20766_v0 = vadd.f32 %v4391_v63, %v20741_v34  ;;  %v18272_v1 = vpop.f32.mrb[59].mxu0 }
 0x790   : > { %v17878_v4 = vpop.f32.mrb[60].mxu0 }
 0x791   : > { %v17879_v6 = vpop.f32.mrb[61].mxu0 }
 0x792   : > { %v17880_v31 = vadd.f32 %v17879_v6, %v17878_v4  ;;  %v17881_v8 = vpop.f32.mrb[62].mxu0 }
 0x793   : > { %v17882_v11 = vpop.f32.mrb[63].mxu0  ;;  %v19160_v8 = vld [vmem:[#allocation3 + $0xd00] sm:$0xff]  }
 0x794   : > { %v4865_v12 = vadd.f32 %v17902_v32, %v17880_v31  ;;  %v19129_v32 = vld [vmem:[#allocation3 + $0xb20] sm:$0xff]  }
 0x795   : > { %v19162_v11 = vld [vmem:[#allocation3 + $0xcc0] sm:$0xff]  }
 0x7b0   : > { %v17922_v14 = vpop.f32.mrb[64].mxu0 }
 0x7b1   : > { %v17923_v34 = vpop.f32.mrb[65].mxu0 }
 0x7b2   : > { %v17924_v41 = vadd.f32 %v17923_v34, %v17922_v14  ;;  %v17925_v15 = vpop.f32.mrb[66].mxu0  ;;  %v19166_v14 = vld [vmem:[#allocation3 + $0xcc8] sm:$0xff]   ;;  %v19168_v34 = vld [vmem:[#allocation3 + $0xd10] sm:$0xff]  }
 0x7b3   : > { %v17926_v16 = vpop.f32.mrb[67].mxu0  ;;  %v19174_v15 = vld [vmem:[#allocation3 + $0xcd8] sm:$0xff]  }
 0x7b4   : > { %v4905_v17 = vadd.f32 %v17924_v41, %v4865_v12  ;;  %v19164_v12 = vld [vmem:[#allocation3 + $0xd08] sm:$0xff]   ;;  %v19170_v41 = vld [vmem:[#allocation3 + $0xcd0] sm:$0xff]   ;;  %v19176_v16 = vld [vmem:[#allocation3 + $0xd20] sm:$0xff]  }
 0x7b6   : > { %v4945_v18 = vadd.f32 %v4944_v39, %v4905_v17  ;;  %v19135_v39 = vld [vmem:[#allocation3 + $0xae8] sm:$0xff]   ;;  %v19178_v17 = vld [vmem:[#allocation3 + $0xce0] sm:$0xff]  }
 0x7b8   : > { %v4953_v45 = vpack.c.bf16 %v4945_v18, %v4945_v18  ;;  %v19180_v18 = vld [vmem:[#allocation3 + $0xd28] sm:$0xff]  }
 0x7ba   : > { %v4963_v20 = vsel %vm1856_vm2, %v4953_v45, 0  ;;  %v19182_v45 = vld [vmem:[#allocation3 + $0xce8] sm:$0xff]  }
 0x7bb   : > { %18280 = vmatpush3.bf16.msra.mxu1 %v4963_v20  ;;  %v19186_v20 = vld [vmem:[#allocation3 + $0xcf0] sm:$0xff]  }
 0x7bc   : > { %17932 = vmatprep.subr.bf16.mxu1 %v19109_v19  ;;  %v19184_v19 = vld [vmem:[#allocation3 + $0xd30] sm:$0xff]  }
 0x7be   : > { %18282 = vmatmul.mubr.msk.bf16.vlgmr.msra.gmra.mrb[68].mxu1 %vm1852_vm3, %v19108_v21  ;;  %v19188_v21 = vld [vmem:[#allocation3 + $0xd38] sm:$0xff]  }
 0x7bf   : > { %17933 = vmatpush3.bf16.msra.mxu1 %v19111_v22  ;;  %5433 = vmatprep.mubr.bf16.mxu1 %v20589_v36  ;;  %v19190_v22 = vld [vmem:[#allocation3 + $0xcf8] sm:$0xff]  }
 0x7c0   : > { %17934 = vmatprep.subr.bf16.mxu1 %v19113_v23 }
 0x7c3   : > { %17935 = vmatpush3.bf16.msra.mxu1 %v19115_v24 }
 0x7c4   : > { %17936 = vmatprep.subr.bf16.mxu1 %v19117_v25 }
 0x7c7   : > { %17937 = vmatpush3.bf16.msra.mxu1 %v19119_v26 }
 0x7c8   : > { %17938 = vmatprep.subr.bf16.mxu1 %v19121_v27 }
 0x7cb   : > { %17939 = vmatpush3.bf16.msra.mxu1 %v19123_v28 }
 0x7cc   : > { %17940 = vmatprep.subr.bf16.mxu1 %v19125_v29  ;;  %v19207_v29 = vld [vmem:[#allocation3 + $0xdc0] sm:$0xff]  }
 0x7cf   : > { %17941 = vmatpush3.bf16.msra.mxu1 %v19127_v30 }
 0x7d0   : > { %17942 = vmatprep.subr.bf16.mxu1 %v19129_v32  ;;  %v17970_v59 = vpop.f32.mrb[68].mxu0 }
 0x7d1   : > { %v17971_v60 = vpop.f32.mrb[69].mxu0 }
 0x7d2   : > { %v17972_v62 = vadd.f32 %v17971_v60, %v17970_v59  ;;  %v17973_v63 = vpop.f32.mrb[70].mxu0  ;;  %v19181_v59 = vld [vmem:[#allocation3 + $0xc68] sm:$0xff]   ;;  %v19183_v60 = vld [vmem:[#allocation3 + $0xcb0] sm:$0xff]  }
 0x7d3   : > { %17943 = vmatpush3.bf16.msra.mxu1 %v19131_v33  ;;  %v17974_v1 = vpop.f32.mrb[71].mxu0  ;;  %v19189_v63 = vld [vmem:[#allocation3 + $0xc78] sm:$0xff]  }
 0x7d4   : > { %17944 = vmatprep.subr.bf16.mxu1 %v19133_v35  ;;  %v19191_v1 = vld [vmem:[#allocation3 + $0xd80] sm:$0xff]  }
 0x7d7   : > { %17945 = vmatpush3.bf16.msra.mxu1 %v19135_v39 }
 0x7d8   : > { %17946 = vmatprep.subr.bf16.mxu1 %v19137_v43  ;;  %v5555_v2 = vpop.f32.mrb[72].mxu0 }
 0x7d9   : > { %v18289_v4 = vpop.f32.mrb[73].mxu0 }
 0x7da   : > { %v5558_v6 = vpop.f32.mrb[74].mxu0  ;;  %v19193_v4 = vld [vmem:[#allocation3 + $0xd88] sm:$0xff]  }
 0x7db   : > { %17947 = vmatpush3.bf16.msra.mxu1 %v19139_v44  ;;  %v18290_v31 = vpop.f32.mrb[75].mxu0  ;;  %v19194_v6 = vld [vmem:[#allocation3 + $0xd48] sm:$0xff]  }
 0x7dc   : > { %17976 = vmatprep.subr.bf16.mxu1 %v19141_v3  ;;  %v19195_v31 = vld [vmem:[#allocation3 + $0xd90] sm:$0xff]  }
 0x7de   : > { %5434 = vmatmul.mubr.bf16.vlgmr.msra.gmra.mrb[72].mxu1 %v20593_v38 }
 0x7df   : > { %17977 = vmatpush3.bf16.msra.mxu1 %v19142_v46  ;;  %5513 = vmatprep.mubr.bf16.mxu1 %v20612_v10 }
 0x7e0   : > { %17978 = vmatprep.subr.bf16.mxu1 %v19143_v47 }
 0x7e3   : > { %17979 = vmatpush3.bf16.msra.mxu1 %v19144_v48 }
 0x7e4   : > { %17980 = vmatprep.subr.bf16.mxu1 %v19145_v49  ;;  %v19159_v49 = vld [vmem:[#allocation3 + $0xc80] sm:$0xff]  }
 0x7e7   : > { %17981 = vmatpush3.bf16.msra.mxu1 %v19146_v7  ;;  %v19158_v7 = vld [vmem:[%s21771_s25 + $0x38] sm:$0xff]  }
 0x7e8   : > { %17982 = vmatprep.subr.bf16.mxu1 %v19147_v5  ;;  %v19161_v5 = vld [vmem:[#allocation3 + $0xc40] sm:$0xff]  }
 0x7eb   : > { %17983 = vmatpush3.bf16.msra.mxu1 %v19148_v51  ;;  %v19163_v51 = vld [vmem:[#allocation3 + $0xc88] sm:$0xff]  }
 0x7ec   : > { %17984 = vmatprep.subr.bf16.mxu1 %v19149_v52  ;;  %v19165_v52 = vld [vmem:[#allocation3 + $0xc48] sm:$0xff]  }
 0x7ef   : > { %17985 = vmatpush3.bf16.msra.mxu1 %v19150_v53  ;;  %v19167_v53 = vld [vmem:[#allocation3 + $0xc90] sm:$0xff]  }
 0x7f0   : > { %17986 = vmatprep.subr.bf16.mxu1 %v19151_v54  ;;  %v19169_v54 = vld [vmem:[#allocation3 + $0xc50] sm:$0xff]  }
 0x7f3   : > { %17987 = vmatpush3.bf16.msra.mxu1 %v19152_v9  ;;  %v19171_v9 = vld [vmem:[#allocation3 + $0xc98] sm:$0xff]  }
 0x7f4   : > { %17988 = vmatprep.subr.bf16.mxu1 %v19153_v55  ;;  %v19173_v55 = vld [vmem:[#allocation3 + $0xc58] sm:$0xff]  }
 0x7f7   : > { %17989 = vmatpush3.bf16.msra.mxu1 %v19154_v56  ;;  %v19175_v56 = vld [vmem:[#allocation3 + $0xca0] sm:$0xff]  }
 0x7f8   : > { %17990 = vmatprep.subr.bf16.mxu1 %v19155_v57  ;;  %v19177_v57 = vld [vmem:[#allocation3 + $0xc60] sm:$0xff]  }
 0x7fb   : > { %17991 = vmatpush3.bf16.msra.mxu1 %v19156_v58  ;;  %v19179_v58 = vld [vmem:[#allocation3 + $0xca8] sm:$0xff]  }
 0x7fc   : > { %18024 = vmatprep.subr.bf16.mxu1 %v19160_v8  ;;  %v19196_v8 = vld [vmem:[#allocation3 + $0xd50] sm:$0xff]  }
 0x7fe   : > { %5514 = vmatmul.mubr.bf16.vlgmr.msra.gmra.mrb[76].mxu1 %v20616_v13 }
 0x7ff   : > { %6084 = vmatprep.mubr.bf16.mxu1 %v20591_v37  ;;  %18025 = vmatpush3.bf16.msra.mxu1 %v19162_v11  ;;  %v19172_v37 = vld [vmem:[#allocation3 + $0xd18] sm:$0xff]  }
 0x800   : > { %18026 = vmatprep.subr.bf16.mxu1 %v19164_v12  ;;  %v19197_v11 = vld [vmem:[#allocation3 + $0xd98] sm:$0xff]  }
 0x801   : > { %v19198_v12 = vld [vmem:[#allocation3 + $0xd58] sm:$0xff]  }
 0x803   : > { %18027 = vmatpush3.bf16.msra.mxu1 %v19166_v14  ;;  %v19199_v14 = vld [vmem:[#allocation3 + $0xda0] sm:$0xff]  }
 0x804   : > { %18028 = vmatprep.subr.bf16.mxu1 %v19168_v34  ;;  %v19200_v34 = vld [vmem:[#allocation3 + $0xd60] sm:$0xff]  }
 0x807   : > { %18029 = vmatpush3.bf16.msra.mxu1 %v19170_v41  ;;  %v19201_v41 = vld [vmem:[#allocation3 + $0xda8] sm:$0xff]  }
 0x808   : > { %18030 = vmatprep.subr.bf16.mxu1 %v19172_v37  ;;  %v19203_v37 = vld [vmem:[#allocation3 + $0xdb0] sm:$0xff]  }
 0x80b   : > { %18031 = vmatpush3.bf16.msra.mxu1 %v19174_v15  ;;  %v19205_v15 = vld [vmem:[#allocation3 + $0xdb8] sm:$0xff]  }
 0x80c   : > { %18032 = vmatprep.subr.bf16.mxu1 %v19176_v16  ;;  %v19206_v16 = vld [vmem:[#allocation3 + $0xd78] sm:$0xff]  }
 0x80f   : > { %18033 = vmatpush3.bf16.msra.mxu1 %v19178_v17 }
 0x810   : > { %18034 = vmatprep.subr.bf16.mxu1 %v19180_v18 }
 0x813   : > { %18035 = vmatpush3.bf16.msra.mxu1 %v19182_v45 }
 0x814   : > { %18036 = vmatprep.subr.bf16.mxu1 %v19184_v19 }
 0x817   : > { %18037 = vmatpush3.bf16.msra.mxu1 %v19186_v20 }
 0x818   : > { %18038 = vmatprep.subr.bf16.mxu1 %v19188_v21 }
 0x81b   : > { %18039 = vmatpush3.bf16.msra.mxu1 %v19190_v22 }
 0x81c   : > { %18297 = vmatprep.subr.bf16.mxu1 %v20255_v42 }
 0x81e   : > { %6085 = vmatmul.mubr.bf16.vlgmr.msra.gmra.mrb[80].mxu1 %v20596_v40 }
 0x81f   : > { %18299 = vmatprep.mubr.msk.bf16.mxu1 %vm20256_vm0, %v20255_v42  ;;  %18298 = vmatpush3.bf16.msra.mxu1 %v19207_v29  ;;  %v6231_v29 = vld [vmem:[%s21772_s19 + $0x8] sm:$0xff] }
 0x820   : > { %18303 = vmatprep.subr.bf16.mxu1 %v20255_v42 }
 0x826   : > { %18300 = vmatmul.mubr.msk.bf16.vlgmr.msra.gmra.mrb[84].mxu1 %vm1123_vm1, %v20606_v50 }
 0x827   : > { %18305 = vmatprep.mubr.msk.bf16.mxu1 %vm20256_vm0, %v20255_v42 }
 0x891   : > { %v4999_v23 = vpop.f32.mrb[68].mxu1 }
 0x892   : > { %v20788_v24 = vadd.f32 %v4999_v23, %v20763_v61  ;;  %v18283_v25 = vpop.f32.mrb[69].mxu1 }
 0x893   : > { %v5002_v26 = vpop.f32.mrb[70].mxu1 }
 0x894   : > { %v20791_v27 = vadd.f32 %v5002_v26, %v20766_v0  ;;  %v18284_v28 = vpop.f32.mrb[71].mxu1  ;;  %v6230_v26 = vld [vmem:[%s21772_s19] sm:$0xff] }
 0x895   : > { %v20257_v28 = vmov 0  }
 0x896   : > { %18757 = vset.pattern.permute.xlu0 %v20257_v28  ;;  %18758 = vset.pattern.permute.xlu1 %v20257_v28 }
 0x897   : > { %6234 = vperm.xlu0 %18757, %v6230_v26   ;;  %v19230_v26 = vld [vmem:[#allocation5 + $0xb4] sm:$0xff]  }
 0x89b   : > { %6239 = vperm.xlu0 %18757, %v6231_v29   ;;  %v19232_v29 = vld [vmem:[#allocation5 + $0xbc] sm:$0xff]  }
 0x8b1   : > { %v17948_v40 = vpop.f32.mrb[72].mxu1 }
 0x8b2   : > { %v17949_v30 = vpop.f32.mrb[73].mxu1 }
 0x8b3   : > { %v17950_v61 = vadd.f32 %v17949_v30, %v17948_v40  ;;  %v17951_v32 = vpop.f32.mrb[74].mxu1  ;;  %v19212_v40 = vld [vmem:[#allocation5 + $0x3c] sm:$0xff]  }
 0x8b4   : > { %v17952_v33 = vpop.f32.mrb[75].mxu1  ;;  %v8759_v30 = vld [vmem:[%s21726_s11 + $0x8] sm:$0xff]  ;;  %v15929_v32 = vld [vmem:[#allocation2] sm:$0x1] }
 0x8b5   : > { %v5476_v35 = vadd.f32 %v17972_v62, %v17950_v61  ;;  %v19187_v62 = vld [vmem:[#allocation3 + $0xcb8] sm:$0xff]   ;;  %v19214_v61 = vld [vmem:[#allocation5 + $0x44] sm:$0xff]   ;;  %8767 = vperm.xlu0 %18757, %v8759_v30  }
 0x8b6   : > { %v19216_v33 = vld [vmem:[#allocation5 + $0x4c] sm:$0xff]   ;;  %v19234_v30 = vld [vmem:[#allocation5 + $0xc4] sm:$0xff]  }
 0x8b9   : > { %15932 = vperm.xlu0 %18757, %v15929_v32   ;;  %v19236_v32 = vld [vmem:[#allocation5 + $0xcc] ss:$0 sps:$4 sm:$0x33]  }
 0x8d1   : > { %v17992_v39 = vpop.f32.mrb[76].mxu1 }
 0x8d2   : > { %v17993_v0 = vpop.f32.mrb[77].mxu1 }
 0x8d3   : > { %v17994_v43 = vadd.f32 %v17993_v0, %v17992_v39  ;;  %v17995_v44 = vpop.f32.mrb[78].mxu1 }
 0x8d4   : > { %v17996_v3 = vpop.f32.mrb[79].mxu1 }
 0x8d5   : > { %v5516_v46 = vadd.f32 %v17994_v43, %v5476_v35  ;;  %v19218_v35 = vld [vmem:[#allocation5 + $0x54] sm:$0xff]  }
 0x8d7   : > { %v5556_v47 = vadd.f32 %v5555_v2, %v5516_v46  ;;  %v19192_v2 = vld [vmem:[#allocation3 + $0xd40] sm:$0xff]  }
 0x8d9   : > { %v5564_v48 = vpack.c.bf16 %v5556_v47, %v5556_v47 }
 0x8db   : > { %v5574_v50 = vsel %vm1856_vm2, %v5564_v48, 0 }
 0x8dc   : > { %18292 = vmatpush3.bf16.msra.mxu0 %v5574_v50 }
 0x8dd   : > { %18002 = vmatprep.subr.bf16.mxu0 %v19159_v49 }
 0x8df   : > { %18294 = vmatmul.mubr.msk.bf16.vlgmr.msra.gmra.mrb[76].mxu0 %vm1852_vm3, %v19158_v7 }
 0x8e0   : > { %18003 = vmatpush3.bf16.msra.mxu0 %v19161_v5  ;;  %6044 = vmatprep.mubr.bf16.mxu0 %v20589_v36  ;;  %v19185_v36 = vld [vmem:[#allocation3 + $0xc70] sm:$0xff]  }
 0x8e1   : > { %18004 = vmatprep.subr.bf16.mxu0 %v19163_v51 }
 0x8e4   : > { %18005 = vmatpush3.bf16.msra.mxu0 %v19165_v52 }
 0x8e5   : > { %18006 = vmatprep.subr.bf16.mxu0 %v19167_v53 }
 0x8e8   : > { %18007 = vmatpush3.bf16.msra.mxu0 %v19169_v54 }
 0x8e9   : > { %18008 = vmatprep.subr.bf16.mxu0 %v19171_v9 }
 0x8ec   : > { %18009 = vmatpush3.bf16.msra.mxu0 %v19173_v55 }
 0x8ed   : > { %18010 = vmatprep.subr.bf16.mxu0 %v19175_v56 }
 0x8f0   : > { %18011 = vmatpush3.bf16.msra.mxu0 %v19177_v57 }
 0x8f1   : > { %18012 = vmatprep.subr.bf16.mxu0 %v19179_v58  ;;  %v18040_v17 = vpop.f32.mrb[80].mxu1  ;;  %v19209_v58 = vld [vmem:[#allocation5] sm:$0xff]  }
 0x8f2   : > { %v18041_v18 = vpop.f32.mrb[81].mxu1 }
 0x8f3   : > { %v18042_v45 = vadd.f32 %v18041_v18, %v18040_v17  ;;  %v18043_v19 = vpop.f32.mrb[82].mxu1  ;;  %v19223_v18 = vld [vmem:[#allocation5 + $0x68] sm:$0xff]  }
 0x8f4   : > { %18013 = vmatpush3.bf16.msra.mxu0 %v19181_v59  ;;  %v18044_v20 = vpop.f32.mrb[83].mxu1  ;;  %v19211_v59 = vld [vmem:[#allocation5 + $0x8] sm:$0xff]  }
 0x8f5   : > { %18014 = vmatprep.subr.bf16.mxu0 %v19183_v60  ;;  %v19213_v60 = vld [vmem:[#allocation5 + $0x10] sm:$0xff]  }
 0x8f6   : > { %v19225_v20 = vld [vmem:[#allocation5 + $0x70] sm:$0xff]  }
 0x8f8   : > { %18015 = vmatpush3.bf16.msra.mxu0 %v19185_v36  ;;  %v19215_v36 = vld [vmem:[#allocation5 + $0x18] sm:$0xff]  }
 0x8f9   : > { %18016 = vmatprep.subr.bf16.mxu0 %v19187_v62  ;;  %v6166_v21 = vpop.f32.mrb[84].mxu1  ;;  %v19217_v62 = vld [vmem:[#allocation5 + $0x20] sm:$0xff]  }
 0x8fa   : > { %v18301_v22 = vpop.f32.mrb[85].mxu1 }
 0x8fb   : > { %v6169_v23 = vpop.f32.mrb[86].mxu1  ;;  %v19227_v22 = vld [vmem:[#allocation5 + $0x78] sm:$0xff]  }
 0x8fc   : > { %18017 = vmatpush3.bf16.msra.mxu0 %v19189_v63  ;;  %v18302_v25 = vpop.f32.mrb[87].mxu1  ;;  %v19219_v63 = vld [vmem:[#allocation5 + $0x28] sm:$0xff]  }
 0x8fd   : > { %18046 = vmatprep.subr.bf16.mxu0 %v19191_v1  ;;  %v19220_v1 = vld [vmem:[#allocation5 + $0x5c] sm:$0xff]   ;;  %v19228_v23 = vld [vmem:[#allocation5 + $0xac] sm:$0xff]  }
 0x8fe   : > { %v19229_v25 = vld [vmem:[#allocation5 + $0x80] sm:$0xff]  }
 0x8ff   : > { %6045 = vmatmul.mubr.bf16.vlgmr.msra.gmra.mrb[80].mxu0 %v20593_v38  ;;  %v19202_v38 = vld [vmem:[#allocation3 + $0xd68] sm:$0xff]  }
 0x900   : > { %18047 = vmatpush3.bf16.msra.mxu0 %v19192_v2  ;;  %6124 = vmatprep.mubr.bf16.mxu0 %v20612_v10  ;;  %v19204_v10 = vld [vmem:[#allocation3 + $0xd70] sm:$0xff]   ;;  %v19221_v2 = vld [vmem:[#allocation5 + $0x30] ss:$0 sps:$4 sm:$0x33]  }
 0x901   : > { %18048 = vmatprep.subr.bf16.mxu0 %v19193_v4  ;;  %v19222_v4 = vld [vmem:[#allocation5 + $0x64] ss:$0 sps:$4 sm:$0x33]  }
 0x904   : > { %18049 = vmatpush3.bf16.msra.mxu0 %v19194_v6  ;;  %v6305_v6 = vsel %vm6303_vm4, %v19221_v2, 0  ;;  %v19240_v2 = vld [vmem:[#allocation7 + $0x18] sm:$0x1f]  }
 0x905   : > { %18050 = vmatprep.subr.bf16.mxu0 %v19195_v31  ;;  %v6402_v31 = vsel %vm6303_vm4, %v19222_v4, 0 }
 0x908   : > { %18051 = vmatpush3.bf16.msra.mxu0 %v19196_v8 }
 0x909   : > { %18052 = vmatprep.subr.bf16.mxu0 %v19197_v11 }
 0x90c   : > { %18053 = vmatpush3.bf16.msra.mxu0 %v19198_v12 }
 0x90d   : > { %18054 = vmatprep.subr.bf16.mxu0 %v19199_v14 }
 0x910   : > { %18055 = vmatpush3.bf16.msra.mxu0 %v19200_v34 }
 0x911   : > { %18056 = vmatprep.subr.bf16.mxu0 %v19201_v41 }
 0x914   : > { %18057 = vmatpush3.bf16.msra.mxu0 %v19202_v38 }
 0x915   : > { %18058 = vmatprep.subr.bf16.mxu0 %v19203_v37 }
 0x916   : > { %v6235_v8 = vpop.permute.xlu0 %6234 }
 0x918   : > { %18059 = vmatpush3.bf16.msra.mxu0 %v19204_v10 }
 0x919   : > { %18060 = vmatprep.subr.bf16.mxu0 %v19205_v15 }
 0x91a   : > { %v6240_v10 = vpop.permute.xlu0 %6239 }
 0x91c   : > { %18061 = vmatpush3.bf16.msra.mxu0 %v19206_v16 }
 0x91d   : > { %18327 = vmatprep.subr.bf16.mxu0 %v20255_v42 }
 0x91f   : > { %6125 = vmatmul.mubr.bf16.vlgmr.msra.gmra.mrb[84].mxu0 %v20616_v13  ;;  %v19210_v13 = vld [vmem:[#allocation5 + $0x34] sm:$0xff]  }
 0x920   : > { %18341 = vmatprep.mubr.msk.bf16.mxu0 %vm20256_vm0, %v20255_v42  ;;  %18328 = vmatpush3.bf16.msra.mxu0 %v19210_v13  ;;  %v19231_v13 = vld [vmem:[#allocation5 + $0x88] sm:$0xff]  }
 0x921   : > { %18329 = vmatprep.subr.bf16.mxu0 %v20255_v42 }
 0x924   : > { %18330 = vmatpush3.bf16.msra.mxu0 %v19212_v40  ;;  %v19233_v40 = vld [vmem:[#allocation5 + $0x90] sm:$0xff]  }
 0x925   : > { %18331 = vmatprep.subr.bf16.mxu0 %v20255_v42 }
 0x928   : > { %18332 = vmatpush3.bf16.msra.mxu0 %v19214_v61  ;;  %v19235_v61 = vld [vmem:[#allocation5 + $0x98] ss:$0 sps:$4 sm:$0x33]  }
 0x929   : > { %18333 = vmatprep.subr.bf16.mxu0 %v20255_v42 }
 0x92c   : > { %18334 = vmatpush3.bf16.msra.mxu0 %v19216_v33  ;;  %v6501_v33 = vsel %vm6303_vm4, %v19235_v61, 0 }
 0x92d   : > { %18335 = vmatprep.subr.bf16.mxu0 %v20255_v42 }
 0x930   : > { %18336 = vmatpush3.bf16.msra.mxu0 %v19218_v35  ;;  %v6600_v35 = vsel %vm6303_vm4, %v19236_v32, 0  ;;  %v19251_v32 = vld [vmem:[#allocation7 + $0x70] sm:$0xff]  }
 0x931   : > { %18337 = vmatprep.subr.bf16.mxu0 %v20255_v42 }
 0x934   : > { %18338 = vmatpush3.bf16.msra.mxu0 %v19220_v1  ;;  %v19239_v1 = vld [vmem:[#allocation7 + $0x10] sm:$0xff]  }
 0x935   : > { %18339 = vmatprep.subr.bf16.mxu0 %v20255_v42 }
 0x938   : > { %18340 = vmatpush3.bf16.msra.mxu0 %v6402_v31 }
 0x939   : > { %18363 = vmatprep.subr.bf16.mxu0 %v20255_v42 }
 0x9b2   : > { %v5610_v39 = vpop.f32.mrb[76].mxu0 }
 0x9b3   : > { %v5617_v0 = vadd.f32 %v5610_v39, %v20788_v24  ;;  %v18295_v43 = vpop.f32.mrb[77].mxu0  ;;  %v19237_v39 = vld [vmem:[#allocation7] sm:$0xff]  }
 0x9b4   : > { %v5613_v44 = vpop.f32.mrb[78].mxu0  ;;  %v20258_v43 = vmov 65535  }
 0x9b5   : > { %v5618_v3 = vadd.f32 %v5613_v44, %v20791_v27  ;;  %v18296_v46 = vpop.f32.mrb[79].mxu0  ;;  %v19208_v27 = vld [vmem:[%s21771_s25 + $0x40] sm:$0xff]   ;;  %v6666_v44 = vsel %vm1856_vm2, 4294967295, %v20258_v43 }
 0x9d2   : > { %v18018_v47 = vpop.f32.mrb[80].mxu0 }
 0x9d3   : > { %v18019_v48 = vpop.f32.mrb[81].mxu0 }
 0x9d4   : > { %v18020_v49 = vadd.f32 %v18019_v48, %v18018_v47  ;;  %v18021_v50 = vpop.f32.mrb[82].mxu0 }
 0x9d5   : > { %v18022_v7 = vpop.f32.mrb[83].mxu0 }
 0x9d6   : > { %v6087_v5 = vadd.f32 %v18042_v45, %v18020_v49  ;;  %v19224_v45 = vld [vmem:[#allocation5 + $0x9c] sm:$0xff]  }
 0x9f2   : > { %v18062_v51 = vpop.f32.mrb[84].mxu0 }
 0x9f3   : > { %v18063_v52 = vpop.f32.mrb[85].mxu0 }
 0x9f4   : > { %v18064_v53 = vadd.f32 %v18063_v52, %v18062_v51  ;;  %v18065_v54 = vpop.f32.mrb[86].mxu0 }
 0x9f5   : > { %v18066_v9 = vpop.f32.mrb[87].mxu0 }
 0x9f6   : > { %v6127_v55 = vadd.f32 %v18064_v53, %v6087_v5 }
 0x9f8   : > { %v6167_v56 = vadd.f32 %v6166_v21, %v6127_v55  ;;  %v19226_v21 = vld [vmem:[#allocation5 + $0xa4] sm:$0xff]  }
 0x9fa   : > { %v6175_v57 = vpack.c.bf16 %v6167_v56, %v6167_v56 }
 0x9fc   : > { %v6185_v24 = vsel %vm1856_vm2, %v6175_v57, 0 }
 0x9fd   : > { %18304 = vmatpush3.bf16.msra.mxu1 %v6185_v24 }
 0x9fe   : > { %18309 = vmatprep.subr.bf16.mxu1 %v20255_v42 }
 0xa00   : > { %18306 = vmatmul.mubr.msk.bf16.vlgmr.msra.gmra.mrb[88].mxu1 %vm1852_vm3, %v19208_v27 }
 0xa01   : > { %18310 = vmatpush3.bf16.msra.mxu1 %v19209_v58  ;;  %18323 = vmatprep.mubr.msk.bf16.mxu1 %vm20256_vm0, %v20255_v42 }
 0xa02   : > { %18311 = vmatprep.subr.bf16.mxu1 %v20255_v42 }
 0xa05   : > { %18312 = vmatpush3.bf16.msra.mxu1 %v19211_v59 }
 0xa06   : > { %18313 = vmatprep.subr.bf16.mxu1 %v20255_v42 }
 0xa09   : > { %18314 = vmatpush3.bf16.msra.mxu1 %v19213_v60 }
 0xa0a   : > { %18315 = vmatprep.subr.bf16.mxu1 %v20255_v42 }
 0xa0d   : > { %18316 = vmatpush3.bf16.msra.mxu1 %v19215_v36 }
 0xa0e   : > { %18317 = vmatprep.subr.bf16.mxu1 %v20255_v42 }
 0xa11   : > { %18318 = vmatpush3.bf16.msra.mxu1 %v19217_v62 }
 0xa12   : > { %18319 = vmatprep.subr.bf16.mxu1 %v20255_v42 }
 0xa15   : > { %18320 = vmatpush3.bf16.msra.mxu1 %v19219_v63 }
 0xa16   : > { %18321 = vmatprep.subr.bf16.mxu1 %v20255_v42 }
 0xa19   : > { %18322 = vmatpush3.bf16.msra.mxu1 %v6305_v6 }
 0xa1a   : > { %18345 = vmatprep.subr.bf16.mxu1 %v20255_v42 }
 0xad3   : > { %v6221_v11 = vpop.f32.mrb[88].mxu1 }
 0xad4   : > { %v6228_v12 = vadd.f32 %v6221_v11, %v5617_v0  ;;  %v18307_v14 = vpop.f32.mrb[89].mxu1  ;;  %v19238_v0 = vld [vmem:[#allocation7 + $0x8] sm:$0x1f]  }
 0xad5   : > { %v6224_v34 = vpop.f32.mrb[90].mxu1 }
 0xad6   : > { %v6242_v41 = vadd.f32 %v6235_v8, %v6228_v12  ;;  %v6229_v38 = vadd.f32 %v6224_v34, %v5618_v3  ;;  %v18308_v37 = vpop.f32.mrb[91].mxu1  ;;  %v20877_v3 = vsel %vm6665_vm6, %v6666_v44, 0  ;;  %v6712_v34 = vld [vmem:[%s21721_s6] sm:$0xf] }
 0xad7   : > { %v6669_v46 = vand.u32 %v19238_v0, %v20877_v3  ;;  %v6731_v6 = vand.u32 %v19240_v2, %v20877_v3  ;;  %v19254_v0 = vld [vmem:[#allocation7 + $0x88] sm:$0x1f]  }
 0xad8   : > { %v6243_v15 = vadd.f32 %v6240_v10, %v6229_v38  ;;  %v6244_v16 = vmax.f32 %v6242_v41, 0.0  ;;  %v7522_v43 = vand.u32 %v19254_v0, %v20877_v3  ;;  %v7612_v44 = vld [vmem:[%s21722_s7] sm:$0xff] }
 0xad9   : > { %7615 = vperm.xlu1 %18758, %v7612_v44  }
 0xada   : > { %v6245_v17 = vmax.f32 %v6243_v15, 0.0 }
 0xadc   : > { %v6246_v19 = vpack.c.bf16 %v6245_v17, %v6244_v16  ;;  %v16710_v16 = vld [vmem:[%s21721_s6 + $0x4] sm:$0xf]  ;;  %v19241_v17 = vld [vmem:[#allocation7 + $0x20] sm:$0xff]  }
 0xade   : > { %18324 = vmatmul.mubr.msk.bf16.vlgmr.msra.gmra.mrb[92].mxu1 %vm6299_vm5, %v6246_v19  ;;  %18342 = vmatmul.mubr.msk.bf16.vlgmr.msra.gmra.mrb[88].mxu0 %vm6299_vm5, %v6246_v19 }
 0xadf   : > { %18346 = vmatpush3.bf16.msra.mxu1 %v19223_v18  ;;  %18364 = vmatpush3.bf16.msra.mxu0 %v19224_v45  ;;  %v19242_v18 = vld [vmem:[#allocation7 + $0x28] sm:$0x1f]  }
 0xae0   : > { %18347 = vmatprep.subr.bf16.mxu1 %v20255_v42  ;;  %18365 = vmatprep.subr.bf16.mxu0 %v20255_v42  ;;  %v6880_v45 = vand.u32 %v19242_v18, %v20877_v3  ;;  %v16736_v18 = vld [vmem:[%s21721_s6 + $0x18] sm:$0xf] }
 0xae1   : > { %18359 = vmatprep.mubr.msk.bf16.mxu1 %vm20256_vm0, %v20255_v42  ;;  %18377 = vmatprep.mubr.msk.bf16.mxu0 %vm20256_vm0, %v20255_v42 }
 0xae3   : > { %18348 = vmatpush3.bf16.msra.mxu1 %v19225_v20  ;;  %18366 = vmatpush3.bf16.msra.mxu0 %v19226_v21  ;;  %v19244_v20 = vld [vmem:[#allocation7 + $0x38] sm:$0x1f]  }
 0xae4   : > { %18349 = vmatprep.subr.bf16.mxu1 %v20255_v42  ;;  %18367 = vmatprep.subr.bf16.mxu0 %v20255_v42  ;;  %v6987_v21 = vand.u32 %v19244_v20, %v20877_v3 }
 0xae7   : > { %18350 = vmatpush3.bf16.msra.mxu1 %v19227_v22  ;;  %18368 = vmatpush3.bf16.msra.mxu0 %v19228_v23  ;;  %v19245_v22 = vld [vmem:[#allocation7 + $0x40] sm:$0xff]   ;;  %v19246_v23 = vld [vmem:[#allocation7 + $0x48] sm:$0x1f]  }
 0xae8   : > { %18351 = vmatprep.subr.bf16.mxu1 %v20255_v42  ;;  %18369 = vmatprep.subr.bf16.mxu0 %v20255_v42 }
 0xaeb   : > { %18352 = vmatpush3.bf16.msra.mxu1 %v19229_v25  ;;  %18370 = vmatpush3.bf16.msra.mxu0 %v19230_v26  ;;  %v7094_v25 = vand.u32 %v19246_v23, %v20877_v3  ;;  %v19247_v26 = vld [vmem:[#allocation7 + $0x50] sm:$0xff]   ;;  %v16741_v23 = vld [vmem:[%s21721_s6 + $0x1c] sm:$0xf] }
 0xaec   : > { %18353 = vmatprep.subr.bf16.mxu1 %v20255_v42  ;;  %18371 = vmatprep.subr.bf16.mxu0 %v20255_v42 }
 0xaef   : > { %18354 = vmatpush3.bf16.msra.mxu1 %v19231_v13  ;;  %18372 = vmatpush3.bf16.msra.mxu0 %v19232_v29  ;;  %v19248_v13 = vld [vmem:[#allocation7 + $0x58] sm:$0x1f]  }
 0xaf0   : > { %18355 = vmatprep.subr.bf16.mxu1 %v20255_v42  ;;  %18373 = vmatprep.subr.bf16.mxu0 %v20255_v42  ;;  %v7201_v29 = vand.u32 %v19248_v13, %v20877_v3 }
 0xaf3   : > { %18356 = vmatpush3.bf16.msra.mxu1 %v19233_v40  ;;  %18374 = vmatpush3.bf16.msra.mxu0 %v19234_v30  ;;  %v19249_v40 = vld [vmem:[#allocation7 + $0x60] sm:$0xff]   ;;  %v19250_v30 = vld [vmem:[#allocation7 + $0x68] sm:$0x1f]  }
 0xaf4   : > { %18357 = vmatprep.subr.bf16.mxu1 %v20255_v42  ;;  %18375 = vmatprep.subr.bf16.mxu0 %v20255_v42  ;;  %v7308_v61 = vand.u32 %v19250_v30, %v20877_v3  ;;  %v16746_v30 = vld [vmem:[%s21721_s6 + $0x20] sm:$0xf] }
 0xaf7   : > { %18358 = vmatpush3.bf16.msra.mxu1 %v6501_v33  ;;  %18376 = vmatpush3.bf16.msra.mxu0 %v6600_v35  ;;  %v19252_v33 = vld [vmem:[#allocation7 + $0x78] sm:$0x1f]  }
 0xaf8   : > { %18381 = vmatprep.subr.bf16.mxu1 %v20255_v42  ;;  %18397 = vmatprep.subr.bf16.mxu0 %v20255_v42  ;;  %v7415_v35 = vand.u32 %v19252_v33, %v20877_v3 }
 0xafa   : > { %18360 = vmatmul.mubr.msk.bf16.vlgmr.msra.gmra.mrb[96].mxu1 %vm6299_vm5, %v6246_v19  ;;  %18378 = vmatmul.mubr.msk.bf16.vlgmr.msra.gmra.mrb[92].mxu0 %vm6299_vm5, %v6246_v19  ;;  %v19243_v19 = vld [vmem:[#allocation7 + $0x30] sm:$0xff]  }
 0xafb   : > { %18385 = vmatprep.mubr.msk.bf16.mxu1 %vm20256_vm0, %v20255_v42  ;;  %18399 = vmatprep.mubr.msk.bf16.mxu0 %vm20256_vm0, %v20255_v42 }
 0xafc   : > { %18382 = vmatpush3.bf16.msra.mxu1 %v19237_v39  ;;  %v19253_v39 = vld [vmem:[#allocation7 + $0x80] sm:$0xff]  }
 0xafd   : > { %18383 = vmatprep.subr.bf16.mxu1 %v20255_v42 }
 0xb00   : > { %18384 = vmatpush3.bf16.msra.mxu1 %v6669_v46  ;;  %v8758_v46 = vld [vmem:[%s21726_s11] sm:$0xff] }
 0xb01   : > { %18389 = vmatprep.subr.bf16.mxu1 %v20255_v42  ;;  %8762 = vperm.xlu1 %18758, %v8758_v46  }
 0xbb1   : > { %v6341_v47 = vpop.f32.mrb[92].mxu1  ;;  %v6438_v48 = vpop.f32.mrb[88].mxu0 }
 0xbb2   : > { %v6445_v49 = vmax.f32 %v6341_v47, %v6438_v48  ;;  %v18325_v50 = vpop.f32.mrb[93].mxu1  ;;  %v18343_v7 = vpop.f32.mrb[89].mxu0  ;;  %v11822_v47 = vld [vmem:[%s21729_s14] sm:$0xff] }
 0xbb3   : > { %v6344_v5 = vpop.f32.mrb[94].mxu1  ;;  %v6441_v51 = vpop.f32.mrb[90].mxu0  ;;  %11825 = vperm.xlu1 %18758, %v11822_v47  }
 0xbb4   : > { %v6446_v52 = vmax.f32 %v6344_v5, %v6441_v51  ;;  %v18326_v53 = vpop.f32.mrb[95].mxu1  ;;  %v18344_v54 = vpop.f32.mrb[91].mxu0 }
 0xbcd   : > { %v6537_v9 = vpop.f32.mrb[96].mxu1  ;;  %v6636_v55 = vpop.f32.mrb[92].mxu0 }
 0xbce   : > { %v6544_v56 = vmax.f32 %v6445_v49, %v6537_v9  ;;  %v18361_v57 = vpop.f32.mrb[97].mxu1  ;;  %v18379_v24 = vpop.f32.mrb[93].mxu0 }
 0xbcf   : > { %v6540_v27 = vpop.f32.mrb[98].mxu1  ;;  %v6639_v58 = vpop.f32.mrb[94].mxu0 }
 0xbd0   : > { %v6643_v59 = vmax.f32 %v6544_v56, %v6636_v55  ;;  %v6545_v60 = vmax.f32 %v6446_v52, %v6540_v27  ;;  %v18362_v36 = vpop.f32.mrb[99].mxu1  ;;  %v18380_v62 = vpop.f32.mrb[95].mxu0  ;;  %v16716_v27 = vld [vmem:[%s21721_s6 + $0x8] sm:$0xf] }
 0xbd2   : > { %v6644_v63 = vmax.f32 %v6545_v60, %v6639_v58 }
 0xbd4   : > { %v20881_v4 = vpack.c.bf16 %v6644_v63, %v6643_v59  ;;  %v16721_v63 = vld [vmem:[%s21721_s6 + $0xc] sm:$0xf] }
 0xbd6   : > { %18386 = vmatmul.mubr.msk.bf16.vlgmr.msra.gmra.mrb[100].mxu1 %vm6661_vm7, %v20881_v4 }
 0xbd7   : > { %18390 = vmatpush3.bf16.msra.mxu1 %v19239_v1  ;;  %18393 = vmatprep.mubr.msk.bf16.mxu1 %vm20256_vm0, %v20255_v42 }
 0xbd8   : > { %18391 = vmatprep.subr.bf16.mxu1 %v20255_v42 }
 0xbdb   : > { %18392 = vmatpush3.bf16.msra.mxu1 %v6731_v6 }
 0xbdc   : > { %18403 = vmatprep.subr.bf16.mxu1 %v20255_v42 }
 0xbde   : > { %18394 = vmatmul.mubr.msk.bf16.vlgmr.msra.gmra.mrb[104].mxu1 %vm6661_vm7, %v20881_v4 }
 0xbdf   : > { %18405 = vmatprep.mubr.msk.bf16.mxu1 %vm20256_vm0, %v20255_v42 }
 0xca9   : > { %v6705_v31 = vpop.f32.mrb[100].mxu1 }
 0xcaa   : > { %v18387_v8 = vpop.f32.mrb[101].mxu1 }
 0xcab   : > { %v6708_v11 = vpop.f32.mrb[102].mxu1  ;;  %v16726_v8 = vld [vmem:[%s21721_s6 + $0x10] sm:$0xf] }
 0xcac   : > { %v6713_v12 = vpack.c.bf16 %v6708_v11, %v6705_v31  ;;  %v18388_v14 = vpop.f32.mrb[103].mxu1 }
 0xcae   : > { %18404 = vmatpush3.bf16.msra.mxu1 %v6713_v12 }
 0xcaf   : > { %18417 = vmatprep.subr.bf16.mxu1 %v20255_v42 }
 0xcb1   : > { %v6767_v41 = vpop.f32.mrb[104].mxu1  ;;  %18406 = vmatmul.mubr.msk.bf16.vlgmr.msra.gmra.mrb[108].mxu1 %vm1123_vm1, %v6712_v34 }
 0xcb2   : > { %v18395_v38 = vpop.f32.mrb[105].mxu1  ;;  %18419 = vmatprep.mubr.msk.bf16.mxu1 %vm20256_vm0, %v20255_v42 }
 0xcb3   : > { %v6770_v37 = vpop.f32.mrb[106].mxu1  ;;  %v16731_v38 = vld [vmem:[%s21721_s6 + $0x14] sm:$0xf] }
 0xcb4   : > { %v6776_v10 = vpack.c.bf16 %v6770_v37, %v6767_v41  ;;  %v18396_v15 = vpop.f32.mrb[107].mxu1 }
 0xcb6   : > { %18398 = vmatpush3.bf16.msra.mxu0 %v6776_v10 }
 0xcb7   : > { %18409 = vmatprep.subr.bf16.mxu0 %v20255_v42 }
 0xcb9   : > { %18400 = vmatmul.mubr.msk.bf16.vlgmr.msra.gmra.mrb[96].mxu0 %vm1123_vm1, %v16710_v16 }
 0xcba   : > { %18410 = vmatpush3.bf16.msra.mxu0 %v19241_v17  ;;  %18413 = vmatprep.mubr.msk.bf16.mxu0 %vm20256_vm0, %v20255_v42 }
 0xcbb   : > { %18411 = vmatprep.subr.bf16.mxu0 %v20255_v42 }
 0xcbe   : > { %18412 = vmatpush3.bf16.msra.mxu0 %v6880_v45 }
 0xcbf   : > { %18423 = vmatprep.subr.bf16.mxu0 %v20255_v42 }
 0xcc1   : > { %18414 = vmatmul.mubr.msk.bf16.vlgmr.msra.gmra.mrb[100].mxu0 %vm6661_vm7, %v20881_v4 }
 0xcc2   : > { %18424 = vmatpush3.bf16.msra.mxu0 %v19243_v19  ;;  %18427 = vmatprep.mubr.msk.bf16.mxu0 %vm20256_vm0, %v20255_v42 }
 0xcc3   : > { %18425 = vmatprep.subr.bf16.mxu0 %v20255_v42 }
 0xcc6   : > { %18426 = vmatpush3.bf16.msra.mxu0 %v6987_v21 }
 0xcc7   : > { %18437 = vmatprep.subr.bf16.mxu0 %v20255_v42 }
 0xcc9   : > { %18428 = vmatmul.mubr.msk.bf16.vlgmr.msra.gmra.mrb[104].mxu0 %vm6661_vm7, %v20881_v4 }
 0xcca   : > { %18438 = vmatpush3.bf16.msra.mxu0 %v19245_v22  ;;  %18441 = vmatprep.mubr.msk.bf16.mxu0 %vm20256_vm0, %v20255_v42 }
 0xccb   : > { %18439 = vmatprep.subr.bf16.mxu0 %v20255_v42 }
 0xcce   : > { %18440 = vmatpush3.bf16.msra.mxu0 %v7094_v25 }
 0xccf   : > { %18451 = vmatprep.subr.bf16.mxu0 %v20255_v42 }
 0xcd1   : > { %18442 = vmatmul.mubr.msk.bf16.vlgmr.msra.gmra.mrb[108].mxu0 %vm6661_vm7, %v20881_v4 }
 0xcd2   : > { %18452 = vmatpush3.bf16.msra.mxu0 %v19247_v26  ;;  %18455 = vmatprep.mubr.msk.bf16.mxu0 %vm20256_vm0, %v20255_v42 }
 0xcd3   : > { %18453 = vmatprep.subr.bf16.mxu0 %v20255_v42 }
 0xcd6   : > { %18454 = vmatpush3.bf16.msra.mxu0 %v7201_v29 }
 0xcd7   : > { %18465 = vmatprep.subr.bf16.mxu0 %v20255_v42 }
 0xcd9   : > { %18456 = vmatmul.mubr.msk.bf16.vlgmr.msra.gmra.mrb[112].mxu0 %vm6661_vm7, %v20881_v4 }
 0xcda   : > { %18466 = vmatpush3.bf16.msra.mxu0 %v19249_v40  ;;  %18469 = vmatprep.mubr.msk.bf16.mxu0 %vm20256_vm0, %v20255_v42 }
 0xcdb   : > { %18467 = vmatprep.subr.bf16.mxu0 %v20255_v42 }
 0xcde   : > { %18468 = vmatpush3.bf16.msra.mxu0 %v7308_v61  ;;  %v19255_v61 = vld [vmem:[#allocation8] sm:$0x1f]  }
 0xcdf   : > { %18479 = vmatprep.subr.bf16.mxu0 %v20255_v42  ;;  %v7633_v33 = vand.u32 %v19255_v61, %v20877_v3 }
 0xce1   : > { %18470 = vmatmul.mubr.msk.bf16.vlgmr.msra.gmra.mrb[116].mxu0 %vm6661_vm7, %v20881_v4 }
 0xce2   : > { %18480 = vmatpush3.bf16.msra.mxu0 %v19251_v32  ;;  %18483 = vmatprep.mubr.msk.bf16.mxu0 %vm20256_vm0, %v20255_v42  ;;  %v19256_v32 = vld [vmem:[#allocation8 + $0x8] sm:$0x1f]  }
 0xce3   : > { %18481 = vmatprep.subr.bf16.mxu0 %v20255_v42 }
 0xce6   : > { %18482 = vmatpush3.bf16.msra.mxu0 %v7415_v35  ;;  %v7684_v35 = vand.u32 %v19256_v32, %v20877_v3 }
 0xce7   : > { %18493 = vmatprep.subr.bf16.mxu0 %v20255_v42 }
 0xce9   : > { %18484 = vmatmul.mubr.msk.bf16.vlgmr.msra.gmra.mrb[120].mxu0 %vm6661_vm7, %v20881_v4 }
 0xcea   : > { %18494 = vmatpush3.bf16.msra.mxu0 %v19253_v39  ;;  %18497 = vmatprep.mubr.msk.bf16.mxu0 %vm20256_vm0, %v20255_v42 }
 0xceb   : > { %18495 = vmatprep.subr.bf16.mxu0 %v20255_v42 }
 0xcee   : > { %18496 = vmatpush3.bf16.msra.mxu0 %v7522_v43 }
 0xcef   : > { %18507 = vmatprep.subr.bf16.mxu0 %v20255_v42 }
 0xcf1   : > { %18498 = vmatmul.mubr.msk.bf16.vlgmr.msra.gmra.mrb[124].mxu0 %vm6661_vm7, %v20881_v4 }
 0xcf2   : > { %18509 = vmatprep.mubr.msk.bf16.mxu0 %vm20256_vm0, %v20255_v42  ;;  %18508 = vmatpush3.bf16.msra.mxu0 %v7633_v33 }
 0xcf3   : > { %18519 = vmatprep.subr.bf16.mxu0 %v20255_v42 }
 0xd84   : > { %v6857_v48 = vpop.f32.mrb[108].mxu1 }
 0xd85   : > { %v18407_v49 = vpop.f32.mrb[109].mxu1 }
 0xd86   : > { %v6860_v50 = vpop.f32.mrb[110].mxu1 }
 0xd87   : > { %v18408_v7 = vpop.f32.mrb[111].mxu1 }
 0xd8c   : > { %v6814_v5 = vpop.f32.mrb[96].mxu0 }
 0xd8d   : > { %v20966_v51 = vadd.f32 %v6857_v48, %v6814_v5  ;;  %v18401_v52 = vpop.f32.mrb[97].mxu0 }
 0xd8e   : > { %v6817_v53 = vpop.f32.mrb[98].mxu0 }
 0xd8f   : > { %v18402_v54 = vpop.f32.mrb[99].mxu0 }
 0xd94   : > { %v6916_v9 = vpop.f32.mrb[100].mxu0 }
 0xd95   : > { %v18415_v55 = vpop.f32.mrb[101].mxu0 }
 0xd96   : > { %v6919_v56 = vpop.f32.mrb[102].mxu0 }
 0xd97   : > { %v6925_v57 = vpack.c.bf16 %v6919_v56, %v6916_v9  ;;  %v18416_v24 = vpop.f32.mrb[103].mxu0 }
 0xd99   : > { %18418 = vmatpush3.bf16.msra.mxu1 %v6925_v57 }
 0xd9a   : > { %18431 = vmatprep.subr.bf16.mxu1 %v20255_v42 }
 0xd9c   : > { %18420 = vmatmul.mubr.msk.bf16.vlgmr.msra.gmra.mrb[112].mxu1 %vm1123_vm1, %v16716_v27  ;;  %v7023_v58 = vpop.f32.mrb[104].mxu0 }
 0xd9d   : > { %v18429_v59 = vpop.f32.mrb[105].mxu0  ;;  %18433 = vmatprep.mubr.msk.bf16.mxu1 %vm20256_vm0, %v20255_v42 }
 0xd9e   : > { %v7026_v60 = vpop.f32.mrb[106].mxu0 }
 0xd9f   : > { %v7032_v36 = vpack.c.bf16 %v7026_v60, %v7023_v58  ;;  %v18430_v62 = vpop.f32.mrb[107].mxu0 }
 0xda1   : > { %18432 = vmatpush3.bf16.msra.mxu1 %v7032_v36 }
 0xda2   : > { %18445 = vmatprep.subr.bf16.mxu1 %v20255_v42 }
 0xda4   : > { %18434 = vmatmul.mubr.msk.bf16.vlgmr.msra.gmra.mrb[116].mxu1 %vm1123_vm1, %v16721_v63  ;;  %v7130_v1 = vpop.f32.mrb[108].mxu0 }
 0xda5   : > { %v18443_v2 = vpop.f32.mrb[109].mxu0  ;;  %18447 = vmatprep.mubr.msk.bf16.mxu1 %vm20256_vm0, %v20255_v42 }
 0xda6   : > { %v7133_v4 = vpop.f32.mrb[110].mxu0 }
 0xda7   : > { %v7139_v6 = vpack.c.bf16 %v7133_v4, %v7130_v1  ;;  %v18444_v31 = vpop.f32.mrb[111].mxu0 }
 0xda9   : > { %18446 = vmatpush3.bf16.msra.mxu1 %v7139_v6 }
 0xdaa   : > { %18459 = vmatprep.subr.bf16.mxu1 %v20255_v42 }
 0xdac   : > { %18448 = vmatmul.mubr.msk.bf16.vlgmr.msra.gmra.mrb[120].mxu1 %vm1123_vm1, %v16726_v8  ;;  %v7237_v11 = vpop.f32.mrb[112].mxu0 }
 0xdad   : > { %v18457_v12 = vpop.f32.mrb[113].mxu0  ;;  %18461 = vmatprep.mubr.msk.bf16.mxu1 %vm20256_vm0, %v20255_v42 }
 0xdae   : > { %v7240_v14 = vpop.f32.mrb[114].mxu0 }
 0xdaf   : > { %v7246_v34 = vpack.c.bf16 %v7240_v14, %v7237_v11  ;;  %v18458_v41 = vpop.f32.mrb[115].mxu0  ;;  %v7616_v11 = vpop.permute.xlu1 %7615  ;;  %v19257_v14 = vld [vmem:[#allocation8 + $0x10] sm:$0x1f]  }
 0xdb1   : > { %18460 = vmatpush3.bf16.msra.mxu1 %v7246_v34  ;;  %v19258_v34 = vld [vmem:[#allocation8 + $0x18] sm:$0x1f]  }
 0xdb2   : > { %18473 = vmatprep.subr.bf16.mxu1 %v20255_v42 }
 0xdb4   : > { %18462 = vmatmul.mubr.msk.bf16.vlgmr.msra.gmra.mrb[124].mxu1 %vm1123_vm1, %v16731_v38  ;;  %v7344_v37 = vpop.f32.mrb[116].mxu0 }
 0xdb5   : > { %v18471_v10 = vpop.f32.mrb[117].mxu0  ;;  %18475 = vmatprep.mubr.msk.bf16.mxu1 %vm20256_vm0, %v20255_v42 }
 0xdb6   : > { %v7347_v15 = vpop.f32.mrb[118].mxu0  ;;  %v7736_v10 = vand.u32 %v19257_v14, %v20877_v3 }
 0xdb7   : > { %v7353_v16 = vpack.c.bf16 %v7347_v15, %v7344_v37  ;;  %v18472_v17 = vpop.f32.mrb[119].mxu0  ;;  %v7788_v15 = vand.u32 %v19258_v34, %v20877_v3 }
 0xdb8   : > { %v7834_v17 = vld [vmem:[#allocation10] sm:$0x3] }
 0xdb9   : > { %18474 = vmatpush3.bf16.msra.mxu1 %v7353_v16 }
 0xdba   : > { %18487 = vmatprep.subr.bf16.mxu1 %v20255_v42 }
 0xdbc   : > { %18476 = vmatmul.mubr.msk.bf16.vlgmr.msra.gmra.mrb[128].mxu1 %vm1123_vm1, %v16736_v18  ;;  %v7451_v45 = vpop.f32.mrb[120].mxu0  ;;  %v7885_v18 = vld [vmem:[#allocation10 + $0x2] sm:$0x3] }
 0xdbd   : > { %v18485_v19 = vpop.f32.mrb[121].mxu0  ;;  %18489 = vmatprep.mubr.msk.bf16.mxu1 %vm20256_vm0, %v20255_v42 }
 0xdbe   : > { %v7454_v20 = vpop.f32.mrb[122].mxu0  ;;  %v7887_v19 = vsel %vm6303_vm4, %v7885_v18, 0 }
 0xdbf   : > { %v7460_v21 = vpack.c.bf16 %v7454_v20, %v7451_v45  ;;  %v18486_v22 = vpop.f32.mrb[123].mxu0  ;;  %v7839_v45 = vsel %vm6303_vm4, %v7834_v17, 0 }
 0xdc1   : > { %18488 = vmatpush3.bf16.msra.mxu1 %v7460_v21 }
 0xdc2   : > { %18501 = vmatprep.subr.bf16.mxu1 %v20255_v42 }
 0xdc4   : > { %18490 = vmatmul.mubr.msk.bf16.vlgmr.msra.gmra.mrb[132].mxu1 %vm1123_vm1, %v16741_v23  ;;  %v7558_v25 = vpop.f32.mrb[124].mxu0 }
 0xdc5   : > { %v18499_v26 = vpop.f32.mrb[125].mxu0  ;;  %18503 = vmatprep.mubr.msk.bf16.mxu1 %vm20256_vm0, %v20255_v42 }
 0xdc6   : > { %v7561_v13 = vpop.f32.mrb[126].mxu0 }
 0xdc7   : > { %v7567_v29 = vpack.c.bf16 %v7561_v13, %v7558_v25  ;;  %v18500_v40 = vpop.f32.mrb[127].mxu0 }
 0xdc9   : > { %18502 = vmatpush3.bf16.msra.mxu1 %v7567_v29 }
 0xdca   : > { %18513 = vmatprep.subr.bf16.mxu1 %v20255_v42 }
 0xdcc   : > { %18504 = vmatmul.mubr.msk.bf16.vlgmr.msra.gmra.mrb[136].mxu1 %vm1123_vm1, %v16746_v30 }
 0xdcd   : > { %18515 = vmatprep.mubr.msk.bf16.mxu1 %vm20256_vm0, %v20255_v42  ;;  %18514 = vmatpush3.bf16.msra.mxu1 %v7684_v35 }
 0xdce   : > { %18525 = vmatprep.subr.bf16.mxu1 %v20255_v42 }
 0xe6f   : > { %v6963_v39 = vpop.f32.mrb[112].mxu1 }
 0xe70   : > { %v6969_v0 = vadd.f32 %v6963_v39, %v20966_v51  ;;  %v18421_v43 = vpop.f32.mrb[113].mxu1 }
 0xe71   : > { %v6966_v44 = vpop.f32.mrb[114].mxu1 }
 0xe72   : > { %v18422_v46 = vpop.f32.mrb[115].mxu1 }
 0xe77   : > { %v7070_v47 = vpop.f32.mrb[116].mxu1 }
 0xe78   : > { %v7076_v48 = vadd.f32 %v7070_v47, %v6969_v0  ;;  %v18435_v49 = vpop.f32.mrb[117].mxu1 }
 0xe79   : > { %v7073_v50 = vpop.f32.mrb[118].mxu1 }
 0xe7a   : > { %v18436_v7 = vpop.f32.mrb[119].mxu1 }
 0xe7f   : > { %v7177_v5 = vpop.f32.mrb[120].mxu1 }
 0xe80   : > { %v7183_v52 = vadd.f32 %v7177_v5, %v7076_v48  ;;  %v18449_v53 = vpop.f32.mrb[121].mxu1 }
 0xe81   : > { %v7180_v54 = vpop.f32.mrb[122].mxu1 }
 0xe82   : > { %v18450_v9 = vpop.f32.mrb[123].mxu1 }
 0xe83   : > { %v8038_v9 = vld [vmem:[#allocation10 + $0x4] sm:$0x3] }
 0xe87   : > { %v7284_v55 = vpop.f32.mrb[124].mxu1 }
 0xe88   : > { %v7290_v56 = vadd.f32 %v7284_v55, %v7183_v52  ;;  %v18463_v57 = vpop.f32.mrb[125].mxu1 }
 0xe89   : > { %v7287_v24 = vpop.f32.mrb[126].mxu1 }
 0xe8a   : > { %v18464_v27 = vpop.f32.mrb[127].mxu1 }
 0xe8b   : > { %v19259_v27 = vld [vmem:[%s21725_s10 + $0x8] sm:$0xff]  }
 0xe8f   : > { %v7391_v58 = vpop.f32.mrb[128].mxu1 }
 0xe90   : > { %v7397_v51 = vadd.f32 %v7391_v58, %v7290_v56  ;;  %v18477_v59 = vpop.f32.mrb[129].mxu1  ;;  %v19260_v58 = vld [vmem:[%s21725_s10] sm:$0xff]  }
 0xe91   : > { %v7394_v60 = vpop.f32.mrb[130].mxu1  ;;  %v8141_v59 = vld [vmem:[#allocation10 + $0x6] sm:$0x3] }
 0xe92   : > { %v18478_v36 = vpop.f32.mrb[131].mxu1  ;;  %v8143_v60 = vsel %vm6303_vm4, %v8141_v59, 0 }
 0xe93   : > { %v8244_v36 = vld [vmem:[#allocation10 + $0x8] sm:$0x3] }
 0xe97   : > { %v7498_v62 = vpop.f32.mrb[132].mxu1 }
 0xe98   : > { %v7504_v63 = vadd.f32 %v7498_v62, %v7397_v51  ;;  %v18491_v1 = vpop.f32.mrb[133].mxu1  ;;  %v8040_v51 = vsel %vm6303_vm4, %v8038_v9, 0  ;;  %v8246_v62 = vsel %vm6303_vm4, %v8244_v36, 0  ;;  %v19266_v36 = vld [vmem:[%s21725_s10 + $0x38] sm:$0xff]  }
 0xe99   : > { %v7501_v2 = vpop.f32.mrb[134].mxu1 }
 0xe9a   : > { %v18492_v4 = vpop.f32.mrb[135].mxu1  ;;  %v8450_v2 = vld [vmem:[#allocation10 + $0xc] sm:$0x3] }
 0xe9b   : > { %v8452_v4 = vsel %vm6303_vm4, %v8450_v2, 0 }
 0xe9f   : > { %v7605_v6 = vpop.f32.mrb[136].mxu1 }
 0xea0   : > { %v7611_v31 = vadd.f32 %v7605_v6, %v7504_v63  ;;  %v18505_v8 = vpop.f32.mrb[137].mxu1  ;;  %v8347_v63 = vld [vmem:[#allocation10 + $0xa] sm:$0x3]  ;;  %v8553_v6 = vld [vmem:[#allocation10 + $0xe] sm:$0x3] }
 0xea1   : > { %v7608_v12 = vpop.f32.mrb[138].mxu1  ;;  %v8349_v1 = vsel %vm6303_vm4, %v8347_v63, 0  ;;  %v8656_v8 = vld [vmem:[#allocation10 + $0x10] sm:$0x3] }
 0xea2   : > { %v7618_v41 = vadd.f32 %v7616_v11, %v7611_v31  ;;  %v18506_v38 = vpop.f32.mrb[139].mxu1  ;;  %v8555_v31 = vsel %vm6303_vm4, %v8553_v6, 0  ;;  %v8658_v11 = vsel %vm6303_vm4, %v8656_v8, 0  ;;  %v19270_v8 = vld [vmem:[#allocation11 + $0x4] ss:$8 sps:$4 sm:$0xff]  }
 0xea4   : > { %v7619_v37 = vmax.f32 %v7618_v41, 0.0 }
 0xea6   : > { %v7620_v16 = vpack.c.bf16 %v7619_v37, %v7619_v37 }
 0xea8   : > { %18510 = vmatmul.mubr.msk.bf16.vlgmr.msra.gmra.mrb[128].mxu0 %vm7628_vm8, %v7620_v16  ;;  %18516 = vmatmul.mubr.msk.bf16.vlgmr.msra.gmra.mrb[140].mxu1 %vm7628_vm8, %v7620_v16 }
 0xea9   : > { %18520 = vmatpush3.bf16.msra.mxu0 %v7736_v10  ;;  %18526 = vmatpush3.bf16.msra.mxu1 %v7788_v15 }
 0xeaa   : > { %18521 = vmatprep.mubr.msk.bf16.mxu0 %vm20256_vm0, %v20255_v42  ;;  %18527 = vmatprep.mubr.msk.bf16.mxu1 %vm20256_vm0, %v20255_v42 }
 0xeab   : > { %18531 = vmatprep.subr.bf16.mxu0 %v20255_v42  ;;  %18537 = vmatprep.subr.bf16.mxu1 %v20255_v42 }
 0xeb0   : > { %18522 = vmatmul.mubr.msk.bf16.vlgmr.msra.gmra.mrb[132].mxu0 %vm7628_vm8, %v7620_v16  ;;  %18528 = vmatmul.mubr.msk.bf16.vlgmr.msra.gmra.mrb[144].mxu1 %vm7628_vm8, %v7620_v16 }
 0xeb1   : > { %18533 = vmatprep.mubr.msk.bf16.mxu0 %vm20256_vm0, %v20255_v42  ;;  %18539 = vmatprep.mubr.msk.bf16.mxu1 %vm20256_vm0, %v20255_v42 }
 0xeb2   : > { %18532 = vmatpush3.bf16.msra.mxu0 %v7839_v45  ;;  %18538 = vmatpush3.bf16.msra.mxu1 %v7887_v19 }
 0xeb3   : > { %18543 = vmatprep.subr.bf16.mxu0 %v20255_v42  ;;  %18549 = vmatprep.subr.bf16.mxu1 %v20255_v42 }
 0xf7b   : > { %v7669_v20 = vpop.f32.mrb[128].mxu0  ;;  %v7720_v21 = vpop.f32.mrb[140].mxu1 }
 0xf7c   : > { %v7726_v22 = vmax.f32 %v7669_v20, %v7720_v21  ;;  %v18511_v23 = vpop.f32.mrb[129].mxu0  ;;  %v18517_v25 = vpop.f32.mrb[141].mxu1 }
 0xf7d   : > { %v7672_v26 = vpop.f32.mrb[130].mxu0  ;;  %v7723_v13 = vpop.f32.mrb[142].mxu1  ;;  %v19261_v23 = vld [vmem:[%s21725_s10 + $0x10] sm:$0xff]  }
 0xf7e   : > { %v18512_v29 = vpop.f32.mrb[131].mxu0  ;;  %v18518_v40 = vpop.f32.mrb[143].mxu1 }
 0xf83   : > { %v7772_v30 = vpop.f32.mrb[132].mxu0  ;;  %v7824_v61 = vpop.f32.mrb[144].mxu1 }
 0xf84   : > { %v7778_v32 = vmax.f32 %v7726_v22, %v7772_v30  ;;  %v18523_v33 = vpop.f32.mrb[133].mxu0  ;;  %v18529_v35 = vpop.f32.mrb[145].mxu1 }
 0xf85   : > { %v7775_v39 = vpop.f32.mrb[134].mxu0  ;;  %v7827_v0 = vpop.f32.mrb[146].mxu1 }
 0xf86   : > { %v7830_v43 = vmax.f32 %v7778_v32, %v7824_v61  ;;  %v18524_v44 = vpop.f32.mrb[135].mxu0  ;;  %v18530_v46 = vpop.f32.mrb[147].mxu1  ;;  %v19262_v61 = vld [vmem:[%s21725_s10 + $0x18] sm:$0xff]  }
 0xf87   : > { %v19263_v44 = vld [vmem:[%s21725_s10 + $0x20] sm:$0xff]  }
 0xf88   : > { %7832 = vst.msk [vmem:[%s711_s20] sm:$0xff] %vm7831_vm9, %v7830_v43  ;;  %v21043_v47 = vpack.c.bf16 %v7830_v43, %v7830_v43 }
 0xf8a   : > { %18534 = vmatmul.mubr.msk.bf16.vlgmr.msra.gmra.mrb[136].mxu0 %vm7831_vm9, %v21043_v47  ;;  %18540 = vmatmul.mubr.msk.bf16.vlgmr.msra.gmra.mrb[148].mxu1 %vm7831_vm9, %v21043_v47 }
 0xf8b   : > { %18545 = vmatprep.mubr.msk.bf16.mxu0 %vm20256_vm0, %v20255_v42  ;;  %18551 = vmatprep.mubr.msk.bf16.mxu1 %vm20256_vm0, %v20255_v42 }
0x105d   : > { %v7875_v48 = vpop.f32.mrb[136].mxu0  ;;  %v7923_v49 = vpop.f32.mrb[148].mxu1 }
0x105e   : > { %v7883_v50 = vpack.c.bf16 %v7875_v48, %v7875_v48  ;;  %v7932_v7 = vpack.c.bf16 %v7923_v49, %v7923_v49  ;;  %v18535_v5 = vpop.f32.mrb[137].mxu0  ;;  %v18541_v52 = vpop.f32.mrb[149].mxu1 }
0x105f   : > { %v7878_v53 = vpop.f32.mrb[138].mxu0  ;;  %v7926_v54 = vpop.f32.mrb[150].mxu1  ;;  %v19264_v5 = vld [vmem:[%s21725_s10 + $0x28] sm:$0xff]  }
0x1060   : > { %v7994_v55 = vsel %vm1856_vm2, %v7883_v50, 0  ;;  %v7942_v56 = vsel %vm1856_vm2, %v7932_v7, 0  ;;  %v18536_v57 = vpop.f32.mrb[139].mxu0  ;;  %v18542_v24 = vpop.f32.mrb[151].mxu1 }
0x1061   : > { %18544 = vmatpush3.bf16.msra.mxu0 %v7942_v56  ;;  %18550 = vmatpush3.bf16.msra.mxu1 %v7994_v55  ;;  %v19265_v57 = vld [vmem:[%s21725_s10 + $0x30] sm:$0xff]  }
0x1062   : > { %18555 = vmatprep.subr.bf16.mxu0 %v20255_v42  ;;  %18561 = vmatprep.subr.bf16.mxu1 %v20255_v42 }
0x1064   : > { %18546 = vmatmul.mubr.msk.bf16.vlgmr.msra.gmra.mrb[140].mxu0 %vm1852_vm3, %v19259_v27  ;;  %18552 = vmatmul.mubr.msk.bf16.vlgmr.msra.gmra.mrb[152].mxu1 %vm1852_vm3, %v19260_v58 }
0x1065   : > { %18556 = vmatpush3.bf16.msra.mxu0 %v8040_v51  ;;  %18557 = vmatprep.mubr.msk.bf16.mxu0 %vm20256_vm0, %v20255_v42 }
0x1066   : > { %18567 = vmatprep.subr.bf16.mxu0 %v20255_v42  ;;  %18563 = vmatprep.mubr.msk.bf16.mxu1 %vm20256_vm0, %v20255_v42 }
0x106c   : > { %18558 = vmatmul.mubr.msk.bf16.vlgmr.msra.gmra.mrb[144].mxu0 %vm7831_vm9, %v21043_v47 }
0x106d   : > { %18568 = vmatpush3.bf16.msra.mxu0 %v8143_v60  ;;  %18569 = vmatprep.mubr.msk.bf16.mxu0 %vm20256_vm0, %v20255_v42 }
0x106e   : > { %18579 = vmatprep.subr.bf16.mxu0 %v20255_v42 }
0x1074   : > { %18570 = vmatmul.mubr.msk.bf16.vlgmr.msra.gmra.mrb[148].mxu0 %vm7831_vm9, %v21043_v47 }
0x1075   : > { %18580 = vmatpush3.bf16.msra.mxu0 %v8246_v62  ;;  %18581 = vmatprep.mubr.msk.bf16.mxu0 %vm20256_vm0, %v20255_v42 }
0x1076   : > { %18591 = vmatprep.subr.bf16.mxu0 %v20255_v42 }
0x107c   : > { %18582 = vmatmul.mubr.msk.bf16.vlgmr.msra.gmra.mrb[152].mxu0 %vm7831_vm9, %v21043_v47 }
0x107d   : > { %18592 = vmatpush3.bf16.msra.mxu0 %v8349_v1  ;;  %18593 = vmatprep.mubr.msk.bf16.mxu0 %vm20256_vm0, %v20255_v42 }
0x107e   : > { %18603 = vmatprep.subr.bf16.mxu0 %v20255_v42 }
0x1084   : > { %18594 = vmatmul.mubr.msk.bf16.vlgmr.msra.gmra.mrb[156].mxu0 %vm7831_vm9, %v21043_v47 }
0x1085   : > { %18604 = vmatpush3.bf16.msra.mxu0 %v8452_v4  ;;  %18605 = vmatprep.mubr.msk.bf16.mxu0 %vm20256_vm0, %v20255_v42 }
0x1086   : > { %18615 = vmatprep.subr.bf16.mxu0 %v20255_v42 }
0x108c   : > { %18606 = vmatmul.mubr.msk.bf16.vlgmr.msra.gmra.mrb[160].mxu0 %vm7831_vm9, %v21043_v47 }
0x108d   : > { %18616 = vmatpush3.bf16.msra.mxu0 %v8555_v31  ;;  %18617 = vmatprep.mubr.msk.bf16.mxu0 %vm20256_vm0, %v20255_v42  ;;  %v19267_v31 = vld [vmem:[%s21725_s10 + $0x40] sm:$0xff]  }
0x108e   : > { %18627 = vmatprep.subr.bf16.mxu0 %v20255_v42 }
0x1094   : > { %18618 = vmatmul.mubr.msk.bf16.vlgmr.msra.gmra.mrb[164].mxu0 %vm7831_vm9, %v21043_v47 }
0x1095   : > { %18628 = vmatpush3.bf16.msra.mxu0 %v8658_v11  ;;  %18629 = vmatprep.mubr.msk.bf16.mxu0 %vm20256_vm0, %v20255_v42  ;;  %v19273_v11 = vld [vmem:[#allocation11 + $0x24] ss:$8 sps:$4 sm:$0xff]  }
0x1096   : > { %8806 = vmatprep.subr.bf16.mxu0 %v19270_v8 }
0x109c   : > { %18630 = vmatmul.mubr.msk.bf16.vlgmr.msra.gmra.mrb[168].mxu0 %vm7831_vm9, %v21043_v47 }
0x109d   : > { %8838 = vmatprep.mubr.bf16.mxu0 %v20257_v28 }
0x1137   : > { %v7978_v12 = vpop.f32.mrb[140].mxu0  ;;  %v8030_v14 = vpop.f32.mrb[152].mxu1 }
0x1138   : > { %v21109_v34 = vadd.f32 %v8030_v14, %v7978_v12  ;;  %v18547_v41 = vpop.f32.mrb[141].mxu0  ;;  %v18553_v38 = vpop.f32.mrb[153].mxu1  ;;  %v19268_v12 = vld [vmem:[#allocation11] ss:$8 sps:$4 sm:$0xff]  }
0x1139   : > { %v7981_v37 = vpop.f32.mrb[142].mxu0  ;;  %v8033_v10 = vpop.f32.mrb[154].mxu1  ;;  %v19271_v14 = vld [vmem:[#allocation11 + $0x20] ss:$8 sps:$4 sm:$0xff]   ;;  %8807 = vmatpush1.bf16.msra.mxu0 %v19268_v12 }
0x113a   : > { %v21111_v15 = vadd.f32 %v8033_v10, %v7981_v37  ;;  %v18548_v16 = vpop.f32.mrb[143].mxu0  ;;  %v18554_v17 = vpop.f32.mrb[155].mxu1  ;;  %v19276_v41 = vld [vmem:[#allocation11 + $0x14] ss:$8 sps:$4 sm:$0x1f]  }
0x113b   : > { %v19279_v38 = vld [vmem:[#allocation11 + $0x34] ss:$8 sps:$4 sm:$0x1f]   ;;  %v19274_v37 = vld [vmem:[#allocation11 + $0x10] ss:$8 sps:$4 sm:$0x1f]   ;;  %v8804_v16 = vand.u32 %v19276_v41, %v20877_v3 }
0x113c   : > { %v19277_v10 = vld [vmem:[#allocation11 + $0x30] ss:$8 sps:$4 sm:$0x1f]   ;;  %v8879_v17 = vand.u32 %v19279_v38, %v20877_v3 }
0x113d   : > { %8808 = vmatprep.subr.bf16.mxu0 %v8804_v16 }
0x113f   : > { %v8076_v18 = vpop.f32.mrb[144].mxu0 }
0x1140   : > { %v8085_v45 = vpack.c.bf16 %v8076_v18, %v8076_v18  ;;  %v18559_v19 = vpop.f32.mrb[145].mxu0  ;;  %v8801_v18 = vand.u32 %v19274_v37, %v20877_v3 }
0x1141   : > { %v8079_v20 = vpop.f32.mrb[146].mxu0 }
0x1142   : > { %v8095_v21 = vsel %vm1856_vm2, %v8085_v45, 0  ;;  %v18560_v22 = vpop.f32.mrb[147].mxu0  ;;  %v8876_v45 = vand.u32 %v19277_v10, %v20877_v3  ;;  %8809 = vmatpush1.bf16.msra.mxu0 %v8801_v18 }
0x1143   : > { %18562 = vmatpush3.bf16.msra.mxu1 %v8095_v21 }
0x1144   : > { %18573 = vmatprep.subr.bf16.mxu1 %v20255_v42 }
0x1146   : > { %18564 = vmatmul.mubr.msk.bf16.vlgmr.msra.gmra.mrb[156].mxu1 %vm1852_vm3, %v19261_v23 }
0x1147   : > { %v8179_v25 = vpop.f32.mrb[148].mxu0  ;;  %18575 = vmatprep.mubr.msk.bf16.mxu1 %vm20256_vm0, %v20255_v42 }
0x1148   : > { %v8188_v26 = vpack.c.bf16 %v8179_v25, %v8179_v25  ;;  %v18571_v13 = vpop.f32.mrb[149].mxu0 }
0x1149   : > { %v8182_v29 = vpop.f32.mrb[150].mxu0 }
0x114a   : > { %v8198_v40 = vsel %vm1856_vm2, %v8188_v26, 0  ;;  %v18572_v30 = vpop.f32.mrb[151].mxu0 }
0x114b   : > { %18574 = vmatpush3.bf16.msra.mxu1 %v8198_v40 }
0x114c   : > { %18585 = vmatprep.subr.bf16.mxu1 %v20255_v42 }
0x114e   : > { %18576 = vmatmul.mubr.msk.bf16.vlgmr.msra.gmra.mrb[160].mxu1 %vm1852_vm3, %v19262_v61 }
0x114f   : > { %v8282_v32 = vpop.f32.mrb[152].mxu0  ;;  %18587 = vmatprep.mubr.msk.bf16.mxu1 %vm20256_vm0, %v20255_v42 }
0x1150   : > { %v8291_v33 = vpack.c.bf16 %v8282_v32, %v8282_v32  ;;  %v18583_v35 = vpop.f32.mrb[153].mxu0 }
0x1151   : > { %v8285_v39 = vpop.f32.mrb[154].mxu0 }
0x1152   : > { %v8301_v0 = vsel %vm1856_vm2, %v8291_v33, 0  ;;  %v18584_v43 = vpop.f32.mrb[155].mxu0 }
0x1153   : > { %18586 = vmatpush3.bf16.msra.mxu1 %v8301_v0 }
0x1154   : > { %18597 = vmatprep.subr.bf16.mxu1 %v20255_v42 }
0x1156   : > { %18588 = vmatmul.mubr.msk.bf16.vlgmr.msra.gmra.mrb[164].mxu1 %vm1852_vm3, %v19263_v44 }
0x1157   : > { %v8385_v46 = vpop.f32.mrb[156].mxu0  ;;  %18599 = vmatprep.mubr.msk.bf16.mxu1 %vm20256_vm0, %v20255_v42 }
0x1158   : > { %v8394_v47 = vpack.c.bf16 %v8385_v46, %v8385_v46  ;;  %v18595_v48 = vpop.f32.mrb[157].mxu0 }
0x1159   : > { %v8388_v49 = vpop.f32.mrb[158].mxu0 }
0x115a   : > { %v8404_v50 = vsel %vm1856_vm2, %v8394_v47, 0  ;;  %v18596_v7 = vpop.f32.mrb[159].mxu0 }
0x115b   : > { %18598 = vmatpush3.bf16.msra.mxu1 %v8404_v50 }
0x115c   : > { %18609 = vmatprep.subr.bf16.mxu1 %v20255_v42 }
0x115e   : > { %18600 = vmatmul.mubr.msk.bf16.vlgmr.msra.gmra.mrb[168].mxu1 %vm1852_vm3, %v19264_v5 }
0x115f   : > { %v8488_v52 = vpop.f32.mrb[160].mxu0  ;;  %18611 = vmatprep.mubr.msk.bf16.mxu1 %vm20256_vm0, %v20255_v42 }
0x1160   : > { %v8497_v53 = vpack.c.bf16 %v8488_v52, %v8488_v52  ;;  %v18607_v54 = vpop.f32.mrb[161].mxu0 }
0x1161   : > { %v8491_v9 = vpop.f32.mrb[162].mxu0 }
0x1162   : > { %v8507_v55 = vsel %vm1856_vm2, %v8497_v53, 0  ;;  %v18608_v56 = vpop.f32.mrb[163].mxu0 }
0x1163   : > { %18610 = vmatpush3.bf16.msra.mxu1 %v8507_v55 }
0x1164   : > { %18621 = vmatprep.subr.bf16.mxu1 %v20255_v42 }
0x1166   : > { %18612 = vmatmul.mubr.msk.bf16.vlgmr.msra.gmra.mrb[172].mxu1 %vm1852_vm3, %v19265_v57 }
0x1167   : > { %v8591_v24 = vpop.f32.mrb[164].mxu0  ;;  %18623 = vmatprep.mubr.msk.bf16.mxu1 %vm20256_vm0, %v20255_v42 }
0x1168   : > { %v8600_v27 = vpack.c.bf16 %v8591_v24, %v8591_v24  ;;  %v18619_v58 = vpop.f32.mrb[165].mxu0 }
0x1169   : > { %v8594_v51 = vpop.f32.mrb[166].mxu0 }
0x116a   : > { %v8610_v59 = vsel %vm1856_vm2, %v8600_v27, 0  ;;  %v18620_v60 = vpop.f32.mrb[167].mxu0 }
0x116b   : > { %18622 = vmatpush3.bf16.msra.mxu1 %v8610_v59  ;;  %v8763_v59 = vpop.permute.xlu1 %8762 }
0x116c   : > { %18633 = vmatprep.subr.bf16.mxu1 %v20255_v42 }
0x116e   : > { %18624 = vmatmul.mubr.msk.bf16.vlgmr.msra.gmra.mrb[176].mxu1 %vm1852_vm3, %v19266_v36 }
0x116f   : > { %v8694_v62 = vpop.f32.mrb[168].mxu0  ;;  %18635 = vmatprep.mubr.msk.bf16.mxu1 %vm20256_vm0, %v20255_v42 }
0x1170   : > { %v8703_v63 = vpack.c.bf16 %v8694_v62, %v8694_v62  ;;  %v18631_v1 = vpop.f32.mrb[169].mxu0 }
0x1171   : > { %v8697_v2 = vpop.f32.mrb[170].mxu0  ;;  %v8768_v1 = vpop.permute.xlu0 %8767 }
0x1172   : > { %v8713_v4 = vsel %vm1856_vm2, %v8703_v63, 0  ;;  %v18632_v6 = vpop.f32.mrb[171].mxu0 }
0x1173   : > { %18634 = vmatpush3.bf16.msra.mxu1 %v8713_v4 }
0x1174   : > { %8881 = vmatprep.subr.bf16.mxu1 %v19273_v11 }
0x1176   : > { %18636 = vmatmul.mubr.msk.bf16.vlgmr.msra.gmra.mrb[180].mxu1 %vm1852_vm3, %v19267_v31 }
0x1177   : > { %8913 = vmatprep.mubr.bf16.mxu1 %v20257_v28  ;;  %8882 = vmatpush1.bf16.msra.mxu1 %v19271_v14 }
0x1178   : > { %8883 = vmatprep.subr.bf16.mxu1 %v8879_v17 }
0x117b   : > { %8884 = vmatpush1.bf16.msra.mxu1 %v8876_v45 }
0x1219   : > { %v8131_v19 = vpop.f32.mrb[156].mxu1 }
0x121a   : > { %v8138_v20 = vadd.f32 %v8131_v19, %v21109_v34  ;;  %v18565_v21 = vpop.f32.mrb[157].mxu1  ;;  %v19282_v19 = vld [vmem:[#allocation11 + $0x44] ss:$8 sps:$4 sm:$0xff]  }
0x121b   : > { %v8134_v22 = vpop.f32.mrb[158].mxu1  ;;  %v16809_v21 = vld [vmem:[%s21728_s13 + $0x4] sm:$0xf] }
0x121c   : > { %v8139_v23 = vadd.f32 %v8134_v22, %v21111_v15  ;;  %v18566_v25 = vpop.f32.mrb[159].mxu1  ;;  %v8849_v22 = vld [vmem:[%s21728_s13] sm:$0xf] }
0x121d   : > { %v19283_v25 = vld [vmem:[#allocation11 + $0x50] ss:$8 sps:$4 sm:$0x1f]  }
0x1221   : > { %v8234_v26 = vpop.f32.mrb[160].mxu1 }
0x1222   : > { %v8241_v13 = vadd.f32 %v8234_v26, %v8138_v20  ;;  %v18577_v29 = vpop.f32.mrb[161].mxu1  ;;  %v19285_v20 = vld [vmem:[#allocation11 + $0x54] ss:$8 sps:$4 sm:$0x1f]  }
0x1223   : > { %v8237_v40 = vpop.f32.mrb[162].mxu1  ;;  %v9043_v26 = vand.u32 %v19285_v20, %v20877_v3  ;;  %v19288_v29 = vld [vmem:[#allocation11 + $0x64] ss:$8 sps:$4 sm:$0xff]  }
0x1224   : > { %v8242_v30 = vadd.f32 %v8237_v40, %v8139_v23  ;;  %v18578_v61 = vpop.f32.mrb[163].mxu1  ;;  %v19280_v23 = vld [vmem:[#allocation11 + $0x40] ss:$8 sps:$4 sm:$0xff]   ;;  %v19291_v40 = vld [vmem:[#allocation11 + $0x74] ss:$8 sps:$4 sm:$0x1f]  }
0x1225   : > { %v19289_v61 = vld [vmem:[#allocation11 + $0x70] ss:$8 sps:$4 sm:$0x1f]  }
0x1229   : > { %v8337_v32 = vpop.f32.mrb[164].mxu1 }
0x122a   : > { %v8344_v33 = vadd.f32 %v8337_v32, %v8241_v13  ;;  %v18589_v35 = vpop.f32.mrb[165].mxu1  ;;  %v9040_v13 = vand.u32 %v19283_v25, %v20877_v3  ;;  %v9165_v32 = vand.u32 %v19291_v40, %v20877_v3  ;;  %v19343_v25 = vld [vmem:[#allocation11 + $0x190] ss:$8 sps:$4 sm:$0x1f]  }
0x122b   : > { %v8340_v39 = vpop.f32.mrb[166].mxu1  ;;  %v19294_v35 = vld [vmem:[#allocation11 + $0x84] ss:$8 sps:$4 sm:$0xff]   ;;  %v19351_v40 = vld [vmem:[#allocation11 + $0x1b4] ss:$8 sps:$4 sm:$0x1f]  }
0x122c   : > { %v8345_v0 = vadd.f32 %v8340_v39, %v8242_v30  ;;  %v18590_v43 = vpop.f32.mrb[167].mxu1  ;;  %v19286_v30 = vld [vmem:[#allocation11 + $0x60] ss:$8 sps:$4 sm:$0xff]   ;;  %v19297_v39 = vld [vmem:[#allocation11 + $0x94] ss:$8 sps:$4 sm:$0x1f]  }
0x122d   : > { %v19295_v43 = vld [vmem:[#allocation11 + $0x90] ss:$8 sps:$4 sm:$0x1f]  }
0x1231   : > { %v8440_v44 = vpop.f32.mrb[168].mxu1 }
0x1232   : > { %v8447_v46 = vadd.f32 %v8440_v44, %v8344_v33  ;;  %v18601_v34 = vpop.f32.mrb[169].mxu1  ;;  %v9162_v33 = vand.u32 %v19289_v61, %v20877_v3  ;;  %v9287_v44 = vand.u32 %v19297_v39, %v20877_v3  ;;  %v19349_v61 = vld [vmem:[#allocation11 + $0x1b0] ss:$8 sps:$4 sm:$0x1f]  }
0x1233   : > { %v8443_v47 = vpop.f32.mrb[170].mxu1  ;;  %v19300_v34 = vld [vmem:[#allocation11 + $0xa4] ss:$8 sps:$4 sm:$0xff]   ;;  %v19357_v39 = vld [vmem:[#allocation11 + $0x1d4] ss:$8 sps:$4 sm:$0x1f]  }
0x1234   : > { %v8448_v48 = vadd.f32 %v8443_v47, %v8345_v0  ;;  %v18602_v49 = vpop.f32.mrb[171].mxu1  ;;  %v19292_v0 = vld [vmem:[#allocation11 + $0x80] ss:$8 sps:$4 sm:$0xff]   ;;  %v19303_v47 = vld [vmem:[#allocation11 + $0xb4] ss:$8 sps:$4 sm:$0x1f]  }
0x1235   : > { %v19301_v49 = vld [vmem:[#allocation11 + $0xb0] ss:$8 sps:$4 sm:$0x1f]  }
0x1239   : > { %v8543_v15 = vpop.f32.mrb[172].mxu1 }
0x123a   : > { %v8550_v50 = vadd.f32 %v8543_v15, %v8447_v46  ;;  %v18613_v7 = vpop.f32.mrb[173].mxu1  ;;  %v9284_v46 = vand.u32 %v19295_v43, %v20877_v3  ;;  %v9409_v15 = vand.u32 %v19303_v47, %v20877_v3  ;;  %v19355_v43 = vld [vmem:[#allocation11 + $0x1d0] ss:$8 sps:$4 sm:$0x1f]  }
0x123b   : > { %v8546_v5 = vpop.f32.mrb[174].mxu1  ;;  %v19306_v7 = vld [vmem:[#allocation11 + $0xc4] ss:$8 sps:$4 sm:$0xff]   ;;  %v19363_v47 = vld [vmem:[#allocation11 + $0x1f4] ss:$8 sps:$4 sm:$0x1f]  }
0x123c   : > { %v8551_v52 = vadd.f32 %v8546_v5, %v8448_v48  ;;  %v18614_v53 = vpop.f32.mrb[175].mxu1  ;;  %v19298_v48 = vld [vmem:[#allocation11 + $0xa0] ss:$8 sps:$4 sm:$0xff]   ;;  %v19309_v5 = vld [vmem:[#allocation11 + $0xd4] ss:$8 sps:$4 sm:$0x1f]  }
0x123d   : > { %v19307_v53 = vld [vmem:[#allocation11 + $0xd0] ss:$8 sps:$4 sm:$0x1f]  }
0x1241   : > { %v8646_v54 = vpop.f32.mrb[176].mxu1 }
0x1242   : > { %v8653_v9 = vadd.f32 %v8646_v54, %v8550_v50  ;;  %v18625_v55 = vpop.f32.mrb[177].mxu1  ;;  %v9406_v50 = vand.u32 %v19301_v49, %v20877_v3  ;;  %v9531_v54 = vand.u32 %v19309_v5, %v20877_v3  ;;  %v19361_v49 = vld [vmem:[#allocation11 + $0x1f0] ss:$8 sps:$4 sm:$0x1f]  }
0x1243   : > { %v8649_v56 = vpop.f32.mrb[178].mxu1  ;;  %v19312_v55 = vld [vmem:[#allocation11 + $0xe4] ss:$8 sps:$4 sm:$0xff]   ;;  %v19369_v5 = vld [vmem:[#allocation11 + $0x214] ss:$8 sps:$4 sm:$0x1f]  }
0x1244   : > { %v8654_v57 = vadd.f32 %v8649_v56, %v8551_v52  ;;  %v18626_v24 = vpop.f32.mrb[179].mxu1  ;;  %v19304_v52 = vld [vmem:[#allocation11 + $0xc0] ss:$8 sps:$4 sm:$0xff]   ;;  %v19315_v56 = vld [vmem:[#allocation11 + $0xf4] ss:$8 sps:$4 sm:$0x1f]  }
0x1245   : > { %v19313_v24 = vld [vmem:[#allocation11 + $0xf0] ss:$8 sps:$4 sm:$0x1f]  }
0x1249   : > { %v8749_v27 = vpop.f32.mrb[180].mxu1 }
0x124a   : > { %v8756_v58 = vadd.f32 %v8749_v27, %v8653_v9  ;;  %v18637_v51 = vpop.f32.mrb[181].mxu1  ;;  %v9528_v9 = vand.u32 %v19307_v53, %v20877_v3  ;;  %v9653_v27 = vand.u32 %v19315_v56, %v20877_v3  ;;  %v19367_v53 = vld [vmem:[#allocation11 + $0x210] ss:$8 sps:$4 sm:$0x1f]  }
0x124b   : > { %v8752_v60 = vpop.f32.mrb[182].mxu1  ;;  %v19318_v51 = vld [vmem:[#allocation11 + $0x104] ss:$8 sps:$4 sm:$0xff]   ;;  %v19375_v56 = vld [vmem:[#allocation11 + $0x234] ss:$8 sps:$4 sm:$0x1f]  }
0x124c   : > { %v8770_v36 = vadd.f32 %v8763_v59, %v8756_v58  ;;  %v8757_v62 = vadd.f32 %v8752_v60, %v8654_v57  ;;  %v18638_v63 = vpop.f32.mrb[183].mxu1  ;;  %v19310_v57 = vld [vmem:[#allocation11 + $0xe0] ss:$8 sps:$4 sm:$0xff]   ;;  %v9650_v58 = vand.u32 %v19313_v24, %v20877_v3  ;;  %v19321_v59 = vld [vmem:[#allocation11 + $0x114] ss:$8 sps:$4 sm:$0x1f]  }
0x124d   : > { %v19316_v60 = vld [vmem:[#allocation11 + $0x100] ss:$8 sps:$4 sm:$0xff]   ;;  %v19373_v24 = vld [vmem:[#allocation11 + $0x230] ss:$8 sps:$4 sm:$0x1f]  }
0x124e   : > { %v8771_v2 = vadd.f32 %v8768_v1, %v8757_v62  ;;  %v8772_v4 = vmax.f32 %v8770_v36, 0.0  ;;  %v19319_v36 = vld [vmem:[#allocation11 + $0x110] ss:$8 sps:$4 sm:$0x1f]   ;;  %v9775_v62 = vand.u32 %v19321_v59, %v20877_v3  ;;  %v19324_v1 = vld [vmem:[#allocation11 + $0x124] ss:$8 sps:$4 sm:$0xff]  }
0x124f   : > { %v9772_v63 = vand.u32 %v19319_v36, %v20877_v3  ;;  %v19381_v59 = vld [vmem:[#allocation11 + $0x254] ss:$8 sps:$4 sm:$0x1f]   ;;  %v19379_v36 = vld [vmem:[#allocation11 + $0x250] ss:$8 sps:$4 sm:$0x1f]  }
0x1250   : > { %v8773_v6 = vmax.f32 %v8771_v2, 0.0  ;;  %v19327_v2 = vld [vmem:[#allocation11 + $0x134] ss:$8 sps:$4 sm:$0x1f]  }
0x1252   : > { %v21173_v31 = vpack.c.bf16 %v8773_v6, %v8772_v4  ;;  %v19322_v4 = vld [vmem:[#allocation11 + $0x120] ss:$8 sps:$4 sm:$0xff]   ;;  %v19325_v6 = vld [vmem:[#allocation11 + $0x130] ss:$8 sps:$4 sm:$0x1f]  }
0x1254   : > { %16803 = vmatmul.mubr.msk.bf16.vlgmr.msra.gmra.mrb[172].mxu0 %vm6661_vm7, %v21173_v31  ;;  %16808 = vmatmul.mubr.msk.bf16.vlgmr.msra.gmra.mrb[184].mxu1 %vm6661_vm7, %v21173_v31 }
0x1255   : > { %8963 = vmatprep.mubr.bf16.mxu0 %v20257_v28  ;;  %9007 = vmatprep.mubr.bf16.mxu1 %v20257_v28 }
0x1327   : > { %v8840_v8 = vpop.f32.mrb[172].mxu0  ;;  %v8915_v11 = vpop.f32.mrb[184].mxu1 }
0x1328   : > { %v8842_v12 = vpop.f32.mrb[173].mxu0  ;;  %v8917_v14 = vpop.f32.mrb[185].mxu1 }
0x1329   : > { %v8844_v41 = vpop.f32.mrb[174].mxu0  ;;  %v8919_v38 = vpop.f32.mrb[186].mxu1 }
0x132a   : > { %v8850_v37 = vpack.c.bf16 %v8844_v41, %v8840_v8  ;;  %v8926_v10 = vpack.c.bf16 %v8919_v38, %v8915_v11  ;;  %v8846_v16 = vpop.f32.mrb[175].mxu0  ;;  %v8921_v17 = vpop.f32.mrb[187].mxu1  ;;  %v9897_v8 = vand.u32 %v19327_v2, %v20877_v3  ;;  %v9894_v11 = vand.u32 %v19325_v6, %v20877_v3  ;;  %v19328_v41 = vld [vmem:[#allocation11 + $0x140] ss:$8 sps:$4 sm:$0xff]  }
0x132b   : > { %v8851_v18 = vpack.c.bf16 %v8846_v16, %v8842_v12  ;;  %v8927_v45 = vpack.c.bf16 %v8921_v17, %v8917_v14  ;;  %v19330_v12 = vld [vmem:[#allocation11 + $0x144] ss:$8 sps:$4 sm:$0xff]   ;;  %v19333_v14 = vld [vmem:[#allocation11 + $0x154] ss:$8 sps:$4 sm:$0x1f]  }
0x132c   : > { %v19331_v38 = vld [vmem:[#allocation11 + $0x150] ss:$8 sps:$4 sm:$0x1f]   ;;  %v19336_v16 = vld [vmem:[#allocation11 + $0x164] ss:$8 sps:$4 sm:$0xff]  }
0x132d   : > { %8931 = vmatprep.subr.bf16.mxu0 %v8927_v45  ;;  %8975 = vmatprep.subr.bf16.mxu1 %v8851_v18  ;;  %v19339_v17 = vld [vmem:[#allocation11 + $0x174] ss:$8 sps:$4 sm:$0x1f]   ;;  %v19334_v18 = vld [vmem:[#allocation11 + $0x160] ss:$8 sps:$4 sm:$0xff]  }
0x132e   : > { %8932 = vmatpush1.bf16.msra.mxu0 %v8926_v10  ;;  %8976 = vmatpush1.bf16.msra.mxu1 %v8850_v37  ;;  %v10019_v37 = vand.u32 %v19333_v14, %v20877_v3  ;;  %v10016_v10 = vand.u32 %v19331_v38, %v20877_v3  ;;  %v19337_v45 = vld [vmem:[#allocation11 + $0x170] ss:$8 sps:$4 sm:$0x1f]   ;;  %v19387_v2 = vld [vmem:[#allocation11 + $0x274] ss:$8 sps:$4 sm:$0x1f]  }
0x132f   : > { %9045 = vmatprep.subr.bf16.mxu0 %v19282_v19  ;;  %v10141_v19 = vand.u32 %v19339_v17, %v20877_v3  ;;  %v10138_v20 = vand.u32 %v19337_v45, %v20877_v3  ;;  %v19385_v6 = vld [vmem:[#allocation11 + $0x270] ss:$8 sps:$4 sm:$0x1f]   ;;  %v19393_v14 = vld [vmem:[#allocation11 + $0x294] ss:$8 sps:$4 sm:$0x1f]  }
0x1330   : > { %v19391_v38 = vld [vmem:[#allocation11 + $0x290] ss:$8 sps:$4 sm:$0x1f]   ;;  %v19399_v17 = vld [vmem:[#allocation11 + $0x2b4] ss:$8 sps:$4 sm:$0x1f]  }
0x1331   : > { %16810 = vmatmul.mubr.msk.bf16.vlgmr.msra.gmra.mrb[176].mxu0 %vm1123_vm1, %v16809_v21  ;;  %16811 = vmatmul.mubr.msk.bf16.vlgmr.msra.gmra.mrb[188].mxu1 %vm1123_vm1, %v8849_v22  ;;  %v19342_v21 = vld [vmem:[#allocation11 + $0x184] ss:$8 sps:$4 sm:$0xff]   ;;  %v19345_v22 = vld [vmem:[#allocation11 + $0x194] ss:$8 sps:$4 sm:$0x1f]  }
0x1332   : > { %9046 = vmatpush1.bf16.msra.mxu0 %v19280_v23  ;;  %9077 = vmatprep.mubr.bf16.mxu0 %v20257_v28  ;;  %v19340_v23 = vld [vmem:[#allocation11 + $0x180] ss:$8 sps:$4 sm:$0xff]   ;;  %v19397_v45 = vld [vmem:[#allocation11 + $0x2b0] ss:$8 sps:$4 sm:$0x1f]  }
0x1333   : > { %9047 = vmatprep.subr.bf16.mxu0 %v9043_v26  ;;  %9127 = vmatprep.mubr.bf16.mxu1 %v20257_v28  ;;  %v10263_v26 = vand.u32 %v19345_v22, %v20877_v3  ;;  %v19405_v22 = vld [vmem:[#allocation11 + $0x2d4] ss:$8 sps:$4 sm:$0x1f]  }
0x1336   : > { %9048 = vmatpush1.bf16.msra.mxu0 %v9040_v13  ;;  %v10260_v13 = vand.u32 %v19343_v25, %v20877_v3  ;;  %v19403_v25 = vld [vmem:[#allocation11 + $0x2d0] ss:$8 sps:$4 sm:$0x1f]  }
0x1337   : > { %9167 = vmatprep.subr.bf16.mxu0 %v19288_v29  ;;  %v19348_v29 = vld [vmem:[#allocation11 + $0x1a4] ss:$8 sps:$4 sm:$0xff]  }
0x1339   : > { %16816 = vmatmul.mubr.msk.bf16.vlgmr.msra.gmra.mrb[180].mxu0 %vm6661_vm7, %v21173_v31 }
0x133a   : > { %9168 = vmatpush1.bf16.msra.mxu0 %v19286_v30  ;;  %9199 = vmatprep.mubr.bf16.mxu0 %v20257_v28  ;;  %v19346_v30 = vld [vmem:[#allocation11 + $0x1a0] ss:$8 sps:$4 sm:$0xff]  }
0x133b   : > { %9169 = vmatprep.subr.bf16.mxu0 %v9165_v32  ;;  %v10385_v32 = vand.u32 %v19351_v40, %v20877_v3  ;;  %v19411_v40 = vld [vmem:[#allocation11 + $0x2f4] ss:$8 sps:$4 sm:$0x1f]  }
0x133e   : > { %9170 = vmatpush1.bf16.msra.mxu0 %v9162_v33  ;;  %v10382_v33 = vand.u32 %v19349_v61, %v20877_v3  ;;  %v19409_v61 = vld [vmem:[#allocation11 + $0x2f0] ss:$8 sps:$4 sm:$0x1f]  }
0x133f   : > { %9289 = vmatprep.subr.bf16.mxu0 %v19294_v35  ;;  %v19354_v35 = vld [vmem:[#allocation11 + $0x1c4] ss:$8 sps:$4 sm:$0xff]  }
0x1341   : > { %16823 = vmatmul.mubr.msk.bf16.vlgmr.msra.gmra.mrb[184].mxu0 %vm6661_vm7, %v21173_v31 }
0x1342   : > { %9290 = vmatpush1.bf16.msra.mxu0 %v19292_v0  ;;  %9321 = vmatprep.mubr.bf16.mxu0 %v20257_v28  ;;  %v19352_v0 = vld [vmem:[#allocation11 + $0x1c0] ss:$8 sps:$4 sm:$0xff]  }
0x1343   : > { %9291 = vmatprep.subr.bf16.mxu0 %v9287_v44  ;;  %v10507_v44 = vand.u32 %v19357_v39, %v20877_v3  ;;  %v19417_v39 = vld [vmem:[#allocation11 + $0x314] ss:$8 sps:$4 sm:$0x1f]  }
0x1346   : > { %9292 = vmatpush1.bf16.msra.mxu0 %v9284_v46  ;;  %v10504_v46 = vand.u32 %v19355_v43, %v20877_v3  ;;  %v19415_v43 = vld [vmem:[#allocation11 + $0x310] ss:$8 sps:$4 sm:$0x1f]  }
0x1347   : > { %9411 = vmatprep.subr.bf16.mxu0 %v19300_v34  ;;  %v19360_v34 = vld [vmem:[#allocation11 + $0x1e4] ss:$8 sps:$4 sm:$0xff]  }
0x1349   : > { %16830 = vmatmul.mubr.msk.bf16.vlgmr.msra.gmra.mrb[188].mxu0 %vm6661_vm7, %v21173_v31 }
0x134a   : > { %9412 = vmatpush1.bf16.msra.mxu0 %v19298_v48  ;;  %9443 = vmatprep.mubr.bf16.mxu0 %v20257_v28  ;;  %v19358_v48 = vld [vmem:[#allocation11 + $0x1e0] ss:$8 sps:$4 sm:$0xff]  }
0x134b   : > { %9413 = vmatprep.subr.bf16.mxu0 %v9409_v15  ;;  %v10629_v15 = vand.u32 %v19363_v47, %v20877_v3 }
0x134e   : > { %9414 = vmatpush1.bf16.msra.mxu0 %v9406_v50  ;;  %v10626_v50 = vand.u32 %v19361_v49, %v20877_v3 }
0x134f   : > { %9533 = vmatprep.subr.bf16.mxu0 %v19306_v7  ;;  %v19366_v7 = vld [vmem:[#allocation11 + $0x204] ss:$8 sps:$4 sm:$0xff]  }
0x1351   : > { %16837 = vmatmul.mubr.msk.bf16.vlgmr.msra.gmra.mrb[192].mxu0 %vm6661_vm7, %v21173_v31 }
0x1352   : > { %9534 = vmatpush1.bf16.msra.mxu0 %v19304_v52  ;;  %9565 = vmatprep.mubr.bf16.mxu0 %v20257_v28  ;;  %v19364_v52 = vld [vmem:[#allocation11 + $0x200] ss:$8 sps:$4 sm:$0xff]  }
0x1353   : > { %9535 = vmatprep.subr.bf16.mxu0 %v9531_v54  ;;  %v10751_v54 = vand.u32 %v19369_v5, %v20877_v3 }
0x1356   : > { %9536 = vmatpush1.bf16.msra.mxu0 %v9528_v9  ;;  %v10748_v9 = vand.u32 %v19367_v53, %v20877_v3 }
0x1357   : > { %9655 = vmatprep.subr.bf16.mxu0 %v19312_v55  ;;  %v19372_v55 = vld [vmem:[#allocation11 + $0x224] ss:$8 sps:$4 sm:$0xff]  }
0x1359   : > { %16844 = vmatmul.mubr.msk.bf16.vlgmr.msra.gmra.mrb[196].mxu0 %vm6661_vm7, %v21173_v31 }
0x135a   : > { %9656 = vmatpush1.bf16.msra.mxu0 %v19310_v57  ;;  %9687 = vmatprep.mubr.bf16.mxu0 %v20257_v28  ;;  %v19370_v57 = vld [vmem:[#allocation11 + $0x220] ss:$8 sps:$4 sm:$0xff]  }
0x135b   : > { %9657 = vmatprep.subr.bf16.mxu0 %v9653_v27  ;;  %v10873_v27 = vand.u32 %v19375_v56, %v20877_v3 }
0x135e   : > { %9658 = vmatpush1.bf16.msra.mxu0 %v9650_v58  ;;  %v10870_v58 = vand.u32 %v19373_v24, %v20877_v3 }
0x135f   : > { %9777 = vmatprep.subr.bf16.mxu0 %v19318_v51  ;;  %v19378_v51 = vld [vmem:[#allocation11 + $0x244] ss:$8 sps:$4 sm:$0xff]  }
0x1361   : > { %16851 = vmatmul.mubr.msk.bf16.vlgmr.msra.gmra.mrb[200].mxu0 %vm6661_vm7, %v21173_v31 }
0x1362   : > { %9778 = vmatpush1.bf16.msra.mxu0 %v19316_v60  ;;  %9809 = vmatprep.mubr.bf16.mxu0 %v20257_v28  ;;  %v19376_v60 = vld [vmem:[#allocation11 + $0x240] ss:$8 sps:$4 sm:$0xff]  }
0x1363   : > { %9779 = vmatprep.subr.bf16.mxu0 %v9775_v62  ;;  %v10995_v62 = vand.u32 %v19381_v59, %v20877_v3 }
0x1366   : > { %9780 = vmatpush1.bf16.msra.mxu0 %v9772_v63  ;;  %v10992_v63 = vand.u32 %v19379_v36, %v20877_v3  ;;  %v16824_v36 = vld [vmem:[%s21728_s13 + $0xc] sm:$0xf] }
0x1367   : > { %9899 = vmatprep.subr.bf16.mxu0 %v19324_v1  ;;  %v19384_v1 = vld [vmem:[#allocation11 + $0x264] ss:$8 sps:$4 sm:$0xff]  }
0x1369   : > { %16858 = vmatmul.mubr.msk.bf16.vlgmr.msra.gmra.mrb[204].mxu0 %vm6661_vm7, %v21173_v31 }
0x136a   : > { %9900 = vmatpush1.bf16.msra.mxu0 %v19322_v4  ;;  %9931 = vmatprep.mubr.bf16.mxu0 %v20257_v28  ;;  %v19382_v4 = vld [vmem:[#allocation11 + $0x260] ss:$8 sps:$4 sm:$0xff]  }
0x136b   : > { %9901 = vmatprep.subr.bf16.mxu0 %v9897_v8  ;;  %v11117_v8 = vand.u32 %v19387_v2, %v20877_v3 }
0x136e   : > { %9902 = vmatpush1.bf16.msra.mxu0 %v9894_v11  ;;  %v11114_v11 = vand.u32 %v19385_v6, %v20877_v3 }
0x136f   : > { %10021 = vmatprep.subr.bf16.mxu0 %v19330_v12  ;;  %v19390_v12 = vld [vmem:[#allocation11 + $0x284] ss:$8 sps:$4 sm:$0xff]  }
0x1371   : > { %16865 = vmatmul.mubr.msk.bf16.vlgmr.msra.gmra.mrb[208].mxu0 %vm6661_vm7, %v21173_v31 }
0x1372   : > { %10022 = vmatpush1.bf16.msra.mxu0 %v19328_v41  ;;  %10053 = vmatprep.mubr.bf16.mxu0 %v20257_v28  ;;  %v19388_v41 = vld [vmem:[#allocation11 + $0x280] ss:$8 sps:$4 sm:$0xff]  }
0x1373   : > { %10023 = vmatprep.subr.bf16.mxu0 %v10019_v37  ;;  %v11239_v37 = vand.u32 %v19393_v14, %v20877_v3 }
0x1376   : > { %10024 = vmatpush1.bf16.msra.mxu0 %v10016_v10  ;;  %v11236_v10 = vand.u32 %v19391_v38, %v20877_v3 }
0x1377   : > { %10143 = vmatprep.subr.bf16.mxu0 %v19336_v16  ;;  %v19396_v16 = vld [vmem:[#allocation11 + $0x2a4] ss:$8 sps:$4 sm:$0xff]  }
0x1379   : > { %16872 = vmatmul.mubr.msk.bf16.vlgmr.msra.gmra.mrb[212].mxu0 %vm6661_vm7, %v21173_v31 }
0x137a   : > { %10144 = vmatpush1.bf16.msra.mxu0 %v19334_v18  ;;  %10175 = vmatprep.mubr.bf16.mxu0 %v20257_v28  ;;  %v19394_v18 = vld [vmem:[#allocation11 + $0x2a0] ss:$8 sps:$4 sm:$0xff]  }
0x137b   : > { %10145 = vmatprep.subr.bf16.mxu0 %v10141_v19  ;;  %v11361_v19 = vand.u32 %v19399_v17, %v20877_v3 }
0x137e   : > { %10146 = vmatpush1.bf16.msra.mxu0 %v10138_v20  ;;  %v11358_v20 = vand.u32 %v19397_v45, %v20877_v3 }
0x137f   : > { %10265 = vmatprep.subr.bf16.mxu0 %v19342_v21  ;;  %v19402_v21 = vld [vmem:[#allocation11 + $0x2c4] ss:$8 sps:$4 sm:$0xff]  }
0x1381   : > { %16879 = vmatmul.mubr.msk.bf16.vlgmr.msra.gmra.mrb[216].mxu0 %vm6661_vm7, %v21173_v31 }
0x1382   : > { %10266 = vmatpush1.bf16.msra.mxu0 %v19340_v23  ;;  %10297 = vmatprep.mubr.bf16.mxu0 %v20257_v28  ;;  %v19400_v23 = vld [vmem:[#allocation11 + $0x2c0] ss:$8 sps:$4 sm:$0xff]  }
0x1383   : > { %10267 = vmatprep.subr.bf16.mxu0 %v10263_v26  ;;  %v11483_v26 = vand.u32 %v19405_v22, %v20877_v3 }
0x1386   : > { %10268 = vmatpush1.bf16.msra.mxu0 %v10260_v13  ;;  %v11480_v13 = vand.u32 %v19403_v25, %v20877_v3 }
0x1387   : > { %10387 = vmatprep.subr.bf16.mxu0 %v19348_v29  ;;  %v19408_v29 = vld [vmem:[#allocation11 + $0x2e4] ss:$8 sps:$4 sm:$0xff]  }
0x1389   : > { %16886 = vmatmul.mubr.msk.bf16.vlgmr.msra.gmra.mrb[220].mxu0 %vm6661_vm7, %v21173_v31 }
0x138a   : > { %10388 = vmatpush1.bf16.msra.mxu0 %v19346_v30  ;;  %10419 = vmatprep.mubr.bf16.mxu0 %v20257_v28  ;;  %v19406_v30 = vld [vmem:[#allocation11 + $0x2e0] ss:$8 sps:$4 sm:$0xff]  }
0x138b   : > { %10389 = vmatprep.subr.bf16.mxu0 %v10385_v32  ;;  %v11605_v32 = vand.u32 %v19411_v40, %v20877_v3  ;;  %v16852_v40 = vld [vmem:[%s21728_s13 + $0x1c] sm:$0xf] }
0x138e   : > { %10390 = vmatpush1.bf16.msra.mxu0 %v10382_v33  ;;  %v11602_v33 = vand.u32 %v19409_v61, %v20877_v3 }
0x138f   : > { %10509 = vmatprep.subr.bf16.mxu0 %v19354_v35  ;;  %v19414_v35 = vld [vmem:[#allocation11 + $0x304] ss:$8 sps:$4 sm:$0xff]  }
0x1391   : > { %16893 = vmatmul.mubr.msk.bf16.vlgmr.msra.gmra.mrb[224].mxu0 %vm6661_vm7, %v21173_v31 }
0x1392   : > { %10510 = vmatpush1.bf16.msra.mxu0 %v19352_v0  ;;  %10541 = vmatprep.mubr.bf16.mxu0 %v20257_v28  ;;  %v19412_v0 = vld [vmem:[#allocation11 + $0x300] ss:$8 sps:$4 sm:$0xff]  }
0x1393   : > { %10511 = vmatprep.subr.bf16.mxu0 %v10507_v44  ;;  %v11727_v44 = vand.u32 %v19417_v39, %v20877_v3 }
0x1396   : > { %10512 = vmatpush1.bf16.msra.mxu0 %v10504_v46  ;;  %v11724_v46 = vand.u32 %v19415_v43, %v20877_v3 }
0x1397   : > { %10631 = vmatprep.subr.bf16.mxu0 %v19360_v34 }
0x1399   : > { %16900 = vmatmul.mubr.msk.bf16.vlgmr.msra.gmra.mrb[228].mxu0 %vm6661_vm7, %v21173_v31 }
0x139a   : > { %10632 = vmatpush1.bf16.msra.mxu0 %v19358_v48  ;;  %10663 = vmatprep.mubr.bf16.mxu0 %v20257_v28 }
0x139b   : > { %10633 = vmatprep.subr.bf16.mxu0 %v10629_v15 }
0x139e   : > { %10634 = vmatpush1.bf16.msra.mxu0 %v10626_v50 }
0x139f   : > { %10753 = vmatprep.subr.bf16.mxu0 %v19366_v7 }
0x13a1   : > { %16907 = vmatmul.mubr.msk.bf16.vlgmr.msra.gmra.mrb[232].mxu0 %vm6661_vm7, %v21173_v31 }
0x13a2   : > { %10754 = vmatpush1.bf16.msra.mxu0 %v19364_v52  ;;  %10785 = vmatprep.mubr.bf16.mxu0 %v20257_v28 }
0x13a3   : > { %10755 = vmatprep.subr.bf16.mxu0 %v10751_v54 }
0x13a6   : > { %10756 = vmatpush1.bf16.msra.mxu0 %v10748_v9 }
0x13a7   : > { %10875 = vmatprep.subr.bf16.mxu0 %v19372_v55 }
0x13a9   : > { %16914 = vmatmul.mubr.msk.bf16.vlgmr.msra.gmra.mrb[236].mxu0 %vm6661_vm7, %v21173_v31 }
0x13aa   : > { %10876 = vmatpush1.bf16.msra.mxu0 %v19370_v57  ;;  %10907 = vmatprep.mubr.bf16.mxu0 %v20257_v28 }
0x13ab   : > { %10877 = vmatprep.subr.bf16.mxu0 %v10873_v27 }
0x13ae   : > { %10878 = vmatpush1.bf16.msra.mxu0 %v10870_v58 }
0x13af   : > { %10997 = vmatprep.subr.bf16.mxu0 %v19378_v51 }
0x13b1   : > { %16921 = vmatmul.mubr.msk.bf16.vlgmr.msra.gmra.mrb[240].mxu0 %vm6661_vm7, %v21173_v31 }
0x13b2   : > { %10998 = vmatpush1.bf16.msra.mxu0 %v19376_v60  ;;  %11029 = vmatprep.mubr.bf16.mxu0 %v20257_v28 }
0x13b3   : > { %10999 = vmatprep.subr.bf16.mxu0 %v10995_v62 }
0x13b6   : > { %11000 = vmatpush1.bf16.msra.mxu0 %v10992_v63 }
0x13b7   : > { %11119 = vmatprep.subr.bf16.mxu0 %v19384_v1 }
0x13b9   : > { %16928 = vmatmul.mubr.msk.bf16.vlgmr.msra.gmra.mrb[244].mxu0 %vm6661_vm7, %v21173_v31 }
0x13ba   : > { %11120 = vmatpush1.bf16.msra.mxu0 %v19382_v4  ;;  %11151 = vmatprep.mubr.bf16.mxu0 %v20257_v28 }
0x13bb   : > { %11121 = vmatprep.subr.bf16.mxu0 %v11117_v8  ;;  %v16831_v8 = vld [vmem:[%s21728_s13 + $0x10] sm:$0xf] }
0x13be   : > { %11122 = vmatpush1.bf16.msra.mxu0 %v11114_v11 }
0x13bf   : > { %11241 = vmatprep.subr.bf16.mxu0 %v19390_v12 }
0x13c1   : > { %16935 = vmatmul.mubr.msk.bf16.vlgmr.msra.gmra.mrb[248].mxu0 %vm6661_vm7, %v21173_v31 }
0x13c2   : > { %11242 = vmatpush1.bf16.msra.mxu0 %v19388_v41  ;;  %11273 = vmatprep.mubr.bf16.mxu0 %v20257_v28 }
0x13c3   : > { %11243 = vmatprep.subr.bf16.mxu0 %v11239_v37 }
0x13c6   : > { %11244 = vmatpush1.bf16.msra.mxu0 %v11236_v10  ;;  %v16838_v10 = vld [vmem:[%s21728_s13 + $0x14] sm:$0xf] }
0x13c7   : > { %11363 = vmatprep.subr.bf16.mxu0 %v19396_v16 }
0x13c9   : > { %16942 = vmatmul.mubr.msk.bf16.vlgmr.msra.gmra.mrb[252].mxu0 %vm6661_vm7, %v21173_v31 }
0x13ca   : > { %11364 = vmatpush1.bf16.msra.mxu0 %v19394_v18  ;;  %11395 = vmatprep.mubr.bf16.mxu0 %v20257_v28 }
0x13cb   : > { %11365 = vmatprep.subr.bf16.mxu0 %v11361_v19 }
0x13ce   : > { %11366 = vmatpush1.bf16.msra.mxu0 %v11358_v20 }
0x13cf   : > { %11485 = vmatprep.subr.bf16.mxu0 %v19402_v21  ;;  %v16845_v21 = vld [vmem:[%s21728_s13 + $0x18] sm:$0xf] }
0x13d1   : > { %16949 = vmatmul.mubr.msk.bf16.vlgmr.msra.gmra.mrb[0].mxu0 %vm6661_vm7, %v21173_v31 }
0x13d2   : > { %11486 = vmatpush1.bf16.msra.mxu0 %v19400_v23  ;;  %11517 = vmatprep.mubr.bf16.mxu0 %v20257_v28 }
0x13d3   : > { %11487 = vmatprep.subr.bf16.mxu0 %v11483_v26 }
0x13d6   : > { %11488 = vmatpush1.bf16.msra.mxu0 %v11480_v13 }
0x13d7   : > { %11607 = vmatprep.subr.bf16.mxu0 %v19408_v29 }
0x13d9   : > { %16956 = vmatmul.mubr.msk.bf16.vlgmr.msra.gmra.mrb[4].mxu0 %vm6661_vm7, %v21173_v31 }
0x13da   : > { %11608 = vmatpush1.bf16.msra.mxu0 %v19406_v30  ;;  %11639 = vmatprep.mubr.bf16.mxu0 %v20257_v28 }
0x13db   : > { %11609 = vmatprep.subr.bf16.mxu0 %v11605_v32 }
0x13de   : > { %11610 = vmatpush1.bf16.msra.mxu0 %v11602_v33 }
0x13df   : > { %11729 = vmatprep.subr.bf16.mxu0 %v19414_v35 }
0x13e1   : > { %16963 = vmatmul.mubr.msk.bf16.vlgmr.msra.gmra.mrb[8].mxu0 %vm6661_vm7, %v21173_v31 }
0x13e2   : > { %11730 = vmatpush1.bf16.msra.mxu0 %v19412_v0  ;;  %11761 = vmatprep.mubr.bf16.mxu0 %v20257_v28  ;;  %v16859_v0 = vld [vmem:[%s21728_s13 + $0x20] sm:$0xf] }
0x13e3   : > { %11731 = vmatprep.subr.bf16.mxu0 %v11727_v44 }
0x13e6   : > { %11732 = vmatpush1.bf16.msra.mxu0 %v11724_v46 }
0x13e9   : > { %16970 = vmatmul.mubr.msk.bf16.vlgmr.msra.gmra.mrb[12].mxu0 %vm6661_vm7, %v21173_v31  ;;  %v16817_v31 = vld [vmem:[%s21728_s13 + $0x8] sm:$0xf] }
0x1404   : > { %v8965_v34 = vpop.f32.mrb[176].mxu0  ;;  %v9009_v47 = vpop.f32.mrb[188].mxu1 }
0x1405   : > { %v21305_v48 = vadd.f32 %v9009_v47, %v8965_v34  ;;  %v8967_v49 = vpop.f32.mrb[177].mxu0  ;;  %v9011_v15 = vpop.f32.mrb[189].mxu1 }
0x1406   : > { %v21307_v50 = vadd.f32 %v9011_v15, %v8967_v49  ;;  %v8969_v7 = vpop.f32.mrb[178].mxu0  ;;  %v9013_v5 = vpop.f32.mrb[190].mxu1  ;;  %v16866_v15 = vld [vmem:[%s21728_s13 + $0x24] sm:$0xf] }
0x1407   : > { %v8970_v52 = vpop.f32.mrb[179].mxu0  ;;  %v9014_v53 = vpop.f32.mrb[191].mxu1 }
0x140c   : > { %v9079_v3 = vpop.f32.mrb[180].mxu0 }
0x140d   : > { %v9081_v54 = vpop.f32.mrb[181].mxu0 }
0x140e   : > { %v9083_v9 = vpop.f32.mrb[182].mxu0 }
0x140f   : > { %v9090_v55 = vpack.c.bf16 %v9083_v9, %v9079_v3  ;;  %v9085_v56 = vpop.f32.mrb[183].mxu0  ;;  %v16873_v9 = vld [vmem:[%s21728_s13 + $0x28] sm:$0xf] }
0x1410   : > { %v9091_v57 = vpack.c.bf16 %v9085_v56, %v9081_v54 }
0x1412   : > { %9095 = vmatprep.subr.bf16.mxu1 %v9091_v57 }
0x1413   : > { %9096 = vmatpush1.bf16.msra.mxu1 %v9090_v55 }
0x1414   : > { %v9201_v24 = vpop.f32.mrb[184].mxu0 }
0x1415   : > { %v9203_v27 = vpop.f32.mrb[185].mxu0 }
0x1416   : > { %16818 = vmatmul.mubr.msk.bf16.vlgmr.msra.gmra.mrb[192].mxu1 %vm1123_vm1, %v16817_v31  ;;  %v9205_v58 = vpop.f32.mrb[186].mxu0 }
0x1417   : > { %v9212_v51 = vpack.c.bf16 %v9205_v58, %v9201_v24  ;;  %v9207_v59 = vpop.f32.mrb[187].mxu0  ;;  %9249 = vmatprep.mubr.bf16.mxu1 %v20257_v28  ;;  %v16880_v58 = vld [vmem:[%s21728_s13 + $0x2c] sm:$0xf] }
0x1418   : > { %v9213_v60 = vpack.c.bf16 %v9207_v59, %v9203_v27 }
0x141a   : > { %9217 = vmatprep.subr.bf16.mxu1 %v9213_v60 }
0x141b   : > { %9218 = vmatpush1.bf16.msra.mxu1 %v9212_v51 }
0x141c   : > { %v9323_v62 = vpop.f32.mrb[188].mxu0 }
0x141d   : > { %v9325_v63 = vpop.f32.mrb[189].mxu0 }
0x141e   : > { %16825 = vmatmul.mubr.msk.bf16.vlgmr.msra.gmra.mrb[196].mxu1 %vm1123_vm1, %v16824_v36  ;;  %v9327_v1 = vpop.f32.mrb[190].mxu0 }
0x141f   : > { %v9334_v2 = vpack.c.bf16 %v9327_v1, %v9323_v62  ;;  %v9329_v4 = vpop.f32.mrb[191].mxu0  ;;  %9371 = vmatprep.mubr.bf16.mxu1 %v20257_v28  ;;  %v16887_v1 = vld [vmem:[%s21728_s13 + $0x30] sm:$0xf] }
0x1420   : > { %v9335_v6 = vpack.c.bf16 %v9329_v4, %v9325_v63 }
0x1422   : > { %9339 = vmatprep.subr.bf16.mxu1 %v9335_v6 }
0x1423   : > { %9340 = vmatpush1.bf16.msra.mxu1 %v9334_v2 }
0x1424   : > { %v9445_v11 = vpop.f32.mrb[192].mxu0 }
0x1425   : > { %v9447_v12 = vpop.f32.mrb[193].mxu0 }
0x1426   : > { %16832 = vmatmul.mubr.msk.bf16.vlgmr.msra.gmra.mrb[200].mxu1 %vm1123_vm1, %v16831_v8  ;;  %v9449_v14 = vpop.f32.mrb[194].mxu0 }
0x1427   : > { %v9456_v41 = vpack.c.bf16 %v9449_v14, %v9445_v11  ;;  %v9451_v38 = vpop.f32.mrb[195].mxu0  ;;  %9493 = vmatprep.mubr.bf16.mxu1 %v20257_v28  ;;  %v16894_v14 = vld [vmem:[%s21728_s13 + $0x34] sm:$0xf] }
0x1428   : > { %v9457_v37 = vpack.c.bf16 %v9451_v38, %v9447_v12 }
0x142a   : > { %9461 = vmatprep.subr.bf16.mxu1 %v9457_v37 }
0x142b   : > { %9462 = vmatpush1.bf16.msra.mxu1 %v9456_v41 }
0x142c   : > { %v9567_v16 = vpop.f32.mrb[196].mxu0 }
0x142d   : > { %v9569_v17 = vpop.f32.mrb[197].mxu0 }
0x142e   : > { %16839 = vmatmul.mubr.msk.bf16.vlgmr.msra.gmra.mrb[204].mxu1 %vm1123_vm1, %v16838_v10  ;;  %v9571_v18 = vpop.f32.mrb[198].mxu0 }
0x142f   : > { %v9578_v45 = vpack.c.bf16 %v9571_v18, %v9567_v16  ;;  %v9573_v19 = vpop.f32.mrb[199].mxu0  ;;  %9615 = vmatprep.mubr.bf16.mxu1 %v20257_v28  ;;  %v16901_v18 = vld [vmem:[%s21728_s13 + $0x38] sm:$0xf] }
0x1430   : > { %v9579_v20 = vpack.c.bf16 %v9573_v19, %v9569_v17 }
0x1432   : > { %9583 = vmatprep.subr.bf16.mxu1 %v9579_v20 }
0x1433   : > { %9584 = vmatpush1.bf16.msra.mxu1 %v9578_v45 }
0x1434   : > { %v9689_v22 = vpop.f32.mrb[200].mxu0 }
0x1435   : > { %v9691_v23 = vpop.f32.mrb[201].mxu0 }
0x1436   : > { %16846 = vmatmul.mubr.msk.bf16.vlgmr.msra.gmra.mrb[208].mxu1 %vm1123_vm1, %v16845_v21  ;;  %v9693_v25 = vpop.f32.mrb[202].mxu0 }
0x1437   : > { %v9700_v26 = vpack.c.bf16 %v9693_v25, %v9689_v22  ;;  %v9695_v13 = vpop.f32.mrb[203].mxu0  ;;  %9737 = vmatprep.mubr.bf16.mxu1 %v20257_v28  ;;  %v16908_v25 = vld [vmem:[%s21728_s13 + $0x3c] sm:$0xf] }
0x1438   : > { %v9701_v29 = vpack.c.bf16 %v9695_v13, %v9691_v23 }
0x143a   : > { %9705 = vmatprep.subr.bf16.mxu1 %v9701_v29 }
0x143b   : > { %9706 = vmatpush1.bf16.msra.mxu1 %v9700_v26 }
0x143c   : > { %v9811_v30 = vpop.f32.mrb[204].mxu0 }
0x143d   : > { %v9813_v61 = vpop.f32.mrb[205].mxu0 }
0x143e   : > { %16853 = vmatmul.mubr.msk.bf16.vlgmr.msra.gmra.mrb[212].mxu1 %vm1123_vm1, %v16852_v40  ;;  %v9815_v32 = vpop.f32.mrb[206].mxu0 }
0x143f   : > { %v9822_v33 = vpack.c.bf16 %v9815_v32, %v9811_v30  ;;  %v9817_v35 = vpop.f32.mrb[207].mxu0  ;;  %9859 = vmatprep.mubr.bf16.mxu1 %v20257_v28  ;;  %v16915_v32 = vld [vmem:[%s21728_s13 + $0x40] sm:$0xf] }
0x1440   : > { %v9823_v39 = vpack.c.bf16 %v9817_v35, %v9813_v61 }
0x1442   : > { %9827 = vmatprep.subr.bf16.mxu1 %v9823_v39 }
0x1443   : > { %9828 = vmatpush1.bf16.msra.mxu1 %v9822_v33 }
0x1444   : > { %v9933_v43 = vpop.f32.mrb[208].mxu0 }
0x1445   : > { %v9935_v44 = vpop.f32.mrb[209].mxu0 }
0x1446   : > { %16860 = vmatmul.mubr.msk.bf16.vlgmr.msra.gmra.mrb[216].mxu1 %vm1123_vm1, %v16859_v0  ;;  %v9937_v46 = vpop.f32.mrb[210].mxu0 }
0x1447   : > { %v9944_v34 = vpack.c.bf16 %v9937_v46, %v9933_v43  ;;  %v9939_v47 = vpop.f32.mrb[211].mxu0  ;;  %9981 = vmatprep.mubr.bf16.mxu1 %v20257_v28  ;;  %v16922_v46 = vld [vmem:[%s21728_s13 + $0x44] sm:$0xf] }
0x1448   : > { %v9945_v49 = vpack.c.bf16 %v9939_v47, %v9935_v44 }
0x144a   : > { %9949 = vmatprep.subr.bf16.mxu1 %v9945_v49 }
0x144b   : > { %9950 = vmatpush1.bf16.msra.mxu1 %v9944_v34 }
0x144c   : > { %v10055_v7 = vpop.f32.mrb[212].mxu0 }
0x144d   : > { %v10057_v5 = vpop.f32.mrb[213].mxu0 }
0x144e   : > { %16867 = vmatmul.mubr.msk.bf16.vlgmr.msra.gmra.mrb[220].mxu1 %vm1123_vm1, %v16866_v15  ;;  %v10059_v52 = vpop.f32.mrb[214].mxu0 }
0x144f   : > { %v10066_v53 = vpack.c.bf16 %v10059_v52, %v10055_v7  ;;  %v10061_v3 = vpop.f32.mrb[215].mxu0  ;;  %10103 = vmatprep.mubr.bf16.mxu1 %v20257_v28  ;;  %v16929_v52 = vld [vmem:[%s21728_s13 + $0x48] sm:$0xf] }
0x1450   : > { %v10067_v54 = vpack.c.bf16 %v10061_v3, %v10057_v5 }
0x1452   : > { %10071 = vmatprep.subr.bf16.mxu1 %v10067_v54 }
0x1453   : > { %10072 = vmatpush1.bf16.msra.mxu1 %v10066_v53 }
0x1454   : > { %v10177_v55 = vpop.f32.mrb[216].mxu0 }
0x1455   : > { %v10179_v56 = vpop.f32.mrb[217].mxu0 }
0x1456   : > { %16874 = vmatmul.mubr.msk.bf16.vlgmr.msra.gmra.mrb[224].mxu1 %vm1123_vm1, %v16873_v9  ;;  %v10181_v57 = vpop.f32.mrb[218].mxu0 }
0x1457   : > { %v10188_v31 = vpack.c.bf16 %v10181_v57, %v10177_v55  ;;  %v10183_v24 = vpop.f32.mrb[219].mxu0  ;;  %10225 = vmatprep.mubr.bf16.mxu1 %v20257_v28  ;;  %v16936_v57 = vld [vmem:[%s21728_s13 + $0x4c] sm:$0xf] }
0x1458   : > { %v10189_v27 = vpack.c.bf16 %v10183_v24, %v10179_v56 }
0x145a   : > { %10193 = vmatprep.subr.bf16.mxu1 %v10189_v27 }
0x145b   : > { %10194 = vmatpush1.bf16.msra.mxu1 %v10188_v31 }
0x145c   : > { %v10299_v51 = vpop.f32.mrb[220].mxu0 }
0x145d   : > { %v10301_v59 = vpop.f32.mrb[221].mxu0 }
0x145e   : > { %16881 = vmatmul.mubr.msk.bf16.vlgmr.msra.gmra.mrb[228].mxu1 %vm1123_vm1, %v16880_v58  ;;  %v10303_v60 = vpop.f32.mrb[222].mxu0 }
0x145f   : > { %v10310_v36 = vpack.c.bf16 %v10303_v60, %v10299_v51  ;;  %v10305_v62 = vpop.f32.mrb[223].mxu0  ;;  %10347 = vmatprep.mubr.bf16.mxu1 %v20257_v28  ;;  %v16943_v60 = vld [vmem:[%s21728_s13 + $0x50] sm:$0xf] }
0x1460   : > { %v10311_v63 = vpack.c.bf16 %v10305_v62, %v10301_v59 }
0x1462   : > { %10315 = vmatprep.subr.bf16.mxu1 %v10311_v63 }
0x1463   : > { %10316 = vmatpush1.bf16.msra.mxu1 %v10310_v36 }
0x1464   : > { %v10421_v2 = vpop.f32.mrb[224].mxu0 }
0x1465   : > { %v10423_v4 = vpop.f32.mrb[225].mxu0 }
0x1466   : > { %16888 = vmatmul.mubr.msk.bf16.vlgmr.msra.gmra.mrb[232].mxu1 %vm1123_vm1, %v16887_v1  ;;  %v10425_v6 = vpop.f32.mrb[226].mxu0 }
0x1467   : > { %v10432_v8 = vpack.c.bf16 %v10425_v6, %v10421_v2  ;;  %v10427_v11 = vpop.f32.mrb[227].mxu0  ;;  %10469 = vmatprep.mubr.bf16.mxu1 %v20257_v28  ;;  %v16950_v6 = vld [vmem:[%s21728_s13 + $0x54] sm:$0xf] }
0x1468   : > { %v10433_v12 = vpack.c.bf16 %v10427_v11, %v10423_v4 }
0x146a   : > { %10437 = vmatprep.subr.bf16.mxu1 %v10433_v12 }
0x146b   : > { %10438 = vmatpush1.bf16.msra.mxu1 %v10432_v8 }
0x146c   : > { %v10543_v41 = vpop.f32.mrb[228].mxu0 }
0x146d   : > { %v10545_v38 = vpop.f32.mrb[229].mxu0 }
0x146e   : > { %16895 = vmatmul.mubr.msk.bf16.vlgmr.msra.gmra.mrb[236].mxu1 %vm1123_vm1, %v16894_v14  ;;  %v10547_v37 = vpop.f32.mrb[230].mxu0 }
0x146f   : > { %v10554_v10 = vpack.c.bf16 %v10547_v37, %v10543_v41  ;;  %v10549_v16 = vpop.f32.mrb[231].mxu0  ;;  %10591 = vmatprep.mubr.bf16.mxu1 %v20257_v28  ;;  %v16957_v37 = vld [vmem:[%s21728_s13 + $0x58] sm:$0xf] }
0x1470   : > { %v10555_v17 = vpack.c.bf16 %v10549_v16, %v10545_v38 }
0x1472   : > { %10559 = vmatprep.subr.bf16.mxu1 %v10555_v17 }
0x1473   : > { %10560 = vmatpush1.bf16.msra.mxu1 %v10554_v10 }
0x1474   : > { %v10665_v45 = vpop.f32.mrb[232].mxu0 }
0x1475   : > { %v10667_v19 = vpop.f32.mrb[233].mxu0 }
0x1476   : > { %16902 = vmatmul.mubr.msk.bf16.vlgmr.msra.gmra.mrb[240].mxu1 %vm1123_vm1, %v16901_v18  ;;  %v10669_v20 = vpop.f32.mrb[234].mxu0 }
0x1477   : > { %v10676_v21 = vpack.c.bf16 %v10669_v20, %v10665_v45  ;;  %v10671_v22 = vpop.f32.mrb[235].mxu0  ;;  %10713 = vmatprep.mubr.bf16.mxu1 %v20257_v28  ;;  %v16964_v20 = vld [vmem:[%s21728_s13 + $0x5c] sm:$0xf] }
0x1478   : > { %v10677_v23 = vpack.c.bf16 %v10671_v22, %v10667_v19 }
0x147a   : > { %10681 = vmatprep.subr.bf16.mxu1 %v10677_v23 }
0x147b   : > { %10682 = vmatpush1.bf16.msra.mxu1 %v10676_v21 }
0x147c   : > { %v10787_v26 = vpop.f32.mrb[236].mxu0 }
0x147d   : > { %v10789_v13 = vpop.f32.mrb[237].mxu0 }
0x147e   : > { %16909 = vmatmul.mubr.msk.bf16.vlgmr.msra.gmra.mrb[244].mxu1 %vm1123_vm1, %v16908_v25  ;;  %v10791_v29 = vpop.f32.mrb[238].mxu0 }
0x147f   : > { %v10798_v40 = vpack.c.bf16 %v10791_v29, %v10787_v26  ;;  %v10793_v30 = vpop.f32.mrb[239].mxu0  ;;  %10835 = vmatprep.mubr.bf16.mxu1 %v20257_v28  ;;  %v16971_v29 = vld [vmem:[%s21728_s13 + $0x60] sm:$0xf] }
0x1480   : > { %v10799_v61 = vpack.c.bf16 %v10793_v30, %v10789_v13  ;;  %v19420_v30 = vld [vmem:[#allocation13 + $0x4] ss:$28 sps:$4 sm:$0xff]  }
0x1481   : > { %12500 = vmatprep.subr.bf16.mxu0 %v19420_v30 }
0x1482   : > { %10803 = vmatprep.subr.bf16.mxu1 %v10799_v61  ;;  %v19421_v61 = vld [vmem:[#allocation13 + $0x8] ss:$28 sps:$4 sm:$0xff]  }
0x1483   : > { %10804 = vmatpush1.bf16.msra.mxu1 %v10798_v40  ;;  %v19418_v40 = vld [vmem:[#allocation13] ss:$28 sps:$4 sm:$0xff]  }
0x1484   : > { %v10909_v33 = vpop.f32.mrb[240].mxu0  ;;  %12501 = vmatpush1.bf16.msra.mxu0 %v19418_v40  ;;  %v19477_v40 = vld [vmem:[#allocation13 + $0x204] ss:$28 sps:$4 sm:$0xff]  }
0x1485   : > { %v10911_v35 = vpop.f32.mrb[241].mxu0 }
0x1486   : > { %16916 = vmatmul.mubr.msk.bf16.vlgmr.msra.gmra.mrb[248].mxu1 %vm1123_vm1, %v16915_v32  ;;  %v10913_v39 = vpop.f32.mrb[242].mxu0  ;;  %v19423_v32 = vld [vmem:[#allocation13 + $0xc] ss:$28 sps:$4 sm:$0xff]  }
0x1487   : > { %v10920_v0 = vpack.c.bf16 %v10913_v39, %v10909_v33  ;;  %v10915_v43 = vpop.f32.mrb[243].mxu0  ;;  %10957 = vmatprep.mubr.bf16.mxu1 %v20257_v28  ;;  %v19429_v39 = vld [vmem:[#allocation13 + $0x44] ss:$28 sps:$4 sm:$0xff]  }
0x1488   : > { %v10921_v44 = vpack.c.bf16 %v10915_v43, %v10911_v35  ;;  %v19426_v35 = vld [vmem:[#allocation13 + $0x3c] ss:$28 sps:$4 sm:$0xff]  }
0x1489   : > { %12502 = vmatprep.subr.bf16.mxu0 %v19426_v35 }
0x148a   : > { %10925 = vmatprep.subr.bf16.mxu1 %v10921_v44  ;;  %v19424_v44 = vld [vmem:[#allocation13 + $0x38] ss:$28 sps:$4 sm:$0xff]  }
0x148b   : > { %10926 = vmatpush1.bf16.msra.mxu1 %v10920_v0  ;;  %12503 = vmatpush1.bf16.msra.mxu0 %v19424_v44  ;;  %v19480_v44 = vld [vmem:[#allocation13 + $0x234] ss:$28 sps:$4 sm:$0xff]  }
0x148c   : > { %v11031_v34 = vpop.f32.mrb[244].mxu0 }
0x148d   : > { %v11033_v47 = vpop.f32.mrb[245].mxu0 }
0x148e   : > { %16923 = vmatmul.mubr.msk.bf16.vlgmr.msra.gmra.mrb[252].mxu1 %vm1123_vm1, %v16922_v46  ;;  %v11035_v49 = vpop.f32.mrb[246].mxu0  ;;  %v19427_v46 = vld [vmem:[#allocation13 + $0x40] ss:$28 sps:$4 sm:$0xff]  }
0x148f   : > { %v11042_v15 = vpack.c.bf16 %v11035_v49, %v11031_v34  ;;  %v11037_v7 = vpop.f32.mrb[247].mxu0  ;;  %11079 = vmatprep.mubr.bf16.mxu1 %v20257_v28 }
0x1490   : > { %v11043_v5 = vpack.c.bf16 %v11037_v7, %v11033_v47  ;;  %v19432_v7 = vld [vmem:[#allocation13 + $0x74] ss:$28 sps:$4 sm:$0xff]  }
0x1491   : > { %12504 = vmatprep.subr.bf16.mxu0 %v19432_v7 }
0x1492   : > { %11047 = vmatprep.subr.bf16.mxu1 %v11043_v5  ;;  %v19433_v5 = vld [vmem:[#allocation13 + $0x78] ss:$28 sps:$4 sm:$0xff]  }
0x1493   : > { %11048 = vmatpush1.bf16.msra.mxu1 %v11042_v15  ;;  %v19430_v15 = vld [vmem:[#allocation13 + $0x70] ss:$28 sps:$4 sm:$0xff]  }
0x1494   : > { %v11153_v53 = vpop.f32.mrb[248].mxu0  ;;  %12505 = vmatpush1.bf16.msra.mxu0 %v19430_v15  ;;  %v19489_v15 = vld [vmem:[#allocation13 + $0x274] ss:$28 sps:$4 sm:$0xff]  }
0x1495   : > { %v11155_v3 = vpop.f32.mrb[249].mxu0 }
0x1496   : > { %16930 = vmatmul.mubr.msk.bf16.vlgmr.msra.gmra.mrb[0].mxu1 %vm1123_vm1, %v16929_v52  ;;  %v11157_v54 = vpop.f32.mrb[250].mxu0  ;;  %v19435_v52 = vld [vmem:[#allocation13 + $0x7c] ss:$28 sps:$4 sm:$0xff]  }
0x1497   : > { %v11164_v9 = vpack.c.bf16 %v11157_v54, %v11153_v53  ;;  %v11159_v55 = vpop.f32.mrb[251].mxu0  ;;  %11201 = vmatprep.mubr.bf16.mxu1 %v20257_v28  ;;  %v19438_v53 = vld [vmem:[#allocation13 + $0xac] ss:$28 sps:$4 sm:$0xff]  }
0x1498   : > { %v11165_v56 = vpack.c.bf16 %v11159_v55, %v11155_v3  ;;  %v19441_v3 = vld [vmem:[#allocation13 + $0xb4] ss:$28 sps:$4 sm:$0xff]   ;;  %12506 = vmatprep.subr.bf16.mxu0 %v19438_v53 }
0x1499   : > { %v19439_v55 = vld [vmem:[#allocation13 + $0xb0] ss:$28 sps:$4 sm:$0xff]  }
0x149a   : > { %11169 = vmatprep.subr.bf16.mxu1 %v11165_v56 }
0x149b   : > { %11170 = vmatpush1.bf16.msra.mxu1 %v11164_v9 }
0x149c   : > { %v11275_v31 = vpop.f32.mrb[252].mxu0 }
0x149d   : > { %v11277_v24 = vpop.f32.mrb[253].mxu0 }
0x149e   : > { %16937 = vmatmul.mubr.msk.bf16.vlgmr.msra.gmra.mrb[4].mxu1 %vm1123_vm1, %v16936_v57  ;;  %v11279_v27 = vpop.f32.mrb[254].mxu0 }
0x149f   : > { %v11286_v58 = vpack.c.bf16 %v11279_v27, %v11275_v31  ;;  %v11281_v51 = vpop.f32.mrb[255].mxu0  ;;  %11323 = vmatprep.mubr.bf16.mxu1 %v20257_v28  ;;  %v19444_v27 = vld [vmem:[#allocation13 + $0xe4] ss:$28 sps:$4 sm:$0xff]  }
0x14a0   : > { %v11287_v59 = vpack.c.bf16 %v11281_v51, %v11277_v24  ;;  %v19442_v24 = vld [vmem:[#allocation13 + $0xe0] ss:$28 sps:$4 sm:$0xff]   ;;  %v19447_v51 = vld [vmem:[#allocation13 + $0xec] ss:$28 sps:$4 sm:$0xff]  }
0x14a2   : > { %11291 = vmatprep.subr.bf16.mxu1 %v11287_v59 }
0x14a3   : > { %11292 = vmatpush1.bf16.msra.mxu1 %v11286_v58  ;;  %v19445_v58 = vld [vmem:[#allocation13 + $0xe8] ss:$28 sps:$4 sm:$0xff]  }
0x14a4   : > { %v11397_v36 = vpop.f32.mrb[0].mxu0 }
0x14a5   : > { %v11399_v62 = vpop.f32.mrb[1].mxu0 }
0x14a6   : > { %16944 = vmatmul.mubr.msk.bf16.vlgmr.msra.gmra.mrb[8].mxu1 %vm1123_vm1, %v16943_v60  ;;  %v11401_v63 = vpop.f32.mrb[2].mxu0  ;;  %v19450_v60 = vld [vmem:[#allocation13 + $0x11c] ss:$28 sps:$4 sm:$0xff]  }
0x14a7   : > { %v11408_v1 = vpack.c.bf16 %v11401_v63, %v11397_v36  ;;  %v11403_v2 = vpop.f32.mrb[3].mxu0  ;;  %11445 = vmatprep.mubr.bf16.mxu1 %v20257_v28  ;;  %v19453_v36 = vld [vmem:[#allocation13 + $0x124] ss:$28 sps:$4 sm:$0xff]  }
0x14a8   : > { %v11409_v4 = vpack.c.bf16 %v11403_v2, %v11399_v62  ;;  %v19451_v2 = vld [vmem:[#allocation13 + $0x120] ss:$28 sps:$4 sm:$0xff]  }
0x14aa   : > { %11413 = vmatprep.subr.bf16.mxu1 %v11409_v4 }
0x14ab   : > { %11414 = vmatpush1.bf16.msra.mxu1 %v11408_v1  ;;  %v19448_v1 = vld [vmem:[#allocation13 + $0x118] ss:$28 sps:$4 sm:$0xff]  }
0x14ac   : > { %v11519_v8 = vpop.f32.mrb[4].mxu0 }
0x14ad   : > { %v11521_v11 = vpop.f32.mrb[5].mxu0 }
0x14ae   : > { %16951 = vmatmul.mubr.msk.bf16.vlgmr.msra.gmra.mrb[12].mxu1 %vm1123_vm1, %v16950_v6  ;;  %v11523_v12 = vpop.f32.mrb[6].mxu0 }
0x14af   : > { %v11530_v14 = vpack.c.bf16 %v11523_v12, %v11519_v8  ;;  %v11525_v41 = vpop.f32.mrb[7].mxu0  ;;  %11567 = vmatprep.mubr.bf16.mxu1 %v20257_v28  ;;  %v19456_v12 = vld [vmem:[#allocation13 + $0x154] ss:$28 sps:$4 sm:$0xff]  }
0x14b0   : > { %v11531_v38 = vpack.c.bf16 %v11525_v41, %v11521_v11  ;;  %v19454_v11 = vld [vmem:[#allocation13 + $0x150] ss:$28 sps:$4 sm:$0xff]   ;;  %v19459_v41 = vld [vmem:[#allocation13 + $0x15c] ss:$28 sps:$4 sm:$0xff]  }
0x14b2   : > { %11535 = vmatprep.subr.bf16.mxu1 %v11531_v38 }
0x14b3   : > { %11536 = vmatpush1.bf16.msra.mxu1 %v11530_v14  ;;  %v19457_v14 = vld [vmem:[#allocation13 + $0x158] ss:$28 sps:$4 sm:$0xff]  }
0x14b4   : > { %v11641_v10 = vpop.f32.mrb[8].mxu0 }
0x14b5   : > { %v11643_v16 = vpop.f32.mrb[9].mxu0 }
0x14b6   : > { %16958 = vmatmul.mubr.msk.bf16.vlgmr.msra.gmra.mrb[16].mxu1 %vm1123_vm1, %v16957_v37  ;;  %v11645_v17 = vpop.f32.mrb[10].mxu0  ;;  %v19462_v37 = vld [vmem:[#allocation13 + $0x18c] ss:$28 sps:$4 sm:$0xff]  }
0x14b7   : > { %v11652_v18 = vpack.c.bf16 %v11645_v17, %v11641_v10  ;;  %v11647_v45 = vpop.f32.mrb[11].mxu0  ;;  %11689 = vmatprep.mubr.bf16.mxu1 %v20257_v28  ;;  %v19465_v10 = vld [vmem:[#allocation13 + $0x194] ss:$28 sps:$4 sm:$0xff]  }
0x14b8   : > { %v11653_v19 = vpack.c.bf16 %v11647_v45, %v11643_v16  ;;  %v19463_v45 = vld [vmem:[#allocation13 + $0x190] ss:$28 sps:$4 sm:$0xff]  }
0x14ba   : > { %11657 = vmatprep.subr.bf16.mxu1 %v11653_v19 }
0x14bb   : > { %11658 = vmatpush1.bf16.msra.mxu1 %v11652_v18  ;;  %v19460_v18 = vld [vmem:[#allocation13 + $0x188] ss:$28 sps:$4 sm:$0xff]  }
0x14bc   : > { %v11763_v21 = vpop.f32.mrb[12].mxu0 }
0x14bd   : > { %v11765_v22 = vpop.f32.mrb[13].mxu0 }
0x14be   : > { %16965 = vmatmul.mubr.msk.bf16.vlgmr.msra.gmra.mrb[20].mxu1 %vm1123_vm1, %v16964_v20  ;;  %v11767_v23 = vpop.f32.mrb[14].mxu0 }
0x14bf   : > { %v11774_v25 = vpack.c.bf16 %v11767_v23, %v11763_v21  ;;  %v11769_v26 = vpop.f32.mrb[15].mxu0  ;;  %11811 = vmatprep.mubr.bf16.mxu1 %v20257_v28  ;;  %v19468_v23 = vld [vmem:[#allocation13 + $0x1c4] ss:$28 sps:$4 sm:$0xff]  }
0x14c0   : > { %v11775_v13 = vpack.c.bf16 %v11769_v26, %v11765_v22  ;;  %v19466_v22 = vld [vmem:[#allocation13 + $0x1c0] ss:$28 sps:$4 sm:$0xff]   ;;  %v19471_v26 = vld [vmem:[#allocation13 + $0x1cc] ss:$28 sps:$4 sm:$0xff]  }
0x14c2   : > { %11779 = vmatprep.subr.bf16.mxu1 %v11775_v13 }
0x14c3   : > { %11780 = vmatpush1.bf16.msra.mxu1 %v11774_v25  ;;  %v19469_v25 = vld [vmem:[#allocation13 + $0x1c8] ss:$28 sps:$4 sm:$0xff]  }
0x14c4   : > { %12541 = vmatprep.subr.bf16.mxu1 %v19423_v32  ;;  %v19472_v32 = vld [vmem:[#allocation13 + $0x1f8] ss:$28 sps:$4 sm:$0xff]  }
0x14c6   : > { %16972 = vmatmul.mubr.msk.bf16.vlgmr.msra.gmra.mrb[24].mxu1 %vm1123_vm1, %v16971_v29  ;;  %v19474_v29 = vld [vmem:[#allocation13 + $0x1fc] ss:$28 sps:$4 sm:$0xff]  }
0x14c7   : > { %12542 = vmatpush1.bf16.msra.mxu1 %v19421_v61 }
0x14c8   : > { %12543 = vmatprep.subr.bf16.mxu1 %v19429_v39 }
0x14cb   : > { %12544 = vmatpush1.bf16.msra.mxu1 %v19427_v46  ;;  %v19481_v46 = vld [vmem:[#allocation13 + $0x238] ss:$28 sps:$4 sm:$0xff]  }
0x14cc   : > { %12545 = vmatprep.subr.bf16.mxu1 %v19435_v52  ;;  %v19484_v52 = vld [vmem:[#allocation13 + $0x268] ss:$28 sps:$4 sm:$0xff]  }
0x14cf   : > { %12546 = vmatpush1.bf16.msra.mxu1 %v19433_v5 }
0x14d0   : > { %12547 = vmatprep.subr.bf16.mxu1 %v19441_v3 }
0x14d3   : > { %12548 = vmatpush1.bf16.msra.mxu1 %v19439_v55  ;;  %v19493_v55 = vld [vmem:[#allocation13 + $0x2a8] ss:$28 sps:$4 sm:$0xff]  }
0x14d4   : > { %12549 = vmatprep.subr.bf16.mxu1 %v19447_v51  ;;  %v19496_v51 = vld [vmem:[#allocation13 + $0x2d8] ss:$28 sps:$4 sm:$0xff]  }
0x14d7   : > { %12550 = vmatpush1.bf16.msra.mxu1 %v19445_v58 }
0x14d8   : > { %12551 = vmatprep.subr.bf16.mxu1 %v19453_v36 }
0x14db   : > { %12552 = vmatpush1.bf16.msra.mxu1 %v19451_v2 }
0x14dc   : > { %12553 = vmatprep.subr.bf16.mxu1 %v19459_v41 }
0x14df   : > { %12554 = vmatpush1.bf16.msra.mxu1 %v19457_v14 }
0x14e0   : > { %12555 = vmatprep.subr.bf16.mxu1 %v19465_v10  ;;  %v19508_v10 = vld [vmem:[#allocation13 + $0x14] ss:$28 sps:$4 sm:$0xff]  }
0x14e3   : > { %12556 = vmatpush1.bf16.msra.mxu1 %v19463_v45 }
0x14e4   : > { %12557 = vmatprep.subr.bf16.mxu1 %v19471_v26 }
0x14e7   : > { %12558 = vmatpush1.bf16.msra.mxu1 %v19469_v25 }
0x14e8   : > { %12559 = vmatprep.subr.bf16.mxu1 %v19477_v40 }
0x14e9   : > { %v9129_v33 = vpop.f32.mrb[192].mxu1 }
0x14ea   : > { %v9136_v0 = vadd.f32 %v9129_v33, %v21305_v48  ;;  %v9131_v43 = vpop.f32.mrb[193].mxu1  ;;  %v19475_v33 = vld [vmem:[#allocation13 + $0x200] ss:$28 sps:$4 sm:$0xff]  }
0x14eb   : > { %v9137_v34 = vadd.f32 %v9131_v43, %v21307_v50  ;;  %v9133_v47 = vpop.f32.mrb[194].mxu1  ;;  %v19436_v50 = vld [vmem:[#allocation13 + $0xa8] ss:$28 sps:$4 sm:$0xff]   ;;  %12560 = vmatpush1.bf16.msra.mxu1 %v19475_v33  ;;  %v19478_v43 = vld [vmem:[#allocation13 + $0x230] ss:$28 sps:$4 sm:$0xff]  }
0x14ec   : > { %v9134_v49 = vpop.f32.mrb[195].mxu1  ;;  %12507 = vmatpush1.bf16.msra.mxu0 %v19436_v50  ;;  %v19492_v50 = vld [vmem:[#allocation13 + $0x2a4] ss:$28 sps:$4 sm:$0xff]  }
0x14ed   : > { %12508 = vmatprep.subr.bf16.mxu0 %v19444_v27  ;;  %v19486_v49 = vld [vmem:[#allocation13 + $0x26c] ss:$28 sps:$4 sm:$0xff]  }
0x14f0   : > { %12509 = vmatpush1.bf16.msra.mxu0 %v19442_v24  ;;  %v19501_v24 = vld [vmem:[#allocation13 + $0x2e4] ss:$28 sps:$4 sm:$0xff]  }
0x14f1   : > { %v9251_v48 = vpop.f32.mrb[196].mxu1  ;;  %12510 = vmatprep.subr.bf16.mxu0 %v19450_v60 }
0x14f2   : > { %v9258_v54 = vadd.f32 %v9251_v48, %v9136_v0  ;;  %v9253_v9 = vpop.f32.mrb[197].mxu1  ;;  %v19487_v48 = vld [vmem:[#allocation13 + $0x270] ss:$28 sps:$4 sm:$0xff]  }
0x14f3   : > { %v9259_v56 = vadd.f32 %v9253_v9, %v9137_v34  ;;  %v9255_v57 = vpop.f32.mrb[198].mxu1  ;;  %v19483_v34 = vld [vmem:[#allocation13 + $0x23c] ss:$28 sps:$4 sm:$0xff]  }
0x14f4   : > { %v9256_v31 = vpop.f32.mrb[199].mxu1  ;;  %12511 = vmatpush1.bf16.msra.mxu0 %v19448_v1  ;;  %12561 = vmatprep.subr.bf16.mxu1 %v19483_v34  ;;  %v19490_v9 = vld [vmem:[#allocation13 + $0x2a0] ss:$28 sps:$4 sm:$0xff]  }
0x14f5   : > { %12512 = vmatprep.subr.bf16.mxu0 %v19456_v12  ;;  %12562 = vmatpush1.bf16.msra.mxu1 %v19481_v46  ;;  %v19498_v31 = vld [vmem:[#allocation13 + $0x2dc] ss:$28 sps:$4 sm:$0xff]  }
0x14f6   : > { %12563 = vmatprep.subr.bf16.mxu1 %v19489_v15 }
0x14f8   : > { %12513 = vmatpush1.bf16.msra.mxu0 %v19454_v11 }
0x14f9   : > { %v9373_v59 = vpop.f32.mrb[200].mxu1  ;;  %12514 = vmatprep.subr.bf16.mxu0 %v19462_v37  ;;  %12564 = vmatpush1.bf16.msra.mxu1 %v19487_v48 }
0x14fa   : > { %v9380_v62 = vadd.f32 %v9373_v59, %v9258_v54  ;;  %v9375_v63 = vpop.f32.mrb[201].mxu1  ;;  %v19499_v59 = vld [vmem:[#allocation13 + $0x2e0] ss:$28 sps:$4 sm:$0xff]  }
0x14fb   : > { %v9381_v4 = vadd.f32 %v9375_v63, %v9259_v56  ;;  %v9377_v6 = vpop.f32.mrb[202].mxu1  ;;  %v19495_v56 = vld [vmem:[#allocation13 + $0x2ac] ss:$28 sps:$4 sm:$0xff]   ;;  %v11947_v63 = vld [vmem:[#allocation13 + $0x318] sm:$0x11] }
0x14fc   : > { %v9378_v8 = vpop.f32.mrb[203].mxu1  ;;  %12515 = vmatpush1.bf16.msra.mxu0 %v19460_v18  ;;  %12565 = vmatprep.subr.bf16.mxu1 %v19495_v56  ;;  %v21426_v6 = vsel %vm12476_vm10, 65535, %v20257_v28  ;;  %v17074_v11 = vcombine.high %v11947_v63, %v11947_v63 }
0x14fd   : > { %12516 = vmatprep.subr.bf16.mxu0 %v19468_v23  ;;  %12566 = vmatpush1.bf16.msra.mxu1 %v19493_v55  ;;  %v17073_v8 = vcombine.low %v11947_v63, %v11947_v63 }
0x14fe   : > { %12567 = vmatprep.subr.bf16.mxu1 %v19501_v24 }
0x14ff   : > { %v12486_v41 = vand.u32 %v17073_v8, %v21426_v6 }
0x1500   : > { %12517 = vmatpush1.bf16.msra.mxu0 %v19466_v22 }
0x1501   : > { %v9495_v38 = vpop.f32.mrb[204].mxu1  ;;  %12518 = vmatprep.subr.bf16.mxu0 %v19474_v29  ;;  %12568 = vmatpush1.bf16.msra.mxu1 %v19499_v59 }
0x1502   : > { %v9502_v16 = vadd.f32 %v9495_v38, %v9380_v62  ;;  %v9497_v17 = vpop.f32.mrb[205].mxu1  ;;  %v11946_v62 = vld [vmem:[#allocation13 + $0x310] sm:$0x11]  ;;  %v12489_v38 = vand.u32 %v17074_v11, %v21426_v6 }
0x1503   : > { %v9503_v19 = vadd.f32 %v9497_v17, %v9381_v4  ;;  %v9499_v20 = vpop.f32.mrb[206].mxu1  ;;  %v17071_v2 = vcombine.low %v11946_v62, %v11946_v62  ;;  %v17072_v4 = vcombine.high %v11946_v62, %v11946_v62 }
0x1504   : > { %v9500_v21 = vpop.f32.mrb[207].mxu1  ;;  %12519 = vmatpush1.bf16.msra.mxu0 %v19472_v32  ;;  %12569 = vmatprep.subr.bf16.mxu1 %v12489_v38 }
0x1505   : > { %12520 = vmatprep.subr.bf16.mxu0 %v19480_v44  ;;  %v12483_v12 = vand.u32 %v17072_v4, %v21426_v6  ;;  %v12480_v14 = vand.u32 %v17071_v2, %v21426_v6  ;;  %12570 = vmatpush1.bf16.msra.mxu1 %v12486_v41 }
0x1506   : > { %12623 = vmatprep.subr.bf16.mxu1 %v20257_v28 }
0x1508   : > { %12521 = vmatpush1.bf16.msra.mxu0 %v19478_v43 }
0x1509   : > { %v9617_v13 = vpop.f32.mrb[208].mxu1  ;;  %12522 = vmatprep.subr.bf16.mxu0 %v19486_v49 }
0x150a   : > { %v9624_v30 = vadd.f32 %v9617_v13, %v9502_v16  ;;  %v9619_v61 = vpop.f32.mrb[209].mxu1 }
0x150b   : > { %v9625_v35 = vadd.f32 %v9619_v61, %v9503_v19  ;;  %v9621_v39 = vpop.f32.mrb[210].mxu1 }
0x150c   : > { %v9622_v0 = vpop.f32.mrb[211].mxu1  ;;  %12523 = vmatpush1.bf16.msra.mxu0 %v19484_v52 }
0x150d   : > { %12524 = vmatprep.subr.bf16.mxu0 %v19492_v50 }
0x1510   : > { %12525 = vmatpush1.bf16.msra.mxu0 %v19490_v9 }
0x1511   : > { %v9739_v47 = vpop.f32.mrb[212].mxu1  ;;  %12526 = vmatprep.subr.bf16.mxu0 %v19498_v31 }
0x1512   : > { %v9746_v7 = vadd.f32 %v9739_v47, %v9624_v30  ;;  %v9741_v5 = vpop.f32.mrb[213].mxu1 }
0x1513   : > { %v9747_v53 = vadd.f32 %v9741_v5, %v9625_v35  ;;  %v9743_v3 = vpop.f32.mrb[214].mxu1 }
0x1514   : > { %v9744_v54 = vpop.f32.mrb[215].mxu1  ;;  %12527 = vmatpush1.bf16.msra.mxu0 %v19496_v51 }
0x1515   : > { %12528 = vmatprep.subr.bf16.mxu0 %v12483_v12 }
0x1518   : > { %12529 = vmatpush1.bf16.msra.mxu0 %v12480_v14 }
0x1519   : > { %v9861_v57 = vpop.f32.mrb[216].mxu1  ;;  %12582 = vmatprep.subr.bf16.mxu0 %v19508_v10 }
0x151a   : > { %v9868_v27 = vadd.f32 %v9861_v57, %v9746_v7  ;;  %v9863_v58 = vpop.f32.mrb[217].mxu1 }
0x151b   : > { %v9869_v60 = vadd.f32 %v9863_v58, %v9747_v53  ;;  %v9865_v36 = vpop.f32.mrb[218].mxu1 }
0x151c   : > { %v9866_v1 = vpop.f32.mrb[219].mxu1 }
0x1521   : > { %v9983_v37 = vpop.f32.mrb[220].mxu1 }
0x1522   : > { %v9990_v16 = vadd.f32 %v9983_v37, %v9868_v27  ;;  %v9985_v17 = vpop.f32.mrb[221].mxu1 }
0x1523   : > { %v9991_v18 = vadd.f32 %v9985_v17, %v9869_v60  ;;  %v9987_v45 = vpop.f32.mrb[222].mxu1 }
0x1524   : > { %v9988_v19 = vpop.f32.mrb[223].mxu1 }
0x1529   : > { %v10105_v20 = vpop.f32.mrb[224].mxu1 }
0x152a   : > { %v10112_v21 = vadd.f32 %v10105_v20, %v9990_v16  ;;  %v10107_v22 = vpop.f32.mrb[225].mxu1 }
0x152b   : > { %v10113_v23 = vadd.f32 %v10107_v22, %v9991_v18  ;;  %v10109_v25 = vpop.f32.mrb[226].mxu1 }
0x152c   : > { %v10110_v26 = vpop.f32.mrb[227].mxu1 }
0x1531   : > { %v10227_v13 = vpop.f32.mrb[228].mxu1 }
0x1532   : > { %v10234_v29 = vadd.f32 %v10227_v13, %v10112_v21  ;;  %v10229_v40 = vpop.f32.mrb[229].mxu1 }
0x1533   : > { %v10235_v30 = vadd.f32 %v10229_v40, %v10113_v23  ;;  %v10231_v61 = vpop.f32.mrb[230].mxu1 }
0x1534   : > { %v10232_v32 = vpop.f32.mrb[231].mxu1 }
0x1539   : > { %v10349_v33 = vpop.f32.mrb[232].mxu1 }
0x153a   : > { %v10356_v35 = vadd.f32 %v10349_v33, %v10234_v29  ;;  %v10351_v39 = vpop.f32.mrb[233].mxu1 }
0x153b   : > { %v10357_v0 = vadd.f32 %v10351_v39, %v10235_v30  ;;  %v10353_v43 = vpop.f32.mrb[234].mxu1 }
0x153c   : > { %v10354_v44 = vpop.f32.mrb[235].mxu1 }
0x1541   : > { %v10471_v46 = vpop.f32.mrb[236].mxu1 }
0x1542   : > { %v10478_v34 = vadd.f32 %v10471_v46, %v10356_v35  ;;  %v10473_v47 = vpop.f32.mrb[237].mxu1 }
0x1543   : > { %v10479_v49 = vadd.f32 %v10473_v47, %v10357_v0  ;;  %v10475_v15 = vpop.f32.mrb[238].mxu1 }
0x1544   : > { %v10476_v7 = vpop.f32.mrb[239].mxu1 }
0x1549   : > { %v10593_v5 = vpop.f32.mrb[240].mxu1 }
0x154a   : > { %v10600_v52 = vadd.f32 %v10593_v5, %v10478_v34  ;;  %v10595_v48 = vpop.f32.mrb[241].mxu1 }
0x154b   : > { %v10601_v53 = vadd.f32 %v10595_v48, %v10479_v49  ;;  %v10597_v3 = vpop.f32.mrb[242].mxu1  ;;  %v11826_v48 = vpop.permute.xlu1 %11825 }
0x154c   : > { %v10598_v54 = vpop.f32.mrb[243].mxu1 }
0x1551   : > { %v10715_v9 = vpop.f32.mrb[244].mxu1 }
0x1552   : > { %v10722_v50 = vadd.f32 %v10715_v9, %v10600_v52  ;;  %v10717_v55 = vpop.f32.mrb[245].mxu1 }
0x1553   : > { %v10723_v56 = vadd.f32 %v10717_v55, %v10601_v53  ;;  %v10719_v57 = vpop.f32.mrb[246].mxu1 }
0x1554   : > { %v10720_v31 = vpop.f32.mrb[247].mxu1 }
0x1555   : > { %v19506_v31 = vld [vmem:[#allocation13 + $0x10] ss:$28 sps:$4 sm:$0xff]  }
0x1559   : > { %v10837_v24 = vpop.f32.mrb[248].mxu1 }
0x155a   : > { %v10844_v27 = vadd.f32 %v10837_v24, %v10722_v50  ;;  %v10839_v58 = vpop.f32.mrb[249].mxu1  ;;  %v19509_v24 = vld [vmem:[#allocation13 + $0x18] ss:$28 sps:$4 sm:$0xff]  }
0x155b   : > { %v10845_v51 = vadd.f32 %v10839_v58, %v10723_v56  ;;  %v10841_v59 = vpop.f32.mrb[250].mxu1  ;;  %v19512_v58 = vld [vmem:[#allocation13 + $0x4c] ss:$28 sps:$4 sm:$0xff]  }
0x155c   : > { %v10842_v60 = vpop.f32.mrb[251].mxu1  ;;  %v19513_v59 = vld [vmem:[#allocation13 + $0x50] ss:$28 sps:$4 sm:$0xff]  }
0x155d   : > { %v19516_v60 = vld [vmem:[#allocation13 + $0x84] ss:$28 sps:$4 sm:$0xff]  }
0x1561   : > { %v10959_v36 = vpop.f32.mrb[252].mxu1 }
0x1562   : > { %v10966_v62 = vadd.f32 %v10959_v36, %v10844_v27  ;;  %v10961_v63 = vpop.f32.mrb[253].mxu1  ;;  %v19514_v36 = vld [vmem:[#allocation13 + $0x80] ss:$28 sps:$4 sm:$0xff]  }
0x1563   : > { %v10967_v1 = vadd.f32 %v10961_v63, %v10845_v51  ;;  %v10963_v2 = vpop.f32.mrb[254].mxu1  ;;  %v19510_v51 = vld [vmem:[#allocation13 + $0x48] ss:$28 sps:$4 sm:$0xff]   ;;  %v19520_v63 = vld [vmem:[#allocation13 + $0xbc] ss:$28 sps:$4 sm:$0xff]  }
0x1564   : > { %v10964_v4 = vpop.f32.mrb[255].mxu1  ;;  %v19521_v2 = vld [vmem:[#allocation13 + $0xc0] ss:$28 sps:$4 sm:$0xff]  }
0x1565   : > { %v19524_v4 = vld [vmem:[#allocation13 + $0xf4] ss:$28 sps:$4 sm:$0xff]  }
0x1569   : > { %v11081_v8 = vpop.f32.mrb[0].mxu1 }
0x156a   : > { %v11088_v11 = vadd.f32 %v11081_v8, %v10966_v62  ;;  %v11083_v12 = vpop.f32.mrb[1].mxu1  ;;  %v19517_v62 = vld [vmem:[#allocation13 + $0x88] ss:$28 sps:$4 sm:$0xff]   ;;  %v19522_v8 = vld [vmem:[#allocation13 + $0xf0] ss:$28 sps:$4 sm:$0xff]  }
0x156b   : > { %v11089_v14 = vadd.f32 %v11083_v12, %v10967_v1  ;;  %v11085_v41 = vpop.f32.mrb[2].mxu1  ;;  %v19518_v1 = vld [vmem:[#allocation13 + $0xb8] ss:$28 sps:$4 sm:$0xff]   ;;  %v19528_v12 = vld [vmem:[#allocation13 + $0x12c] ss:$28 sps:$4 sm:$0xff]  }
0x156c   : > { %v11086_v38 = vpop.f32.mrb[3].mxu1  ;;  %v19529_v41 = vld [vmem:[#allocation13 + $0x130] ss:$28 sps:$4 sm:$0xff]  }
0x156d   : > { %v19532_v38 = vld [vmem:[#allocation13 + $0x164] ss:$28 sps:$4 sm:$0xff]  }
0x1571   : > { %v11203_v37 = vpop.f32.mrb[4].mxu1 }
0x1572   : > { %v11210_v10 = vadd.f32 %v11203_v37, %v11088_v11  ;;  %v11205_v16 = vpop.f32.mrb[5].mxu1  ;;  %v19525_v11 = vld [vmem:[#allocation13 + $0xf8] ss:$28 sps:$4 sm:$0xff]   ;;  %v19530_v37 = vld [vmem:[#allocation13 + $0x160] ss:$28 sps:$4 sm:$0xff]  }
0x1573   : > { %v11211_v17 = vadd.f32 %v11205_v16, %v11089_v14  ;;  %v11207_v18 = vpop.f32.mrb[6].mxu1  ;;  %v19526_v14 = vld [vmem:[#allocation13 + $0x128] ss:$28 sps:$4 sm:$0xff]   ;;  %v19536_v16 = vld [vmem:[#allocation13 + $0x19c] ss:$28 sps:$4 sm:$0xff]  }
0x1574   : > { %v11208_v45 = vpop.f32.mrb[7].mxu1  ;;  %v19537_v18 = vld [vmem:[#allocation13 + $0x1a0] ss:$28 sps:$4 sm:$0xff]  }
0x1575   : > { %v19540_v45 = vld [vmem:[#allocation13 + $0x1d4] ss:$28 sps:$4 sm:$0xff]  }
0x1579   : > { %v11325_v19 = vpop.f32.mrb[8].mxu1 }
0x157a   : > { %v11332_v20 = vadd.f32 %v11325_v19, %v11210_v10  ;;  %v11327_v21 = vpop.f32.mrb[9].mxu1  ;;  %v19533_v10 = vld [vmem:[#allocation13 + $0x168] ss:$28 sps:$4 sm:$0xff]   ;;  %v19538_v19 = vld [vmem:[#allocation13 + $0x1d0] ss:$28 sps:$4 sm:$0xff]  }
0x157b   : > { %v11333_v22 = vadd.f32 %v11327_v21, %v11211_v17  ;;  %v11329_v23 = vpop.f32.mrb[10].mxu1  ;;  %v19534_v17 = vld [vmem:[#allocation13 + $0x198] ss:$28 sps:$4 sm:$0xff]   ;;  %v19544_v21 = vld [vmem:[#allocation13 + $0x20c] ss:$28 sps:$4 sm:$0xff]  }
0x157c   : > { %v11330_v25 = vpop.f32.mrb[11].mxu1  ;;  %v19545_v23 = vld [vmem:[#allocation13 + $0x210] ss:$28 sps:$4 sm:$0xff]  }
0x157d   : > { %v19548_v25 = vld [vmem:[#allocation13 + $0x244] ss:$28 sps:$4 sm:$0xff]  }
0x1581   : > { %v11447_v26 = vpop.f32.mrb[12].mxu1 }
0x1582   : > { %v11454_v13 = vadd.f32 %v11447_v26, %v11332_v20  ;;  %v11449_v29 = vpop.f32.mrb[13].mxu1  ;;  %v19541_v20 = vld [vmem:[#allocation13 + $0x1d8] ss:$28 sps:$4 sm:$0xff]   ;;  %v19546_v26 = vld [vmem:[#allocation13 + $0x240] ss:$28 sps:$4 sm:$0xff]  }
0x1583   : > { %v11455_v40 = vadd.f32 %v11449_v29, %v11333_v22  ;;  %v11451_v30 = vpop.f32.mrb[14].mxu1  ;;  %v19542_v22 = vld [vmem:[#allocation13 + $0x208] ss:$28 sps:$4 sm:$0xff]   ;;  %v19552_v29 = vld [vmem:[#allocation13 + $0x27c] ss:$28 sps:$4 sm:$0xff]  }
0x1584   : > { %v11452_v61 = vpop.f32.mrb[15].mxu1  ;;  %v19553_v30 = vld [vmem:[#allocation13 + $0x280] ss:$28 sps:$4 sm:$0xff]  }
0x1585   : > { %v19556_v61 = vld [vmem:[#allocation13 + $0x2b4] ss:$28 sps:$4 sm:$0xff]  }
0x1589   : > { %v11569_v32 = vpop.f32.mrb[16].mxu1 }
0x158a   : > { %v11576_v33 = vadd.f32 %v11569_v32, %v11454_v13  ;;  %v11571_v35 = vpop.f32.mrb[17].mxu1  ;;  %v19549_v13 = vld [vmem:[#allocation13 + $0x248] ss:$28 sps:$4 sm:$0xff]  }
0x158b   : > { %v11577_v39 = vadd.f32 %v11571_v35, %v11455_v40  ;;  %v11573_v0 = vpop.f32.mrb[18].mxu1  ;;  %v19550_v40 = vld [vmem:[#allocation13 + $0x278] ss:$28 sps:$4 sm:$0xff]   ;;  %v11948_v32 = vld [vmem:[#allocation13 + $0x320] sm:$0x11] }
0x158c   : > { %v11574_v43 = vpop.f32.mrb[19].mxu1  ;;  %v19557_v35 = vld [vmem:[#allocation13 + $0x2b8] ss:$28 sps:$4 sm:$0xff]   ;;  %v17076_v0 = vcombine.high %v11948_v32, %v11948_v32 }
0x158d   : > { %v19558_v43 = vld [vmem:[#allocation13 + $0x2e8] ss:$28 sps:$4 sm:$0xff]  }
0x1591   : > { %v11691_v44 = vpop.f32.mrb[20].mxu1 }
0x1592   : > { %v11698_v46 = vadd.f32 %v11691_v44, %v11576_v33  ;;  %v11693_v34 = vpop.f32.mrb[21].mxu1  ;;  %v19554_v33 = vld [vmem:[#allocation13 + $0x2b0] ss:$28 sps:$4 sm:$0xff]  }
0x1593   : > { %v11699_v47 = vadd.f32 %v11693_v34, %v11577_v39  ;;  %v11695_v49 = vpop.f32.mrb[22].mxu1  ;;  %v19560_v39 = vld [vmem:[#allocation13 + $0x2ec] ss:$28 sps:$4 sm:$0xff]  }
0x1594   : > { %v11696_v15 = vpop.f32.mrb[23].mxu1  ;;  %v19561_v44 = vld [vmem:[#allocation13 + $0x2f0] ss:$28 sps:$4 sm:$0xff]   ;;  %v19564_v34 = vld [vmem:[#allocation13 + $0x328] ss:$0 sps:$4 sm:$0x11]  }
0x1595   : > { %v12498_v15 = vand.u32 %v19564_v34, %v21426_v6 }
0x1599   : > { %v11813_v7 = vpop.f32.mrb[24].mxu1 }
0x159a   : > { %v11820_v5 = vadd.f32 %v11813_v7, %v11698_v46  ;;  %v11815_v52 = vpop.f32.mrb[25].mxu1  ;;  %v17075_v46 = vcombine.low %v11948_v32, %v11948_v32  ;;  %v19567_v7 = vld [vmem:[#allocation13 + $0x330] ss:$28 sps:$4 sm:$0xff]   ;;  %v19634_v32 = vld [vmem:[#allocation13 + $0x59c] ss:$28 sps:$4 sm:$0xff]  }
0x159b   : > { %v11821_v53 = vadd.f32 %v11815_v52, %v11699_v47  ;;  %v11817_v3 = vpop.f32.mrb[26].mxu1  ;;  %v12495_v47 = vand.u32 %v17076_v0, %v21426_v6  ;;  %v19565_v52 = vld [vmem:[#allocation13 + $0x32c] ss:$28 sps:$4 sm:$0xff]  }
0x159c   : > { %v11828_v54 = vadd.f32 %v11826_v48, %v11820_v5  ;;  %v11818_v9 = vpop.f32.mrb[27].mxu1  ;;  %v12492_v49 = vand.u32 %v17075_v46, %v21426_v6  ;;  %v19570_v5 = vld [vmem:[#allocation13 + $0x338] ss:$28 sps:$4 sm:$0xff]   ;;  %v19576_v3 = vld [vmem:[#allocation13 + $0x370] ss:$28 sps:$4 sm:$0xff]  }
0x159d   : > { %v11829_v50 = vadd.f32 %v11826_v48, %v11821_v53  ;;  %v19568_v48 = vld [vmem:[#allocation13 + $0x334] ss:$28 sps:$4 sm:$0xff]   ;;  %v19573_v53 = vld [vmem:[#allocation13 + $0x368] ss:$28 sps:$4 sm:$0xff]  }
0x159e   : > { %v11830_v55 = vmax.f32 %v11828_v54, 0.0  ;;  %v19571_v54 = vld [vmem:[#allocation13 + $0x364] ss:$28 sps:$4 sm:$0xff]   ;;  %v19574_v9 = vld [vmem:[#allocation13 + $0x36c] ss:$28 sps:$4 sm:$0xff]  }
0x159f   : > { %v11831_v56 = vmax.f32 %v11829_v50, 0.0  ;;  %v19579_v50 = vld [vmem:[#allocation13 + $0x3a0] ss:$28 sps:$4 sm:$0xff]   ;;  %v12785_v0 = vld [vmem:[#allocation13 + $0x644] sm:$0x11] }
0x15a0   : > { %v21435_v27 = vpack.c.bf16 %v11830_v55, %v11830_v55  ;;  %v19582_v55 = vld [vmem:[#allocation13 + $0x3a8] ss:$28 sps:$4 sm:$0xff]  }
0x15a1   : > { %v21433_v57 = vpack.c.bf16 %v11831_v56, %v11831_v56  ;;  %v19577_v56 = vld [vmem:[#allocation13 + $0x39c] ss:$28 sps:$4 sm:$0xff]   ;;  %v19645_v46 = vld [vmem:[#allocation13 + $0x608] ss:$28 sps:$4 sm:$0xff]  }
0x15a3   : > { %17078 = vmatprep.mubr.msk.bf16.mxu0 %vm12472_vm11, %v21433_v57  ;;  %17079 = vmatprep.mubr.msk.bf16.mxu1 %vm12472_vm11, %v21433_v57 }
0x15a4   : > { %12533 = vmatmul.mubr.bf16.vlgmr.msra.gmra.mrb[16].mxu0 %v21435_v27  ;;  %12574 = vmatmul.mubr.bf16.vlgmr.msra.gmra.mrb[28].mxu1 %v21435_v27 }
0x15a5   : > { %12583 = vmatpush1.bf16.msra.mxu0 %v19506_v31  ;;  %12624 = vmatpush1.bf16.msra.mxu1 %v19509_v24  ;;  %v19580_v31 = vld [vmem:[#allocation13 + $0x3a4] ss:$28 sps:$4 sm:$0xff]   ;;  %v19585_v24 = vld [vmem:[#allocation13 + $0x3d8] ss:$28 sps:$4 sm:$0xff]  }
0x15a6   : > { %17080 = vmatprep.mubr.msk.bf16.mxu0 %vm12472_vm11, %v21433_v57  ;;  %17081 = vmatprep.mubr.msk.bf16.mxu1 %vm12472_vm11, %v21433_v57 }
0x15a7   : > { %12584 = vmatprep.subr.bf16.mxu0 %v19512_v58  ;;  %12625 = vmatprep.subr.bf16.mxu1 %v20257_v28  ;;  %v19588_v58 = vld [vmem:[#allocation13 + $0x3e0] ss:$28 sps:$4 sm:$0xff]  }
0x15a9   : > { %12585 = vmatpush1.bf16.msra.mxu0 %v19510_v51  ;;  %12626 = vmatpush1.bf16.msra.mxu1 %v19513_v59  ;;  %v19583_v51 = vld [vmem:[#allocation13 + $0x3d4] ss:$28 sps:$4 sm:$0xff]   ;;  %v19586_v59 = vld [vmem:[#allocation13 + $0x3dc] ss:$28 sps:$4 sm:$0xff]  }
0x15aa   : > { %12586 = vmatprep.subr.bf16.mxu0 %v19516_v60  ;;  %12627 = vmatprep.subr.bf16.mxu1 %v20257_v28  ;;  %v19591_v60 = vld [vmem:[#allocation13 + $0x410] ss:$28 sps:$4 sm:$0xff]  }
0x15ad   : > { %12587 = vmatpush1.bf16.msra.mxu0 %v19514_v36  ;;  %12628 = vmatpush1.bf16.msra.mxu1 %v19517_v62  ;;  %v19594_v36 = vld [vmem:[#allocation13 + $0x418] ss:$28 sps:$4 sm:$0xff]   ;;  %v19589_v62 = vld [vmem:[#allocation13 + $0x40c] ss:$28 sps:$4 sm:$0xff]  }
0x15ae   : > { %12588 = vmatprep.subr.bf16.mxu0 %v19520_v63  ;;  %12629 = vmatprep.subr.bf16.mxu1 %v20257_v28  ;;  %v19592_v63 = vld [vmem:[#allocation13 + $0x414] ss:$28 sps:$4 sm:$0xff]  }
0x15b1   : > { %12589 = vmatpush1.bf16.msra.mxu0 %v19518_v1  ;;  %12630 = vmatpush1.bf16.msra.mxu1 %v19521_v2  ;;  %v19597_v1 = vld [vmem:[#allocation13 + $0x448] ss:$28 sps:$4 sm:$0xff]   ;;  %v19600_v2 = vld [vmem:[#allocation13 + $0x450] ss:$28 sps:$4 sm:$0xff]  }
0x15b2   : > { %12590 = vmatprep.subr.bf16.mxu0 %v19524_v4  ;;  %12631 = vmatprep.subr.bf16.mxu1 %v20257_v28  ;;  %v19595_v4 = vld [vmem:[#allocation13 + $0x444] ss:$28 sps:$4 sm:$0xff]  }
0x15b5   : > { %12591 = vmatpush1.bf16.msra.mxu0 %v19522_v8  ;;  %12632 = vmatpush1.bf16.msra.mxu1 %v19525_v11  ;;  %v19598_v8 = vld [vmem:[#allocation13 + $0x44c] ss:$28 sps:$4 sm:$0xff]   ;;  %v19603_v11 = vld [vmem:[#allocation13 + $0x480] ss:$28 sps:$4 sm:$0xff]  }
0x15b6   : > { %12592 = vmatprep.subr.bf16.mxu0 %v19528_v12  ;;  %12633 = vmatprep.subr.bf16.mxu1 %v20257_v28  ;;  %v19606_v12 = vld [vmem:[#allocation13 + $0x488] ss:$28 sps:$4 sm:$0xff]  }
0x15b9   : > { %12593 = vmatpush1.bf16.msra.mxu0 %v19526_v14  ;;  %12634 = vmatpush1.bf16.msra.mxu1 %v19529_v41  ;;  %v19601_v14 = vld [vmem:[#allocation13 + $0x47c] ss:$28 sps:$4 sm:$0xff]   ;;  %v19604_v41 = vld [vmem:[#allocation13 + $0x484] ss:$28 sps:$4 sm:$0xff]  }
0x15ba   : > { %12594 = vmatprep.subr.bf16.mxu0 %v19532_v38  ;;  %12635 = vmatprep.subr.bf16.mxu1 %v20257_v28  ;;  %v19609_v38 = vld [vmem:[#allocation13 + $0x4b8] ss:$28 sps:$4 sm:$0xff]  }
0x15bd   : > { %12595 = vmatpush1.bf16.msra.mxu0 %v19530_v37  ;;  %12636 = vmatpush1.bf16.msra.mxu1 %v19533_v10  ;;  %v19612_v37 = vld [vmem:[#allocation13 + $0x4c0] ss:$28 sps:$4 sm:$0xff]   ;;  %v19607_v10 = vld [vmem:[#allocation13 + $0x4b4] ss:$28 sps:$4 sm:$0xff]  }
0x15be   : > { %12596 = vmatprep.subr.bf16.mxu0 %v19536_v16  ;;  %12637 = vmatprep.subr.bf16.mxu1 %v20257_v28  ;;  %v19610_v16 = vld [vmem:[#allocation13 + $0x4bc] ss:$28 sps:$4 sm:$0xff]  }
0x15c1   : > { %12597 = vmatpush1.bf16.msra.mxu0 %v19534_v17  ;;  %12638 = vmatpush1.bf16.msra.mxu1 %v19537_v18  ;;  %v19615_v17 = vld [vmem:[#allocation13 + $0x4f0] ss:$28 sps:$4 sm:$0xff]   ;;  %v19618_v18 = vld [vmem:[#allocation13 + $0x4f8] ss:$28 sps:$4 sm:$0xff]  }
0x15c2   : > { %12598 = vmatprep.subr.bf16.mxu0 %v19540_v45  ;;  %12639 = vmatprep.subr.bf16.mxu1 %v20257_v28  ;;  %v19613_v45 = vld [vmem:[#allocation13 + $0x4ec] ss:$28 sps:$4 sm:$0xff]  }
0x15c5   : > { %12599 = vmatpush1.bf16.msra.mxu0 %v19538_v19  ;;  %12640 = vmatpush1.bf16.msra.mxu1 %v19541_v20  ;;  %v19616_v19 = vld [vmem:[#allocation13 + $0x4f4] ss:$28 sps:$4 sm:$0xff]   ;;  %v19621_v20 = vld [vmem:[#allocation13 + $0x528] ss:$28 sps:$4 sm:$0xff]  }
0x15c6   : > { %12600 = vmatprep.subr.bf16.mxu0 %v19544_v21  ;;  %12641 = vmatprep.subr.bf16.mxu1 %v20257_v28  ;;  %v19624_v21 = vld [vmem:[#allocation13 + $0x530] ss:$28 sps:$4 sm:$0xff]  }
0x15c9   : > { %12601 = vmatpush1.bf16.msra.mxu0 %v19542_v22  ;;  %12642 = vmatpush1.bf16.msra.mxu1 %v19545_v23  ;;  %v19619_v22 = vld [vmem:[#allocation13 + $0x524] ss:$28 sps:$4 sm:$0xff]   ;;  %v19622_v23 = vld [vmem:[#allocation13 + $0x52c] ss:$28 sps:$4 sm:$0xff]  }
0x15ca   : > { %12602 = vmatprep.subr.bf16.mxu0 %v19548_v25  ;;  %12643 = vmatprep.subr.bf16.mxu1 %v20257_v28  ;;  %v19627_v25 = vld [vmem:[#allocation13 + $0x560] ss:$28 sps:$4 sm:$0xff]  }
0x15cd   : > { %12603 = vmatpush1.bf16.msra.mxu0 %v19546_v26  ;;  %12644 = vmatpush1.bf16.msra.mxu1 %v19549_v13  ;;  %v19630_v26 = vld [vmem:[#allocation13 + $0x568] ss:$28 sps:$4 sm:$0xff]   ;;  %v19625_v13 = vld [vmem:[#allocation13 + $0x55c] ss:$28 sps:$4 sm:$0xff]  }
0x15ce   : > { %12604 = vmatprep.subr.bf16.mxu0 %v19552_v29  ;;  %12645 = vmatprep.subr.bf16.mxu1 %v20257_v28  ;;  %v19628_v29 = vld [vmem:[#allocation13 + $0x564] ss:$28 sps:$4 sm:$0xff]  }
0x15d1   : > { %12605 = vmatpush1.bf16.msra.mxu0 %v19550_v40  ;;  %12646 = vmatpush1.bf16.msra.mxu1 %v19553_v30  ;;  %v19633_v40 = vld [vmem:[#allocation13 + $0x598] ss:$28 sps:$4 sm:$0xff]   ;;  %v19636_v30 = vld [vmem:[#allocation13 + $0x5a0] ss:$28 sps:$4 sm:$0xff]  }
0x15d2   : > { %12606 = vmatprep.subr.bf16.mxu0 %v19556_v61  ;;  %12647 = vmatprep.subr.bf16.mxu1 %v20257_v28  ;;  %v19631_v61 = vld [vmem:[#allocation13 + $0x594] ss:$28 sps:$4 sm:$0xff]  }
0x15d5   : > { %12607 = vmatpush1.bf16.msra.mxu0 %v19554_v33  ;;  %12648 = vmatpush1.bf16.msra.mxu1 %v19557_v35  ;;  %v19639_v33 = vld [vmem:[#allocation13 + $0x5d0] ss:$28 sps:$4 sm:$0xff]   ;;  %v19642_v35 = vld [vmem:[#allocation13 + $0x5d8] ss:$28 sps:$4 sm:$0xff]  }
0x15d6   : > { %12608 = vmatprep.subr.bf16.mxu0 %v19560_v39  ;;  %12649 = vmatprep.subr.bf16.mxu1 %v20257_v28  ;;  %v12784_v39 = vld [vmem:[#allocation13 + $0x63c] sm:$0x11] }
0x15d7   : > { %v17181_v34 = vcombine.high %v12784_v39, %v12784_v39 }
0x15d9   : > { %12609 = vmatpush1.bf16.msra.mxu0 %v19558_v43  ;;  %12650 = vmatpush1.bf16.msra.mxu1 %v19561_v44  ;;  %v19637_v43 = vld [vmem:[#allocation13 + $0x5cc] ss:$28 sps:$4 sm:$0xff]   ;;  %v19640_v44 = vld [vmem:[#allocation13 + $0x5d4] ss:$28 sps:$4 sm:$0xff]  }
0x15da   : > { %12610 = vmatprep.subr.bf16.mxu0 %v12495_v47  ;;  %12651 = vmatprep.subr.bf16.mxu1 %v20257_v28  ;;  %v19648_v47 = vld [vmem:[#allocation13 + $0x610] ss:$28 sps:$4 sm:$0xff]  }
0x15dd   : > { %12611 = vmatpush1.bf16.msra.mxu0 %v12492_v49  ;;  %12652 = vmatpush1.bf16.msra.mxu1 %v12498_v15  ;;  %v17183_v49 = vcombine.high %v12785_v0, %v12785_v0  ;;  %v19643_v15 = vld [vmem:[#allocation13 + $0x604] ss:$28 sps:$4 sm:$0xff]  }
0x15de   : > { %13331 = vmatprep.subr.bf16.mxu0 %v19567_v7  ;;  %13372 = vmatprep.subr.bf16.mxu1 %v19570_v5  ;;  %v17180_v7 = vcombine.low %v12784_v39, %v12784_v39  ;;  %v19646_v5 = vld [vmem:[#allocation13 + $0x60c] ss:$28 sps:$4 sm:$0xff]  }
0x15e0   : > { %12615 = vmatmul.mubr.bf16.vlgmr.msra.gmra.mrb[20].mxu0 %v21435_v27  ;;  %12656 = vmatmul.mubr.bf16.vlgmr.msra.gmra.mrb[32].mxu1 %v21435_v27 }
0x15e1   : > { %13332 = vmatpush1.bf16.msra.mxu0 %v19565_v52  ;;  %17187 = vmatprep.mubr.msk.bf16.mxu0 %vm12472_vm11, %v21433_v57  ;;  %v13314_v52 = vand.u32 %v17181_v34, %v21426_v6 }
0x15e2   : > { %13373 = vmatpush1.bf16.msra.mxu1 %v19568_v48  ;;  %17188 = vmatprep.mubr.msk.bf16.mxu1 %vm12472_vm11, %v21433_v57  ;;  %v17182_v48 = vcombine.low %v12785_v0, %v12785_v0  ;;  %v19708_v0 = vld [vmem:[#allocation13 + $0x61c] ss:$28 sps:$4 sm:$0xff]  }
0x15e3   : > { %13333 = vmatprep.subr.bf16.mxu0 %v19573_v53  ;;  %13374 = vmatprep.subr.bf16.mxu1 %v19576_v3  ;;  %v13320_v53 = vand.u32 %v17183_v49, %v21426_v6  ;;  %v13311_v3 = vand.u32 %v17180_v7, %v21426_v6 }
0x15e5   : > { %13334 = vmatpush1.bf16.msra.mxu0 %v19571_v54  ;;  %v13317_v54 = vand.u32 %v17182_v48, %v21426_v6 }
0x15e6   : > { %13375 = vmatpush1.bf16.msra.mxu1 %v19574_v9  ;;  %13335 = vmatprep.subr.bf16.mxu0 %v19579_v50  ;;  %v19655_v9 = vld [vmem:[#allocation13 + $0x340] ss:$28 sps:$4 sm:$0xff]  }
0x15e7   : > { %13376 = vmatprep.subr.bf16.mxu1 %v19582_v55  ;;  %v19653_v50 = vld [vmem:[#allocation13 + $0x33c] ss:$28 sps:$4 sm:$0xff]   ;;  %v19656_v55 = vld [vmem:[#allocation13 + $0x344] ss:$28 sps:$4 sm:$0xff]  }
0x15e9   : > { %13336 = vmatpush1.bf16.msra.mxu0 %v19577_v56  ;;  %v19659_v56 = vld [vmem:[#allocation13 + $0x378] ss:$28 sps:$4 sm:$0xff]  }
0x15ea   : > { %13377 = vmatpush1.bf16.msra.mxu1 %v19580_v31  ;;  %13337 = vmatprep.subr.bf16.mxu0 %v19585_v24  ;;  %v19657_v31 = vld [vmem:[#allocation13 + $0x374] ss:$28 sps:$4 sm:$0xff]   ;;  %v19660_v24 = vld [vmem:[#allocation13 + $0x37c] ss:$28 sps:$4 sm:$0xff]  }
0x15eb   : > { %13378 = vmatprep.subr.bf16.mxu1 %v19588_v58  ;;  %v19663_v58 = vld [vmem:[#allocation13 + $0x3b0] ss:$28 sps:$4 sm:$0xff]  }
0x15ed   : > { %13338 = vmatpush1.bf16.msra.mxu0 %v19583_v51  ;;  %v19661_v51 = vld [vmem:[#allocation13 + $0x3ac] ss:$28 sps:$4 sm:$0xff]  }
0x15ee   : > { %13379 = vmatpush1.bf16.msra.mxu1 %v19586_v59  ;;  %13339 = vmatprep.subr.bf16.mxu0 %v19591_v60  ;;  %v19664_v59 = vld [vmem:[#allocation13 + $0x3b4] ss:$28 sps:$4 sm:$0xff]   ;;  %v19667_v60 = vld [vmem:[#allocation13 + $0x3e8] ss:$28 sps:$4 sm:$0xff]  }
0x15ef   : > { %13380 = vmatprep.subr.bf16.mxu1 %v19594_v36  ;;  %v19665_v36 = vld [vmem:[#allocation13 + $0x3e4] ss:$28 sps:$4 sm:$0xff]  }
0x15f1   : > { %13340 = vmatpush1.bf16.msra.mxu0 %v19589_v62  ;;  %v19668_v62 = vld [vmem:[#allocation13 + $0x3ec] ss:$28 sps:$4 sm:$0xff]  }
0x15f2   : > { %13381 = vmatpush1.bf16.msra.mxu1 %v19592_v63  ;;  %13341 = vmatprep.subr.bf16.mxu0 %v19597_v1  ;;  %v19671_v63 = vld [vmem:[#allocation13 + $0x420] ss:$28 sps:$4 sm:$0xff]  }
0x15f3   : > { %13382 = vmatprep.subr.bf16.mxu1 %v19600_v2  ;;  %v19669_v1 = vld [vmem:[#allocation13 + $0x41c] ss:$28 sps:$4 sm:$0xff]   ;;  %v19672_v2 = vld [vmem:[#allocation13 + $0x424] ss:$28 sps:$4 sm:$0xff]  }
0x15f5   : > { %13342 = vmatpush1.bf16.msra.mxu0 %v19595_v4  ;;  %v19675_v4 = vld [vmem:[#allocation13 + $0x458] ss:$28 sps:$4 sm:$0xff]  }
0x15f6   : > { %13383 = vmatpush1.bf16.msra.mxu1 %v19598_v8  ;;  %13343 = vmatprep.subr.bf16.mxu0 %v19603_v11  ;;  %v19673_v8 = vld [vmem:[#allocation13 + $0x454] ss:$28 sps:$4 sm:$0xff]   ;;  %v19676_v11 = vld [vmem:[#allocation13 + $0x45c] ss:$28 sps:$4 sm:$0xff]  }
0x15f7   : > { %13384 = vmatprep.subr.bf16.mxu1 %v19606_v12  ;;  %v19679_v12 = vld [vmem:[#allocation13 + $0x490] ss:$28 sps:$4 sm:$0xff]  }
0x15f9   : > { %13344 = vmatpush1.bf16.msra.mxu0 %v19601_v14  ;;  %v19677_v14 = vld [vmem:[#allocation13 + $0x48c] ss:$28 sps:$4 sm:$0xff]  }
0x15fa   : > { %13385 = vmatpush1.bf16.msra.mxu1 %v19604_v41  ;;  %13345 = vmatprep.subr.bf16.mxu0 %v19609_v38  ;;  %v19680_v41 = vld [vmem:[#allocation13 + $0x494] ss:$28 sps:$4 sm:$0xff]   ;;  %v19683_v38 = vld [vmem:[#allocation13 + $0x4c8] ss:$28 sps:$4 sm:$0xff]  }
0x15fb   : > { %13386 = vmatprep.subr.bf16.mxu1 %v19612_v37  ;;  %v19681_v37 = vld [vmem:[#allocation13 + $0x4c4] ss:$28 sps:$4 sm:$0xff]  }
0x15fd   : > { %13346 = vmatpush1.bf16.msra.mxu0 %v19607_v10  ;;  %v19684_v10 = vld [vmem:[#allocation13 + $0x4cc] ss:$28 sps:$4 sm:$0xff]  }
0x15fe   : > { %13387 = vmatpush1.bf16.msra.mxu1 %v19610_v16  ;;  %13347 = vmatprep.subr.bf16.mxu0 %v19615_v17  ;;  %v19687_v16 = vld [vmem:[#allocation13 + $0x500] ss:$28 sps:$4 sm:$0xff]  }
0x15ff   : > { %13388 = vmatprep.subr.bf16.mxu1 %v19618_v18  ;;  %v19685_v17 = vld [vmem:[#allocation13 + $0x4fc] ss:$28 sps:$4 sm:$0xff]   ;;  %v19688_v18 = vld [vmem:[#allocation13 + $0x504] ss:$28 sps:$4 sm:$0xff]  }
0x1601   : > { %13348 = vmatpush1.bf16.msra.mxu0 %v19613_v45  ;;  %v19691_v45 = vld [vmem:[#allocation13 + $0x538] ss:$28 sps:$4 sm:$0xff]  }
0x1602   : > { %13389 = vmatpush1.bf16.msra.mxu1 %v19616_v19  ;;  %13349 = vmatprep.subr.bf16.mxu0 %v19621_v20  ;;  %v19689_v19 = vld [vmem:[#allocation13 + $0x534] ss:$28 sps:$4 sm:$0xff]   ;;  %v19692_v20 = vld [vmem:[#allocation13 + $0x53c] ss:$28 sps:$4 sm:$0xff]  }
0x1603   : > { %13390 = vmatprep.subr.bf16.mxu1 %v19624_v21  ;;  %v19695_v21 = vld [vmem:[#allocation13 + $0x570] ss:$28 sps:$4 sm:$0xff]  }
0x1605   : > { %13350 = vmatpush1.bf16.msra.mxu0 %v19619_v22  ;;  %v19693_v22 = vld [vmem:[#allocation13 + $0x56c] ss:$28 sps:$4 sm:$0xff]  }
0x1606   : > { %13391 = vmatpush1.bf16.msra.mxu1 %v19622_v23  ;;  %13351 = vmatprep.subr.bf16.mxu0 %v19627_v25  ;;  %v19696_v23 = vld [vmem:[#allocation13 + $0x574] ss:$28 sps:$4 sm:$0xff]   ;;  %v19699_v25 = vld [vmem:[#allocation13 + $0x5a8] ss:$28 sps:$4 sm:$0xff]  }
0x1607   : > { %13392 = vmatprep.subr.bf16.mxu1 %v19630_v26  ;;  %v19697_v26 = vld [vmem:[#allocation13 + $0x5a4] ss:$28 sps:$4 sm:$0xff]  }
0x1609   : > { %13352 = vmatpush1.bf16.msra.mxu0 %v19625_v13  ;;  %v19700_v13 = vld [vmem:[#allocation13 + $0x5ac] ss:$28 sps:$4 sm:$0xff]  }
0x160a   : > { %13393 = vmatpush1.bf16.msra.mxu1 %v19628_v29  ;;  %13353 = vmatprep.subr.bf16.mxu0 %v19633_v40  ;;  %v19703_v29 = vld [vmem:[#allocation13 + $0x5e0] ss:$28 sps:$4 sm:$0xff]   ;;  %v12786_v40 = vld [vmem:[#allocation13 + $0x64c] sm:$0x11] }
0x160b   : > { %13394 = vmatprep.subr.bf16.mxu1 %v19636_v30  ;;  %v19701_v30 = vld [vmem:[#allocation13 + $0x5dc] ss:$28 sps:$4 sm:$0xff]   ;;  %v17184_v39 = vcombine.low %v12786_v40, %v12786_v40 }
0x160d   : > { %13354 = vmatpush1.bf16.msra.mxu0 %v19631_v61  ;;  %v19704_v61 = vld [vmem:[#allocation13 + $0x5e4] ss:$28 sps:$4 sm:$0xff]  }
0x160e   : > { %13395 = vmatpush1.bf16.msra.mxu1 %v19634_v32  ;;  %13355 = vmatprep.subr.bf16.mxu0 %v19639_v33  ;;  %v19707_v32 = vld [vmem:[#allocation13 + $0x618] ss:$28 sps:$4 sm:$0xff]   ;;  %v17185_v33 = vcombine.high %v12786_v40, %v12786_v40 }
0x160f   : > { %13396 = vmatprep.subr.bf16.mxu1 %v19642_v35  ;;  %v19705_v35 = vld [vmem:[#allocation13 + $0x614] ss:$28 sps:$4 sm:$0xff]  }
0x1611   : > { %13356 = vmatpush1.bf16.msra.mxu0 %v19637_v43  ;;  %v13326_v43 = vand.u32 %v17185_v33, %v21426_v6 }
0x1612   : > { %13397 = vmatpush1.bf16.msra.mxu1 %v19640_v44  ;;  %13357 = vmatprep.subr.bf16.mxu0 %v19645_v46  ;;  %v19711_v44 = vld [vmem:[#allocation13 + $0x654] ss:$0 sps:$4 sm:$0x11]   ;;  %v13323_v46 = vand.u32 %v17184_v39, %v21426_v6  ;;  %v12663_v39 = vld [vmem:[%s21773_s2] sm:$0x1] }
0x1613   : > { %13398 = vmatprep.subr.bf16.mxu1 %v19648_v47  ;;  %v13329_v34 = vand.u32 %v19711_v44, %v21426_v6 }
0x1615   : > { %13358 = vmatpush1.bf16.msra.mxu0 %v19643_v15 }
0x1616   : > { %13399 = vmatpush1.bf16.msra.mxu1 %v19646_v5  ;;  %13359 = vmatprep.subr.bf16.mxu0 %v13314_v52 }
0x1617   : > { %13400 = vmatprep.subr.bf16.mxu1 %v13320_v53 }
0x1619   : > { %13360 = vmatpush1.bf16.msra.mxu0 %v13311_v3 }
0x161a   : > { %13401 = vmatpush1.bf16.msra.mxu1 %v13317_v54  ;;  %13413 = vmatprep.subr.bf16.mxu0 %v19655_v9 }
0x161b   : > { %13454 = vmatprep.subr.bf16.mxu1 %v20257_v28 }
0x161c   : > { %13364 = vmatmul.mubr.bf16.vlgmr.msra.gmra.mrb[24].mxu0 %v21435_v27 }
0x161d   : > { %13405 = vmatmul.mubr.bf16.vlgmr.msra.gmra.mrb[36].mxu1 %v21435_v27  ;;  %13414 = vmatpush1.bf16.msra.mxu0 %v19653_v50 }
0x161e   : > { %17189 = vmatprep.mubr.msk.bf16.mxu0 %vm12472_vm11, %v21433_v57  ;;  %13455 = vmatpush1.bf16.msra.mxu1 %v19656_v55 }
0x161f   : > { %17190 = vmatprep.mubr.msk.bf16.mxu1 %vm12472_vm11, %v21433_v57  ;;  %13415 = vmatprep.subr.bf16.mxu0 %v19659_v56 }
0x1620   : > { %13456 = vmatprep.subr.bf16.mxu1 %v20257_v28 }
0x1621   : > { %13416 = vmatpush1.bf16.msra.mxu0 %v19657_v31 }
0x1622   : > { %13457 = vmatpush1.bf16.msra.mxu1 %v19660_v24  ;;  %13417 = vmatprep.subr.bf16.mxu0 %v19663_v58 }
0x1623   : > { %13458 = vmatprep.subr.bf16.mxu1 %v20257_v28 }
0x1625   : > { %13418 = vmatpush1.bf16.msra.mxu0 %v19661_v51 }
0x1626   : > { %13459 = vmatpush1.bf16.msra.mxu1 %v19664_v59  ;;  %13419 = vmatprep.subr.bf16.mxu0 %v19667_v60 }
0x1627   : > { %13460 = vmatprep.subr.bf16.mxu1 %v20257_v28 }
0x1629   : > { %13420 = vmatpush1.bf16.msra.mxu0 %v19665_v36 }
0x162a   : > { %13461 = vmatpush1.bf16.msra.mxu1 %v19668_v62  ;;  %13421 = vmatprep.subr.bf16.mxu0 %v19671_v63 }
0x162b   : > { %13462 = vmatprep.subr.bf16.mxu1 %v20257_v28 }
0x162d   : > { %13422 = vmatpush1.bf16.msra.mxu0 %v19669_v1 }
0x162e   : > { %13463 = vmatpush1.bf16.msra.mxu1 %v19672_v2  ;;  %13423 = vmatprep.subr.bf16.mxu0 %v19675_v4 }
0x162f   : > { %13464 = vmatprep.subr.bf16.mxu1 %v20257_v28 }
0x1631   : > { %13424 = vmatpush1.bf16.msra.mxu0 %v19673_v8 }
0x1632   : > { %13465 = vmatpush1.bf16.msra.mxu1 %v19676_v11  ;;  %13425 = vmatprep.subr.bf16.mxu0 %v19679_v12 }
0x1633   : > { %13466 = vmatprep.subr.bf16.mxu1 %v20257_v28 }
0x1635   : > { %13426 = vmatpush1.bf16.msra.mxu0 %v19677_v14 }
0x1636   : > { %13467 = vmatpush1.bf16.msra.mxu1 %v19680_v41  ;;  %13427 = vmatprep.subr.bf16.mxu0 %v19683_v38  ;;  %v17191_v41 = vld [vmem:[%s21773_s2 + $0x1] sm:$0x1] }
0x1637   : > { %13468 = vmatprep.subr.bf16.mxu1 %v20257_v28 }
0x1639   : > { %13428 = vmatpush1.bf16.msra.mxu0 %v19681_v37 }
0x163a   : > { %13469 = vmatpush1.bf16.msra.mxu1 %v19684_v10  ;;  %13429 = vmatprep.subr.bf16.mxu0 %v19687_v16 }
0x163b   : > { %13470 = vmatprep.subr.bf16.mxu1 %v20257_v28 }
0x163d   : > { %13430 = vmatpush1.bf16.msra.mxu0 %v19685_v17 }
0x163e   : > { %13471 = vmatpush1.bf16.msra.mxu1 %v19688_v18  ;;  %13431 = vmatprep.subr.bf16.mxu0 %v19691_v45 }
0x163f   : > { %13472 = vmatprep.subr.bf16.mxu1 %v20257_v28 }
0x1641   : > { %13432 = vmatpush1.bf16.msra.mxu0 %v19689_v19 }
0x1642   : > { %13473 = vmatpush1.bf16.msra.mxu1 %v19692_v20  ;;  %13433 = vmatprep.subr.bf16.mxu0 %v19695_v21 }
0x1643   : > { %13474 = vmatprep.subr.bf16.mxu1 %v20257_v28 }
0x1645   : > { %13434 = vmatpush1.bf16.msra.mxu0 %v19693_v22 }
0x1646   : > { %13475 = vmatpush1.bf16.msra.mxu1 %v19696_v23  ;;  %13435 = vmatprep.subr.bf16.mxu0 %v19699_v25 }
0x1647   : > { %13476 = vmatprep.subr.bf16.mxu1 %v20257_v28 }
0x1649   : > { %13436 = vmatpush1.bf16.msra.mxu0 %v19697_v26 }
0x164a   : > { %13477 = vmatpush1.bf16.msra.mxu1 %v19700_v13  ;;  %13437 = vmatprep.subr.bf16.mxu0 %v19703_v29 }
0x164b   : > { %13478 = vmatprep.subr.bf16.mxu1 %v20257_v28 }
0x164d   : > { %13438 = vmatpush1.bf16.msra.mxu0 %v19701_v30 }
0x164e   : > { %13479 = vmatpush1.bf16.msra.mxu1 %v19704_v61  ;;  %13439 = vmatprep.subr.bf16.mxu0 %v19707_v32 }
0x164f   : > { %13480 = vmatprep.subr.bf16.mxu1 %v20257_v28 }
0x1651   : > { %13440 = vmatpush1.bf16.msra.mxu0 %v19705_v35 }
0x1652   : > { %13481 = vmatpush1.bf16.msra.mxu1 %v19708_v0  ;;  %13441 = vmatprep.subr.bf16.mxu0 %v13326_v43  ;;  %v19714_v0 = vld [vmem:[#allocation13 + $0x664] ss:$28 sps:$4 sm:$0xff]   ;;  %v19717_v43 = vld [vmem:[#allocation13 + $0x65c] ss:$28 sps:$4 sm:$0xff]  }
0x1653   : > { %13482 = vmatprep.subr.bf16.mxu1 %v20257_v28 }
0x1655   : > { %13442 = vmatpush1.bf16.msra.mxu0 %v13323_v46 }
0x1656   : > { %13483 = vmatpush1.bf16.msra.mxu1 %v13329_v34  ;;  %v19712_v34 = vld [vmem:[#allocation13 + $0x660] ss:$28 sps:$4 sm:$0xff]  }
0x1658   : > { %13446 = vmatmul.mubr.bf16.vlgmr.msra.gmra.mrb[28].mxu0 %v21435_v27 }
0x1659   : > { %13487 = vmatmul.mubr.bf16.vlgmr.msra.gmra.mrb[40].mxu1 %v21435_v27  ;;  %13559 = vmatprep.mubr.bf16.mxu0 %v20257_v28 }
0x165a   : > { %13600 = vmatprep.mubr.bf16.mxu1 %v20257_v28 }
0x1677   : > { %v21502_v47 = vpop.f32.mrb[16].mxu0  ;;  %v21504_v49 = vpop.f32.mrb[28].mxu1 }
0x1678   : > { %v12536_v15 = vpop.f32.mrb[17].mxu0  ;;  %v12577_v7 = vpop.f32.mrb[29].mxu1  ;;  %v12664_v20 = vpack.c.bf16 %v21502_v47, %v21502_v47  ;;  %v12666_v25 = vpack.c.bf16 %v21504_v49, %v21504_v49  ;;  %v19715_v47 = vld [vmem:[#allocation13 + $0x658] ss:$28 sps:$4 sm:$0xff]  }
0x1679   : > { %v12538_v5 = vpop.f32.mrb[18].mxu0  ;;  %v12579_v52 = vpop.f32.mrb[30].mxu1  ;;  %v12665_v26 = vpack.c.bf16 %v12536_v15, %v12536_v15  ;;  %v12667_v13 = vpack.c.bf16 %v12577_v7, %v12577_v7  ;;  %v19720_v49 = vld [vmem:[#allocation13 + $0x69c] ss:$28 sps:$4 sm:$0xff]   ;;  %v19723_v15 = vld [vmem:[#allocation13 + $0x694] ss:$28 sps:$4 sm:$0xff]  }
0x167a   : > { %v12539_v48 = vpop.f32.mrb[19].mxu0  ;;  %v12580_v53 = vpop.f32.mrb[31].mxu1  ;;  %v13694_v30 = vsel %vm1856_vm2, %v12664_v20, 0  ;;  %v13700_v61 = vsel %vm1856_vm2, %v12666_v25, 0  ;;  %v19718_v7 = vld [vmem:[#allocation13 + $0x698] ss:$28 sps:$4 sm:$0xff]  }
0x167b   : > { %v19721_v5 = vld [vmem:[#allocation13 + $0x690] ss:$28 sps:$4 sm:$0xff]   ;;  %v19778_v25 = vld [vmem:[#allocation13 + $0x8c8] ss:$28 sps:$4 sm:$0xff]  }
0x167c   : > { %v19726_v52 = vld [vmem:[#allocation13 + $0x6d4] ss:$28 sps:$4 sm:$0xff]   ;;  %v19729_v48 = vld [vmem:[#allocation13 + $0x6cc] ss:$28 sps:$4 sm:$0xff]  }
0x167d   : > { %v19724_v53 = vld [vmem:[#allocation13 + $0x6d0] ss:$28 sps:$4 sm:$0xff]  }
0x167e   : > { %v19772_v20 = vld [vmem:[#allocation13 + $0x890] ss:$28 sps:$4 sm:$0xff]  }
0x16b3   : > { %v21506_v3 = vpop.f32.mrb[20].mxu0  ;;  %v21508_v54 = vpop.f32.mrb[32].mxu1 }
0x16b4   : > { %v12618_v9 = vpop.f32.mrb[21].mxu0  ;;  %v12659_v50 = vpop.f32.mrb[33].mxu1  ;;  %v12668_v33 = vpack.c.bf16 %v21506_v3, %v21506_v3  ;;  %v12670_v35 = vpack.c.bf16 %v21508_v54, %v21508_v54  ;;  %v19727_v3 = vld [vmem:[#allocation13 + $0x6c8] ss:$28 sps:$4 sm:$0xff]  }
0x16b5   : > { %v12620_v55 = vpop.f32.mrb[22].mxu0  ;;  %v12660_v56 = vpop.f32.mrb[34].mxu1  ;;  %v12669_v32 = vpack.c.bf16 %v12618_v9, %v12618_v9  ;;  %v19732_v54 = vld [vmem:[#allocation13 + $0x70c] ss:$28 sps:$4 sm:$0xff]   ;;  %v19735_v9 = vld [vmem:[#allocation13 + $0x704] ss:$28 sps:$4 sm:$0xff]  }
0x16b6   : > { %v12621_v31 = vpop.f32.mrb[23].mxu0  ;;  %v12661_v24 = vpop.f32.mrb[35].mxu1  ;;  %v13706_v44 = vsel %vm1856_vm2, %v12668_v33, 0  ;;  %v13712_v46 = vsel %vm1856_vm2, %v12670_v35, 0  ;;  %v19730_v50 = vld [vmem:[#allocation13 + $0x708] ss:$28 sps:$4 sm:$0xff]  }
0x16b7   : > { %v19733_v55 = vld [vmem:[#allocation13 + $0x700] ss:$28 sps:$4 sm:$0xff]   ;;  %v19795_v35 = vld [vmem:[#allocation13 + $0x934] ss:$28 sps:$4 sm:$0xff]  }
0x16b8   : > { %v19738_v56 = vld [vmem:[#allocation13 + $0x744] ss:$28 sps:$4 sm:$0xff]   ;;  %v19741_v31 = vld [vmem:[#allocation13 + $0x73c] ss:$28 sps:$4 sm:$0xff]  }
0x16b9   : > { %v19736_v24 = vld [vmem:[#allocation13 + $0x740] ss:$28 sps:$4 sm:$0xff]  }
0x16ba   : > { %v19792_v33 = vld [vmem:[#allocation13 + $0x93c] ss:$28 sps:$4 sm:$0xff]  }
0x16ef   : > { %v13365_v58 = vpop.f32.mrb[24].mxu0 }
0x16f0   : > { %v13496_v51 = vpack.c.bf16 %v13365_v58, %v13365_v58  ;;  %v13406_v59 = vpop.f32.mrb[36].mxu1  ;;  %v13367_v60 = vpop.f32.mrb[25].mxu0  ;;  %v19739_v58 = vld [vmem:[#allocation13 + $0x738] ss:$28 sps:$4 sm:$0xff]  }
0x16f1   : > { %v13498_v36 = vpack.c.bf16 %v13406_v59, %v13406_v59  ;;  %v13497_v62 = vpack.c.bf16 %v13367_v60, %v13367_v60  ;;  %v13408_v63 = vpop.f32.mrb[37].mxu1  ;;  %v13369_v1 = vpop.f32.mrb[26].mxu0  ;;  %v19747_v59 = vld [vmem:[#allocation13 + $0x774] ss:$28 sps:$4 sm:$0xff]  }
0x16f2   : > { %v13507_v2 = vsel %vm1856_vm2, %v13496_v51, 0  ;;  %v13499_v4 = vpack.c.bf16 %v13408_v63, %v13408_v63  ;;  %v13410_v8 = vpop.f32.mrb[38].mxu1  ;;  %v13370_v11 = vpop.f32.mrb[27].mxu0  ;;  %v19744_v51 = vld [vmem:[#allocation13 + $0x77c] ss:$28 sps:$4 sm:$0xff]  }
0x16f3   : > { %v13513_v12 = vsel %vm1856_vm2, %v13498_v36, 0  ;;  %v13411_v14 = vpop.f32.mrb[39].mxu1  ;;  %17192 = vmatprep.subr.msk.bf16.mxu0 %vm1856_vm2, %v13497_v62  ;;  %v19742_v60 = vld [vmem:[#allocation13 + $0x778] ss:$28 sps:$4 sm:$0xff]   ;;  %v19745_v36 = vld [vmem:[#allocation13 + $0x770] ss:$28 sps:$4 sm:$0xff]  }
0x16f4   : > { %17194 = vmatprep.subr.msk.bf16.mxu1 %vm1856_vm2, %v13499_v4  ;;  %13528 = vmatpush1.bf16.msra.mxu0 %v13507_v2  ;;  %v19750_v62 = vld [vmem:[#allocation13 + $0x7b4] ss:$28 sps:$4 sm:$0xff]   ;;  %v19753_v63 = vld [vmem:[#allocation13 + $0x7ac] ss:$28 sps:$4 sm:$0xff]   ;;  %v19759_v8 = vld [vmem:[#allocation13 + $0x7e4] ss:$28 sps:$4 sm:$0xff]  }
0x16f5   : > { %13569 = vmatpush1.bf16.msra.mxu1 %v13513_v12  ;;  %v19748_v1 = vld [vmem:[#allocation13 + $0x7b0] ss:$28 sps:$4 sm:$0xff]   ;;  %v19751_v2 = vld [vmem:[#allocation13 + $0x7a8] ss:$28 sps:$4 sm:$0xff]   ;;  %v19757_v12 = vld [vmem:[#allocation13 + $0x7e0] ss:$28 sps:$4 sm:$0xff]  }
0x16f6   : > { %18639 = vmatprep.subr.bf16.mxu1 %v20255_v42  ;;  %v19756_v4 = vld [vmem:[#allocation13 + $0x7ec] ss:$28 sps:$4 sm:$0xff]   ;;  %v19762_v14 = vld [vmem:[#allocation13 + $0x824] ss:$28 sps:$4 sm:$0xff]  }
0x16f7   : > { %17193 = vmatmul.mubr.msk.bf16.vlgmr.msra.gmra.mrb[32].mxu0 %vm1852_vm3, %v17191_v41  ;;  %v19754_v11 = vld [vmem:[#allocation13 + $0x7e8] ss:$28 sps:$4 sm:$0xff]  }
0x16f8   : > { %17195 = vmatmul.mubr.msk.bf16.vlgmr.msra.gmra.mrb[44].mxu1 %vm1852_vm3, %v17191_v41  ;;  %13641 = vmatprep.mubr.bf16.mxu0 %v20257_v28 }
0x16f9   : > { %18641 = vmatprep.mubr.msk.bf16.mxu1 %vm20256_vm0, %v20255_v42 }
0x172b   : > { %v13447_v38 = vpop.f32.mrb[28].mxu0 }
0x172c   : > { %v13500_v37 = vpack.c.bf16 %v13447_v38, %v13447_v38  ;;  %v13488_v10 = vpop.f32.mrb[40].mxu1  ;;  %v13449_v16 = vpop.f32.mrb[29].mxu0  ;;  %v19760_v38 = vld [vmem:[#allocation13 + $0x820] ss:$28 sps:$4 sm:$0xff]  }
0x172d   : > { %v13502_v17 = vpack.c.bf16 %v13488_v10, %v13488_v10  ;;  %v13501_v18 = vpack.c.bf16 %v13449_v16, %v13449_v16  ;;  %v13490_v45 = vpop.f32.mrb[41].mxu1  ;;  %v13451_v19 = vpop.f32.mrb[30].mxu0  ;;  %v19768_v10 = vld [vmem:[#allocation13 + $0x85c] ss:$28 sps:$4 sm:$0xff]   ;;  %v19771_v16 = vld [vmem:[#allocation13 + $0x854] ss:$28 sps:$4 sm:$0xff]  }
0x172e   : > { %v13519_v21 = vsel %vm1856_vm2, %v13500_v37, 0  ;;  %v13491_v22 = vpop.f32.mrb[42].mxu1  ;;  %v13452_v23 = vpop.f32.mrb[31].mxu0  ;;  %v19763_v37 = vld [vmem:[#allocation13 + $0x818] ss:$28 sps:$4 sm:$0xff]  }
0x172f   : > { %v13525_v29 = vsel %vm1856_vm2, %v13502_v17, 0  ;;  %v13492_v40 = vpop.f32.mrb[43].mxu1  ;;  %17196 = vmatprep.subr.msk.bf16.mxu0 %vm1856_vm2, %v13501_v18  ;;  %v19766_v17 = vld [vmem:[#allocation13 + $0x858] ss:$28 sps:$4 sm:$0xff]   ;;  %v19769_v18 = vld [vmem:[#allocation13 + $0x850] ss:$28 sps:$4 sm:$0xff]  }
0x1730   : > { %18640 = vmatpush3.bf16.msra.mxu1 %v13525_v29  ;;  %13610 = vmatpush1.bf16.msra.mxu0 %v13519_v21  ;;  %v19774_v45 = vld [vmem:[#allocation13 + $0x894] ss:$28 sps:$4 sm:$0xff]   ;;  %v19777_v19 = vld [vmem:[#allocation13 + $0x88c] ss:$28 sps:$4 sm:$0xff]   ;;  %v19783_v23 = vld [vmem:[#allocation13 + $0x8c4] ss:$28 sps:$4 sm:$0xff]  }
0x1731   : > { %17201 = vmatprep.subr.msk.bf16.mxu1 %vm1856_vm2, %v12667_v13  ;;  %17199 = vmatprep.subr.msk.bf16.mxu0 %vm1856_vm2, %v12665_v26  ;;  %v19775_v21 = vld [vmem:[#allocation13 + $0x888] ss:$28 sps:$4 sm:$0xff]   ;;  %v19781_v26 = vld [vmem:[#allocation13 + $0x8c0] ss:$28 sps:$4 sm:$0xff]   ;;  %v13991_v40 = vld [vmem:[#allocation13 + $0x970] sm:$0x11] }
0x1732   : > { %v19780_v22 = vld [vmem:[#allocation13 + $0x8cc] ss:$28 sps:$4 sm:$0xff]   ;;  %v19786_v13 = vld [vmem:[#allocation13 + $0x904] ss:$28 sps:$4 sm:$0xff]   ;;  %v19789_v29 = vld [vmem:[#allocation13 + $0x8fc] ss:$28 sps:$4 sm:$0xff]  }
0x1733   : > { %18642 = vmatmul.mubr.msk.bf16.vlgmr.msra.gmra.mrb[48].mxu1 %vm1852_vm3, %v17191_v41  ;;  %17197 = vmatmul.mubr.msk.bf16.vlgmr.msra.gmra.mrb[36].mxu0 %vm1852_vm3, %v17191_v41  ;;  %v19765_v41 = vld [vmem:[#allocation13 + $0x81c] ss:$28 sps:$4 sm:$0xff]  }
0x1734   : > { %13756 = vmatpush1.bf16.msra.mxu1 %v13700_v61  ;;  %13715 = vmatpush1.bf16.msra.mxu0 %v13694_v30  ;;  %v13990_v30 = vld [vmem:[#allocation13 + $0x968] sm:$0x11]  ;;  %v19784_v61 = vld [vmem:[#allocation13 + $0x900] ss:$28 sps:$4 sm:$0xff]  }
0x1735   : > { %17203 = vmatprep.subr.msk.bf16.mxu0 %vm1856_vm2, %v12669_v32  ;;  %13787 = vmatprep.mubr.bf16.mxu1 %v20257_v28  ;;  %v19787_v32 = vld [vmem:[#allocation13 + $0x8f8] ss:$28 sps:$4 sm:$0xff]  }
0x1736   : > { %18645 = vmatprep.subr.bf16.mxu1 %v20255_v42  ;;  %13746 = vmatprep.mubr.bf16.mxu0 %v20257_v28 }
0x173b   : > { %17202 = vmatmul.mubr.msk.bf16.vlgmr.msra.gmra.mrb[52].mxu1 %vm1852_vm3, %v12663_v39  ;;  %17200 = vmatmul.mubr.msk.bf16.vlgmr.msra.gmra.mrb[40].mxu0 %vm1852_vm3, %v12663_v39 }
0x173c   : > { %18646 = vmatpush3.bf16.msra.mxu1 %v13712_v46  ;;  %13797 = vmatpush1.bf16.msra.mxu0 %v13706_v44  ;;  %v19793_v44 = vld [vmem:[#allocation13 + $0x930] ss:$28 sps:$4 sm:$0xff]   ;;  %v17306_v46 = vcombine.low %v13991_v40, %v13991_v40 }
0x173d   : > { %18647 = vmatprep.mubr.msk.bf16.mxu1 %vm20256_vm0, %v20255_v42  ;;  %14578 = vmatprep.subr.bf16.mxu1 %v19714_v0  ;;  %v17305_v0 = vcombine.high %v13990_v30, %v13990_v30 }
0x173e   : > { %13828 = vmatprep.mubr.bf16.mxu0 %v20257_v28  ;;  %14537 = vmatprep.subr.bf16.mxu0 %v19717_v43  ;;  %v19790_v43 = vld [vmem:[#allocation13 + $0x938] ss:$28 sps:$4 sm:$0xff]  }
0x1743   : > { %18648 = vmatmul.mubr.msk.bf16.vlgmr.msra.gmra.mrb[56].mxu1 %vm1852_vm3, %v12663_v39  ;;  %17204 = vmatmul.mubr.msk.bf16.vlgmr.msra.gmra.mrb[44].mxu0 %vm1852_vm3, %v12663_v39  ;;  %v17307_v39 = vcombine.high %v13991_v40, %v13991_v40  ;;  %v19858_v40 = vld [vmem:[#allocation13 + $0x980] ss:$0 sps:$4 sm:$0x11]  }
0x1744   : > { %14579 = vmatpush1.bf16.msra.mxu1 %v19712_v34  ;;  %14538 = vmatpush1.bf16.msra.mxu0 %v19715_v47  ;;  %v17304_v34 = vcombine.low %v13990_v30, %v13990_v30  ;;  %v19852_v30 = vld [vmem:[#allocation13 + $0x940] ss:$28 sps:$4 sm:$0xff]  }
0x1745   : > { %17312 = vmatprep.mubr.msk.bf16.mxu1 %vm12472_vm11, %v21433_v57  ;;  %17311 = vmatprep.mubr.msk.bf16.mxu0 %vm12472_vm11, %v21433_v57  ;;  %v14526_v47 = vand.u32 %v17307_v39, %v21426_v6 }
0x1746   : > { %14580 = vmatprep.subr.bf16.mxu1 %v19720_v49  ;;  %14539 = vmatprep.subr.bf16.mxu0 %v19723_v15  ;;  %v14520_v49 = vand.u32 %v17305_v0, %v21426_v6  ;;  %v14523_v15 = vand.u32 %v17306_v46, %v21426_v6 }
0x1748   : > { %14581 = vmatpush1.bf16.msra.mxu1 %v19718_v7  ;;  %14540 = vmatpush1.bf16.msra.mxu0 %v19721_v5  ;;  %v14517_v7 = vand.u32 %v17304_v34, %v21426_v6  ;;  %v19802_v5 = vld [vmem:[#allocation13 + $0x66c] ss:$28 sps:$4 sm:$0xff]  }
0x1749   : > { %14582 = vmatprep.subr.bf16.mxu1 %v19726_v52  ;;  %14541 = vmatprep.subr.bf16.mxu0 %v19729_v48  ;;  %v19803_v52 = vld [vmem:[#allocation13 + $0x670] ss:$28 sps:$4 sm:$0xff]   ;;  %v19800_v48 = vld [vmem:[#allocation13 + $0x668] ss:$28 sps:$4 sm:$0xff]  }
0x174c   : > { %14583 = vmatpush1.bf16.msra.mxu1 %v19724_v53  ;;  %14542 = vmatpush1.bf16.msra.mxu0 %v19727_v3  ;;  %v19806_v53 = vld [vmem:[#allocation13 + $0x6a4] ss:$28 sps:$4 sm:$0xff]  }
0x174d   : > { %14584 = vmatprep.subr.bf16.mxu1 %v19732_v54  ;;  %14543 = vmatprep.subr.bf16.mxu0 %v19735_v9  ;;  %v19807_v3 = vld [vmem:[#allocation13 + $0x6a8] ss:$28 sps:$4 sm:$0xff]   ;;  %v19804_v54 = vld [vmem:[#allocation13 + $0x6a0] ss:$28 sps:$4 sm:$0xff]  }
0x174e   : > { %v19810_v9 = vld [vmem:[#allocation13 + $0x6dc] ss:$28 sps:$4 sm:$0xff]  }
0x1750   : > { %14585 = vmatpush1.bf16.msra.mxu1 %v19730_v50  ;;  %14544 = vmatpush1.bf16.msra.mxu0 %v19733_v55  ;;  %v19811_v50 = vld [vmem:[#allocation13 + $0x6e0] ss:$28 sps:$4 sm:$0xff]   ;;  %v19808_v55 = vld [vmem:[#allocation13 + $0x6d8] ss:$28 sps:$4 sm:$0xff]  }
0x1751   : > { %14586 = vmatprep.subr.bf16.mxu1 %v19738_v56  ;;  %14545 = vmatprep.subr.bf16.mxu0 %v19741_v31  ;;  %v19814_v56 = vld [vmem:[#allocation13 + $0x714] ss:$28 sps:$4 sm:$0xff]  }
0x1752   : > { %v19815_v31 = vld [vmem:[#allocation13 + $0x718] ss:$28 sps:$4 sm:$0xff]  }
0x1754   : > { %14587 = vmatpush1.bf16.msra.mxu1 %v19736_v24  ;;  %14546 = vmatpush1.bf16.msra.mxu0 %v19739_v58  ;;  %v19812_v24 = vld [vmem:[#allocation13 + $0x710] ss:$28 sps:$4 sm:$0xff]  }
0x1755   : > { %14588 = vmatprep.subr.bf16.mxu1 %v19744_v51  ;;  %14547 = vmatprep.subr.bf16.mxu0 %v19747_v59  ;;  %v19818_v58 = vld [vmem:[#allocation13 + $0x74c] ss:$28 sps:$4 sm:$0xff]  }
0x1756   : > { %v19819_v51 = vld [vmem:[#allocation13 + $0x750] ss:$28 sps:$4 sm:$0xff]   ;;  %v19816_v59 = vld [vmem:[#allocation13 + $0x748] ss:$28 sps:$4 sm:$0xff]  }
0x1758   : > { %14589 = vmatpush1.bf16.msra.mxu1 %v19742_v60  ;;  %14548 = vmatpush1.bf16.msra.mxu0 %v19745_v36  ;;  %v19822_v60 = vld [vmem:[#allocation13 + $0x784] ss:$28 sps:$4 sm:$0xff]  }
0x1759   : > { %14590 = vmatprep.subr.bf16.mxu1 %v19750_v62  ;;  %14549 = vmatprep.subr.bf16.mxu0 %v19753_v63  ;;  %v19823_v36 = vld [vmem:[#allocation13 + $0x788] ss:$28 sps:$4 sm:$0xff]   ;;  %v19820_v62 = vld [vmem:[#allocation13 + $0x780] ss:$28 sps:$4 sm:$0xff]  }
0x175a   : > { %v19826_v63 = vld [vmem:[#allocation13 + $0x7bc] ss:$28 sps:$4 sm:$0xff]  }
0x175c   : > { %14591 = vmatpush1.bf16.msra.mxu1 %v19748_v1  ;;  %14550 = vmatpush1.bf16.msra.mxu0 %v19751_v2  ;;  %v19827_v1 = vld [vmem:[#allocation13 + $0x7c0] ss:$28 sps:$4 sm:$0xff]   ;;  %v19824_v2 = vld [vmem:[#allocation13 + $0x7b8] ss:$28 sps:$4 sm:$0xff]  }
0x175d   : > { %14592 = vmatprep.subr.bf16.mxu1 %v19756_v4  ;;  %14551 = vmatprep.subr.bf16.mxu0 %v19759_v8  ;;  %v19830_v4 = vld [vmem:[#allocation13 + $0x7f4] ss:$28 sps:$4 sm:$0xff]  }
0x175e   : > { %v19831_v8 = vld [vmem:[#allocation13 + $0x7f8] ss:$28 sps:$4 sm:$0xff]  }
0x1760   : > { %14593 = vmatpush1.bf16.msra.mxu1 %v19754_v11  ;;  %14552 = vmatpush1.bf16.msra.mxu0 %v19757_v12  ;;  %v19828_v11 = vld [vmem:[#allocation13 + $0x7f0] ss:$28 sps:$4 sm:$0xff]  }
0x1761   : > { %14594 = vmatprep.subr.bf16.mxu1 %v19762_v14  ;;  %14553 = vmatprep.subr.bf16.mxu0 %v19765_v41  ;;  %v19834_v12 = vld [vmem:[#allocation13 + $0x82c] ss:$28 sps:$4 sm:$0xff]  }
0x1762   : > { %v19835_v14 = vld [vmem:[#allocation13 + $0x830] ss:$28 sps:$4 sm:$0xff]   ;;  %v19832_v41 = vld [vmem:[#allocation13 + $0x828] ss:$28 sps:$4 sm:$0xff]  }
0x1764   : > { %14595 = vmatpush1.bf16.msra.mxu1 %v19760_v38  ;;  %14554 = vmatpush1.bf16.msra.mxu0 %v19763_v37  ;;  %v19838_v38 = vld [vmem:[#allocation13 + $0x864] ss:$28 sps:$4 sm:$0xff]  }
0x1765   : > { %14596 = vmatprep.subr.bf16.mxu1 %v19768_v10  ;;  %14555 = vmatprep.subr.bf16.mxu0 %v19771_v16  ;;  %v19839_v37 = vld [vmem:[#allocation13 + $0x868] ss:$28 sps:$4 sm:$0xff]   ;;  %v19836_v10 = vld [vmem:[#allocation13 + $0x860] ss:$28 sps:$4 sm:$0xff]  }
0x1766   : > { %v19842_v16 = vld [vmem:[#allocation13 + $0x89c] ss:$28 sps:$4 sm:$0xff]  }
0x1768   : > { %14597 = vmatpush1.bf16.msra.mxu1 %v19766_v17  ;;  %14556 = vmatpush1.bf16.msra.mxu0 %v19769_v18  ;;  %v19843_v17 = vld [vmem:[#allocation13 + $0x8a0] ss:$28 sps:$4 sm:$0xff]   ;;  %v19840_v18 = vld [vmem:[#allocation13 + $0x898] ss:$28 sps:$4 sm:$0xff]  }
0x1769   : > { %14598 = vmatprep.subr.bf16.mxu1 %v19774_v45  ;;  %14557 = vmatprep.subr.bf16.mxu0 %v19777_v19  ;;  %v19846_v45 = vld [vmem:[#allocation13 + $0x8d4] ss:$28 sps:$4 sm:$0xff]  }
0x176a   : > { %v19847_v19 = vld [vmem:[#allocation13 + $0x8d8] ss:$28 sps:$4 sm:$0xff]  }
0x176c   : > { %14599 = vmatpush1.bf16.msra.mxu1 %v19772_v20  ;;  %14558 = vmatpush1.bf16.msra.mxu0 %v19775_v21  ;;  %v19844_v20 = vld [vmem:[#allocation13 + $0x8d0] ss:$28 sps:$4 sm:$0xff]  }
0x176d   : > { %14600 = vmatprep.subr.bf16.mxu1 %v19780_v22  ;;  %14559 = vmatprep.subr.bf16.mxu0 %v19783_v23  ;;  %v19850_v21 = vld [vmem:[#allocation13 + $0x90c] ss:$28 sps:$4 sm:$0xff]   ;;  %v13992_v22 = vld [vmem:[#allocation13 + $0x978] sm:$0x11] }
0x176e   : > { %v19851_v23 = vld [vmem:[#allocation13 + $0x910] ss:$28 sps:$4 sm:$0xff]  }
0x1770   : > { %14601 = vmatpush1.bf16.msra.mxu1 %v19778_v25  ;;  %14560 = vmatpush1.bf16.msra.mxu0 %v19781_v26  ;;  %v19848_v25 = vld [vmem:[#allocation13 + $0x908] ss:$28 sps:$4 sm:$0xff]  }
0x1771   : > { %14602 = vmatprep.subr.bf16.mxu1 %v19786_v13  ;;  %14561 = vmatprep.subr.bf16.mxu0 %v19789_v29  ;;  %v19854_v26 = vld [vmem:[#allocation13 + $0x944] ss:$28 sps:$4 sm:$0xff]   ;;  %v17309_v13 = vcombine.high %v13992_v22, %v13992_v22 }
0x1772   : > { %v19855_v29 = vld [vmem:[#allocation13 + $0x948] ss:$28 sps:$4 sm:$0xff]  }
0x1774   : > { %14603 = vmatpush1.bf16.msra.mxu1 %v19784_v61  ;;  %14562 = vmatpush1.bf16.msra.mxu0 %v19787_v32  ;;  %v17308_v61 = vcombine.low %v13992_v22, %v13992_v22  ;;  %v14532_v32 = vand.u32 %v17309_v13, %v21426_v6 }
0x1775   : > { %14604 = vmatprep.subr.bf16.mxu1 %v19792_v33  ;;  %14563 = vmatprep.subr.bf16.mxu0 %v19795_v35  ;;  %v14535_v33 = vand.u32 %v19858_v40, %v21426_v6  ;;  %v17315_v40 = vld [vmem:[%s21773_s2 + $0x2] sm:$0x1] }
0x1776   : > { %v14529_v35 = vand.u32 %v17308_v61, %v21426_v6 }
0x1778   : > { %14605 = vmatpush1.bf16.msra.mxu1 %v19790_v43  ;;  %14564 = vmatpush1.bf16.msra.mxu0 %v19793_v44 }
0x1779   : > { %14606 = vmatprep.subr.bf16.mxu1 %v14526_v47  ;;  %14565 = vmatprep.subr.bf16.mxu0 %v14520_v49 }
0x177c   : > { %14607 = vmatpush1.bf16.msra.mxu1 %v14523_v15  ;;  %14566 = vmatpush1.bf16.msra.mxu0 %v14517_v7 }
0x177d   : > { %14660 = vmatprep.subr.bf16.mxu1 %v20257_v28  ;;  %14619 = vmatprep.subr.bf16.mxu0 %v19802_v5 }
0x177f   : > { %14611 = vmatmul.mubr.bf16.vlgmr.msra.gmra.mrb[60].mxu1 %v21435_v27  ;;  %14570 = vmatmul.mubr.bf16.vlgmr.msra.gmra.mrb[48].mxu0 %v21435_v27 }
0x1780   : > { %14661 = vmatpush1.bf16.msra.mxu1 %v19803_v52  ;;  %17314 = vmatprep.mubr.msk.bf16.mxu1 %vm12472_vm11, %v21433_v57 }
0x1781   : > { %14620 = vmatpush1.bf16.msra.mxu0 %v19800_v48  ;;  %17313 = vmatprep.mubr.msk.bf16.mxu0 %vm12472_vm11, %v21433_v57 }
0x1782   : > { %14662 = vmatprep.subr.bf16.mxu1 %v20257_v28  ;;  %14621 = vmatprep.subr.bf16.mxu0 %v19806_v53 }
0x1784   : > { %14663 = vmatpush1.bf16.msra.mxu1 %v19807_v3 }
0x1785   : > { %14622 = vmatpush1.bf16.msra.mxu0 %v19804_v54  ;;  %14664 = vmatprep.subr.bf16.mxu1 %v20257_v28 }
0x1786   : > { %14623 = vmatprep.subr.bf16.mxu0 %v19810_v9 }
0x1788   : > { %14665 = vmatpush1.bf16.msra.mxu1 %v19811_v50 }
0x1789   : > { %14624 = vmatpush1.bf16.msra.mxu0 %v19808_v55  ;;  %14666 = vmatprep.subr.bf16.mxu1 %v20257_v28 }
0x178a   : > { %14625 = vmatprep.subr.bf16.mxu0 %v19814_v56 }
0x178c   : > { %14667 = vmatpush1.bf16.msra.mxu1 %v19815_v31 }
0x178d   : > { %14626 = vmatpush1.bf16.msra.mxu0 %v19812_v24  ;;  %14668 = vmatprep.subr.bf16.mxu1 %v20257_v28 }
0x178e   : > { %14627 = vmatprep.subr.bf16.mxu0 %v19818_v58 }
0x1790   : > { %14669 = vmatpush1.bf16.msra.mxu1 %v19819_v51 }
0x1791   : > { %14628 = vmatpush1.bf16.msra.mxu0 %v19816_v59  ;;  %14670 = vmatprep.subr.bf16.mxu1 %v20257_v28 }
0x1792   : > { %14629 = vmatprep.subr.bf16.mxu0 %v19822_v60 }
0x1794   : > { %14671 = vmatpush1.bf16.msra.mxu1 %v19823_v36 }
0x1795   : > { %14630 = vmatpush1.bf16.msra.mxu0 %v19820_v62  ;;  %14672 = vmatprep.subr.bf16.mxu1 %v20257_v28 }
0x1796   : > { %14631 = vmatprep.subr.bf16.mxu0 %v19826_v63 }
0x1798   : > { %14673 = vmatpush1.bf16.msra.mxu1 %v19827_v1 }
0x1799   : > { %14632 = vmatpush1.bf16.msra.mxu0 %v19824_v2  ;;  %14674 = vmatprep.subr.bf16.mxu1 %v20257_v28 }
0x179a   : > { %14633 = vmatprep.subr.bf16.mxu0 %v19830_v4 }
0x179c   : > { %14675 = vmatpush1.bf16.msra.mxu1 %v19831_v8 }
0x179d   : > { %14634 = vmatpush1.bf16.msra.mxu0 %v19828_v11  ;;  %14676 = vmatprep.subr.bf16.mxu1 %v20257_v28 }
0x179e   : > { %14635 = vmatprep.subr.bf16.mxu0 %v19834_v12 }
0x17a0   : > { %14677 = vmatpush1.bf16.msra.mxu1 %v19835_v14 }
0x17a1   : > { %14636 = vmatpush1.bf16.msra.mxu0 %v19832_v41  ;;  %14678 = vmatprep.subr.bf16.mxu1 %v20257_v28 }
0x17a2   : > { %14637 = vmatprep.subr.bf16.mxu0 %v19838_v38 }
0x17a4   : > { %14679 = vmatpush1.bf16.msra.mxu1 %v19839_v37 }
0x17a5   : > { %14638 = vmatpush1.bf16.msra.mxu0 %v19836_v10  ;;  %14680 = vmatprep.subr.bf16.mxu1 %v20257_v28 }
0x17a6   : > { %14639 = vmatprep.subr.bf16.mxu0 %v19842_v16 }
0x17a8   : > { %14681 = vmatpush1.bf16.msra.mxu1 %v19843_v17 }
0x17a9   : > { %14640 = vmatpush1.bf16.msra.mxu0 %v19840_v18  ;;  %14682 = vmatprep.subr.bf16.mxu1 %v20257_v28 }
0x17aa   : > { %14641 = vmatprep.subr.bf16.mxu0 %v19846_v45 }
0x17ac   : > { %14683 = vmatpush1.bf16.msra.mxu1 %v19847_v19 }
0x17ad   : > { %14642 = vmatpush1.bf16.msra.mxu0 %v19844_v20  ;;  %14684 = vmatprep.subr.bf16.mxu1 %v20257_v28 }
0x17ae   : > { %14643 = vmatprep.subr.bf16.mxu0 %v19850_v21 }
0x17b0   : > { %14685 = vmatpush1.bf16.msra.mxu1 %v19851_v23 }
0x17b1   : > { %14644 = vmatpush1.bf16.msra.mxu0 %v19848_v25  ;;  %14686 = vmatprep.subr.bf16.mxu1 %v20257_v28 }
0x17b2   : > { %14645 = vmatprep.subr.bf16.mxu0 %v19854_v26 }
0x17b4   : > { %14687 = vmatpush1.bf16.msra.mxu1 %v19855_v29 }
0x17b5   : > { %14646 = vmatpush1.bf16.msra.mxu0 %v19852_v30  ;;  %14688 = vmatprep.subr.bf16.mxu1 %v20257_v28 }
0x17b6   : > { %14647 = vmatprep.subr.bf16.mxu0 %v14532_v32 }
0x17b8   : > { %14689 = vmatpush1.bf16.msra.mxu1 %v14535_v33 }
0x17b9   : > { %14648 = vmatpush1.bf16.msra.mxu0 %v14529_v35  ;;  %v19861_v35 = vld [vmem:[#allocation13 + $0x990] ss:$28 sps:$4 sm:$0xff]  }
0x17bb   : > { %14693 = vmatmul.mubr.bf16.vlgmr.msra.gmra.mrb[64].mxu1 %v21435_v27 }
0x17bc   : > { %14652 = vmatmul.mubr.bf16.vlgmr.msra.gmra.mrb[52].mxu0 %v21435_v27  ;;  %14806 = vmatprep.mubr.bf16.mxu1 %v20257_v28 }
0x17bd   : > { %14765 = vmatprep.mubr.bf16.mxu0 %v20257_v28 }
0x17ca   : > { %v13561_v39 = vpop.f32.mrb[32].mxu0 }
0x17cb   : > { %v13563_v0 = vpop.f32.mrb[33].mxu0  ;;  %v13602_v43 = vpop.f32.mrb[44].mxu1 }
0x17cc   : > { %v13565_v44 = vpop.f32.mrb[34].mxu0  ;;  %v13604_v46 = vpop.f32.mrb[45].mxu1 }
0x17cd   : > { %v13566_v34 = vpop.f32.mrb[35].mxu0  ;;  %v13606_v47 = vpop.f32.mrb[46].mxu1 }
0x17ce   : > { %v13607_v49 = vpop.f32.mrb[47].mxu1 }
0x17cf   : > { %v19864_v49 = vld [vmem:[#allocation13 + $0x988] ss:$28 sps:$4 sm:$0xff]  }
0x1806   : > { %v13643_v15 = vpop.f32.mrb[36].mxu0  ;;  %v13684_v7 = vpop.f32.mrb[48].mxu1 }
0x1807   : > { %v13645_v5 = vpop.f32.mrb[37].mxu0  ;;  %v18643_v52 = vpop.f32.mrb[49].mxu1 }
0x1808   : > { %v13647_v48 = vpop.f32.mrb[38].mxu0  ;;  %v13687_v53 = vpop.f32.mrb[50].mxu1  ;;  %v19867_v52 = vld [vmem:[#allocation13 + $0x9c8] ss:$28 sps:$4 sm:$0xff]  }
0x1809   : > { %v13648_v3 = vpop.f32.mrb[39].mxu0  ;;  %v18644_v54 = vpop.f32.mrb[51].mxu1  ;;  %v19862_v48 = vld [vmem:[#allocation13 + $0x984] ss:$28 sps:$4 sm:$0xff]  }
0x180a   : > { %v19870_v53 = vld [vmem:[#allocation13 + $0x9c0] ss:$28 sps:$4 sm:$0xff]  }
0x180b   : > { %v19865_v3 = vld [vmem:[#allocation13 + $0x9c4] ss:$28 sps:$4 sm:$0xff]  }
0x180c   : > { %v19873_v54 = vld [vmem:[#allocation13 + $0xa00] ss:$28 sps:$4 sm:$0xff]  }
0x180e   : > { %v13789_v9 = vpop.f32.mrb[52].mxu1  ;;  %v13748_v50 = vpop.f32.mrb[40].mxu0 }
0x180f   : > { %v21592_v55 = vadd.f32 %v13789_v9, %v13602_v43  ;;  %v21594_v56 = vadd.f32 %v13748_v50, %v13561_v39  ;;  %v13791_v31 = vpop.f32.mrb[53].mxu1  ;;  %v13750_v24 = vpop.f32.mrb[41].mxu0  ;;  %v19868_v9 = vld [vmem:[#allocation13 + $0x9bc] ss:$28 sps:$4 sm:$0xff]  }
0x1810   : > { %v21596_v58 = vadd.f32 %v13791_v31, %v13604_v46  ;;  %v21598_v51 = vadd.f32 %v13750_v24, %v13563_v0  ;;  %v13752_v59 = vpop.f32.mrb[42].mxu0  ;;  %v13793_v60 = vpop.f32.mrb[54].mxu1  ;;  %v19876_v50 = vld [vmem:[#allocation13 + $0x9f8] ss:$28 sps:$4 sm:$0xff]  }
0x1811   : > { %v13753_v36 = vpop.f32.mrb[43].mxu0  ;;  %v13794_v62 = vpop.f32.mrb[55].mxu1  ;;  %v19871_v31 = vld [vmem:[#allocation13 + $0x9fc] ss:$28 sps:$4 sm:$0xff]   ;;  %v19874_v59 = vld [vmem:[#allocation13 + $0x9f4] ss:$28 sps:$4 sm:$0xff]  }
0x1812   : > { %v19879_v24 = vld [vmem:[#allocation13 + $0xa38] ss:$28 sps:$4 sm:$0xff]   ;;  %v19882_v60 = vld [vmem:[#allocation13 + $0xa30] ss:$28 sps:$4 sm:$0xff]  }
0x1813   : > { %v19877_v36 = vld [vmem:[#allocation13 + $0xa34] ss:$28 sps:$4 sm:$0xff]  }
0x1814   : > { %v19885_v62 = vld [vmem:[#allocation13 + $0xa70] ss:$28 sps:$4 sm:$0xff]  }
0x1816   : > { %v13871_v63 = vpop.f32.mrb[56].mxu1  ;;  %v13830_v1 = vpop.f32.mrb[44].mxu0 }
0x1817   : > { %v21600_v2 = vadd.f32 %v13871_v63, %v13684_v7  ;;  %v21602_v4 = vadd.f32 %v13830_v1, %v13643_v15  ;;  %v13832_v8 = vpop.f32.mrb[45].mxu0  ;;  %v18649_v11 = vpop.f32.mrb[57].mxu1  ;;  %v19880_v63 = vld [vmem:[#allocation13 + $0xa2c] ss:$28 sps:$4 sm:$0xff]  }
0x1818   : > { %v21604_v12 = vadd.f32 %v13832_v8, %v13645_v5  ;;  %v13834_v14 = vpop.f32.mrb[46].mxu0  ;;  %v13874_v41 = vpop.f32.mrb[58].mxu1  ;;  %v19859_v5 = vld [vmem:[#allocation13 + $0x98c] ss:$28 sps:$4 sm:$0xff]  }
0x1819   : > { %v13835_v38 = vpop.f32.mrb[47].mxu0  ;;  %v18650_v37 = vpop.f32.mrb[59].mxu1  ;;  %v19888_v1 = vld [vmem:[#allocation13 + $0xa68] ss:$28 sps:$4 sm:$0xff]   ;;  %v19894_v41 = vld [vmem:[#allocation13 + $0xaa0] ss:$28 sps:$4 sm:$0xff]  }
0x181a   : > { %v19883_v8 = vld [vmem:[#allocation13 + $0xa6c] ss:$28 sps:$4 sm:$0xff]   ;;  %v19886_v14 = vld [vmem:[#allocation13 + $0xa64] ss:$28 sps:$4 sm:$0xff]  }
0x181b   : > { %v19891_v11 = vld [vmem:[#allocation13 + $0xaa8] ss:$28 sps:$4 sm:$0xff]   ;;  %v19897_v37 = vld [vmem:[#allocation13 + $0xae0] ss:$28 sps:$4 sm:$0xff]  }
0x181c   : > { %v19889_v38 = vld [vmem:[#allocation13 + $0xaa4] ss:$28 sps:$4 sm:$0xff]  }
0x1852   : > { %v14612_v10 = vpop.f32.mrb[60].mxu1  ;;  %v14571_v16 = vpop.f32.mrb[48].mxu0 }
0x1853   : > { %v14704_v17 = vpack.c.bf16 %v14612_v10, %v14612_v10  ;;  %v14702_v18 = vpack.c.bf16 %v14571_v16, %v14571_v16  ;;  %v14614_v45 = vpop.f32.mrb[61].mxu1  ;;  %v14573_v19 = vpop.f32.mrb[49].mxu0  ;;  %v19892_v10 = vld [vmem:[#allocation13 + $0xa9c] ss:$28 sps:$4 sm:$0xff]  }
0x1854   : > { %v14705_v20 = vpack.c.bf16 %v14614_v45, %v14614_v45  ;;  %v14703_v21 = vpack.c.bf16 %v14573_v19, %v14573_v19  ;;  %v14616_v22 = vpop.f32.mrb[62].mxu1  ;;  %v14575_v23 = vpop.f32.mrb[50].mxu0  ;;  %v19900_v16 = vld [vmem:[#allocation13 + $0xad8] ss:$28 sps:$4 sm:$0xff]   ;;  %v19906_v19 = vld [vmem:[#allocation13 + $0xb10] ss:$28 sps:$4 sm:$0xff]  }
0x1855   : > { %v14719_v25 = vsel %vm1856_vm2, %v14704_v17, 0  ;;  %v14713_v26 = vsel %vm1856_vm2, %v14702_v18, 0  ;;  %v14617_v13 = vpop.f32.mrb[63].mxu1  ;;  %v14576_v29 = vpop.f32.mrb[51].mxu0  ;;  %v19895_v17 = vld [vmem:[#allocation13 + $0xadc] ss:$28 sps:$4 sm:$0xff]  }
0x1856   : > { %17318 = vmatprep.subr.msk.bf16.mxu1 %vm1856_vm2, %v14705_v20  ;;  %17316 = vmatprep.subr.msk.bf16.mxu0 %vm1856_vm2, %v14703_v21  ;;  %v19903_v18 = vld [vmem:[#allocation13 + $0xb18] ss:$28 sps:$4 sm:$0xff]   ;;  %v19909_v21 = vld [vmem:[#allocation13 + $0xb50] ss:$28 sps:$4 sm:$0xff]   ;;  %v19912_v23 = vld [vmem:[#allocation13 + $0xb48] ss:$28 sps:$4 sm:$0xff]  }
0x1857   : > { %14775 = vmatpush1.bf16.msra.mxu1 %v14719_v25  ;;  %14734 = vmatpush1.bf16.msra.mxu0 %v14713_v26  ;;  %v19898_v45 = vld [vmem:[#allocation13 + $0xad4] ss:$28 sps:$4 sm:$0xff]   ;;  %v19904_v22 = vld [vmem:[#allocation13 + $0xb0c] ss:$28 sps:$4 sm:$0xff]   ;;  %v19910_v13 = vld [vmem:[#allocation13 + $0xb44] ss:$28 sps:$4 sm:$0xff]  }
0x1858   : > { %18651 = vmatprep.subr.bf16.mxu1 %v20255_v42  ;;  %v19901_v20 = vld [vmem:[#allocation13 + $0xb14] ss:$28 sps:$4 sm:$0xff]   ;;  %v19907_v25 = vld [vmem:[#allocation13 + $0xb4c] ss:$28 sps:$4 sm:$0xff]   ;;  %v19918_v29 = vld [vmem:[#allocation13 + $0xb80] ss:$28 sps:$4 sm:$0xff]  }
0x1859   : > { %v19915_v26 = vld [vmem:[#allocation13 + $0xb88] ss:$28 sps:$4 sm:$0xff]  }
0x185a   : > { %17319 = vmatmul.mubr.msk.bf16.vlgmr.msra.gmra.mrb[68].mxu1 %vm1852_vm3, %v17315_v40  ;;  %17317 = vmatmul.mubr.msk.bf16.vlgmr.msra.gmra.mrb[56].mxu0 %vm1852_vm3, %v17315_v40 }
0x185b   : > { %18653 = vmatprep.mubr.msk.bf16.mxu1 %vm20256_vm0, %v20255_v42  ;;  %14847 = vmatprep.mubr.bf16.mxu0 %v20257_v28 }
0x188e   : > { %v14694_v30 = vpop.f32.mrb[64].mxu1 }
0x188f   : > { %v14708_v61 = vpack.c.bf16 %v14694_v30, %v14694_v30  ;;  %v14653_v32 = vpop.f32.mrb[52].mxu0  ;;  %v14696_v33 = vpop.f32.mrb[65].mxu1  ;;  %v19921_v30 = vld [vmem:[#allocation13 + $0xbc0] ss:$28 sps:$4 sm:$0xff]  }
0x1890   : > { %v14706_v39 = vpack.c.bf16 %v14653_v32, %v14653_v32  ;;  %v14655_v0 = vpop.f32.mrb[53].mxu0  ;;  %v14697_v43 = vpop.f32.mrb[66].mxu1  ;;  %v19924_v32 = vld [vmem:[#allocation13 + $0xbb8] ss:$28 sps:$4 sm:$0xff]  }
0x1891   : > { %v14731_v44 = vsel %vm1856_vm2, %v14708_v61, 0  ;;  %v14707_v46 = vpack.c.bf16 %v14655_v0, %v14655_v0  ;;  %v14657_v34 = vpop.f32.mrb[54].mxu0  ;;  %v14698_v47 = vpop.f32.mrb[67].mxu1  ;;  %v19916_v61 = vld [vmem:[#allocation13 + $0xb7c] ss:$28 sps:$4 sm:$0xff]  }
0x1892   : > { %v14725_v15 = vsel %vm1856_vm2, %v14706_v39, 0  ;;  %v14658_v7 = vpop.f32.mrb[55].mxu0  ;;  %18652 = vmatpush3.bf16.msra.mxu1 %v14731_v44  ;;  %v19919_v33 = vld [vmem:[#allocation13 + $0xbbc] ss:$28 sps:$4 sm:$0xff]   ;;  %v19922_v39 = vld [vmem:[#allocation13 + $0xbb4] ss:$28 sps:$4 sm:$0xff]  }
0x1893   : > { %17320 = vmatprep.subr.msk.bf16.mxu0 %vm1856_vm2, %v14707_v46  ;;  %15604 = vmatprep.subr.bf16.mxu1 %v19861_v35  ;;  %v19927_v35 = vld [vmem:[#allocation13 + $0xbf8] ss:$28 sps:$4 sm:$0xff]   ;;  %v19930_v0 = vld [vmem:[#allocation13 + $0xbf0] ss:$28 sps:$4 sm:$0xff]   ;;  %v15017_v34 = vld [vmem:[#allocation13 + $0xc9c] sm:$0x11] }
0x1894   : > { %14816 = vmatpush1.bf16.msra.mxu0 %v14725_v15  ;;  %v19925_v43 = vld [vmem:[#allocation13 + $0xbf4] ss:$28 sps:$4 sm:$0xff]   ;;  %v19928_v46 = vld [vmem:[#allocation13 + $0xbec] ss:$28 sps:$4 sm:$0xff]  }
0x1895   : > { %18654 = vmatmul.mubr.msk.bf16.vlgmr.msra.gmra.mrb[72].mxu1 %vm1852_vm3, %v17315_v40  ;;  %15563 = vmatprep.subr.bf16.mxu0 %v19864_v49  ;;  %v19933_v44 = vld [vmem:[#allocation13 + $0xc30] ss:$28 sps:$4 sm:$0xff]   ;;  %v19936_v47 = vld [vmem:[#allocation13 + $0xc28] ss:$28 sps:$4 sm:$0xff]   ;;  %v15016_v15 = vld [vmem:[#allocation13 + $0xc94] sm:$0x11] }
0x1896   : > { %15605 = vmatpush1.bf16.msra.mxu1 %v19859_v5  ;;  %17429 = vmatprep.mubr.msk.bf16.mxu1 %vm12472_vm11, %v21433_v57  ;;  %v19931_v49 = vld [vmem:[#allocation13 + $0xc2c] ss:$28 sps:$4 sm:$0xff]   ;;  %v17424_v5 = vcombine.high %v15017_v34, %v15017_v34 }
0x1897   : > { %17321 = vmatmul.mubr.msk.bf16.vlgmr.msra.gmra.mrb[60].mxu0 %vm1852_vm3, %v17315_v40  ;;  %15606 = vmatprep.subr.bf16.mxu1 %v19867_v52  ;;  %v19913_v40 = vld [vmem:[#allocation13 + $0xb84] ss:$28 sps:$4 sm:$0xff]  }
0x1898   : > { %15564 = vmatpush1.bf16.msra.mxu0 %v19862_v48  ;;  %17428 = vmatprep.mubr.msk.bf16.mxu0 %vm12472_vm11, %v21433_v57  ;;  %v19939_v7 = vld [vmem:[#allocation13 + $0xc68] ss:$28 sps:$4 sm:$0xff]   ;;  %v19942_v48 = vld [vmem:[#allocation13 + $0xc60] ss:$28 sps:$4 sm:$0xff]  }
0x1899   : > { %15565 = vmatprep.subr.bf16.mxu0 %v19870_v53  ;;  %v19934_v52 = vld [vmem:[#allocation13 + $0xc24] ss:$28 sps:$4 sm:$0xff]   ;;  %v17422_v53 = vcombine.high %v15016_v15, %v15016_v15 }
0x189a   : > { %15607 = vmatpush1.bf16.msra.mxu1 %v19865_v3  ;;  %v19937_v3 = vld [vmem:[#allocation13 + $0xc64] ss:$28 sps:$4 sm:$0xff]  }
0x189b   : > { %15608 = vmatprep.subr.bf16.mxu1 %v19873_v54  ;;  %v17423_v54 = vcombine.low %v15017_v34, %v15017_v34  ;;  %v19998_v34 = vld [vmem:[#allocation13 + $0xc38] ss:$28 sps:$4 sm:$0xff]  }
0x189c   : > { %15566 = vmatpush1.bf16.msra.mxu0 %v19868_v9  ;;  %v15552_v9 = vand.u32 %v17424_v5, %v21426_v6 }
0x189d   : > { %15567 = vmatprep.subr.bf16.mxu0 %v19876_v50  ;;  %v19940_v50 = vld [vmem:[#allocation13 + $0xc5c] ss:$28 sps:$4 sm:$0xff]  }
0x189e   : > { %15609 = vmatpush1.bf16.msra.mxu1 %v19871_v31  ;;  %v17421_v31 = vcombine.low %v15016_v15, %v15016_v15  ;;  %v19996_v15 = vld [vmem:[#allocation13 + $0xc34] ss:$28 sps:$4 sm:$0xff]  }
0x189f   : > { %15610 = vmatprep.subr.bf16.mxu1 %v19879_v24  ;;  %v15546_v24 = vand.u32 %v17422_v53, %v21426_v6  ;;  %v20000_v53 = vld [vmem:[#allocation13 + $0xc6c] ss:$28 sps:$4 sm:$0xff]  }
0x18a0   : > { %15568 = vmatpush1.bf16.msra.mxu0 %v19874_v59  ;;  %v15549_v59 = vand.u32 %v17423_v54, %v21426_v6 }
0x18a1   : > { %15569 = vmatprep.subr.bf16.mxu0 %v19882_v60  ;;  %v15543_v60 = vand.u32 %v17421_v31, %v21426_v6 }
0x18a2   : > { %15611 = vmatpush1.bf16.msra.mxu1 %v19877_v36  ;;  %v19950_v36 = vld [vmem:[#allocation13 + $0x998] ss:$28 sps:$4 sm:$0xff]  }
0x18a3   : > { %15612 = vmatprep.subr.bf16.mxu1 %v19885_v62  ;;  %v19947_v62 = vld [vmem:[#allocation13 + $0x99c] ss:$28 sps:$4 sm:$0xff]  }
0x18a4   : > { %15570 = vmatpush1.bf16.msra.mxu0 %v19880_v63  ;;  %v19948_v63 = vld [vmem:[#allocation13 + $0x994] ss:$28 sps:$4 sm:$0xff]  }
0x18a5   : > { %15571 = vmatprep.subr.bf16.mxu0 %v19888_v1  ;;  %v19954_v1 = vld [vmem:[#allocation13 + $0x9d0] ss:$28 sps:$4 sm:$0xff]  }
0x18a6   : > { %15613 = vmatpush1.bf16.msra.mxu1 %v19883_v8  ;;  %v19951_v8 = vld [vmem:[#allocation13 + $0x9d4] ss:$28 sps:$4 sm:$0xff]  }
0x18a7   : > { %15614 = vmatprep.subr.bf16.mxu1 %v19891_v11  ;;  %v19952_v11 = vld [vmem:[#allocation13 + $0x9cc] ss:$28 sps:$4 sm:$0xff]  }
0x18a8   : > { %15572 = vmatpush1.bf16.msra.mxu0 %v19886_v14  ;;  %v19958_v14 = vld [vmem:[#allocation13 + $0xa08] ss:$28 sps:$4 sm:$0xff]  }
0x18a9   : > { %15573 = vmatprep.subr.bf16.mxu0 %v19894_v41  ;;  %v19955_v41 = vld [vmem:[#allocation13 + $0xa0c] ss:$28 sps:$4 sm:$0xff]  }
0x18aa   : > { %15615 = vmatpush1.bf16.msra.mxu1 %v19889_v38  ;;  %v19956_v38 = vld [vmem:[#allocation13 + $0xa04] ss:$28 sps:$4 sm:$0xff]  }
0x18ab   : > { %15616 = vmatprep.subr.bf16.mxu1 %v19897_v37  ;;  %v19962_v37 = vld [vmem:[#allocation13 + $0xa40] ss:$28 sps:$4 sm:$0xff]  }
0x18ac   : > { %15574 = vmatpush1.bf16.msra.mxu0 %v19892_v10  ;;  %v19959_v10 = vld [vmem:[#allocation13 + $0xa44] ss:$28 sps:$4 sm:$0xff]  }
0x18ad   : > { %15575 = vmatprep.subr.bf16.mxu0 %v19900_v16  ;;  %v19960_v16 = vld [vmem:[#allocation13 + $0xa3c] ss:$28 sps:$4 sm:$0xff]  }
0x18ae   : > { %15617 = vmatpush1.bf16.msra.mxu1 %v19895_v17  ;;  %v19966_v17 = vld [vmem:[#allocation13 + $0xa78] ss:$28 sps:$4 sm:$0xff]  }
0x18af   : > { %15618 = vmatprep.subr.bf16.mxu1 %v19903_v18  ;;  %v19964_v18 = vld [vmem:[#allocation13 + $0xa74] ss:$28 sps:$4 sm:$0xff]  }
0x18b0   : > { %15576 = vmatpush1.bf16.msra.mxu0 %v19898_v45  ;;  %v19970_v45 = vld [vmem:[#allocation13 + $0xab0] ss:$28 sps:$4 sm:$0xff]  }
0x18b1   : > { %15577 = vmatprep.subr.bf16.mxu0 %v19906_v19  ;;  %v19967_v19 = vld [vmem:[#allocation13 + $0xab4] ss:$28 sps:$4 sm:$0xff]  }
0x18b2   : > { %15619 = vmatpush1.bf16.msra.mxu1 %v19901_v20  ;;  %v19968_v20 = vld [vmem:[#allocation13 + $0xaac] ss:$28 sps:$4 sm:$0xff]  }
0x18b3   : > { %15620 = vmatprep.subr.bf16.mxu1 %v19909_v21  ;;  %v19974_v21 = vld [vmem:[#allocation13 + $0xae8] ss:$28 sps:$4 sm:$0xff]  }
0x18b4   : > { %15578 = vmatpush1.bf16.msra.mxu0 %v19904_v22  ;;  %v19971_v22 = vld [vmem:[#allocation13 + $0xaec] ss:$28 sps:$4 sm:$0xff]  }
0x18b5   : > { %15579 = vmatprep.subr.bf16.mxu0 %v19912_v23  ;;  %v19972_v23 = vld [vmem:[#allocation13 + $0xae4] ss:$28 sps:$4 sm:$0xff]  }
0x18b6   : > { %15621 = vmatpush1.bf16.msra.mxu1 %v19907_v25  ;;  %v19978_v25 = vld [vmem:[#allocation13 + $0xb20] ss:$28 sps:$4 sm:$0xff]  }
0x18b7   : > { %15622 = vmatprep.subr.bf16.mxu1 %v19915_v26  ;;  %v19975_v26 = vld [vmem:[#allocation13 + $0xb24] ss:$28 sps:$4 sm:$0xff]  }
0x18b8   : > { %15580 = vmatpush1.bf16.msra.mxu0 %v19910_v13  ;;  %v19976_v13 = vld [vmem:[#allocation13 + $0xb1c] ss:$28 sps:$4 sm:$0xff]  }
0x18b9   : > { %15581 = vmatprep.subr.bf16.mxu0 %v19918_v29  ;;  %v19982_v29 = vld [vmem:[#allocation13 + $0xb58] ss:$28 sps:$4 sm:$0xff]  }
0x18ba   : > { %15623 = vmatpush1.bf16.msra.mxu1 %v19913_v40  ;;  %v19979_v40 = vld [vmem:[#allocation13 + $0xb5c] ss:$28 sps:$4 sm:$0xff]  }
0x18bb   : > { %15624 = vmatprep.subr.bf16.mxu1 %v19921_v30  ;;  %v19980_v30 = vld [vmem:[#allocation13 + $0xb54] ss:$28 sps:$4 sm:$0xff]  }
0x18bc   : > { %15582 = vmatpush1.bf16.msra.mxu0 %v19916_v61  ;;  %v19986_v61 = vld [vmem:[#allocation13 + $0xb90] ss:$28 sps:$4 sm:$0xff]  }
0x18bd   : > { %15583 = vmatprep.subr.bf16.mxu0 %v19924_v32  ;;  %v19983_v32 = vld [vmem:[#allocation13 + $0xb94] ss:$28 sps:$4 sm:$0xff]  }
0x18be   : > { %15625 = vmatpush1.bf16.msra.mxu1 %v19919_v33  ;;  %v19984_v33 = vld [vmem:[#allocation13 + $0xb8c] ss:$28 sps:$4 sm:$0xff]  }
0x18bf   : > { %15626 = vmatprep.subr.bf16.mxu1 %v19927_v35  ;;  %v19990_v35 = vld [vmem:[#allocation13 + $0xbc8] ss:$28 sps:$4 sm:$0xff]  }
0x18c0   : > { %15584 = vmatpush1.bf16.msra.mxu0 %v19922_v39  ;;  %v19987_v39 = vld [vmem:[#allocation13 + $0xbcc] ss:$28 sps:$4 sm:$0xff]  }
0x18c1   : > { %15585 = vmatprep.subr.bf16.mxu0 %v19930_v0  ;;  %v19988_v0 = vld [vmem:[#allocation13 + $0xbc4] ss:$28 sps:$4 sm:$0xff]  }
0x18c2   : > { %15627 = vmatpush1.bf16.msra.mxu1 %v19925_v43  ;;  %v19994_v43 = vld [vmem:[#allocation13 + $0xc00] ss:$28 sps:$4 sm:$0xff]  }
0x18c3   : > { %15628 = vmatprep.subr.bf16.mxu1 %v19933_v44  ;;  %v19991_v44 = vld [vmem:[#allocation13 + $0xc04] ss:$28 sps:$4 sm:$0xff]  }
0x18c4   : > { %15586 = vmatpush1.bf16.msra.mxu0 %v19928_v46  ;;  %v19992_v46 = vld [vmem:[#allocation13 + $0xbfc] ss:$28 sps:$4 sm:$0xff]  }
0x18c5   : > { %15587 = vmatprep.subr.bf16.mxu0 %v19936_v47  ;;  %v19995_v47 = vld [vmem:[#allocation13 + $0xc3c] ss:$28 sps:$4 sm:$0xff]  }
0x18c6   : > { %15629 = vmatpush1.bf16.msra.mxu1 %v19931_v49  ;;  %v15018_v49 = vld [vmem:[#allocation13 + $0xca4] sm:$0x11] }
0x18c7   : > { %15630 = vmatprep.subr.bf16.mxu1 %v19939_v7  ;;  %v20002_v7 = vld [vmem:[#allocation13 + $0xc70] ss:$28 sps:$4 sm:$0xff]   ;;  %v17426_v5 = vcombine.high %v15018_v49, %v15018_v49 }
0x18c8   : > { %15588 = vmatpush1.bf16.msra.mxu0 %v19934_v52  ;;  %v19999_v52 = vld [vmem:[#allocation13 + $0xc74] ss:$28 sps:$4 sm:$0xff]  }
0x18c9   : > { %15589 = vmatprep.subr.bf16.mxu0 %v19942_v48  ;;  %v20003_v48 = vld [vmem:[#allocation13 + $0xcac] ss:$0 sps:$4 sm:$0x11]   ;;  %v15558_v54 = vand.u32 %v17426_v5, %v21426_v6 }
0x18ca   : > { %15631 = vmatpush1.bf16.msra.mxu1 %v19937_v3  ;;  %v17425_v3 = vcombine.low %v15018_v49, %v15018_v49 }
0x18cb   : > { %15632 = vmatprep.subr.bf16.mxu1 %v15552_v9  ;;  %v15561_v9 = vand.u32 %v20003_v48, %v21426_v6 }
0x18cc   : > { %15590 = vmatpush1.bf16.msra.mxu0 %v19940_v50  ;;  %v15555_v50 = vand.u32 %v17425_v3, %v21426_v6 }
0x18cd   : > { %15591 = vmatprep.subr.bf16.mxu0 %v15546_v24 }
0x18ce   : > { %15633 = vmatpush1.bf16.msra.mxu1 %v15549_v59 }
0x18cf   : > { %15686 = vmatprep.subr.bf16.mxu1 %v20257_v28 }
0x18d0   : > { %15592 = vmatpush1.bf16.msra.mxu0 %v15543_v60 }
0x18d1   : > { %15637 = vmatmul.mubr.bf16.vlgmr.msra.gmra.mrb[76].mxu1 %v21435_v27  ;;  %15645 = vmatprep.subr.bf16.mxu0 %v19950_v36 }
0x18d2   : > { %15687 = vmatpush1.bf16.msra.mxu1 %v19947_v62  ;;  %17431 = vmatprep.mubr.msk.bf16.mxu1 %vm12472_vm11, %v21433_v57 }
0x18d3   : > { %15596 = vmatmul.mubr.bf16.vlgmr.msra.gmra.mrb[64].mxu0 %v21435_v27  ;;  %15688 = vmatprep.subr.bf16.mxu1 %v20257_v28 }
0x18d4   : > { %15646 = vmatpush1.bf16.msra.mxu0 %v19948_v63  ;;  %17430 = vmatprep.mubr.msk.bf16.mxu0 %vm12472_vm11, %v21433_v57  ;;  %v19963_v57 = vld [vmem:[#allocation13 + $0xa7c] ss:$28 sps:$4 sm:$0xff]  }
0x18d5   : > { %15647 = vmatprep.subr.bf16.mxu0 %v19954_v1 }
0x18d6   : > { %15689 = vmatpush1.bf16.msra.mxu1 %v19951_v8 }
0x18d7   : > { %15690 = vmatprep.subr.bf16.mxu1 %v20257_v28 }
0x18d8   : > { %15648 = vmatpush1.bf16.msra.mxu0 %v19952_v11 }
0x18d9   : > { %15649 = vmatprep.subr.bf16.mxu0 %v19958_v14 }
0x18da   : > { %15691 = vmatpush1.bf16.msra.mxu1 %v19955_v41 }
0x18db   : > { %15692 = vmatprep.subr.bf16.mxu1 %v20257_v28 }
0x18dc   : > { %15650 = vmatpush1.bf16.msra.mxu0 %v19956_v38 }
0x18dd   : > { %15651 = vmatprep.subr.bf16.mxu0 %v19962_v37 }
0x18de   : > { %15693 = vmatpush1.bf16.msra.mxu1 %v19959_v10 }
0x18df   : > { %15694 = vmatprep.subr.bf16.mxu1 %v20257_v28 }
0x18e0   : > { %15652 = vmatpush1.bf16.msra.mxu0 %v19960_v16 }
0x18e1   : > { %15653 = vmatprep.subr.bf16.mxu0 %v19966_v17 }
0x18e2   : > { %15695 = vmatpush1.bf16.msra.mxu1 %v19963_v57 }
0x18e3   : > { %15696 = vmatprep.subr.bf16.mxu1 %v20257_v28 }
0x18e4   : > { %15654 = vmatpush1.bf16.msra.mxu0 %v19964_v18 }
0x18e5   : > { %15655 = vmatprep.subr.bf16.mxu0 %v19970_v45 }
0x18e6   : > { %15697 = vmatpush1.bf16.msra.mxu1 %v19967_v19 }
0x18e7   : > { %15698 = vmatprep.subr.bf16.mxu1 %v20257_v28 }
0x18e8   : > { %15656 = vmatpush1.bf16.msra.mxu0 %v19968_v20 }
0x18e9   : > { %15657 = vmatprep.subr.bf16.mxu0 %v19974_v21 }
0x18ea   : > { %15699 = vmatpush1.bf16.msra.mxu1 %v19971_v22 }
0x18eb   : > { %15700 = vmatprep.subr.bf16.mxu1 %v20257_v28 }
0x18ec   : > { %15658 = vmatpush1.bf16.msra.mxu0 %v19972_v23 }
0x18ed   : > { %15659 = vmatprep.subr.bf16.mxu0 %v19978_v25 }
0x18ee   : > { %15701 = vmatpush1.bf16.msra.mxu1 %v19975_v26 }
0x18ef   : > { %15702 = vmatprep.subr.bf16.mxu1 %v20257_v28 }
0x18f0   : > { %15660 = vmatpush1.bf16.msra.mxu0 %v19976_v13 }
0x18f1   : > { %15661 = vmatprep.subr.bf16.mxu0 %v19982_v29  ;;  %v17432_v29 = vld [vmem:[%s21773_s2 + $0x3] sm:$0x1] }
0x18f2   : > { %15703 = vmatpush1.bf16.msra.mxu1 %v19979_v40 }
0x18f3   : > { %15704 = vmatprep.subr.bf16.mxu1 %v20257_v28 }
0x18f4   : > { %15662 = vmatpush1.bf16.msra.mxu0 %v19980_v30 }
0x18f5   : > { %15663 = vmatprep.subr.bf16.mxu0 %v19986_v61 }
0x18f6   : > { %15705 = vmatpush1.bf16.msra.mxu1 %v19983_v32 }
0x18f7   : > { %15706 = vmatprep.subr.bf16.mxu1 %v20257_v28 }
0x18f8   : > { %15664 = vmatpush1.bf16.msra.mxu0 %v19984_v33 }
0x18f9   : > { %15665 = vmatprep.subr.bf16.mxu0 %v19990_v35 }
0x18fa   : > { %15707 = vmatpush1.bf16.msra.mxu1 %v19987_v39 }
0x18fb   : > { %15708 = vmatprep.subr.bf16.mxu1 %v20257_v28 }
0x18fc   : > { %15666 = vmatpush1.bf16.msra.mxu0 %v19988_v0 }
0x18fd   : > { %15667 = vmatprep.subr.bf16.mxu0 %v19994_v43 }
0x18fe   : > { %15709 = vmatpush1.bf16.msra.mxu1 %v19991_v44 }
0x18ff   : > { %15710 = vmatprep.subr.bf16.mxu1 %v20257_v28 }
0x1900   : > { %15668 = vmatpush1.bf16.msra.mxu0 %v19992_v46 }
0x1901   : > { %15669 = vmatprep.subr.bf16.mxu0 %v19998_v34 }
0x1902   : > { %15711 = vmatpush1.bf16.msra.mxu1 %v19995_v47 }
0x1903   : > { %15712 = vmatprep.subr.bf16.mxu1 %v20257_v28 }
0x1904   : > { %15670 = vmatpush1.bf16.msra.mxu0 %v19996_v15  ;;  %v15933_v15 = vpop.permute.xlu0 %15932 }
0x1905   : > { %15671 = vmatprep.subr.bf16.mxu0 %v20002_v7 }
0x1906   : > { %15713 = vmatpush1.bf16.msra.mxu1 %v19999_v52 }
0x1907   : > { %15714 = vmatprep.subr.bf16.mxu1 %v20257_v28 }
0x1908   : > { %15672 = vmatpush1.bf16.msra.mxu0 %v20000_v53 }
0x1909   : > { %15673 = vmatprep.subr.bf16.mxu0 %v15558_v54 }
0x190a   : > { %15715 = vmatpush1.bf16.msra.mxu1 %v15561_v9 }
0x190c   : > { %15674 = vmatpush1.bf16.msra.mxu0 %v15555_v50 }
0x190d   : > { %15719 = vmatmul.mubr.bf16.vlgmr.msra.gmra.mrb[80].mxu1 %v21435_v27 }
0x190e   : > { %15832 = vmatprep.mubr.bf16.mxu1 %v20257_v28 }
0x190f   : > { %15678 = vmatmul.mubr.bf16.vlgmr.msra.gmra.mrb[68].mxu0 %v21435_v27 }
0x1910   : > { %15791 = vmatprep.mubr.bf16.mxu0 %v20257_v28 }
0x192d   : > { %v14808_v31 = vpop.f32.mrb[68].mxu1  ;;  %v14767_v24 = vpop.f32.mrb[56].mxu0 }
0x192e   : > { %v21661_v59 = vadd.f32 %v14808_v31, %v21592_v55  ;;  %v21664_v60 = vadd.f32 %v14767_v24, %v21594_v56  ;;  %v14810_v6 = vpop.f32.mrb[69].mxu1  ;;  %v14769_v36 = vpop.f32.mrb[57].mxu0 }
0x192f   : > { %v21667_v62 = vadd.f32 %v14810_v6, %v21596_v58  ;;  %v21670_v63 = vadd.f32 %v14769_v36, %v21598_v51  ;;  %v14771_v1 = vpop.f32.mrb[58].mxu0  ;;  %v14812_v27 = vpop.f32.mrb[70].mxu1 }
0x1930   : > { %v14772_v8 = vpop.f32.mrb[59].mxu0  ;;  %v14813_v11 = vpop.f32.mrb[71].mxu1 }
0x1968   : > { %v14890_v14 = vpop.f32.mrb[72].mxu1 }
0x1969   : > { %v21673_v41 = vadd.f32 %v14890_v14, %v21600_v2  ;;  %v18655_v55 = vpop.f32.mrb[73].mxu1 }
0x196a   : > { %v14849_v38 = vpop.f32.mrb[60].mxu0  ;;  %v14893_v56 = vpop.f32.mrb[74].mxu1 }
0x196b   : > { %v21676_v37 = vadd.f32 %v14849_v38, %v21602_v4  ;;  %v14851_v10 = vpop.f32.mrb[61].mxu0  ;;  %v18656_v58 = vpop.f32.mrb[75].mxu1 }
0x196c   : > { %v21679_v16 = vadd.f32 %v14851_v10, %v21604_v12  ;;  %v14853_v51 = vpop.f32.mrb[62].mxu0 }
0x196d   : > { %v14854_v17 = vpop.f32.mrb[63].mxu0 }
0x19a4   : > { %v15638_v57 = vpop.f32.mrb[76].mxu1 }
0x19a5   : > { %v15730_v18 = vpack.c.bf16 %v15638_v57, %v15638_v57  ;;  %v15640_v45 = vpop.f32.mrb[77].mxu1 }
0x19a6   : > { %v15731_v19 = vpack.c.bf16 %v15640_v45, %v15640_v45  ;;  %v15597_v20 = vpop.f32.mrb[64].mxu0  ;;  %v15642_v2 = vpop.f32.mrb[78].mxu1 }
0x19a7   : > { %v15745_v21 = vsel %vm1856_vm2, %v15730_v18, 0  ;;  %v15728_v22 = vpack.c.bf16 %v15597_v20, %v15597_v20  ;;  %v15599_v23 = vpop.f32.mrb[65].mxu0  ;;  %v15643_v25 = vpop.f32.mrb[79].mxu1 }
0x19a8   : > { %v15729_v4 = vpack.c.bf16 %v15599_v23, %v15599_v23  ;;  %v15601_v26 = vpop.f32.mrb[66].mxu0  ;;  %17435 = vmatprep.subr.msk.bf16.mxu1 %vm1856_vm2, %v15731_v19 }
0x19a9   : > { %v15739_v12 = vsel %vm1856_vm2, %v15728_v22, 0  ;;  %v15602_v13 = vpop.f32.mrb[67].mxu0  ;;  %15801 = vmatpush1.bf16.msra.mxu1 %v15745_v21 }
0x19aa   : > { %17433 = vmatprep.subr.msk.bf16.mxu0 %vm1856_vm2, %v15729_v4  ;;  %18657 = vmatprep.subr.bf16.mxu1 %v20255_v42 }
0x19ab   : > { %15760 = vmatpush1.bf16.msra.mxu0 %v15739_v12 }
0x19ac   : > { %17436 = vmatmul.mubr.msk.bf16.vlgmr.msra.gmra.mrb[84].mxu1 %vm1852_vm3, %v17432_v29 }
0x19ad   : > { %18659 = vmatprep.mubr.msk.bf16.mxu1 %vm20256_vm0, %v20255_v42 }
0x19ae   : > { %17434 = vmatmul.mubr.msk.bf16.vlgmr.msra.gmra.mrb[72].mxu0 %vm1852_vm3, %v17432_v29 }
0x19af   : > { %15873 = vmatprep.mubr.bf16.mxu0 %v20257_v28  ;;  %v15935_v28 = vlaneseq }
0x19b1   : > { %v15936_v47 = vshrl.u32 %v15935_v28, 7  ;;  %vm16011_vm12 = vcmp.lt.s32.totalorder %v15935_v28, 784 }
0x19b3   : > { %v15937_v49 = vsub.s32 0, %v15936_v47 }
0x19b5   : > { %v15938_v5 = vrot.slane %v15933_v15, %v15937_v49 }
0x19e0   : > { %v15720_v40 = vpop.f32.mrb[80].mxu1 }
0x19e1   : > { %v15734_v30 = vpack.c.bf16 %v15720_v40, %v15720_v40  ;;  %v15722_v61 = vpop.f32.mrb[81].mxu1 }
0x19e2   : > { %v15679_v32 = vpop.f32.mrb[68].mxu0  ;;  %v15723_v33 = vpop.f32.mrb[82].mxu1 }
0x19e3   : > { %v15757_v35 = vsel %vm1856_vm2, %v15734_v30, 0  ;;  %v15732_v39 = vpack.c.bf16 %v15679_v32, %v15679_v32  ;;  %v15681_v0 = vpop.f32.mrb[69].mxu0  ;;  %v15724_v43 = vpop.f32.mrb[83].mxu1 }
0x19e4   : > { %v15733_v44 = vpack.c.bf16 %v15681_v0, %v15681_v0  ;;  %v15683_v46 = vpop.f32.mrb[70].mxu0  ;;  %18658 = vmatpush3.bf16.msra.mxu1 %v15757_v35 }
0x19e5   : > { %v15751_v34 = vsel %vm1856_vm2, %v15732_v39, 0  ;;  %v15684_v42 = vpop.f32.mrb[71].mxu0 }
0x19e6   : > { %17437 = vmatprep.subr.msk.bf16.mxu0 %vm1856_vm2, %v15733_v44 }
0x19e7   : > { %15842 = vmatpush1.bf16.msra.mxu0 %v15751_v34  ;;  %18660 = vmatmul.mubr.msk.bf16.vlgmr.msra.gmra.mrb[88].mxu1 %vm1852_vm3, %v17432_v29 }
0x19ea   : > { %17438 = vmatmul.mubr.msk.bf16.vlgmr.msra.gmra.mrb[76].mxu0 %vm1852_vm3, %v17432_v29 }
0x1a7f   : > { %v15834_v7 = vpop.f32.mrb[84].mxu1 }
0x1a80   : > { %v15924_v52 = vadd.f32 %v15834_v7, %v21661_v59  ;;  %v15836_v48 = vpop.f32.mrb[85].mxu1  ;;  %v20259_v59 = vmov 1966171168  }
0x1a81   : > { %v15925_v53 = vadd.f32 %v15836_v48, %v21667_v62  ;;  %v15793_v3 = vpop.f32.mrb[72].mxu0  ;;  %v15838_v54 = vpop.f32.mrb[86].mxu1  ;;  %v15964_v62 = vunpack.c.l.s4 %v20259_v59 }
0x1a82   : > { %v15941_v9 = vadd.f32 %v15938_v5, %v15924_v52  ;;  %v15922_v50 = vadd.f32 %v15793_v3, %v21664_v60  ;;  %v15795_v31 = vpop.f32.mrb[73].mxu0  ;;  %v15839_v24 = vpop.f32.mrb[87].mxu1 }
0x1a83   : > { %v15942_v6 = vadd.f32 %v15938_v5, %v15925_v53  ;;  %v15923_v36 = vadd.f32 %v15795_v31, %v21670_v63  ;;  %v15797_v1 = vpop.f32.mrb[74].mxu0  ;;  %v15965_v14 = vunpack.c.0.s8 %v15964_v62 }
0x1a84   : > { %20006 = vtanh.f32 %v15941_v9  ;;  %v15939_v27 = vadd.f32 %v15938_v5, %v15922_v50  ;;  %v15798_v8 = vpop.f32.mrb[75].mxu0 }
0x1a85   : > { %20008 = vtanh.f32 %v15942_v6  ;;  %v15940_v11 = vadd.f32 %v15938_v5, %v15923_v36  ;;  %v15968_v60 = vsub.s32 %v15965_v14, %v15936_v47 }
0x1a86   : > { %20010 = vtanh.f32 %v15939_v27 }
0x1a87   : > { %20012 = vtanh.f32 %v15940_v11 }
0x1a8e   : > { %v20007_v55 = vpop.eup %20006 }
0x1a8f   : > { %v20009_v38 = vpop.eup %20008 }
0x1a90   : > { %v20011_v56 = vpop.eup %20010  ;;  %v15961_v10 = vcombine.low %v20007_v55, %v20009_v38 }
0x1a91   : > { %v20013_v58 = vpop.eup %20012 }
0x1a92   : > { %v15960_v51 = vcombine.low %v20011_v56, %v20013_v58  ;;  %v15976_v17 = vrot.slane %v15961_v10, %v15968_v60 }
0x1a94   : > { %v15969_v63 = vrot.slane %v15960_v51, %v15968_v60 }
0x1a96   : > { %v15991_v57 = vcombine.low %v15969_v63, %v15976_v17 }
0x1aba   : > { %v15916_v18 = vpop.f32.mrb[88].mxu1 }
0x1abb   : > { %v15928_v45 = vadd.f32 %v15916_v18, %v21673_v41  ;;  %v18661_v19 = vpop.f32.mrb[89].mxu1 }
0x1abc   : > { %v15919_v20 = vpop.f32.mrb[90].mxu1 }
0x1abd   : > { %v15945_v2 = vadd.f32 %v15938_v5, %v15928_v45  ;;  %v15875_v21 = vpop.f32.mrb[76].mxu0  ;;  %v18662_v22 = vpop.f32.mrb[91].mxu1 }
0x1abe   : > { %v15926_v23 = vadd.f32 %v15875_v21, %v21676_v37  ;;  %v15877_v25 = vpop.f32.mrb[77].mxu0  ;;  %v15999_v37 = vrot.slane %v15991_v57, %v15968_v60 }
0x1abf   : > { %v15927_v4 = vadd.f32 %v15877_v25, %v21679_v16  ;;  %v15879_v26 = vpop.f32.mrb[78].mxu0  ;;  %20014 = vtanh.f32 %v15945_v2 }
0x1ac0   : > { %v15943_v12 = vadd.f32 %v15938_v5, %v15926_v23  ;;  %v15880_v13 = vpop.f32.mrb[79].mxu0 }
0x1ac1   : > { %v15944_v29 = vadd.f32 %v15938_v5, %v15927_v4 }
0x1ac2   : > { %20016 = vtanh.f32 %v15943_v12 }
0x1ac3   : > { %20018 = vtanh.f32 %v15944_v29 }
0x1ac9   : > { %v20015_v40 = vpop.eup %20014 }
0x1aca   : > { %v15990_v32 = vrot.slane %v20015_v40, %v15968_v60 }
0x1acc   : > { %v20017_v41 = vpop.eup %20016 }
0x1acd   : > { %v20019_v30 = vpop.eup %20018 }
0x1ace   : > { %v15962_v61 = vcombine.low %v20017_v41, %v20019_v30 }
0x1ad0   : > { %v15983_v33 = vrot.slane %v15962_v61, %v15968_v60 }
0x1ad2   : > { %v15992_v35 = vcombine.low %v15983_v33, %v15990_v32 }
0x1ad4   : > { %v16006_v39 = vrot.slane %v15992_v35, %v15968_v60 }
0x1ad6   : > { %v16007_v16 = vcombine.low %v15999_v37, %v16006_v39 }
0x1ad8   : > { %16013 = vst.msk [vmem:[%s715_s30] sm:$0x7f] %vm16011_vm12, %v16007_v16 }
0x1ad9 PF: > { %s21775_s26 = sld [smem:[#allocation18_spill]] }
0x1adf   : > { %s36_s20 = sadd.s32 1, %s21775_s26  }
0x1ae0   : > { %p33_p9 = scmp.ge.s32.totalorder %s36_s20, 4  }
0x1ae2   :  { %35 = sbr.rel (!%p33_p9) target bundleno = 12 (0xc), region = 271 }
0x1ae9   :  { %16047 = vsyncpa [#allocation4], 1 }
0x1aea   :  { %16049 = vsyncpa [#allocation4 + $0x1], 1 }
0x1aeb   :  { %16050 = vsyncpa [#allocation6], 1 }
0x1aec   :  { %16051 = vsyncpa [#allocation9], 1 }
0x1aed   :  { %16052 = vsyncpa [#allocation12], 1 }

</bundles_post_ra>
